<compile_context>
chip_gen: v7x
topology: tpu7x:2x2x1
jax: 0.10.0
libtpu: 0.0.40
codegen_flags: <defaults>
</compile_context>

<pallas_src>
import functools

import jax
import jax.numpy as jnp
from jax.experimental import pallas as pl
from jax.experimental.pallas import tpu as pltpu


def _round_up(x, m):
    return (x + m - 1) // m * m


def _basic_block_kernel(x_ref, w1_ref, b1_ref, w2_ref, b2_ref, o_ref,
                        xb_ref, h1_ref, *, H, W, C):
    """Fused BasicBlockNoRelu for one spatially pre-padded image.

    x_ref : (1, H+2, W+2, C) f32   input, zero-padded by 1 in H and W (conv1 padding)
    wK_ref: (9, C, C)        bf16  3x3 conv weights with BN scale folded in, k = 3*dy + dx
    bK_ref: (1, C)           f32   folded BatchNorm bias
    o_ref : (1, H, W, C)     f32   output block
    xb_ref: (H+2, W+2, C)    bf16  VMEM scratch: x cast once to bf16 (MXU operand)
    h1_ref: (H+2, W+2, C)    bf16  VMEM scratch: relu(bn1(conv1(x))) with zero halo
    """
    # Cast the haloed input tile to bf16 once; each conv1 tap then reads a bf16
    # slice directly instead of re-casting 9 overlapping f32 windows.
    xb_ref[...] = x_ref[0].astype(jnp.bfloat16)

    # ---- conv1 (3x3) + bn1 + ReLU: 9 shifted MXU matmuls, f32 accumulation ----
    acc = jnp.zeros((H * W, C), jnp.float32)
    for k in range(9):
        dy, dx = divmod(k, 3)
        patch = xb_ref[dy:dy + H, dx:dx + W, :].reshape(H * W, C)
        acc += jnp.dot(patch, w1_ref[k], preferred_element_type=jnp.float32)
    out1 = jnp.maximum(acc + b1_ref[...], 0.0)

    # Stash conv1 result (bf16) in a zero-haloed VMEM scratch so conv2's pad-1 reads
    # are plain shifted slices (the zero halo ring IS conv2's zero padding).
    h1_ref[...] = jnp.zeros(h1_ref.shape, h1_ref.dtype)
    h1_ref[1:H + 1, 1:W + 1, :] = out1.astype(jnp.bfloat16).reshape(H, W, C)

    # ---- conv2 (3x3) + bn2 + identity residual (NO final ReLU) ----
    acc2 = jnp.zeros((H * W, C), jnp.float32)
    for k in range(9):
        dy, dx = divmod(k, 3)
        patch = h1_ref[dy:dy + H, dx:dx + W, :].reshape(H * W, C)
        acc2 += jnp.dot(patch, w2_ref[k], preferred_element_type=jnp.float32)
    residual = x_ref[0, 1:H + 1, 1:W + 1, :].reshape(H * W, C)   # exact f32 residual
    out2 = acc2 + b2_ref[...] + residual
    o_ref[...] = out2.reshape(1, H, W, C).astype(o_ref.dtype)


def _fold_scale_into_w(w_hwio, scale, cp):
    """Fold the BN per-output-channel scale into the conv weights, pad, bf16-cast."""
    kh, kw, ci, co = w_hwio.shape
    w = w_hwio.astype(jnp.float32) * scale.astype(jnp.float32)[None, None, None, :]
    w = jnp.pad(w, ((0, 0), (0, 0), (0, cp - ci), (0, cp - co)))
    return w.reshape(kh * kw, cp, cp).astype(jnp.bfloat16)


def _pad_vec(v, cp):
    return jnp.pad(v, (0, cp - v.shape[0]))[None, :].astype(jnp.float32)


def basic_block_no_relu(x_nchw, params):
    """Forward of BasicBlockNoRelu (eval-mode folded BN, downsample=None)."""
    N, C, H, W = x_nchw.shape
    P = params["w1"].shape[-1]                       # planes (expansion = 1)
    if C != P:
        raise ValueError("downsample=None (identity residual) requires in_channels == planes")
    if W % 8 != 0:
        # keeps the in-kernel (H, W, C) -> (H*W, C) collapse layout-trivial
        raise ValueError("W must be a multiple of 8 for this kernel")

    Cp = _round_up(C, 128)                           # lane-dense channel dimension

    x = jnp.transpose(x_nchw, (0, 2, 3, 1)).astype(jnp.float32)      # NCHW -> NHWC
    x_pad = jnp.pad(x, ((0, 0), (1, 1), (1, 1), (0, Cp - C)))        # conv pad + lane pad

    w1 = _fold_scale_into_w(params["w1"], params["s1"], Cp)
    w2 = _fold_scale_into_w(params["w2"], params["s2"], Cp)
    b1 = _pad_vec(params["b1"], Cp)
    b2 = _pad_vec(params["b2"], Cp)

    kernel = functools.partial(_basic_block_kernel, H=H, W=W, C=Cp)

    flops = 2 * (N * H * W) * (9 * Cp) * Cp * 2      # two 3x3 convs
    bytes_accessed = (x_pad.size * 4 + (w1.size + w2.size) * 2
                      + 2 * Cp * 4 + N * H * W * Cp * 4)

    out = pl.pallas_call(
        kernel,
        out_shape=jax.ShapeDtypeStruct((N, H, W, Cp), jnp.float32),
        grid=(N,),
        in_specs=[
            pl.BlockSpec((1, H + 2, W + 2, Cp), lambda n: (n, 0, 0, 0)),  # x (haloed)
            pl.BlockSpec((9, Cp, Cp), lambda n: (0, 0, 0)),               # w1 (resident)
            pl.BlockSpec((1, Cp), lambda n: (0, 0)),                      # b1
            pl.BlockSpec((9, Cp, Cp), lambda n: (0, 0, 0)),               # w2 (resident)
            pl.BlockSpec((1, Cp), lambda n: (0, 0)),                      # b2
        ],
        out_specs=pl.BlockSpec((1, H, W, Cp), lambda n: (n, 0, 0, 0)),
        scratch_shapes=[pltpu.VMEM((H + 2, W + 2, Cp), jnp.bfloat16),     # x in bf16
                        pltpu.VMEM((H + 2, W + 2, Cp), jnp.bfloat16)],    # conv1 act (haloed)
        compiler_params=pltpu.CompilerParams(
            dimension_semantics=("parallel",),
            vmem_limit_bytes=48 * 1024 * 1024),
        cost_estimate=pl.CostEstimate(flops=flops, transcendentals=0,
                                      bytes_accessed=bytes_accessed),
    )(x_pad, w1, b1, w2, b2)

    out = out[..., :C]                                # drop lane padding
    return jnp.transpose(out, (0, 3, 1, 2))           # NHWC -> NCHW


def _fold_bn(gamma, beta, mean, var, eps=1e-5):
    scale = gamma / jnp.sqrt(var + eps)
    bias = beta - mean * scale
    return scale.astype(jnp.float32), bias.astype(jnp.float32)


def _reference(x_nchw, params):
    """Pure-JAX reference (same semantics) for the correctness check."""
    dn = ("NCHW", "HWIO", "NCHW")

    def bn(y, s, b):
        return y * s[None, :, None, None] + b[None, :, None, None]

    out = jax.lax.conv_general_dilated(x_nchw, params["w1"], (1, 1),
                                       ((1, 1), (1, 1)), dimension_numbers=dn)
    out = jnp.maximum(bn(out, params["s1"], params["b1"]), 0.0)
    out = jax.lax.conv_general_dilated(out, params["w2"], (1, 1),
                                       ((1, 1), (1, 1)), dimension_numbers=dn)
    out = bn(out, params["s2"], params["b2"])
    return out + x_nchw                               # no final ReLU


def make_params(key, cin, planes):
    """Deterministic synthetic conv weights + folded eval-mode BatchNorm."""
    ks = jax.random.split(key, 4)

    def bn_params(k, c):
        k0, k1, k2, k3 = jax.random.split(k, 4)
        gamma = jax.random.uniform(k0, (c,), minval=0.5, maxval=1.5)
        beta = 0.1 * jax.random.normal(k1, (c,))
        mean = 0.1 * jax.random.normal(k2, (c,))
        var = jax.random.uniform(k3, (c,), minval=0.5, maxval=1.5)
        return _fold_bn(gamma, beta, mean, var)

    w1 = 0.05 * jax.random.normal(ks[0], (3, 3, cin, planes), dtype=jnp.float32)
    w2 = 0.05 * jax.random.normal(ks[1], (3, 3, planes, planes), dtype=jnp.float32)
    s1, b1 = bn_params(ks[2], planes)
    s2, b2 = bn_params(ks[3], planes)
    return {"w1": w1, "s1": s1, "b1": b1, "w2": w2, "s2": s2, "b2": b2}


if __name__ == "__main__":
    # Small shapes consistent with the module (BasicBlock, expansion=1 => Cin == planes).
    N, C, H, W = 2, 32, 16, 16
    planes = C

    key = jax.random.PRNGKey(0)
    kx, kp = jax.random.split(key)
    x = jax.random.normal(kx, (N, C, H, W), dtype=jnp.float32)
    params = make_params(kp, C, planes)

    out = jax.jit(basic_block_no_relu)(x, params)
    out = jax.block_until_ready(out)

    ref = jax.block_until_ready(_reference(x, params))
    assert out.shape == (N, C, H, W)
    err = float(jnp.max(jnp.abs(out - ref)))
    # bf16 MXU operands vs f32 reference => tolerance covers the bf16 rounding
    assert jnp.allclose(out, ref, atol=2e-2, rtol=2e-2), err

    print("KERNEL_OK")
</pallas_src>

<mosaic_0001>
module attributes {stable_mosaic.version = 11 : i64} {
  func.func @_basic_block_kernel(%arg0: i32, %arg1: memref<1x18x18x128xf32, #tpu.memory_space<vmem>>, %arg2: memref<9x128x128xbf16, #tpu.memory_space<vmem>>, %arg3: memref<1x128xf32, #tpu.memory_space<vmem>>, %arg4: memref<9x128x128xbf16, #tpu.memory_space<vmem>>, %arg5: memref<1x128xf32, #tpu.memory_space<vmem>>, %arg6: memref<1x16x16x128xf32, #tpu.memory_space<vmem>>, %arg7: memref<18x18x128xbf16, #tpu.memory_space<vmem>>, %arg8: memref<18x18x128xbf16, #tpu.memory_space<vmem>>) attributes {dimension_semantics = [#tpu.dimension_semantics<parallel>], iteration_bounds = array<i64: 2>, scalar_prefetch = 0 : i64, scratch_operands = 2 : i64, tpu.core_type = #tpu.core_type<tc>, window_params = [{transform_indices = @transform_0, window_bounds = array<i64: 1, 18, 18, 128>}, {pipeline_mode = #tpu.pipeline_mode<synchronous>, transform_indices = @transform_1, window_bounds = array<i64: 9, 128, 128>}, {pipeline_mode = #tpu.pipeline_mode<synchronous>, transform_indices = @transform_2, window_bounds = array<i64: 1, 128>}, {pipeline_mode = #tpu.pipeline_mode<synchronous>, transform_indices = @transform_3, window_bounds = array<i64: 9, 128, 128>}, {pipeline_mode = #tpu.pipeline_mode<synchronous>, transform_indices = @transform_4, window_bounds = array<i64: 1, 128>}, {transform_indices = @transform_5, window_bounds = array<i64: 1, 16, 16, 128>}]} {
    %c0 = arith.constant 0 : index
    %c0_0 = arith.constant 0 : index
    %c0_1 = arith.constant 0 : index
    %c0_2 = arith.constant 0 : index
    %0 = vector.load %arg1[%c0, %c0_0, %c0_1, %c0_2] : memref<1x18x18x128xf32, #tpu.memory_space<vmem>>, vector<1x18x18x128xf32>
    %1 = vector.shape_cast %0 : vector<1x18x18x128xf32> to vector<18x18x128xf32>
    %2 = arith.truncf %1 : vector<18x18x128xf32> to vector<18x18x128xbf16>
    %c0_3 = arith.constant 0 : index
    %c0_4 = arith.constant 0 : index
    %c0_5 = arith.constant 0 : index
    %3 = vector.load %arg7[%c0_3, %c0_4, %c0_5] : memref<18x18x128xbf16, #tpu.memory_space<vmem>>, vector<18x18x128xbf16>
    tpu.vector_store %arg7[%c0_3, %c0_4, %c0_5], %2 {strides = array<i32>} : memref<18x18x128xbf16, #tpu.memory_space<vmem>>, vector<18x18x128xbf16>,
    %cst = arith.constant 0.000000e+00 : f32
    %4 = vector.broadcast %cst : f32 to vector<256x128xf32>
    %c0_6 = arith.constant 0 : index
    %c0_7 = arith.constant 0 : index
    %c0_8 = arith.constant 0 : index
    %5 = vector.load %arg7[%c0_6, %c0_7, %c0_8] : memref<18x18x128xbf16, #tpu.memory_space<vmem>>, vector<16x16x128xbf16>
    %6 = vector.shape_cast %5 : vector<16x16x128xbf16> to vector<256x128xbf16>
    %c0_9 = arith.constant 0 : index
    %c0_10 = arith.constant 0 : index
    %c0_11 = arith.constant 0 : index
    %7 = vector.load %arg2[%c0_9, %c0_10, %c0_11] : memref<9x128x128xbf16, #tpu.memory_space<vmem>>, vector<1x128x128xbf16>
    %8 = vector.shape_cast %7 : vector<1x128x128xbf16> to vector<128x128xbf16>
    %cst_12 = arith.constant dense<0.000000e+00> : vector<256x128xf32>
    %9 = tpu.matmul %6, %8, %cst_12 {dimension_numbers = #tpu.dot_dimension_numbers<[1], [0], [0], [1], [0, 0, 1, 1], [], []>} : vector<256x128xbf16>, vector<128x128xbf16>, vector<256x128xf32> -> vector<256x128xf32>
    %10 = arith.addf %4, %9 : vector<256x128xf32>
    %c0_13 = arith.constant 0 : index
    %c1 = arith.constant 1 : index
    %c0_14 = arith.constant 0 : index
    %11 = vector.load %arg7[%c0_13, %c1, %c0_14] : memref<18x18x128xbf16, #tpu.memory_space<vmem>>, vector<16x16x128xbf16>
    %12 = vector.shape_cast %11 : vector<16x16x128xbf16> to vector<256x128xbf16>
    %c1_15 = arith.constant 1 : index
    %c0_16 = arith.constant 0 : index
    %c0_17 = arith.constant 0 : index
    %13 = vector.load %arg2[%c1_15, %c0_16, %c0_17] : memref<9x128x128xbf16, #tpu.memory_space<vmem>>, vector<1x128x128xbf16>
    %14 = vector.shape_cast %13 : vector<1x128x128xbf16> to vector<128x128xbf16>
    %cst_18 = arith.constant dense<0.000000e+00> : vector<256x128xf32>
    %15 = tpu.matmul %12, %14, %cst_18 {dimension_numbers = #tpu.dot_dimension_numbers<[1], [0], [0], [1], [0, 0, 1, 1], [], []>} : vector<256x128xbf16>, vector<128x128xbf16>, vector<256x128xf32> -> vector<256x128xf32>
    %16 = arith.addf %10, %15 : vector<256x128xf32>
    %c0_19 = arith.constant 0 : index
    %c2 = arith.constant 2 : index
    %c0_20 = arith.constant 0 : index
    %17 = vector.load %arg7[%c0_19, %c2, %c0_20] : memref<18x18x128xbf16, #tpu.memory_space<vmem>>, vector<16x16x128xbf16>
    %18 = vector.shape_cast %17 : vector<16x16x128xbf16> to vector<256x128xbf16>
    %c2_21 = arith.constant 2 : index
    %c0_22 = arith.constant 0 : index
    %c0_23 = arith.constant 0 : index
    %19 = vector.load %arg2[%c2_21, %c0_22, %c0_23] : memref<9x128x128xbf16, #tpu.memory_space<vmem>>, vector<1x128x128xbf16>
    %20 = vector.shape_cast %19 : vector<1x128x128xbf16> to vector<128x128xbf16>
    %cst_24 = arith.constant dense<0.000000e+00> : vector<256x128xf32>
    %21 = tpu.matmul %18, %20, %cst_24 {dimension_numbers = #tpu.dot_dimension_numbers<[1], [0], [0], [1], [0, 0, 1, 1], [], []>} : vector<256x128xbf16>, vector<128x128xbf16>, vector<256x128xf32> -> vector<256x128xf32>
    %22 = arith.addf %16, %21 : vector<256x128xf32>
    %c1_25 = arith.constant 1 : index
    %c0_26 = arith.constant 0 : index
    %c0_27 = arith.constant 0 : index
    %23 = vector.load %arg7[%c1_25, %c0_26, %c0_27] : memref<18x18x128xbf16, #tpu.memory_space<vmem>>, vector<16x16x128xbf16>
    %24 = vector.shape_cast %23 : vector<16x16x128xbf16> to vector<256x128xbf16>
    %c3 = arith.constant 3 : index
    %c0_28 = arith.constant 0 : index
    %c0_29 = arith.constant 0 : index
    %25 = vector.load %arg2[%c3, %c0_28, %c0_29] : memref<9x128x128xbf16, #tpu.memory_space<vmem>>, vector<1x128x128xbf16>
    %26 = vector.shape_cast %25 : vector<1x128x128xbf16> to vector<128x128xbf16>
    %cst_30 = arith.constant dense<0.000000e+00> : vector<256x128xf32>
    %27 = tpu.matmul %24, %26, %cst_30 {dimension_numbers = #tpu.dot_dimension_numbers<[1], [0], [0], [1], [0, 0, 1, 1], [], []>} : vector<256x128xbf16>, vector<128x128xbf16>, vector<256x128xf32> -> vector<256x128xf32>
    %28 = arith.addf %22, %27 : vector<256x128xf32>
    %c1_31 = arith.constant 1 : index
    %c1_32 = arith.constant 1 : index
    %c0_33 = arith.constant 0 : index
    %29 = vector.load %arg7[%c1_31, %c1_32, %c0_33] : memref<18x18x128xbf16, #tpu.memory_space<vmem>>, vector<16x16x128xbf16>
    %30 = vector.shape_cast %29 : vector<16x16x128xbf16> to vector<256x128xbf16>
    %c4 = arith.constant 4 : index
    %c0_34 = arith.constant 0 : index
    %c0_35 = arith.constant 0 : index
    %31 = vector.load %arg2[%c4, %c0_34, %c0_35] : memref<9x128x128xbf16, #tpu.memory_space<vmem>>, vector<1x128x128xbf16>
    %32 = vector.shape_cast %31 : vector<1x128x128xbf16> to vector<128x128xbf16>
    %cst_36 = arith.constant dense<0.000000e+00> : vector<256x128xf32>
    %33 = tpu.matmul %30, %32, %cst_36 {dimension_numbers = #tpu.dot_dimension_numbers<[1], [0], [0], [1], [0, 0, 1, 1], [], []>} : vector<256x128xbf16>, vector<128x128xbf16>, vector<256x128xf32> -> vector<256x128xf32>
    %34 = arith.addf %28, %33 : vector<256x128xf32>
    %c1_37 = arith.constant 1 : index
    %c2_38 = arith.constant 2 : index
    %c0_39 = arith.constant 0 : index
    %35 = vector.load %arg7[%c1_37, %c2_38, %c0_39] : memref<18x18x128xbf16, #tpu.memory_space<vmem>>, vector<16x16x128xbf16>
    %36 = vector.shape_cast %35 : vector<16x16x128xbf16> to vector<256x128xbf16>
    %c5 = arith.constant 5 : index
    %c0_40 = arith.constant 0 : index
    %c0_41 = arith.constant 0 : index
    %37 = vector.load %arg2[%c5, %c0_40, %c0_41] : memref<9x128x128xbf16, #tpu.memory_space<vmem>>, vector<1x128x128xbf16>
    %38 = vector.shape_cast %37 : vector<1x128x128xbf16> to vector<128x128xbf16>
    %cst_42 = arith.constant dense<0.000000e+00> : vector<256x128xf32>
    %39 = tpu.matmul %36, %38, %cst_42 {dimension_numbers = #tpu.dot_dimension_numbers<[1], [0], [0], [1], [0, 0, 1, 1], [], []>} : vector<256x128xbf16>, vector<128x128xbf16>, vector<256x128xf32> -> vector<256x128xf32>
    %40 = arith.addf %34, %39 : vector<256x128xf32>
    %c2_43 = arith.constant 2 : index
    %c0_44 = arith.constant 0 : index
    %c0_45 = arith.constant 0 : index
    %41 = vector.load %arg7[%c2_43, %c0_44, %c0_45] : memref<18x18x128xbf16, #tpu.memory_space<vmem>>, vector<16x16x128xbf16>
    %42 = vector.shape_cast %41 : vector<16x16x128xbf16> to vector<256x128xbf16>
    %c6 = arith.constant 6 : index
    %c0_46 = arith.constant 0 : index
    %c0_47 = arith.constant 0 : index
    %43 = vector.load %arg2[%c6, %c0_46, %c0_47] : memref<9x128x128xbf16, #tpu.memory_space<vmem>>, vector<1x128x128xbf16>
    %44 = vector.shape_cast %43 : vector<1x128x128xbf16> to vector<128x128xbf16>
    %cst_48 = arith.constant dense<0.000000e+00> : vector<256x128xf32>
    %45 = tpu.matmul %42, %44, %cst_48 {dimension_numbers = #tpu.dot_dimension_numbers<[1], [0], [0], [1], [0, 0, 1, 1], [], []>} : vector<256x128xbf16>, vector<128x128xbf16>, vector<256x128xf32> -> vector<256x128xf32>
    %46 = arith.addf %40, %45 : vector<256x128xf32>
    %c2_49 = arith.constant 2 : index
    %c1_50 = arith.constant 1 : index
    %c0_51 = arith.constant 0 : index
    %47 = vector.load %arg7[%c2_49, %c1_50, %c0_51] : memref<18x18x128xbf16, #tpu.memory_space<vmem>>, vector<16x16x128xbf16>
    %48 = vector.shape_cast %47 : vector<16x16x128xbf16> to vector<256x128xbf16>
    %c7 = arith.constant 7 : index
    %c0_52 = arith.constant 0 : index
    %c0_53 = arith.constant 0 : index
    %49 = vector.load %arg2[%c7, %c0_52, %c0_53] : memref<9x128x128xbf16, #tpu.memory_space<vmem>>, vector<1x128x128xbf16>
    %50 = vector.shape_cast %49 : vector<1x128x128xbf16> to vector<128x128xbf16>
    %cst_54 = arith.constant dense<0.000000e+00> : vector<256x128xf32>
    %51 = tpu.matmul %48, %50, %cst_54 {dimension_numbers = #tpu.dot_dimension_numbers<[1], [0], [0], [1], [0, 0, 1, 1], [], []>} : vector<256x128xbf16>, vector<128x128xbf16>, vector<256x128xf32> -> vector<256x128xf32>
    %52 = arith.addf %46, %51 : vector<256x128xf32>
    %c2_55 = arith.constant 2 : index
    %c2_56 = arith.constant 2 : index
    %c0_57 = arith.constant 0 : index
    %53 = vector.load %arg7[%c2_55, %c2_56, %c0_57] : memref<18x18x128xbf16, #tpu.memory_space<vmem>>, vector<16x16x128xbf16>
    %54 = vector.shape_cast %53 : vector<16x16x128xbf16> to vector<256x128xbf16>
    %c8 = arith.constant 8 : index
    %c0_58 = arith.constant 0 : index
    %c0_59 = arith.constant 0 : index
    %55 = vector.load %arg2[%c8, %c0_58, %c0_59] : memref<9x128x128xbf16, #tpu.memory_space<vmem>>, vector<1x128x128xbf16>
    %56 = vector.shape_cast %55 : vector<1x128x128xbf16> to vector<128x128xbf16>
    %cst_60 = arith.constant dense<0.000000e+00> : vector<256x128xf32>
    %57 = tpu.matmul %54, %56, %cst_60 {dimension_numbers = #tpu.dot_dimension_numbers<[1], [0], [0], [1], [0, 0, 1, 1], [], []>} : vector<256x128xbf16>, vector<128x128xbf16>, vector<256x128xf32> -> vector<256x128xf32>
    %58 = arith.addf %52, %57 : vector<256x128xf32>
    %c0_61 = arith.constant 0 : index
    %c0_62 = arith.constant 0 : index
    %59 = vector.load %arg3[%c0_61, %c0_62] : memref<1x128xf32, #tpu.memory_space<vmem>>, vector<1x128xf32>
    %60 = vector.broadcast %59 : vector<1x128xf32> to vector<256x128xf32>
    %61 = arith.addf %58, %60 : vector<256x128xf32>
    %cst_63 = arith.constant 0.000000e+00 : f32
    %62 = vector.broadcast %cst_63 : f32 to vector<256x128xf32>
    %63 = arith.maximumf %61, %62 : vector<256x128xf32>
    %cst_64 = arith.constant 0.000000e+00 : bf16
    %64 = vector.broadcast %cst_64 : bf16 to vector<18x18x128xbf16>
    %c0_65 = arith.constant 0 : index
    %c0_66 = arith.constant 0 : index
    %c0_67 = arith.constant 0 : index
    %65 = vector.load %arg8[%c0_65, %c0_66, %c0_67] : memref<18x18x128xbf16, #tpu.memory_space<vmem>>, vector<18x18x128xbf16>
    tpu.vector_store %arg8[%c0_65, %c0_66, %c0_67], %64 {strides = array<i32>} : memref<18x18x128xbf16, #tpu.memory_space<vmem>>, vector<18x18x128xbf16>,
    %66 = arith.truncf %63 : vector<256x128xf32> to vector<256x128xbf16>
    %67 = vector.shape_cast %66 : vector<256x128xbf16> to vector<16x16x128xbf16>
    %c1_68 = arith.constant 1 : index
    %c1_69 = arith.constant 1 : index
    %c0_70 = arith.constant 0 : index
    %68 = vector.load %arg8[%c1_68, %c1_69, %c0_70] : memref<18x18x128xbf16, #tpu.memory_space<vmem>>, vector<16x16x128xbf16>
    tpu.vector_store %arg8[%c1_68, %c1_69, %c0_70], %67 {strides = array<i32>} : memref<18x18x128xbf16, #tpu.memory_space<vmem>>, vector<16x16x128xbf16>,
    %cst_71 = arith.constant 0.000000e+00 : f32
    %69 = vector.broadcast %cst_71 : f32 to vector<256x128xf32>
    %c0_72 = arith.constant 0 : index
    %c0_73 = arith.constant 0 : index
    %c0_74 = arith.constant 0 : index
    %70 = vector.load %arg8[%c0_72, %c0_73, %c0_74] : memref<18x18x128xbf16, #tpu.memory_space<vmem>>, vector<16x16x128xbf16>
    %71 = vector.shape_cast %70 : vector<16x16x128xbf16> to vector<256x128xbf16>
    %c0_75 = arith.constant 0 : index
    %c0_76 = arith.constant 0 : index
    %c0_77 = arith.constant 0 : index
    %72 = vector.load %arg4[%c0_75, %c0_76, %c0_77] : memref<9x128x128xbf16, #tpu.memory_space<vmem>>, vector<1x128x128xbf16>
    %73 = vector.shape_cast %72 : vector<1x128x128xbf16> to vector<128x128xbf16>
    %cst_78 = arith.constant dense<0.000000e+00> : vector<256x128xf32>
    %74 = tpu.matmul %71, %73, %cst_78 {dimension_numbers = #tpu.dot_dimension_numbers<[1], [0], [0], [1], [0, 0, 1, 1], [], []>} : vector<256x128xbf16>, vector<128x128xbf16>, vector<256x128xf32> -> vector<256x128xf32>
    %75 = arith.addf %69, %74 : vector<256x128xf32>
    %c0_79 = arith.constant 0 : index
    %c1_80 = arith.constant 1 : index
    %c0_81 = arith.constant 0 : index
    %76 = vector.load %arg8[%c0_79, %c1_80, %c0_81] : memref<18x18x128xbf16, #tpu.memory_space<vmem>>, vector<16x16x128xbf16>
    %77 = vector.shape_cast %76 : vector<16x16x128xbf16> to vector<256x128xbf16>
    %c1_82 = arith.constant 1 : index
    %c0_83 = arith.constant 0 : index
    %c0_84 = arith.constant 0 : index
    %78 = vector.load %arg4[%c1_82, %c0_83, %c0_84] : memref<9x128x128xbf16, #tpu.memory_space<vmem>>, vector<1x128x128xbf16>
    %79 = vector.shape_cast %78 : vector<1x128x128xbf16> to vector<128x128xbf16>
    %cst_85 = arith.constant dense<0.000000e+00> : vector<256x128xf32>
    %80 = tpu.matmul %77, %79, %cst_85 {dimension_numbers = #tpu.dot_dimension_numbers<[1], [0], [0], [1], [0, 0, 1, 1], [], []>} : vector<256x128xbf16>, vector<128x128xbf16>, vector<256x128xf32> -> vector<256x128xf32>
    %81 = arith.addf %75, %80 : vector<256x128xf32>
    %c0_86 = arith.constant 0 : index
    %c2_87 = arith.constant 2 : index
    %c0_88 = arith.constant 0 : index
    %82 = vector.load %arg8[%c0_86, %c2_87, %c0_88] : memref<18x18x128xbf16, #tpu.memory_space<vmem>>, vector<16x16x128xbf16>
    %83 = vector.shape_cast %82 : vector<16x16x128xbf16> to vector<256x128xbf16>
    %c2_89 = arith.constant 2 : index
    %c0_90 = arith.constant 0 : index
    %c0_91 = arith.constant 0 : index
    %84 = vector.load %arg4[%c2_89, %c0_90, %c0_91] : memref<9x128x128xbf16, #tpu.memory_space<vmem>>, vector<1x128x128xbf16>
    %85 = vector.shape_cast %84 : vector<1x128x128xbf16> to vector<128x128xbf16>
    %cst_92 = arith.constant dense<0.000000e+00> : vector<256x128xf32>
    %86 = tpu.matmul %83, %85, %cst_92 {dimension_numbers = #tpu.dot_dimension_numbers<[1], [0], [0], [1], [0, 0, 1, 1], [], []>} : vector<256x128xbf16>, vector<128x128xbf16>, vector<256x128xf32> -> vector<256x128xf32>
    %87 = arith.addf %81, %86 : vector<256x128xf32>
    %c1_93 = arith.constant 1 : index
    %c0_94 = arith.constant 0 : index
    %c0_95 = arith.constant 0 : index
    %88 = vector.load %arg8[%c1_93, %c0_94, %c0_95] : memref<18x18x128xbf16, #tpu.memory_space<vmem>>, vector<16x16x128xbf16>
    %89 = vector.shape_cast %88 : vector<16x16x128xbf16> to vector<256x128xbf16>
    %c3_96 = arith.constant 3 : index
    %c0_97 = arith.constant 0 : index
    %c0_98 = arith.constant 0 : index
    %90 = vector.load %arg4[%c3_96, %c0_97, %c0_98] : memref<9x128x128xbf16, #tpu.memory_space<vmem>>, vector<1x128x128xbf16>
    %91 = vector.shape_cast %90 : vector<1x128x128xbf16> to vector<128x128xbf16>
    %cst_99 = arith.constant dense<0.000000e+00> : vector<256x128xf32>
    %92 = tpu.matmul %89, %91, %cst_99 {dimension_numbers = #tpu.dot_dimension_numbers<[1], [0], [0], [1], [0, 0, 1, 1], [], []>} : vector<256x128xbf16>, vector<128x128xbf16>, vector<256x128xf32> -> vector<256x128xf32>
    %93 = arith.addf %87, %92 : vector<256x128xf32>
    %c1_100 = arith.constant 1 : index
    %c1_101 = arith.constant 1 : index
    %c0_102 = arith.constant 0 : index
    %94 = vector.load %arg8[%c1_100, %c1_101, %c0_102] : memref<18x18x128xbf16, #tpu.memory_space<vmem>>, vector<16x16x128xbf16>
    %95 = vector.shape_cast %94 : vector<16x16x128xbf16> to vector<256x128xbf16>
    %c4_103 = arith.constant 4 : index
    %c0_104 = arith.constant 0 : index
    %c0_105 = arith.constant 0 : index
    %96 = vector.load %arg4[%c4_103, %c0_104, %c0_105] : memref<9x128x128xbf16, #tpu.memory_space<vmem>>, vector<1x128x128xbf16>
    %97 = vector.shape_cast %96 : vector<1x128x128xbf16> to vector<128x128xbf16>
    %cst_106 = arith.constant dense<0.000000e+00> : vector<256x128xf32>
    %98 = tpu.matmul %95, %97, %cst_106 {dimension_numbers = #tpu.dot_dimension_numbers<[1], [0], [0], [1], [0, 0, 1, 1], [], []>} : vector<256x128xbf16>, vector<128x128xbf16>, vector<256x128xf32> -> vector<256x128xf32>
    %99 = arith.addf %93, %98 : vector<256x128xf32>
    %c1_107 = arith.constant 1 : index
    %c2_108 = arith.constant 2 : index
    %c0_109 = arith.constant 0 : index
    %100 = vector.load %arg8[%c1_107, %c2_108, %c0_109] : memref<18x18x128xbf16, #tpu.memory_space<vmem>>, vector<16x16x128xbf16>
    %101 = vector.shape_cast %100 : vector<16x16x128xbf16> to vector<256x128xbf16>
    %c5_110 = arith.constant 5 : index
    %c0_111 = arith.constant 0 : index
    %c0_112 = arith.constant 0 : index
    %102 = vector.load %arg4[%c5_110, %c0_111, %c0_112] : memref<9x128x128xbf16, #tpu.memory_space<vmem>>, vector<1x128x128xbf16>
    %103 = vector.shape_cast %102 : vector<1x128x128xbf16> to vector<128x128xbf16>
    %cst_113 = arith.constant dense<0.000000e+00> : vector<256x128xf32>
    %104 = tpu.matmul %101, %103, %cst_113 {dimension_numbers = #tpu.dot_dimension_numbers<[1], [0], [0], [1], [0, 0, 1, 1], [], []>} : vector<256x128xbf16>, vector<128x128xbf16>, vector<256x128xf32> -> vector<256x128xf32>
    %105 = arith.addf %99, %104 : vector<256x128xf32>
    %c2_114 = arith.constant 2 : index
    %c0_115 = arith.constant 0 : index
    %c0_116 = arith.constant 0 : index
    %106 = vector.load %arg8[%c2_114, %c0_115, %c0_116] : memref<18x18x128xbf16, #tpu.memory_space<vmem>>, vector<16x16x128xbf16>
    %107 = vector.shape_cast %106 : vector<16x16x128xbf16> to vector<256x128xbf16>
    %c6_117 = arith.constant 6 : index
    %c0_118 = arith.constant 0 : index
    %c0_119 = arith.constant 0 : index
    %108 = vector.load %arg4[%c6_117, %c0_118, %c0_119] : memref<9x128x128xbf16, #tpu.memory_space<vmem>>, vector<1x128x128xbf16>
    %109 = vector.shape_cast %108 : vector<1x128x128xbf16> to vector<128x128xbf16>
    %cst_120 = arith.constant dense<0.000000e+00> : vector<256x128xf32>
    %110 = tpu.matmul %107, %109, %cst_120 {dimension_numbers = #tpu.dot_dimension_numbers<[1], [0], [0], [1], [0, 0, 1, 1], [], []>} : vector<256x128xbf16>, vector<128x128xbf16>, vector<256x128xf32> -> vector<256x128xf32>
    %111 = arith.addf %105, %110 : vector<256x128xf32>
    %c2_121 = arith.constant 2 : index
    %c1_122 = arith.constant 1 : index
    %c0_123 = arith.constant 0 : index
    %112 = vector.load %arg8[%c2_121, %c1_122, %c0_123] : memref<18x18x128xbf16, #tpu.memory_space<vmem>>, vector<16x16x128xbf16>
    %113 = vector.shape_cast %112 : vector<16x16x128xbf16> to vector<256x128xbf16>
    %c7_124 = arith.constant 7 : index
    %c0_125 = arith.constant 0 : index
    %c0_126 = arith.constant 0 : index
    %114 = vector.load %arg4[%c7_124, %c0_125, %c0_126] : memref<9x128x128xbf16, #tpu.memory_space<vmem>>, vector<1x128x128xbf16>
    %115 = vector.shape_cast %114 : vector<1x128x128xbf16> to vector<128x128xbf16>
    %cst_127 = arith.constant dense<0.000000e+00> : vector<256x128xf32>
    %116 = tpu.matmul %113, %115, %cst_127 {dimension_numbers = #tpu.dot_dimension_numbers<[1], [0], [0], [1], [0, 0, 1, 1], [], []>} : vector<256x128xbf16>, vector<128x128xbf16>, vector<256x128xf32> -> vector<256x128xf32>
    %117 = arith.addf %111, %116 : vector<256x128xf32>
    %c2_128 = arith.constant 2 : index
    %c2_129 = arith.constant 2 : index
    %c0_130 = arith.constant 0 : index
    %118 = vector.load %arg8[%c2_128, %c2_129, %c0_130] : memref<18x18x128xbf16, #tpu.memory_space<vmem>>, vector<16x16x128xbf16>
    %119 = vector.shape_cast %118 : vector<16x16x128xbf16> to vector<256x128xbf16>
    %c8_131 = arith.constant 8 : index
    %c0_132 = arith.constant 0 : index
    %c0_133 = arith.constant 0 : index
    %120 = vector.load %arg4[%c8_131, %c0_132, %c0_133] : memref<9x128x128xbf16, #tpu.memory_space<vmem>>, vector<1x128x128xbf16>
    %121 = vector.shape_cast %120 : vector<1x128x128xbf16> to vector<128x128xbf16>
    %cst_134 = arith.constant dense<0.000000e+00> : vector<256x128xf32>
    %122 = tpu.matmul %119, %121, %cst_134 {dimension_numbers = #tpu.dot_dimension_numbers<[1], [0], [0], [1], [0, 0, 1, 1], [], []>} : vector<256x128xbf16>, vector<128x128xbf16>, vector<256x128xf32> -> vector<256x128xf32>
    %123 = arith.addf %117, %122 : vector<256x128xf32>
    %c0_135 = arith.constant 0 : index
    %c1_136 = arith.constant 1 : index
    %c1_137 = arith.constant 1 : index
    %c0_138 = arith.constant 0 : index
    %124 = vector.load %arg1[%c0_135, %c1_136, %c1_137, %c0_138] : memref<1x18x18x128xf32, #tpu.memory_space<vmem>>, vector<1x16x16x128xf32>
    %125 = vector.shape_cast %124 : vector<1x16x16x128xf32> to vector<16x16x128xf32>
    %126 = vector.shape_cast %125 : vector<16x16x128xf32> to vector<256x128xf32>
    %c0_139 = arith.constant 0 : index
    %c0_140 = arith.constant 0 : index
    %127 = vector.load %arg5[%c0_139, %c0_140] : memref<1x128xf32, #tpu.memory_space<vmem>>, vector<1x128xf32>
    %128 = vector.broadcast %127 : vector<1x128xf32> to vector<256x128xf32>
    %129 = arith.addf %123, %128 : vector<256x128xf32>
    %130 = arith.addf %129, %126 : vector<256x128xf32>
    %131 = vector.shape_cast %130 : vector<256x128xf32> to vector<1x16x16x128xf32>
    %c0_141 = arith.constant 0 : index
    %c0_142 = arith.constant 0 : index
    %c0_143 = arith.constant 0 : index
    %c0_144 = arith.constant 0 : index
    %132 = vector.load %arg6[%c0_141, %c0_142, %c0_143, %c0_144] : memref<1x16x16x128xf32, #tpu.memory_space<vmem>>, vector<1x16x16x128xf32>
    tpu.vector_store %arg6[%c0_141, %c0_142, %c0_143, %c0_144], %131 {strides = array<i32>} : memref<1x16x16x128xf32, #tpu.memory_space<vmem>>, vector<1x16x16x128xf32>,
    return
  }
  func.func @transform_0(%arg0: i32) -> (i32, i32, i32, i32) {
    %c0_i32 = arith.constant 0 : i32
    %c0_i32_0 = arith.constant 0 : i32
    %c0_i32_1 = arith.constant 0 : i32
    %c0_i32_2 = arith.constant 0 : i32
    return %arg0, %c0_i32, %c0_i32_0, %c0_i32_1 : i32, i32, i32, i32
  }
  func.func @transform_1(%arg0: i32) -> (i32, i32, i32) {
    %c0_i32 = arith.constant 0 : i32
    %c0_i32_0 = arith.constant 0 : i32
    %c0_i32_1 = arith.constant 0 : i32
    %c0_i32_2 = arith.constant 0 : i32
    return %c0_i32, %c0_i32_0, %c0_i32_1 : i32, i32, i32
  }
  func.func @transform_2(%arg0: i32) -> (i32, i32) {
    %c0_i32 = arith.constant 0 : i32
    %c0_i32_0 = arith.constant 0 : i32
    %c0_i32_1 = arith.constant 0 : i32
    return %c0_i32, %c0_i32_0 : i32, i32
  }
  func.func @transform_3(%arg0: i32) -> (i32, i32, i32) {
    %c0_i32 = arith.constant 0 : i32
    %c0_i32_0 = arith.constant 0 : i32
    %c0_i32_1 = arith.constant 0 : i32
    %c0_i32_2 = arith.constant 0 : i32
    return %c0_i32, %c0_i32_0, %c0_i32_1 : i32, i32, i32
  }
  func.func @transform_4(%arg0: i32) -> (i32, i32) {
    %c0_i32 = arith.constant 0 : i32
    %c0_i32_0 = arith.constant 0 : i32
    %c0_i32_1 = arith.constant 0 : i32
    return %c0_i32, %c0_i32_0 : i32, i32
  }
  func.func @transform_5(%arg0: i32) -> (i32, i32, i32, i32) {
    %c0_i32 = arith.constant 0 : i32
    %c0_i32_0 = arith.constant 0 : i32
    %c0_i32_1 = arith.constant 0 : i32
    %c0_i32_2 = arith.constant 0 : i32
    return %arg0, %c0_i32, %c0_i32_0, %c0_i32_1 : i32, i32, i32, i32
  }
}

</mosaic_0001>

<bundles_post_ra>
// kernel: basic_block_no_relu.1
= control target key start
LH: loop header
LB: loop body
LE: loop exit
PB: predicated region body
PF: predicated region fallthrough
CT: control target
= control target key end

     0   :  { %s14246_s18 = smov 0   ;;  %s17739_s0 = inlined_call_operand.vmem [shape: f32[2,18,18,128], index: 0, kind: input, shape index: {}]   ;;  %s17740_s1 = inlined_call_operand.vmem [shape: bf16[9,128,128], index: 1, kind: input, shape index: {}]   ;;  %s17741_s2 = inlined_call_operand.vmem [shape: f32[1,128], index: 2, kind: input, shape index: {}]   ;;  %s17742_s3 = inlined_call_operand.vmem [shape: bf16[9,128,128], index: 3, kind: input, shape index: {}]   ;;  %s17743_s4 = inlined_call_operand.vmem [shape: f32[1,128], index: 4, kind: input, shape index: {}]   ;;  %s17744_s5 = inlined_call_operand.vmem [shape: f32[2,16,16,128], index: 5, kind: output, shape index: {}]  }
   0x1 LB: > { %s11032_s19 = sadd.s32 4294967295, %s14213_s18   ;;  %p11036_p0 = scmp.ge.s32.totalorder %s14213_s18, 1  ;;  %s14213_s18 = sphi %s14246_s18, %s15_s18  }
   0x2   : > { %p187_p1 = scmp.lt.s32.totalorder %s14213_s18, 3 }
   0x4   : > { %p188_p2 = pnand %p11036_p0, %p187_p1 }
   0x6   : > { %191 = sbr.rel (%p188_p2) target bundleno = 1667 (0x683), region = 40 }
   0xd   : > { %v13904_v0 = vld [vmem:[%s17740_s1 + $0x40] sm:$0xff]   ;;  %p215_p3 = scmp.lt.s32.totalorder %s11032_s19, 1  ;;  %v13905_v1 = vld [vmem:[%s17740_s1 + $0x48] sm:$0xff]   ;;  %v13906_v2 = vld [vmem:[%s17740_s1 + $0x50] sm:$0xff]   ;;  %vm632_vm0 = vsmask.f32 3328 }
   0xe   : > { %12518 = vmatprep.subr.bf16.mxu0 %v13904_v0  ;;  %v13907_v3 = vld [vmem:[%s17740_s1 + $0x58] sm:$0xff]   ;;  %v13908_v15 = vld [vmem:[%s17740_s1 + $0x60] sm:$0xff]   ;;  %v13909_v26 = vld [vmem:[%s17740_s1 + $0x68] sm:$0xff]   ;;  %vm633_vm1 = vsmask.f32 7440  ;;  %vm1662_vm3 = vcmask 1042432  }
   0xf   : > { %s18080_s19 = smov (!%p215_p3, %s11032_s19), 1  ;;  %12519 = vmatpush3.bf16.msra.mxu0 %v13904_v0  ;;  %v13910_v50 = vld [vmem:[%s17740_s1 + $0x70] sm:$0xff]   ;;  %vm14328_vm2 = vmor %vm632_vm0, %vm633_vm1  ;;  %vm1663_vm4 = vcmask 1046532   ;;  %vm5922_vm6 = vcmask 1043456   ;;  %vm5923_vm7 = vsmask.f32 7938 }
  0x10   : > { %12520 = vmatprep.subr.bf16.mxu0 %v13905_v1  ;;  %s13894_s26 = smul.u32 432, %s18080_s19  ;;  %vm14634_vm5 = vmor %vm1662_vm3, %vm1663_vm4  ;;  %vm5598_vm8 = vsmask.f32 256  ;;  %vm5599_vm9 = vsmask.f32 4368  ;;  %vm5929_vm10 = vcmask 1040384  }
  0x11   : > { %vm15937_vm11 = vmand %vm5922_vm6, %vm5923_vm7  ;;  %s11946_s7 = sshll.u32 %s18080_s19, 8 }
  0x12   : > { %s14269_s29 = scalar_lea.vmem %s17739_s0, %s13894_s26  ;;  %vm15944_vm12 = vmor %vm5598_vm8, %vm5599_vm9  ;;  %s17641_s10 = scalar_lea.vmem %s17744_s5, %s11946_s7 }
  0x13   : > { %12521 = vmatpush3.bf16.msra.mxu0 %v13905_v1  ;;  %v226_v4 = vld [vmem:[%s14269_s29] sm:$0xff]  ;;  %v227_v5 = vld [vmem:[%s14269_s29 + $0x8] sm:$0xff]  ;;  %v228_v6 = vld [vmem:[%s14269_s29 + $0x10] sm:$0x3] }
  0x14   : > { %12522 = vmatprep.subr.bf16.mxu0 %v13906_v2  ;;  %v11949_v7 = vpack.c.bf16 %v228_v6, %v228_v6  ;;  %v12036_v8 = vpack.c.bf16 %v227_v5, %v226_v4  ;;  %v229_v9 = vld [vmem:[%s14269_s29 + $0x18] sm:$0xff]  ;;  %v230_v10 = vld [vmem:[%s14269_s29 + $0x20] sm:$0xff]  ;;  %v231_v11 = vld [vmem:[%s14269_s29 + $0x28] sm:$0x3] }
  0x15   : > { %v11950_v12 = vpack.c.bf16 %v229_v9, %v229_v9  ;;  %v11951_v13 = vpack.c.bf16 %v230_v10, %v230_v10  ;;  %v11952_v14 = vpack.c.bf16 %v231_v11, %v231_v11  ;;  %v232_v16 = vld [vmem:[%s14269_s29 + $0x30] sm:$0xff]  ;;  %v233_v17 = vld [vmem:[%s14269_s29 + $0x38] sm:$0xff]  ;;  %v234_v18 = vld [vmem:[%s14269_s29 + $0x40] sm:$0x3] }
  0x16   : > { %12037 = vst [vmem:[#allocation2] sm:$0xff] %v12036_v8   ;;  %516 = vst [vmem:[#allocation2 + $0x8] sm:$0x1] %v11949_v7  ;;  %v12041_v19 = vpack.c.bf16 %v233_v17, %v232_v16  ;;  %v235_v20 = vld [vmem:[%s14269_s29 + $0x48] sm:$0xff]  ;;  %v236_v21 = vld [vmem:[%s14269_s29 + $0x50] sm:$0xff]  ;;  %v11955_v22 = vpack.c.bf16 %v234_v18, %v234_v18 }
  0x17   : > { %12523 = vmatpush3.bf16.msra.mxu0 %v13906_v2  ;;  %517 = vst [vmem:[#allocation2 + $0xc] sm:$0xf] %v11950_v12  ;;  %518 = vst [vmem:[#allocation2 + $0x10] sm:$0xf] %v11951_v13  ;;  %v237_v23 = vld [vmem:[%s14269_s29 + $0x58] sm:$0x3]  ;;  %v11956_v24 = vpack.c.bf16 %v235_v20, %v235_v20  ;;  %v11957_v25 = vpack.c.bf16 %v236_v21, %v236_v21 }
  0x18   : > { %12524 = vmatprep.subr.bf16.mxu0 %v13907_v3  ;;  %519 = vst [vmem:[#allocation2 + $0x14] sm:$0x1] %v11952_v14  ;;  %12078 = vst [vmem:[#allocation2 + $0x18] sm:$0xff] %v12041_v19   ;;  %v11958_v27 = vpack.c.bf16 %v237_v23, %v237_v23  ;;  %v238_v28 = vld [vmem:[%s14269_s29 + $0x60] sm:$0xff]  ;;  %v239_v29 = vld [vmem:[%s14269_s29 + $0x68] sm:$0xff] }
  0x19   : > { %522 = vst [vmem:[#allocation2 + $0x20] sm:$0x1] %v11955_v22  ;;  %523 = vst [vmem:[#allocation2 + $0x24] sm:$0xf] %v11956_v24  ;;  %v240_v30 = vld [vmem:[%s14269_s29 + $0x70] sm:$0x3]  ;;  %v12046_v31 = vpack.c.bf16 %v239_v29, %v238_v28 }
  0x1a   : > { %524 = vst [vmem:[#allocation2 + $0x28] sm:$0xf] %v11957_v25  ;;  %v241_v32 = vld [vmem:[%s14269_s29 + $0x78] sm:$0xff]  ;;  %v242_v33 = vld [vmem:[%s14269_s29 + $0x80] sm:$0xff]  ;;  %525 = vst [vmem:[#allocation2 + $0x2c] sm:$0x1] %v11958_v27  ;;  %v11961_v34 = vpack.c.bf16 %v240_v30, %v240_v30 }
  0x1b   : > { %12525 = vmatpush3.bf16.msra.mxu0 %v13907_v3  ;;  %v243_v35 = vld [vmem:[%s14269_s29 + $0x88] sm:$0x3]  ;;  %v11962_v36 = vpack.c.bf16 %v241_v32, %v241_v32  ;;  %v11963_v37 = vpack.c.bf16 %v242_v33, %v242_v33  ;;  %12079 = vst [vmem:[#allocation2 + $0x30] sm:$0xff] %v12046_v31   ;;  %v244_v39 = vld [vmem:[%s14269_s29 + $0x90] sm:$0xff]  ;;  %v245_v40 = vld [vmem:[%s14269_s29 + $0x98] sm:$0xff] }
  0x1c   : > { %12526 = vmatprep.subr.bf16.mxu0 %v13908_v15  ;;  %v11964_v38 = vpack.c.bf16 %v243_v35, %v243_v35  ;;  %528 = vst [vmem:[#allocation2 + $0x38] sm:$0x1] %v11961_v34  ;;  %v12051_v44 = vpack.c.bf16 %v245_v40, %v244_v39  ;;  %v13911_v4 = vld [vmem:[%s17740_s1 + $0x78] sm:$0xff]   ;;  %v13912_v25 = vld [vmem:[%s17740_s1] sm:$0xff]   ;;  %vm15950_vm13 = vmand %vm5929_vm10, %vm5598_vm8 }
  0x1d   : > { %v14300_v41 = vld [vmem:[#allocation2] sm:$0xf]  ;;  %v14302_v42 = vld [vmem:[#allocation2 + $0x4] sm:$0xf]  ;;  %v616_v43 = vld [vmem:[#allocation2 + $0x8] sm:$0x1] }
  0x1e   : > { %529 = vst [vmem:[#allocation2 + $0x3c] sm:$0xf] %v11962_v36  ;;  %530 = vst [vmem:[#allocation2 + $0x40] sm:$0xf] %v11963_v37  ;;  %v636_v45 = vshrl.u32 %v14300_v41, 16  ;;  %v639_v46 = vshll.u32 %v14300_v41, 16 }
  0x1f   : > { %12527 = vmatpush3.bf16.msra.mxu0 %v13908_v15  ;;  %v645_v47 = vshll.u32 %v14302_v42, 16  ;;  %v649_v48 = vshrl.u32 %v14302_v42, 16  ;;  %v14308_v49 = vld [vmem:[#allocation2 + $0xc] sm:$0xf]  ;;  %531 = vst [vmem:[#allocation2 + $0x44] sm:$0x1] %v11964_v38 }
  0x20   : > { %12528 = vmatprep.subr.bf16.mxu0 %v13909_v26  ;;  %v655_v51 = vshll.u32 %v616_v43, 16  ;;  %v14313_v52 = vld [vmem:[#allocation2 + $0x10] sm:$0xf]  ;;  %v617_v53 = vld [vmem:[#allocation2 + $0x14] sm:$0x1]  ;;  %12080 = vst [vmem:[#allocation2 + $0x48] sm:$0xff] %v12051_v44  }
  0x21   : > { %v638_v54 = vrot.slane %v636_v45, 4  ;;  %v641_v55 = vrot.slane %v639_v46, 5  ;;  %v647_v56 = vrot.slane %v645_v47, 5  ;;  %v651_v57 = vrot.slane %v649_v48, 4  ;;  %v14319_v2 = vld [vmem:[#allocation2 + $0x18] sm:$0xf] }
  0x22   : > { %v657_v58 = vrot.slane %v655_v51, 5  ;;  %v660_v59 = vshrl.u32 %v14308_v49, 16  ;;  %v663_v60 = vshll.u32 %v14308_v49, 16  ;;  %v669_v61 = vshll.u32 %v14313_v52, 16  ;;  %v14321_v3 = vld [vmem:[#allocation2 + $0x1c] sm:$0xf] }
  0x23   : > { %12529 = vmatpush3.bf16.msra.mxu0 %v13909_v26  ;;  %v642_v62 = vor.u32 %v641_v55, %v638_v54  ;;  %v652_v63 = vor.u32 %v651_v57, %v647_v56  ;;  %v673_v0 = vshrl.u32 %v14313_v52, 16  ;;  %v679_v1 = vshll.u32 %v617_v53, 16  ;;  %v618_v14 = vld [vmem:[#allocation2 + $0x20] sm:$0x1]  ;;  %v14340_v22 = vld [vmem:[#allocation2 + $0x24] sm:$0xf] }
  0x24   : > { %12530 = vmatprep.subr.bf16.mxu0 %v13910_v50  ;;  %v662_v6 = vrot.slane %v660_v59, 4  ;;  %v665_v7 = vrot.slane %v663_v60, 5  ;;  %v671_v8 = vrot.slane %v669_v61, 5  ;;  %v684_v15 = vshrl.u32 %v14319_v2, 16  ;;  %v14345_v28 = vld [vmem:[#allocation2 + $0x28] sm:$0xf] }
  0x25   : > { %v643_v9 = vrot.slane %v642_v62, 4  ;;  %v653_v10 = vrot.slane %v652_v63, 4  ;;  %v675_v11 = vrot.slane %v673_v0, 4  ;;  %v681_v12 = vrot.slane %v679_v1, 5  ;;  %v619_v35 = vld [vmem:[#allocation2 + $0x2c] sm:$0x1] }
  0x26   : > { %v666_v13 = vor.u32 %v665_v7, %v662_v6  ;;  %v687_v16 = vshll.u32 %v14319_v2, 16  ;;  %v693_v17 = vshll.u32 %v14321_v3, 16  ;;  %v697_v21 = vshrl.u32 %v14321_v3, 16  ;;  %v14354_v44 = vld [vmem:[#allocation2 + $0x30] sm:$0xf] }
  0x27   : > { %12531 = vmatpush3.bf16.msra.mxu0 %v13910_v50  ;;  %v648_v18 = vsel %vm14328_vm2, %v643_v9, %v647_v56  ;;  %v658_v19 = vsel %vm14328_vm2, %v653_v10, %v657_v58  ;;  %v676_v20 = vor.u32 %v675_v11, %v671_v8  ;;  %v686_v26 = vrot.slane %v684_v15, 4  ;;  %v13913_v50 = vld [vmem:[%s17740_s1 + $0x8] sm:$0xff]   ;;  %v14359_v51 = vld [vmem:[#allocation2 + $0x34] sm:$0xf]  ;;  %v620_v59 = vld [vmem:[#allocation2 + $0x38] sm:$0x1] }
  0x28   : > { %12532 = vmatprep.subr.bf16.mxu0 %v13911_v4  ;;  %v11110_v23 = vcombine.low %v648_v18, %v658_v19  ;;  %v667_v24 = vrot.slane %v666_v13, 4  ;;  %v689_v27 = vrot.slane %v687_v16, 5  ;;  %v695_v30 = vrot.slane %v693_v17, 5  ;;  %v14371_v10 = vld [vmem:[#allocation2 + $0x40] sm:$0xf]  ;;  %v13914_v11 = vld [vmem:[%s17740_s1 + $0x10] sm:$0xff]  }
  0x29   : > { %v677_v29 = vrot.slane %v676_v20, 4  ;;  %v699_v31 = vrot.slane %v697_v21, 4  ;;  %v703_v32 = vshll.u32 %v618_v14, 16  ;;  %v708_v36 = vshrl.u32 %v14340_v22, 16  ;;  %v621_v18 = vld [vmem:[#allocation2 + $0x44] sm:$0x1] }
  0x2a   : > { %12534 = vmatprep.mubr.bf16.mxu0 %v11110_v23  ;;  %v672_v33 = vsel %vm14328_vm2, %v667_v24, %v671_v8  ;;  %v690_v34 = vor.u32 %v689_v27, %v686_v26  ;;  %v711_v37 = vshll.u32 %v14340_v22, 16  ;;  %v717_v43 = vshll.u32 %v14345_v28, 16  ;;  %v14384_v21 = vld [vmem:[%s17740_s1 + $0x18] sm:$0xff]   ;;  %v246_v27 = vld [vmem:[%s14269_s29 + $0xa0] sm:$0x3] }
  0x2b   : > { %12533 = vmatpush3.bf16.msra.mxu0 %v13911_v4  ;;  %v682_v38 = vsel %vm14328_vm2, %v677_v29, %v681_v12  ;;  %v700_v39 = vor.u32 %v699_v31, %v695_v30  ;;  %v705_v40 = vrot.slane %v703_v32, 5  ;;  %v710_v47 = vrot.slane %v708_v36, 4  ;;  %v14369_v4 = vld [vmem:[#allocation2 + $0x3c] sm:$0xf] }
  0x2c   : > { %v11111_v45 = vcombine.low %v672_v33, %v682_v38  ;;  %12566 = vmatprep.subr.bf16.mxu0 %v13912_v25  ;;  %v691_v46 = vrot.slane %v690_v34, 4  ;;  %v713_v48 = vrot.slane %v711_v37, 5  ;;  %v719_v54 = vrot.slane %v717_v43, 5  ;;  %v14389_v33 = vld [vmem:[#allocation2 + $0x48] sm:$0xf] }
  0x2d   : > { %v701_v53 = vrot.slane %v700_v39, 4  ;;  %v721_v55 = vshrl.u32 %v14345_v28, 16  ;;  %v727_v56 = vshll.u32 %v619_v35, 16  ;;  %v732_v60 = vshrl.u32 %v14354_v44, 16  ;;  %v247_v34 = vld [vmem:[%s14269_s29 + $0xa8] sm:$0xff] }
  0x2e   : > { %12535 = vmatmul.mubr.bf16.vlgmr.msra.gmra.mrb[0].mxu0 %v11111_v45  ;;  %v696_v57 = vsel %vm14328_vm2, %v691_v46, %v695_v30  ;;  %v714_v58 = vor.u32 %v713_v48, %v710_v47  ;;  %v735_v61 = vshll.u32 %v14354_v44, 16  ;;  %v741_v1 = vshll.u32 %v14359_v51, 16  ;;  %v14394_v39 = vld [vmem:[#allocation2 + $0x4c] sm:$0xf]  ;;  %v248_v47 = vld [vmem:[%s14269_s29 + $0xb0] sm:$0xff] }
  0x2f   : > { %12567 = vmatpush3.bf16.msra.mxu0 %v13912_v25  ;;  %v706_v62 = vsel %vm14328_vm2, %v701_v53, %v705_v40  ;;  %v723_v63 = vrot.slane %v721_v55, 4  ;;  %v729_v0 = vrot.slane %v727_v56, 5  ;;  %v734_v8 = vrot.slane %v732_v60, 4  ;;  %v249_v48 = vld [vmem:[%s14269_s29 + $0xb8] sm:$0x3]  ;;  %v250_v56 = vld [vmem:[%s14269_s29 + $0xc0] sm:$0xff] }
  0x30   : > { %v11112_v6 = vcombine.low %v696_v57, %v706_v62  ;;  %v715_v7 = vrot.slane %v714_v58, 4  ;;  %12568 = vmatprep.subr.bf16.mxu0 %v13913_v50  ;;  %v737_v9 = vrot.slane %v735_v61, 5  ;;  %v743_v13 = vrot.slane %v741_v1, 5  ;;  %v251_v57 = vld [vmem:[%s14269_s29 + $0xc8] sm:$0xff]  ;;  %v252_v58 = vld [vmem:[%s14269_s29 + $0xd0] sm:$0x3] }
  0x31   : > { %v724_v12 = vor.u32 %v723_v63, %v719_v54  ;;  %v745_v14 = vshrl.u32 %v14359_v51, 16  ;;  %v751_v15 = vshll.u32 %v620_v59, 16  ;;  %v756_v19 = vshrl.u32 %v14369_v4, 16  ;;  %v253_v63 = vld [vmem:[%s14269_s29 + $0xd8] sm:$0xff]  ;;  %v13916_v1 = vld [vmem:[%s17740_s1 + $0x20] sm:$0xff]  }
  0x32   : > { %12538 = vmatprep.mubr.bf16.mxu0 %v11112_v6  ;;  %v720_v16 = vsel %vm14328_vm2, %v715_v7, %v719_v54  ;;  %v738_v17 = vor.u32 %v737_v9, %v734_v8  ;;  %v759_v20 = vshll.u32 %v14369_v4, 16  ;;  %v765_v26 = vshll.u32 %v14371_v10, 16 }
  0x33   : > { %v725_v23 = vrot.slane %v724_v12, 4  ;;  %12569 = vmatpush3.bf16.msra.mxu0 %v13913_v50  ;;  %v747_v24 = vrot.slane %v745_v14, 4  ;;  %v753_v25 = vrot.slane %v751_v15, 5  ;;  %v758_v30 = vrot.slane %v756_v19, 4  ;;  %v256_v12 = vld [vmem:[%s14269_s29 + $0xf0] sm:$0xff]  ;;  %v259_v19 = vld [vmem:[%s14269_s29 + $0x108] sm:$0xff] }
  0x34   : > { %v739_v29 = vrot.slane %v738_v17, 4  ;;  %v761_v31 = vrot.slane %v759_v20, 5  ;;  %v769_v32 = vshrl.u32 %v14371_v10, 16  ;;  %12570 = vmatprep.subr.bf16.mxu0 %v13914_v11  ;;  %v767_v37 = vrot.slane %v765_v26, 5  ;;  %v258_v14 = vld [vmem:[%s14269_s29 + $0x100] sm:$0x3] }
  0x35   : > { %v730_v35 = vsel %vm14328_vm2, %v725_v23, %v729_v0  ;;  %v748_v36 = vor.u32 %v747_v24, %v743_v13  ;;  %v775_v38 = vshll.u32 %v621_v18, 16  ;;  %v11967_v54 = vpack.c.bf16 %v246_v27, %v246_v27  ;;  %v254_v0 = vld [vmem:[%s14269_s29 + $0xe0] sm:$0xff]  ;;  %v260_v20 = vld [vmem:[%s14269_s29 + $0x110] sm:$0xff]  ;;  %v261_v23 = vld [vmem:[%s14269_s29 + $0x118] sm:$0x3] }
  0x36   : > { %v11113_v40 = vcombine.low %v720_v16, %v730_v35  ;;  %v744_v43 = vsel %vm14328_vm2, %v739_v29, %v743_v13  ;;  %v762_v45 = vor.u32 %v761_v31, %v758_v30  ;;  %v771_v46 = vrot.slane %v769_v32, 4  ;;  %v257_v13 = vld [vmem:[%s14269_s29 + $0xf8] sm:$0xff]  ;;  %v14427_v24 = vld [vmem:[%s17740_s1 + $0x28] sm:$0xff]   ;;  %v262_v30 = vld [vmem:[%s14269_s29 + $0x120] sm:$0xff] }
  0x37   : > { %v749_v50 = vrot.slane %v748_v36, 4  ;;  %v777_v53 = vrot.slane %v775_v38, 5  ;;  %12571 = vmatpush3.bf16.msra.mxu0 %v13914_v11  ;;  %v780_v55 = vshrl.u32 %v14389_v33, 16  ;;  %v783_v61 = vshll.u32 %v14389_v33, 16  ;;  %534 = vst [vmem:[#allocation2 + $0x50] sm:$0x1] %v11967_v54 }
  0x38   : > { %12539 = vmatmul.mubr.bf16.gmra.mrb[4].mxu0 %v11113_v40  ;;  %v763_v59 = vrot.slane %v762_v45, 4  ;;  %v772_v60 = vor.u32 %v771_v46, %v767_v37  ;;  %v789_v62 = vshll.u32 %v14394_v39, 16  ;;  %12572 = vmatprep.subr.bf16.mxu0 %v14384_v21  ;;  %v793_v8 = vshrl.u32 %v14394_v39, 16  ;;  %v255_v11 = vld [vmem:[%s14269_s29 + $0xe8] sm:$0x3]  ;;  %v265_v38 = vld [vmem:[%s14269_s29 + $0x138] sm:$0xff] }
  0x39   : > { %v754_v6 = vsel %vm14328_vm2, %v749_v50, %v753_v25  ;;  %v782_v7 = vrot.slane %v780_v55, 4  ;;  %v11968_v9 = vpack.c.bf16 %v247_v34, %v247_v34  ;;  %v785_v18 = vrot.slane %v783_v61, 5  ;;  %v263_v31 = vld [vmem:[%s14269_s29 + $0x128] sm:$0xff]  ;;  %v264_v32 = vld [vmem:[%s14269_s29 + $0x130] sm:$0x3]  ;;  %v266_v40 = vld [vmem:[%s14269_s29 + $0x140] sm:$0xff] }
  0x3a   : > { %v11114_v15 = vcombine.low %v744_v43, %v754_v6  ;;  %v768_v16 = vsel %vm14328_vm2, %v763_v59, %v767_v37  ;;  %v773_v17 = vrot.slane %v772_v60, 4  ;;  %v14429_v25 = vrot.slane %v789_v62, 5  ;;  %v267_v43 = vld [vmem:[%s14269_s29 + $0x148] sm:$0x3]  ;;  %v269_v50 = vld [vmem:[%s14269_s29 + $0x158] sm:$0xff]  ;;  %v272_v59 = vld [vmem:[%s14269_s29 + $0x170] sm:$0xff] }
  0x3b   : > { %v795_v26 = vrot.slane %v793_v8, 4  ;;  %v11969_v27 = vpack.c.bf16 %v248_v47, %v248_v47  ;;  %v11970_v29 = vpack.c.bf16 %v249_v48, %v249_v48  ;;  %535 = vst [vmem:[#allocation2 + $0x54] sm:$0xf] %v11968_v9  ;;  %12573 = vmatpush3.bf16.msra.mxu0 %v14384_v21  ;;  %v786_v35 = vor.u32 %v785_v18, %v782_v7  ;;  %v268_v48 = vld [vmem:[%s14269_s29 + $0x150] sm:$0xff]  ;;  %v271_v54 = vld [vmem:[%s14269_s29 + $0x168] sm:$0xff] }
  0x3c   : > { %12542 = vmatprep.mubr.bf16.mxu0 %v11114_v15  ;;  %v778_v34 = vsel %vm14328_vm2, %v773_v17, %v777_v53  ;;  %v11973_v36 = vpack.c.bf16 %v252_v58, %v252_v58  ;;  %v12056_v37 = vpack.c.bf16 %v251_v57, %v250_v56  ;;  %v11974_v46 = vpack.c.bf16 %v253_v63, %v253_v63  ;;  %v270_v53 = vld [vmem:[%s14269_s29 + $0x160] sm:$0x3]  ;;  %v273_v63 = vld [vmem:[%s14269_s29 + $0x178] sm:$0x3] }
  0x3d   : > { %v11115_v45 = vcombine.low %v768_v16, %v778_v34  ;;  %v796_v21 = vor.u32 %v795_v26, %v14429_v25  ;;  %536 = vst [vmem:[#allocation2 + $0x58] sm:$0xf] %v11969_v27  ;;  %537 = vst [vmem:[#allocation2 + $0x5c] sm:$0x1] %v11970_v29  ;;  %v11975_v47 = vpack.c.bf16 %v254_v0, %v254_v0  ;;  %12574 = vmatprep.subr.bf16.mxu0 %v13916_v1  ;;  %v13919_v27 = vld [vmem:[%s17740_s1 + $0x38] sm:$0xff]  }
  0x3e   : > { %v787_v55 = vrot.slane %v786_v35, 4  ;;  %12081 = vst [vmem:[#allocation2 + $0x60] sm:$0xff] %v12056_v37   ;;  %540 = vst [vmem:[#allocation2 + $0x68] sm:$0x1] %v11973_v36  ;;  %v11976_v56 = vpack.c.bf16 %v255_v11, %v255_v11  ;;  %v11979_v57 = vpack.c.bf16 %v258_v14, %v258_v14  ;;  %v12061_v58 = vpack.c.bf16 %v257_v13, %v256_v12  ;;  %v14447_v0 = vld [vmem:[#allocation2 + $0x50] sm:$0x1] }
  0x3f   : > { %541 = vst [vmem:[#allocation2 + $0x6c] sm:$0xf] %v11974_v46  ;;  %542 = vst [vmem:[#allocation2 + $0x70] sm:$0xf] %v11975_v47  ;;  %12575 = vmatpush3.bf16.msra.mxu0 %v13916_v1  ;;  %v11980_v60 = vpack.c.bf16 %v259_v19, %v259_v19  ;;  %v11981_v61 = vpack.c.bf16 %v260_v20, %v260_v20  ;;  %v11982_v62 = vpack.c.bf16 %v261_v23, %v261_v23  ;;  %v13918_v1 = vld [vmem:[%s17740_s1 + $0x30] sm:$0xff]  }
  0x40   : > { %12543 = vmatmul.mubr.bf16.gmra.mrb[8].mxu0 %v11115_v45  ;;  %v792_v6 = vsel %vm14328_vm2, %v787_v55, %v14429_v25  ;;  %v797_v7 = vrot.slane %v796_v21, 4  ;;  %543 = vst [vmem:[#allocation2 + $0x74] sm:$0x1] %v11976_v56  ;;  %12082 = vst [vmem:[#allocation2 + $0x78] sm:$0xff] %v12061_v58   ;;  %12576 = vmatprep.subr.bf16.mxu0 %v14427_v24  ;;  %v11985_v8 = vpack.c.bf16 %v264_v32, %v264_v32  ;;  %v14489_v56 = vld [vmem:[%s17740_s1 + $0x80] sm:$0xff]  }
  0x41   : > { %546 = vst [vmem:[#allocation2 + $0x80] sm:$0x1] %v11979_v57  ;;  %v12066_v9 = vpack.c.bf16 %v263_v31, %v262_v30  ;;  %v799_v11 = vshll.u32 %v14447_v0, 16  ;;  %547 = vst [vmem:[#allocation2 + $0x84] sm:$0xf] %v11980_v60  ;;  %v11986_v12 = vpack.c.bf16 %v265_v38, %v265_v38  ;;  %v11987_v13 = vpack.c.bf16 %v266_v40, %v266_v40 }
  0x42   : > { %548 = vst [vmem:[#allocation2 + $0x88] sm:$0xf] %v11981_v61  ;;  %549 = vst [vmem:[#allocation2 + $0x8c] sm:$0x1] %v11982_v62  ;;  %v11988_v14 = vpack.c.bf16 %v267_v43, %v267_v43  ;;  %v14457_v15 = vld [vmem:[#allocation2 + $0x54] sm:$0xf]  ;;  %v11991_v16 = vpack.c.bf16 %v270_v53, %v270_v53  ;;  %v12071_v17 = vpack.c.bf16 %v269_v50, %v268_v48 }
  0x43   : > { %12083 = vst [vmem:[#allocation2 + $0x90] sm:$0xff] %v12066_v9   ;;  %552 = vst [vmem:[#allocation2 + $0x98] sm:$0x1] %v11985_v8  ;;  %v11992_v18 = vpack.c.bf16 %v271_v54, %v271_v54  ;;  %v11993_v19 = vpack.c.bf16 %v272_v59, %v272_v59  ;;  %v801_v20 = vrot.slane %v799_v11, 5  ;;  %v804_v23 = vshrl.u32 %v14457_v15, 16  ;;  %12577 = vmatpush3.bf16.msra.mxu0 %v14427_v24 }
  0x44   : > { %v807_v25 = vshll.u32 %v14457_v15, 16  ;;  %553 = vst [vmem:[#allocation2 + $0x9c] sm:$0xf] %v11986_v12  ;;  %554 = vst [vmem:[#allocation2 + $0xa0] sm:$0xf] %v11987_v13  ;;  %v11994_v26 = vpack.c.bf16 %v273_v63, %v273_v63  ;;  %12578 = vmatprep.subr.bf16.mxu0 %v13918_v1 }
  0x45   : > { %555 = vst [vmem:[#allocation2 + $0xa4] sm:$0x1] %v11988_v14  ;;  %v14465_v29 = vld [vmem:[#allocation2 + $0x58] sm:$0xf]  ;;  %v14467_v30 = vld [vmem:[#allocation2 + $0x5c] sm:$0x1]  ;;  %v802_v24 = vsel %vm14328_vm2, %v797_v7, %v801_v20 }
  0x46   : > { %12084 = vst [vmem:[#allocation2 + $0xa8] sm:$0xff] %v12071_v17   ;;  %558 = vst [vmem:[#allocation2 + $0xb0] sm:$0x1] %v11991_v16  ;;  %v806_v31 = vrot.slane %v804_v23, 4  ;;  %v809_v32 = vrot.slane %v807_v25, 5  ;;  %v813_v34 = vshll.u32 %v14465_v29, 16  ;;  %v11116_v36 = vcombine.low %v792_v6, %v802_v24 }
  0x47   : > { %559 = vst [vmem:[#allocation2 + $0xb4] sm:$0xf] %v11992_v18  ;;  %560 = vst [vmem:[#allocation2 + $0xb8] sm:$0xf] %v11993_v19  ;;  %v14472_v35 = vld [vmem:[#allocation2 + $0x60] sm:$0xf]  ;;  %12579 = vmatpush3.bf16.msra.mxu0 %v13918_v1 }
  0x48   : > { %561 = vst [vmem:[#allocation2 + $0xbc] sm:$0x1] %v11994_v26  ;;  %v817_v37 = vshrl.u32 %v14465_v29, 16  ;;  %v823_v38 = vshll.u32 %v14467_v30, 16  ;;  %v14476_v40 = vld [vmem:[#allocation2 + $0x64] sm:$0xf]  ;;  %v810_v45 = vor.u32 %v809_v32, %v806_v31  ;;  %12546 = vmatprep.mubr.bf16.mxu0 %v11116_v36  ;;  %12580 = vmatprep.subr.bf16.mxu0 %v13919_v27 }
  0x49   : > { %v14478_v43 = vld [vmem:[#allocation2 + $0x68] sm:$0x1]  ;;  %v815_v21 = vrot.slane %v813_v34, 5  ;;  %v828_v46 = vshrl.u32 %v14472_v35, 16  ;;  %v831_v47 = vshll.u32 %v14472_v35, 16  ;;  %v837_v54 = vshll.u32 %v14476_v40, 16 }
  0x4a   : > { %v14482_v48 = vld [vmem:[#allocation2 + $0x6c] sm:$0xf]  ;;  %v819_v50 = vrot.slane %v817_v37, 4  ;;  %v825_v53 = vrot.slane %v823_v38, 5  ;;  %v841_v55 = vshrl.u32 %v14476_v40, 16  ;;  %v811_v57 = vrot.slane %v810_v45, 4 }
  0x4b   : > { %v830_v58 = vrot.slane %v828_v46, 4  ;;  %v833_v59 = vrot.slane %v831_v47, 5  ;;  %v847_v60 = vshll.u32 %v14478_v43, 16  ;;  %v14492_v61 = vld [vmem:[#allocation2 + $0x70] sm:$0xf]  ;;  %v839_v63 = vrot.slane %v837_v54, 5  ;;  %12581 = vmatpush3.bf16.msra.mxu0 %v13919_v27 }
  0x4c   : > { %v820_v62 = vor.u32 %v819_v50, %v815_v21  ;;  %v843_v6 = vrot.slane %v841_v55, 4  ;;  %v14494_v7 = vld [vmem:[#allocation2 + $0x74] sm:$0x1]  ;;  %v852_v8 = vshrl.u32 %v14482_v48, 16  ;;  %v816_v9 = vsel %vm14328_vm2, %v811_v57, %v815_v21  ;;  %v14500_v13 = vld [vmem:[#allocation2 + $0x78] sm:$0xf]  ;;  %12614 = vmatprep.subr.bf16.mxu0 %v14489_v56 }
  0x4d   : > { %v834_v1 = vor.u32 %v833_v59, %v830_v58  ;;  %v849_v11 = vrot.slane %v847_v60, 5  ;;  %v855_v12 = vshll.u32 %v14482_v48, 16  ;;  %v861_v18 = vshll.u32 %v14492_v61, 16  ;;  %v14508_v32 = vld [vmem:[#allocation2 + $0x7c] sm:$0xf] }
  0x4e   : > { %v821_v14 = vrot.slane %v820_v62, 4  ;;  %v844_v16 = vor.u32 %v843_v6, %v839_v63  ;;  %v854_v17 = vrot.slane %v852_v8, 4  ;;  %v865_v23 = vshrl.u32 %v14492_v61, 16  ;;  %v14513_v45 = vld [vmem:[#allocation2 + $0x80] sm:$0x1] }
  0x4f   : > { %v835_v19 = vrot.slane %v834_v1, 4  ;;  %v857_v20 = vrot.slane %v855_v12, 5  ;;  %v871_v25 = vshll.u32 %v14494_v7, 16  ;;  %v863_v31 = vrot.slane %v861_v18, 5  ;;  %v14515_v21 = vld [vmem:[#allocation2 + $0x84] sm:$0xf] }
  0x50   : > { %v826_v26 = vsel %vm14328_vm2, %v821_v14, %v825_v53  ;;  %v845_v24 = vrot.slane %v844_v16, 4  ;;  %v876_v27 = vshrl.u32 %v14500_v13, 16  ;;  %v867_v38 = vrot.slane %v865_v23, 4 }
  0x51   : > { %v11117_v34 = vcombine.low %v816_v9, %v826_v26  ;;  %v840_v36 = vsel %vm14328_vm2, %v835_v19, %v839_v63  ;;  %v858_v37 = vor.u32 %v857_v20, %v854_v17  ;;  %v873_v47 = vrot.slane %v871_v25, 5  ;;  %v14523_v63 = vld [vmem:[#allocation2 + $0x88] sm:$0xf]  ;;  %v14531_v19 = vld [vmem:[#allocation2 + $0x90] sm:$0xf] }
  0x52   : > { %v850_v46 = vsel %vm14328_vm2, %v845_v24, %v849_v11  ;;  %v878_v50 = vrot.slane %v876_v27, 4  ;;  %v879_v53 = vshll.u32 %v14500_v13, 16  ;;  %v868_v57 = vor.u32 %v867_v38, %v863_v31  ;;  %v14528_v11 = vld [vmem:[#allocation2 + $0x8c] sm:$0x1] }
  0x53   : > { %12547 = vmatmul.mubr.bf16.gmra.mrb[12].mxu0 %v11117_v34  ;;  %v11118_v54 = vcombine.low %v840_v36, %v850_v46  ;;  %v859_v55 = vrot.slane %v858_v37, 4  ;;  %v885_v58 = vshll.u32 %v14508_v32, 16  ;;  %v889_v60 = vshrl.u32 %v14508_v32, 16  ;;  %v14538_v36 = vld [vmem:[#allocation2 + $0x94] sm:$0xf] }
  0x54   : > { %v881_v59 = vrot.slane %v879_v53, 5  ;;  %v895_v62 = vshll.u32 %v14513_v45, 16  ;;  %v900_v6 = vshrl.u32 %v14515_v21, 16  ;;  %v869_v9 = vrot.slane %v868_v57, 4  ;;  %v14540_v37 = vld [vmem:[#allocation2 + $0x98] sm:$0x1] }
  0x55   : > { %12550 = vmatprep.mubr.bf16.mxu0 %v11118_v54  ;;  %v864_v8 = vsel %vm14328_vm2, %v859_v55, %v863_v31  ;;  %v887_v1 = vrot.slane %v885_v58, 5  ;;  %v903_v12 = vshll.u32 %v14515_v21, 16  ;;  %v891_v16 = vrot.slane %v889_v60, 4 }
  0x56   : > { %v882_v14 = vor.u32 %v881_v59, %v878_v50  ;;  %v897_v17 = vrot.slane %v895_v62, 5  ;;  %v902_v18 = vrot.slane %v900_v6, 4  ;;  %v874_v20 = vsel %vm14328_vm2, %v869_v9, %v873_v47  ;;  %v14543_v47 = vld [vmem:[#allocation2 + $0x9c] sm:$0xf]  ;;  %v14548_v59 = vld [vmem:[#allocation2 + $0xa0] sm:$0xf] }
  0x57   : > { %v905_v23 = vrot.slane %v903_v12, 5  ;;  %v909_v25 = vshll.u32 %v14523_v63, 16  ;;  %v913_v26 = vshrl.u32 %v14523_v63, 16  ;;  %v11119_v24 = vcombine.low %v864_v8, %v874_v20 }
  0x58   : > { %v883_v31 = vrot.slane %v882_v14, 4  ;;  %v892_v27 = vor.u32 %v891_v16, %v887_v1  ;;  %v919_v34 = vshll.u32 %v14528_v11, 16  ;;  %v924_v53 = vshrl.u32 %v14531_v19, 16 }
  0x59   : > { %v906_v38 = vor.u32 %v905_v23, %v902_v18  ;;  %v911_v46 = vrot.slane %v909_v25, 5  ;;  %v915_v50 = vrot.slane %v913_v26, 4  ;;  %v927_v58 = vshll.u32 %v14531_v19, 16  ;;  %v14557_v25 = vld [vmem:[#allocation2 + $0xa4] sm:$0x1] }
  0x5a   : > { %v888_v54 = vsel %vm14328_vm2, %v883_v31, %v887_v1  ;;  %v893_v55 = vrot.slane %v892_v27, 4  ;;  %v921_v57 = vrot.slane %v919_v34, 5  ;;  %v926_v6 = vrot.slane %v924_v53, 4  ;;  %17835 = vst [vmem:[#allocation4_spill] sm:$0xff] %v14557_v25  ;;  %v14560_v34 = vld [vmem:[#allocation2 + $0xa8] sm:$0xf] }
  0x5b   : > { %12551 = vmatmul.mubr.bf16.gmra.mrb[16].mxu0 %v11119_v24  ;;  %v907_v60 = vrot.slane %v906_v38, 4  ;;  %v916_v62 = vor.u32 %v915_v50, %v911_v46  ;;  %v933_v8 = vshll.u32 %v14538_v36, 16  ;;  %v929_v12 = vrot.slane %v927_v58, 5 }
  0x5c   : > { %v898_v9 = vsel %vm14328_vm2, %v893_v55, %v897_v17  ;;  %v937_v14 = vshrl.u32 %v14538_v36, 16  ;;  %v943_v1 = vshll.u32 %v14540_v37, 16  ;;  %v948_v27 = vshrl.u32 %v14543_v47, 16 }
  0x5d   : > { %v11120_v16 = vcombine.low %v888_v54, %v898_v9  ;;  %v912_v18 = vsel %vm14328_vm2, %v907_v60, %v911_v46  ;;  %v917_v20 = vrot.slane %v916_v62, 4  ;;  %v935_v23 = vrot.slane %v933_v8, 5  ;;  %v14567_v60 = vld [vmem:[#allocation2 + $0xac] sm:$0xf] }
  0x5e   : > { %v930_v26 = vor.u32 %v929_v12, %v926_v6  ;;  %v939_v24 = vrot.slane %v937_v14, 4  ;;  %v945_v31 = vrot.slane %v943_v1, 5  ;;  %v951_v38 = vshll.u32 %v14543_v47, 16  ;;  %v14570_v12 = vld [vmem:[#allocation2 + $0xb0] sm:$0x1] }
  0x5f   : > { %12554 = vmatprep.mubr.bf16.mxu0 %v11120_v16  ;;  %v922_v17 = vsel %vm14328_vm2, %v917_v20, %v921_v57  ;;  %v957_v50 = vshll.u32 %v14548_v59, 16  ;;  %v961_v46 = vshrl.u32 %v14548_v59, 16  ;;  %v950_v58 = vrot.slane %v948_v27, 4  ;;  %17836 = vst [vmem:[#allocation5_spill] sm:$0xff] %v14570_v12  ;;  %v14577_v27 = vld [vmem:[#allocation2 + $0xb4] sm:$0xf] }
  0x60   : > { %v11121_v53 = vcombine.low %v912_v18, %v922_v17  ;;  %v931_v54 = vrot.slane %v930_v26, 4  ;;  %v940_v55 = vor.u32 %v939_v24, %v935_v23  ;;  %v953_v62 = vrot.slane %v951_v38, 5 }
  0x61   : > { %v959_v6 = vrot.slane %v957_v50, 5  ;;  %v963_v8 = vrot.slane %v961_v46, 4  ;;  %v967_v9 = vshll.u32 %v14557_v25, 16  ;;  %v972_v1 = vshrl.u32 %v14560_v34, 16  ;;  %v14582_v46 = vld [vmem:[#allocation2 + $0xb8] sm:$0xf] }
  0x62   : > { %v936_v57 = vsel %vm14328_vm2, %v931_v54, %v935_v23  ;;  %v941_v14 = vrot.slane %v940_v55, 4  ;;  %v975_v16 = vshll.u32 %v14560_v34, 16  ;;  %v954_v18 = vor.u32 %v953_v62, %v950_v58 }
  0x63   : > { %12555 = vmatmul.mubr.bf16.gmra.mrb[20].mxu0 %v11121_v53  ;;  %v964_v20 = vor.u32 %v963_v8, %v959_v6  ;;  %v969_v26 = vrot.slane %v967_v9, 5  ;;  %v981_v24 = vshll.u32 %v14567_v60, 16  ;;  %v974_v38 = vrot.slane %v972_v1, 4  ;;  %v14590_v1 = vld [vmem:[#allocation2 + $0xbc] sm:$0x1] }
  0x64   : > { %v946_v17 = vsel %vm14328_vm2, %v941_v14, %v945_v31  ;;  %v977_v50 = vrot.slane %v975_v16, 5  ;;  %v985_v23 = vshrl.u32 %v14567_v60, 16  ;;  %v955_v55 = vrot.slane %v954_v18, 4 }
  0x65   : > { %v11122_v54 = vcombine.low %v936_v57, %v946_v17  ;;  %v965_v25 = vrot.slane %v964_v20, 4  ;;  %v983_v53 = vrot.slane %v981_v24, 5  ;;  %v991_v8 = vshll.u32 %v14570_v12, 16 }
  0x66   : > { %v978_v58 = vor.u32 %v977_v50, %v974_v38  ;;  %v987_v62 = vrot.slane %v985_v23, 4  ;;  %v996_v9 = vshrl.u32 %v14577_v27, 16  ;;  %v960_v31 = vsel %vm14328_vm2, %v955_v55, %v959_v6 }
  0x67   : > { %12558 = vmatprep.mubr.bf16.mxu0 %v11122_v54  ;;  %v970_v14 = vsel %vm14328_vm2, %v965_v25, %v969_v26  ;;  %v999_v57 = vshll.u32 %v14577_v27, 16  ;;  %v1005_v16 = vshll.u32 %v14582_v46, 16  ;;  %v993_v17 = vrot.slane %v991_v8, 5 }
  0x68   : > { %v11123_v18 = vcombine.low %v960_v31, %v970_v14  ;;  %v979_v20 = vrot.slane %v978_v58, 4  ;;  %v988_v24 = vor.u32 %v987_v62, %v983_v53  ;;  %v998_v38 = vrot.slane %v996_v9, 4 }
  0x69   : > { %v1001_v50 = vrot.slane %v999_v57, 5  ;;  %v1007_v23 = vrot.slane %v1005_v16, 5  ;;  %v1009_v54 = vshrl.u32 %v14582_v46, 16  ;;  %v1015_v25 = vshll.u32 %v14590_v1, 16 }
  0x6a   : > { %v984_v6 = vsel %vm14328_vm2, %v979_v20, %v983_v53  ;;  %v989_v55 = vrot.slane %v988_v24, 4  ;;  %v11140_v26 = vcombine.low %v14389_v33, %v14394_v39  ;;  %v11141_v58 = vcombine.low %v14457_v15, %v14465_v29  ;;  %v14144_v33 = vld [vmem:[#allocation2 + $0x8] sm:$0x1]  ;;  %v14145_v15 = vld [vmem:[#allocation2 + $0x4] sm:$0xf] }
  0x6b   : > { %12559 = vmatmul.mubr.bf16.gmra.mrb[24].mxu0 %v11123_v18  ;;  %v1002_v12 = vor.u32 %v1001_v50, %v998_v38  ;;  %v1011_v31 = vrot.slane %v1009_v54, 4  ;;  %v11142_v62 = vcombine.low %v14472_v35, %v14476_v40  ;;  %v1017_v9 = vrot.slane %v1015_v25, 5  ;;  %v1628_v50 = vld [vmem:[#allocation2 + $0xa8] sm:$0xe]  ;;  %v1629_v38 = vld [vmem:[#allocation2 + $0xb4] sm:$0xe] }
  0x6c   : > { %v994_v8 = vsel %vm14328_vm2, %v989_v55, %v993_v17  ;;  %v11143_v53 = vcombine.low %v14482_v48, %v14492_v61  ;;  %v11144_v14 = vcombine.low %v14500_v13, %v14508_v32  ;;  %v11145_v20 = vcombine.low %v14515_v21, %v14523_v63  ;;  %v1627_v17 = vld [vmem:[#allocation2 + $0x9c] sm:$0xe]  ;;  %v14146_v21 = vld [vmem:[#allocation2 + $0x10] sm:$0xf] }
  0x6d   : > { %v11124_v57 = vcombine.low %v984_v6, %v994_v8  ;;  %v1003_v16 = vrot.slane %v1002_v12, 4  ;;  %v1012_v18 = vor.u32 %v1011_v31, %v1007_v23  ;;  %v11134_v55 = vcombine.low %v14300_v41, %v14302_v42  ;;  %v1620_v31 = vld [vmem:[#allocation2 + $0x48] sm:$0xe]  ;;  %v1621_v8 = vld [vmem:[#allocation2 + $0x54] sm:$0xe] }
  0x6e   : > { %v11136_v41 = vcombine.low %v14319_v2, %v14321_v3  ;;  %v1716_v2 = vrot.slane %v14465_v29, 5  ;;  %v1719_v3 = vrot.slane %v14467_v30, 5  ;;  %v1667_v29 = vrot.slane %v14145_v15, 5 }
  0x6f   : > { %12562 = vmatprep.mubr.bf16.mxu0 %v11124_v57  ;;  %v1008_v12 = vsel %vm14328_vm2, %v1003_v16, %v1007_v23  ;;  %v1013_v54 = vrot.slane %v1012_v18, 4  ;;  %v11135_v57 = vcombine.low %v14308_v49, %v14313_v52  ;;  %v13925_v23 = vld [vmem:[%s17740_s1 + $0x88] sm:$0xff]   ;;  %v11164_v16 = vrot.slane %v1620_v31, 9  ;;  %v1622_v18 = vld [vmem:[#allocation2 + $0x60] sm:$0xe] }
  0x70   : > { %v11139_v31 = vcombine.low %v14369_v4, %v14371_v10  ;;  %v1718_v30 = vrot.slane %v1716_v2, 4  ;;  %v13943_v4 = vld [vmem:[%s17740_s1 + $0xb8] sm:$0xff]   ;;  %v13944_v10 = vld [vmem:[%s17740_s1 + $0xc0] sm:$0xff]   ;;  %v17841_v35 = vcombine.low %v14531_v19, %v14538_v36  ;;  %v1669_v48 = vrot.slane %v1667_v29, 4 }
  0x71   : > { %v1018_v6 = vsel %vm14328_vm2, %v1013_v54, %v1017_v9  ;;  %v1709_v9 = vrot.slane %v14394_v39, 5  ;;  %v11137_v54 = vcombine.low %v14340_v22, %v14345_v28  ;;  %v11166_v28 = vrot.slane %v1622_v18, 9 }
  0x72   : > { %v11125_v25 = vcombine.low %v1008_v12, %v1018_v6  ;;  %v1623_v12 = vld [vmem:[#allocation2 + $0x6c] sm:$0xe]  ;;  %v1712_v6 = vrot.slane %v14447_v0, 5  ;;  %v1624_v0 = vld [vmem:[#allocation2 + $0x78] sm:$0xe]  ;;  %v1670_v39 = vrot.slane %v14144_v33, 5  ;;  %v17842_v13 = vcombine.low %v14543_v47, %v14548_v59 }
  0x73   : > { %v14642_v49 = vsel %vm14634_vm5, %v11164_v16, %v1709_v9  ;;  %v1711_v52 = vrot.slane %v1709_v9, 4  ;;  %v1723_v16 = vrot.slane %v14476_v40, 5  ;;  %v13928_v9 = vld [vmem:[%s17740_s1 + $0x90] sm:$0xff]   ;;  %v1614_v40 = vld [vmem:[#allocation2] sm:$0xe]  ;;  %v17843_v19 = vcombine.low %v14560_v34, %v14567_v60 }
  0x74   : > { %12563 = vmatmul.mubr.bf16.gmra.mrb[28].mxu0 %v11125_v25  ;;  %v11165_v25 = vrot.slane %v1621_v8, 9  ;;  %v1726_v8 = vrot.slane %v14478_v43, 5  ;;  %v1733_v43 = vrot.slane %v14494_v7, 5  ;;  %v1751_v7 = vrot.slane %v14538_v36, 5  ;;  %v1617_v34 = vld [vmem:[#allocation2 + $0x24] sm:$0xe] }
  0x75   : > { %12582 = vmatprep.mubr.bf16.mxu0 %v11134_v55  ;;  %v11138_v55 = vcombine.low %v14354_v44, %v14359_v51  ;;  %v14653_v22 = vsel %vm14634_vm5, %v1711_v52, %v1712_v6  ;;  %v1725_v18 = vrot.slane %v1723_v16, 4  ;;  %v1730_v52 = vrot.slane %v14492_v61, 5  ;;  %v1626_v6 = vld [vmem:[#allocation2 + $0x90] sm:$0xe]  ;;  %v274_v61 = vld [vmem:[%s14269_s29 + $0x180] sm:$0xff] }
  0x76   : > { %v14661_v51 = vsel %vm14634_vm5, %v11165_v25, %v1716_v2  ;;  %v14674_v25 = vsel %vm14634_vm5, %v1718_v30, %v1719_v3  ;;  %v11168_v2 = vrot.slane %v1624_v0, 9  ;;  %v1737_v44 = vrot.slane %v14508_v32, 5  ;;  %v1615_v32 = vld [vmem:[#allocation2 + $0xc] sm:$0xe]  ;;  %v14150_v33 = vld [vmem:[#allocation2 + $0x28] sm:$0xf] }
  0x77   : > { %v1740_v30 = vrot.slane %v14513_v45, 5 }
  0x78   : > { %v14692_v3 = vsel %vm14634_vm5, %v11168_v2, %v1737_v44  ;;  %v1739_v0 = vrot.slane %v1737_v44, 4  ;;  %v11170_v2 = vrot.slane %v1626_v6, 9  ;;  %v1753_v6 = vrot.slane %v1751_v7, 4 }
  0x7a   : > { %v14708_v45 = vsel %vm14634_vm5, %v1739_v0, %v1740_v30  ;;  %v14720_v0 = vsel %vm14634_vm5, %v11170_v2, %v1751_v7  ;;  %v11171_v30 = vrot.slane %v1627_v17, 9 }
  0x7c   : > { %12583 = vmatmul.mubr.bf16.vlgmr.msra.gmra.mrb[0].mxu0 %v11135_v57  ;;  %v1625_v57 = vld [vmem:[#allocation2 + $0x84] sm:$0xe] }
  0x7d   : > { %12615 = vmatpush3.bf16.msra.mxu0 %v14489_v56  ;;  %12586 = vmatprep.mubr.bf16.mxu0 %v11136_v41  ;;  %v14669_v56 = vsel %vm14634_vm5, %v11166_v28, %v1723_v16  ;;  %v11167_v41 = vrot.slane %v1623_v12, 9  ;;  %v14682_v28 = vsel %vm14634_vm5, %v1725_v18, %v1726_v8  ;;  %v1732_v16 = vrot.slane %v1730_v52, 4  ;;  %v13931_v8 = vld [vmem:[%s17740_s1 + $0x98] sm:$0xff]  }
  0x7e   : > { %12616 = vmatprep.subr.bf16.mxu0 %v13925_v23 }
  0x7f   : > { %v14686_v12 = vsel %vm14634_vm5, %v11167_v41, %v1730_v52  ;;  %v14700_v18 = vsel %vm14634_vm5, %v1732_v16, %v1733_v43  ;;  %v1744_v41 = vrot.slane %v14523_v63, 5  ;;  %v1747_v52 = vrot.slane %v14528_v11, 5 }
  0x80   : > { %v1754_v11 = vrot.slane %v14540_v37, 5  ;;  %v17839_v37 = vld [vmem:[#allocation4_spill] sm:$0xff]  ;;  %v1765_v43 = vrot.slane %v14567_v60, 5  ;;  %v1674_v63 = vrot.slane %v14146_v21, 5  ;;  %v14153_v21 = vld [vmem:[#allocation2 + $0x38] sm:$0x1] }
  0x81   : > { %12617 = vmatpush3.bf16.msra.mxu0 %v13925_v23  ;;  %v11169_v23 = vrot.slane %v1625_v57, 9  ;;  %v1746_v16 = vrot.slane %v1744_v41, 4  ;;  %v1618_v60 = vld [vmem:[#allocation2 + $0x30] sm:$0xe] }
  0x82   : > { %12618 = vmatprep.subr.bf16.mxu0 %v13928_v9  ;;  %v14736_v17 = vsel %vm14634_vm5, %v1753_v6, %v1754_v11  ;;  %v13937_v11 = vld [vmem:[%s17740_s1 + $0xa8] sm:$0xff]  }
  0x83   : > { %v14715_v57 = vsel %vm14634_vm5, %v11169_v23, %v1744_v41  ;;  %v13934_v23 = vld [vmem:[%s17740_s1 + $0xa0] sm:$0xff]   ;;  %v14728_v41 = vsel %vm14634_vm5, %v1746_v16, %v1747_v52  ;;  %v1767_v16 = vrot.slane %v1765_v43, 4  ;;  %v1775_v52 = vrot.slane %v14590_v1, 5  ;;  %v13940_v1 = vld [vmem:[%s17740_s1 + $0xb0] sm:$0xff]  }
  0x84   : > { %12587 = vmatmul.mubr.bf16.gmra.mrb[4].mxu0 %v11137_v54  ;;  %v1758_v54 = vrot.slane %v14548_v59, 5  ;;  %v11201_v7 = vcombine.low %v14715_v57, %v14728_v41  ;;  %v11159_v59 = vrot.slane %v1615_v32, 9  ;;  %v2490_v57 = vld [vmem:[#allocation2 + $0x1c] sm:$0xf] }
  0x85   : > { %12590 = vmatprep.mubr.bf16.mxu0 %v11138_v55  ;;  %12619 = vmatpush3.bf16.msra.mxu0 %v13928_v9  ;;  %v1761_v55 = vrot.slane %v17839_v37, 5  ;;  %v11172_v9 = vrot.slane %v1628_v50, 9  ;;  %v17840_v37 = vld [vmem:[#allocation5_spill] sm:$0xff] }
  0x86   : > { %12620 = vmatprep.subr.bf16.mxu0 %v13931_v8  ;;  %v14740_v2 = vsel %vm14634_vm5, %v11171_v30, %v1758_v54  ;;  %v1760_v44 = vrot.slane %v1758_v54, 4  ;;  %v1768_v24 = vrot.slane %v17840_v37, 5  ;;  %v11173_v30 = vrot.slane %v1629_v38, 9 }
  0x87   : > { %v14746_v50 = vsel %vm14634_vm5, %v11172_v9, %v1765_v43  ;;  %v1772_v54 = vrot.slane %v14582_v46, 5 }
  0x88   : > { %v14754_v6 = vsel %vm14634_vm5, %v1760_v44, %v1761_v55 }
  0x89   : > { %12621 = vmatpush3.bf16.msra.mxu0 %v13931_v8  ;;  %v11203_v43 = vcombine.low %v14740_v2, %v14754_v6  ;;  %v14762_v8 = vsel %vm14634_vm5, %v1767_v16, %v1768_v24  ;;  %v14768_v44 = vsel %vm14634_vm5, %v11173_v30, %v1772_v54  ;;  %v1774_v38 = vrot.slane %v1772_v54, 4  ;;  %v14149_v30 = vld [vmem:[#allocation2 + $0x20] sm:$0x1] }
  0x8a   : > { %12622 = vmatprep.subr.bf16.mxu0 %v13934_v23  ;;  %v11204_v9 = vcombine.low %v14746_v50, %v14762_v8  ;;  %v1676_v16 = vrot.slane %v1674_v63, 4  ;;  %v1684_v54 = vrot.slane %v14149_v30, 5  ;;  %v13947_v30 = vld [vmem:[%s17740_s1 + $0xd8] sm:$0xff]   ;;  %v2572_v2 = vshrl.u32 %v2490_v57, 16  ;;  %v2488_v50 = vld [vmem:[#allocation2 + $0x14] sm:$0x1] }
  0x8b   : > { %v14781_v24 = vsel %vm14634_vm5, %v1774_v38, %v1775_v52  ;;  %v17844_v38 = vcombine.low %v14577_v27, %v14582_v46 }
  0x8c   : > { %12591 = vmatmul.mubr.bf16.gmra.mrb[8].mxu0 %v11139_v31  ;;  %v11205_v55 = vcombine.low %v14768_v44, %v14781_v24  ;;  %v1671_v31 = vsel %vm14634_vm5, %v1669_v48, %v1670_v39  ;;  %v1688_v39 = vrot.slane %v14150_v33, 5  ;;  %v13950_v33 = vld [vmem:[%s17740_s1 + $0xf0] sm:$0xff]   ;;  %v13957_v44 = vld [vmem:[%s17740_s1 + $0x108] sm:$0xff]   ;;  %v2554_v24 = vshll.u32 %v2488_v50, 16 }
  0x8d   : > { %12594 = vmatprep.mubr.bf16.mxu0 %v11140_v26  ;;  %12623 = vmatpush3.bf16.msra.mxu0 %v13934_v23  ;;  %v11158_v26 = vrot.slane %v1614_v40, 9  ;;  %v14148_v23 = vld [vmem:[#allocation2 + $0x14] sm:$0x1]  ;;  %v11161_v40 = vrot.slane %v1617_v34, 9  ;;  %v13948_v34 = vld [vmem:[%s17740_s1 + $0xe0] sm:$0xff]  }
  0x8e   : > { %12624 = vmatprep.subr.bf16.mxu0 %v13937_v11  ;;  %v1677_v52 = vrot.slane %v14148_v23, 5  ;;  %v1690_v48 = vrot.slane %v1688_v39, 4  ;;  %v1619_v23 = vld [vmem:[#allocation2 + $0x3c] sm:$0xe]  ;;  %v13972_v50 = vld [vmem:[%s17740_s1 + $0x130] sm:$0xff]  }
  0x8f   : > { %v1668_v36 = vsel %vm14634_vm5, %v11158_v26, %v1667_v29 }
  0x90   : > { %v11190_v47 = vcombine.low %v1668_v36, %v1671_v31 }
  0x91   : > { %12625 = vmatpush3.bf16.msra.mxu0 %v13937_v11 }
  0x92   : > { %12626 = vmatprep.subr.bf16.mxu0 %v13940_v1 }
  0x94   : > { %12595 = vmatmul.mubr.bf16.gmra.mrb[12].mxu0 %v11141_v58  ;;  %v275_v58 = vld [vmem:[%s14269_s29 + $0x188] sm:$0xff] }
  0x95   : > { %12598 = vmatprep.mubr.bf16.mxu0 %v11142_v62  ;;  %12627 = vmatpush3.bf16.msra.mxu0 %v13940_v1  ;;  %v12076_v62 = vpack.c.bf16 %v275_v58, %v274_v61  ;;  %v1675_v1 = vsel %vm14634_vm5, %v11159_v59, %v1674_v63  ;;  %v14152_v61 = vld [vmem:[#allocation2 + $0x2c] sm:$0x1]  ;;  %v1698_v63 = vrot.slane %v14153_v21, 5  ;;  %v11163_v59 = vrot.slane %v1619_v23, 9 }
  0x96   : > { %12628 = vmatprep.subr.bf16.mxu0 %v13943_v4  ;;  %v1691_v58 = vrot.slane %v14152_v61, 5 }
  0x97   : > { %12085 = vst [vmem:[#allocation2 + $0xc0] sm:$0xff] %v12076_v62   ;;  %v13945_v62 = vld [vmem:[%s17740_s1 + $0xc8] sm:$0xff]  }
  0x99   : > { %12629 = vmatpush3.bf16.msra.mxu0 %v13943_v4  ;;  %v1678_v4 = vsel %vm14634_vm5, %v1676_v16, %v1677_v52 }
  0x9a   : > { %12662 = vmatprep.subr.bf16.mxu0 %v13944_v10  ;;  %v11191_v46 = vcombine.low %v1675_v1, %v1678_v4  ;;  %v13949_v1 = vld [vmem:[%s17740_s1 + $0xe8] sm:$0xff]   ;;  %v17845_v4 = vcombine.low %v14642_v49, %v14653_v22  ;;  %v17847_v49 = vcombine.low %v14669_v56, %v14682_v28  ;;  %v13954_v22 = vld [vmem:[%s17740_s1 + $0x100] sm:$0xff]   ;;  %v17850_v56 = vcombine.low %v14720_v0, %v14736_v17 }
  0x9b   : > { %v2486_v28 = vld [vmem:[#allocation2 + $0xc] sm:$0xf] }
  0x9c   : > { %12599 = vmatmul.mubr.bf16.gmra.mrb[16].mxu0 %v11143_v53  ;;  %v1616_v53 = vld [vmem:[#allocation2 + $0x18] sm:$0xe]  ;;  %v2535_v41 = vshrl.u32 %v2486_v28, 16 }
  0x9d   : > { %12602 = vmatprep.mubr.bf16.mxu0 %v11144_v14  ;;  %v14147_v14 = vld [vmem:[#allocation2 + $0x1c] sm:$0xf]  ;;  %v11160_v37 = vrot.slane %v1616_v53, 9  ;;  %v1689_v53 = vsel %vm14634_vm5, %v11161_v40, %v1688_v39  ;;  %v2491_v40 = vld [vmem:[#allocation2 + $0x20] sm:$0x1] }
  0x9e   : > { %v13951_v39 = vld [vmem:[%s17740_s1 + $0xf8] sm:$0xff]   ;;  %v2537_v6 = vrot.slane %v2535_v41, 4 }
  0xa4   : > { %12603 = vmatmul.mubr.bf16.gmra.mrb[20].mxu0 %v11145_v20  ;;  %v1681_v20 = vrot.slane %v14147_v14, 5  ;;  %v1692_v14 = vsel %vm14634_vm5, %v1690_v48, %v1691_v58  ;;  %v13955_v58 = vld [vmem:[#allocation2 + $0x24] sm:$0xff]  }
  0xa5   : > { %12606 = vmatprep.mubr.bf16.mxu0 %v17841_v35  ;;  %v14151_v35 = vld [vmem:[#allocation2 + $0x34] sm:$0xf]  ;;  %v11193_v52 = vcombine.low %v1689_v53, %v1692_v14  ;;  %v2493_v53 = vld [vmem:[#allocation2 + $0x28] sm:$0xf] }
  0xa6   : > { %v1683_v11 = vrot.slane %v1681_v20, 4  ;;  %v1682_v15 = vsel %vm14634_vm5, %v11160_v37, %v1681_v20  ;;  %v1695_v27 = vrot.slane %v14151_v35, 5  ;;  %v14154_v20 = vld [vmem:[#allocation2 + $0x40] sm:$0xf]  ;;  %v14155_v37 = vld [vmem:[#allocation2 + $0x44] sm:$0x1] }
  0xa8   : > { %v1685_v29 = vsel %vm14634_vm5, %v1683_v11, %v1684_v54  ;;  %v1697_v32 = vrot.slane %v1695_v27, 4  ;;  %v1705_v11 = vrot.slane %v14155_v37, 5 }
  0xa9   : > { %v11192_v26 = vcombine.low %v1682_v15, %v1685_v29  ;;  %v17846_v15 = vcombine.low %v14661_v51, %v14674_v25  ;;  %v17848_v29 = vcombine.low %v14686_v12, %v14700_v18  ;;  %v17849_v51 = vcombine.low %v14692_v3, %v14708_v45  ;;  %v276_v25 = vld [vmem:[%s14269_s29 + $0x190] sm:$0x3]  ;;  %v2489_v18 = vld [vmem:[#allocation2 + $0x18] sm:$0xf] }
  0xaa   : > { %v1699_v31 = vsel %vm14634_vm5, %v1697_v32, %v1698_v63  ;;  %v2487_v12 = vld [vmem:[#allocation2 + $0x10] sm:$0xf]  ;;  %v11997_v3 = vpack.c.bf16 %v276_v25, %v276_v25  ;;  %v2559_v35 = vshrl.u32 %v2489_v18, 16  ;;  %v2492_v32 = vld [vmem:[#allocation2 + $0x24] sm:$0xf] }
  0xab   : > { %v13952_v45 = vld [vmem:[#allocation2 + $0xc] sm:$0xff]   ;;  %v2544_v0 = vshll.u32 %v2487_v12, 16  ;;  %v2548_v17 = vshrl.u32 %v2487_v12, 16  ;;  %v3245_v25 = vld [vmem:[#allocation2 + $0x48] sm:$0xe] }
  0xac   : > { %12607 = vmatmul.mubr.bf16.gmra.mrb[24].mxu0 %v17842_v13  ;;  %v11162_v13 = vrot.slane %v1618_v60, 9  ;;  %564 = vst [vmem:[#allocation2 + $0xc8] sm:$0x1] %v11997_v3  ;;  %v2561_v48 = vrot.slane %v2559_v35, 4  ;;  %v13959_v3 = vld [vmem:[#allocation2 + $0x48] sm:$0xff]  }
  0xad   : > { %12610 = vmatprep.mubr.bf16.mxu0 %v17843_v19  ;;  %v1702_v19 = vrot.slane %v14154_v20, 5  ;;  %v14899_v8 = vrot.slane %v2544_v0, 5  ;;  %v2583_v20 = vshrl.u32 %v2492_v32, 16  ;;  %v13969_v0 = vld [vmem:[%s17740_s1 + $0x128] sm:$0xff]  }
  0xae   : > { %v1696_v36 = vsel %vm14634_vm5, %v11162_v13, %v1695_v27  ;;  %v2562_v27 = vshll.u32 %v2489_v18, 16  ;;  %v2574_v13 = vrot.slane %v2572_v2, 4 }
  0xaf   : > { %v1704_v16 = vrot.slane %v1702_v19, 4  ;;  %v1703_v54 = vsel %vm14634_vm5, %v11163_v59, %v1702_v19  ;;  %v2586_v19 = vshll.u32 %v2492_v32, 16  ;;  %v13956_v59 = vld [vmem:[#allocation2 + $0x30] sm:$0xff]   ;;  %v2585_v37 = vrot.slane %v2583_v20, 4  ;;  %v13962_v32 = vld [vmem:[#allocation2 + $0x60] sm:$0xff]  }
  0xb0   : > { %v2564_v61 = vrot.slane %v2562_v27, 5 }
  0xb2   : > { %v2565_v14 = vor.u32 %v2564_v61, %v2561_v48  ;;  %v3247_v61 = vld [vmem:[#allocation2 + $0x60] sm:$0xe] }
  0xb4   : > { %12611 = vmatmul.mubr.bf16.gmra.mrb[28].mxu0 %v17844_v38  ;;  %v1706_v38 = vsel %vm14634_vm5, %v1704_v16, %v1705_v11  ;;  %v14919_v16 = vrot.slane %v2565_v14, 4  ;;  %v2588_v11 = vrot.slane %v2586_v19, 5  ;;  %v2498_v14 = vld [vmem:[#allocation2 + $0x3c] sm:$0xf] }
  0xb5   : > { %12630 = vmatprep.mubr.bf16.mxu0 %v11190_v47  ;;  %v11194_v47 = vcombine.low %v1696_v36, %v1699_v31  ;;  %v11195_v60 = vcombine.low %v1703_v54, %v1706_v38  ;;  %v13960_v31 = vld [vmem:[%s17740_s1 + $0x110] sm:$0xff]   ;;  %v13958_v54 = vld [vmem:[#allocation2 + $0x3c] sm:$0xff]  }
  0xb6   : > { %v2589_v35 = vor.u32 %v2588_v11, %v2585_v37 }
  0xbc   : > { %12631 = vmatmul.mubr.bf16.vlgmr.msra.gmra.mrb[0].mxu0 %v11191_v46  ;;  %v2568_v46 = vshll.u32 %v2490_v57, 16  ;;  %v13961_v57 = vld [vmem:[#allocation2 + $0x54] sm:$0xff]  }
  0xbd   : > { %12663 = vmatpush3.bf16.msra.mxu0 %v13944_v10  ;;  %12634 = vmatprep.mubr.bf16.mxu0 %v11192_v26  ;;  %v13946_v10 = vld [vmem:[%s17740_s1 + $0xd0] sm:$0xff]   ;;  %v13953_v26 = vld [vmem:[#allocation2 + $0x18] sm:$0xff]  }
  0xbe   : > { %12664 = vmatprep.subr.bf16.mxu0 %v13945_v62 }
  0xc1   : > { %12665 = vmatpush3.bf16.msra.mxu0 %v13945_v62  ;;  %v14901_v62 = vrot.slane %v2568_v46, 5  ;;  %v14948_v46 = vld [vmem:[#allocation2 + $0x38] sm:$0x1] }
  0xc2   : > { %12666 = vmatprep.subr.bf16.mxu0 %v13946_v10 }
  0xc3   : > { %v2575_v36 = vor.u32 %v2574_v13, %v14901_v62 }
  0xc4   : > { %12635 = vmatmul.mubr.bf16.gmra.mrb[4].mxu0 %v11193_v52  ;;  %v14915_v52 = vrot.slane %v2554_v24, 5  ;;  %v11301_v24 = vrot.slane %v3247_v61, 9  ;;  %v3251_v61 = vld [vmem:[#allocation2 + $0x90] sm:$0xe] }
  0xc5   : > { %12638 = vmatprep.mubr.bf16.mxu0 %v11194_v47  ;;  %12667 = vmatpush3.bf16.msra.mxu0 %v13946_v10  ;;  %v14921_v38 = vrot.slane %v2575_v36, 4 }
  0xc6   : > { %12668 = vmatprep.subr.bf16.mxu0 %v13947_v30 }
  0xc9   : > { %12669 = vmatpush3.bf16.msra.mxu0 %v13947_v30  ;;  %v2592_v30 = vshll.u32 %v2493_v53, 16 }
  0xca   : > { %12670 = vmatprep.subr.bf16.mxu0 %v13948_v34 }
  0xcc   : > { %12639 = vmatmul.mubr.bf16.gmra.mrb[8].mxu0 %v11195_v60  ;;  %v2495_v60 = vld [vmem:[#allocation2 + $0x30] sm:$0xf] }
  0xcd   : > { %12642 = vmatprep.mubr.bf16.mxu0 %v17845_v4  ;;  %12671 = vmatpush3.bf16.msra.mxu0 %v13948_v34  ;;  %v2596_v34 = vshrl.u32 %v2493_v53, 16  ;;  %v2494_v4 = vld [vmem:[#allocation2 + $0x2c] sm:$0x1]  ;;  %v13975_v53 = vld [vmem:[%s17740_s1 + $0x138] sm:$0xff]  }
  0xce   : > { %12672 = vmatprep.subr.bf16.mxu0 %v13949_v1 }
  0xcf   : > { %v2598_v41 = vrot.slane %v2596_v34, 4  ;;  %v2631_v34 = vshrl.u32 %v2498_v14, 16 }
  0xd1   : > { %12673 = vmatpush3.bf16.msra.mxu0 %v13949_v1  ;;  %v13963_v1 = vld [vmem:[%s17740_s1 + $0x118] sm:$0xff]  }
  0xd2   : > { %12674 = vmatprep.subr.bf16.mxu0 %v13950_v33 }
  0xd4   : > { %12643 = vmatmul.mubr.bf16.gmra.mrb[12].mxu0 %v17846_v15  ;;  %v14929_v15 = vrot.slane %v2592_v30, 5  ;;  %v14987_v30 = vld [vmem:[#allocation2 + $0x7c] sm:$0xf] }
  0xd5   : > { %12646 = vmatprep.mubr.bf16.mxu0 %v17847_v49  ;;  %12675 = vmatpush3.bf16.msra.mxu0 %v13950_v33  ;;  %v2496_v33 = vld [vmem:[#allocation2 + $0x34] sm:$0xf]  ;;  %v2607_v49 = vshrl.u32 %v2495_v60, 16 }
  0xd6   : > { %12676 = vmatprep.subr.bf16.mxu0 %v13951_v39  ;;  %v2616_v18 = vshll.u32 %v2496_v33, 16  ;;  %v2599_v36 = vor.u32 %v2598_v41, %v14929_v15 }
  0xd8   : > { %v14985_v37 = vrot.slane %v2616_v18, 5 }
  0xd9   : > { %12677 = vmatpush3.bf16.msra.mxu0 %v13951_v39  ;;  %v13966_v39 = vld [vmem:[%s17740_s1 + $0x120] sm:$0xff]  }
  0xda   : > { %12710 = vmatprep.subr.bf16.mxu0 %v13954_v22 }
  0xdc   : > { %12647 = vmatmul.mubr.bf16.gmra.mrb[16].mxu0 %v17848_v29  ;;  %v14933_v29 = vld [vmem:[#allocation2 + $0x50] sm:$0x1] }
  0xdd   : > { %12650 = vmatprep.mubr.bf16.mxu0 %v17849_v51  ;;  %v2602_v51 = vshll.u32 %v2494_v4, 16  ;;  %v3344_v12 = vrot.slane %v14933_v29, 5  ;;  %v3369_v4 = vrot.slane %v14987_v30, 5 }
  0xdf   : > { %v14961_v48 = vrot.slane %v2602_v51, 5 }
  0xe4   : > { %12651 = vmatmul.mubr.bf16.gmra.mrb[20].mxu0 %v11201_v7  ;;  %v2538_v7 = vshll.u32 %v2486_v28, 16 }
  0xe5   : > { %12654 = vmatprep.mubr.bf16.mxu0 %v17850_v56  ;;  %v2610_v56 = vshll.u32 %v2495_v60, 16  ;;  %v2634_v60 = vshll.u32 %v2498_v14, 16  ;;  %v15031_v14 = vld [vmem:[#allocation2 + $0xa0] sm:$0xf] }
  0xec   : > { %12655 = vmatmul.mubr.bf16.gmra.mrb[24].mxu0 %v11203_v43  ;;  %v2540_v43 = vrot.slane %v2538_v7, 5 }
  0xed   : > { %12658 = vmatprep.mubr.bf16.mxu0 %v11204_v9  ;;  %v2550_v9 = vrot.slane %v2548_v17, 4 }
  0xee   : > { %v2541_v21 = vor.u32 %v2540_v43, %v2537_v6  ;;  %v2609_v6 = vrot.slane %v2607_v49, 4  ;;  %v2620_v43 = vshrl.u32 %v2496_v33, 16  ;;  %v14993_v49 = vrot.slane %v2599_v36, 4  ;;  %v15033_v36 = vld [vmem:[#allocation2 + $0xa4] sm:$0x1] }
  0xef   : > { %v2551_v63 = vor.u32 %v2550_v9, %v14899_v8  ;;  %v14955_v9 = vld [vmem:[#allocation2 + $0x64] sm:$0xf] }
  0xf0   : > { %v14911_v23 = vrot.slane %v2541_v21, 4  ;;  %v2626_v21 = vshll.u32 %v14948_v46, 16  ;;  %v2622_v11 = vrot.slane %v2620_v43, 4  ;;  %v15020_v43 = vrot.slane %v2634_v60, 5  ;;  %v15041_v60 = vld [vmem:[#allocation2 + $0xac] sm:$0xf] }
  0xf1   : > { %v14913_v10 = vrot.slane %v2551_v63, 4 }
  0xf2   : > { %v2623_v41 = vor.u32 %v2622_v11, %v14985_v37 }
  0xf4   : > { %12659 = vmatmul.mubr.bf16.gmra.mrb[28].mxu0 %v11205_v55  ;;  %v2578_v55 = vshll.u32 %v2491_v40, 16  ;;  %v14957_v40 = vld [vmem:[#allocation2 + $0x68] sm:$0x1] }
  0xf5   : > { %12678 = vmatprep.mubr.bf16.mxu0 %v13952_v45  ;;  %v11299_v45 = vrot.slane %v3245_v25, 9  ;;  %v3358_v13 = vrot.slane %v14957_v40, 5  ;;  %v14995_v25 = vrot.slane %v2626_v21, 5  ;;  %v15025_v21 = vrot.slane %v2623_v41, 4 }
  0xf6   : > { %v14917_v47 = vrot.slane %v2578_v55, 5  ;;  %v13964_v55 = vld [vmem:[#allocation2 + $0x6c] sm:$0xff]   ;;  %v3397_v41 = vrot.slane %v15041_v60, 5 }
  0xfc   : > { %12679 = vmatmul.mubr.bf16.vlgmr.msra.gmra.mrb[0].mxu0 %v13953_v26  ;;  %v14959_v26 = vrot.slane %v2589_v35, 4  ;;  %v15014_v35 = vld [vmem:[#allocation2 + $0x94] sm:$0xf] }
  0xfd   : > { %12711 = vmatpush3.bf16.msra.mxu0 %v13954_v22  ;;  %12682 = vmatprep.mubr.bf16.mxu0 %v13955_v58  ;;  %v14931_v22 = vld [vmem:[#allocation2 + $0x4c] sm:$0xf]  ;;  %v3355_v58 = vrot.slane %v14955_v9, 5 }
  0xfe   : > { %12712 = vmatprep.subr.bf16.mxu0 %v13957_v44  ;;  %v3341_v28 = vrot.slane %v14931_v22, 5 }
  0xff   : > { %v3357_v63 = vrot.slane %v3355_v58, 4  ;;  %v14971_v20 = vsel %vm14634_vm5, %v11301_v24, %v3355_v58  ;;  %v3383_v58 = vrot.slane %v15014_v35, 5  ;;  %v11305_v24 = vrot.slane %v3251_v61, 9 }
 0x100   : > { %v3343_v7 = vrot.slane %v3341_v28, 4  ;;  %v14942_v17 = vsel %vm14634_vm5, %v11299_v45, %v3341_v28  ;;  %v14997_v28 = vld [vmem:[#allocation2 + $0x40] sm:$0xf] }
 0x101   : > { %12713 = vmatpush3.bf16.msra.mxu0 %v13957_v44  ;;  %v2612_v44 = vrot.slane %v2610_v56, 5  ;;  %v14975_v19 = vsel %vm14634_vm5, %v3357_v63, %v3358_v13  ;;  %v13967_v56 = vld [vmem:[#allocation2 + $0x84] sm:$0xff]   ;;  %v3385_v63 = vrot.slane %v3383_v58, 4 }
 0x102   : > { %12714 = vmatprep.subr.bf16.mxu0 %v13960_v31  ;;  %v14946_v27 = vsel %vm14634_vm5, %v3343_v7, %v3344_v12  ;;  %v3371_v12 = vrot.slane %v3369_v4, 4 }
 0x104   : > { %12683 = vmatmul.mubr.bf16.gmra.mrb[4].mxu0 %v13956_v59  ;;  %v14983_v59 = vld [vmem:[%s17740_s1 + $0x140] sm:$0xff]  }
 0x105   : > { %12686 = vmatprep.mubr.bf16.mxu0 %v13958_v54  ;;  %12715 = vmatpush3.bf16.msra.mxu0 %v13960_v31  ;;  %v14989_v54 = vld [vmem:[#allocation2 + $0x80] sm:$0x1]  ;;  %v15068_v31 = vld [vmem:[#allocation2 + $0xbc] sm:$0x1] }
 0x106   : > { %12716 = vmatprep.subr.bf16.mxu0 %v13963_v1  ;;  %v3372_v33 = vrot.slane %v14989_v54, 5  ;;  %v3407_v2 = vrot.slane %v15068_v31, 5 }
 0x108   : > { %v15005_v45 = vsel %vm14634_vm5, %v3371_v12, %v3372_v33  ;;  %v3252_v33 = vld [vmem:[#allocation2 + $0x9c] sm:$0xe] }
 0x109   : > { %12717 = vmatpush3.bf16.msra.mxu0 %v13963_v1  ;;  %v3249_v1 = vld [vmem:[#allocation2 + $0x78] sm:$0xe]  ;;  %v11306_v12 = vrot.slane %v3252_v33, 9 }
 0x10a   : > { %12718 = vmatprep.subr.bf16.mxu0 %v13966_v39  ;;  %v11303_v51 = vrot.slane %v3249_v1, 9  ;;  %v15066_v33 = vld [vmem:[#allocation2 + $0xb8] sm:$0xf] }
 0x10c   : > { %12687 = vmatmul.mubr.bf16.gmra.mrb[8].mxu0 %v13959_v3  ;;  %v2613_v3 = vor.u32 %v2612_v44, %v2609_v6  ;;  %v15001_v18 = vsel %vm14634_vm5, %v11303_v51, %v3369_v4  ;;  %v15018_v6 = vrot.slane %v2631_v34, 4  ;;  %v2644_v44 = vshrl.u32 %v14997_v28, 16  ;;  %v15039_v34 = vld [vmem:[#allocation2 + $0x48] sm:$0xf]  ;;  %v15045_v4 = vld [vmem:[#allocation2 + $0xb0] sm:$0x1] }
 0x10d   : > { %12690 = vmatprep.mubr.bf16.mxu0 %v13961_v57  ;;  %12719 = vmatpush3.bf16.msra.mxu0 %v13966_v39  ;;  %v13965_v39 = vld [vmem:[#allocation2 + $0x78] sm:$0xff]   ;;  %v3393_v51 = vrot.slane %v15033_v36, 5  ;;  %v3400_v61 = vrot.slane %v15045_v4, 5  ;;  %v3399_v57 = vrot.slane %v3397_v41, 4 }
 0x10e   : > { %12720 = vmatprep.subr.bf16.mxu0 %v13969_v0  ;;  %v15011_v7 = vrot.slane %v2613_v3, 4  ;;  %v3253_v3 = vld [vmem:[#allocation2 + $0xa8] sm:$0xe] }
 0x111   : > { %12721 = vmatpush3.bf16.msra.mxu0 %v13969_v0  ;;  %v2640_v0 = vshll.u32 %v14997_v28, 16 }
 0x112   : > { %12722 = vmatprep.subr.bf16.mxu0 %v13972_v50 }
 0x114   : > { %12691 = vmatmul.mubr.bf16.gmra.mrb[12].mxu0 %v13962_v32  ;;  %v13968_v32 = vld [vmem:[#allocation2 + $0x90] sm:$0xff]  }
 0x115   : > { %12694 = vmatprep.mubr.bf16.mxu0 %v13964_v55  ;;  %12723 = vmatpush3.bf16.msra.mxu0 %v13972_v50  ;;  %v15016_v50 = vld [vmem:[#allocation2 + $0x98] sm:$0x1]  ;;  %v13970_v55 = vld [vmem:[#allocation2 + $0x9c] sm:$0xff]  }
 0x116   : > { %12724 = vmatprep.subr.bf16.mxu0 %v13975_v53  ;;  %v3386_v13 = vrot.slane %v15016_v50, 5 }
 0x118   : > { %v15037_v11 = vsel %vm14634_vm5, %v3385_v63, %v3386_v13  ;;  %v2655_v63 = vshrl.u32 %v15039_v34, 16 }
 0x119   : > { %12725 = vmatpush3.bf16.msra.mxu0 %v13975_v53  ;;  %v15029_v53 = vsel %vm14634_vm5, %v11305_v24, %v3383_v58  ;;  %17852 = vst [vmem:[#allocation5_spill] sm:$0xff] %v15037_v11  ;;  %v13971_v58 = vld [vmem:[#allocation2 + $0xa8] sm:$0xff]   ;;  %v11307_v24 = vrot.slane %v3253_v3, 9 }
 0x11a   : > { %12758 = vmatprep.subr.bf16.mxu0 %v14983_v59  ;;  %17851 = vst [vmem:[#allocation4_spill] sm:$0xff] %v15029_v53  ;;  %v15088_v3 = vld [vmem:[#allocation2 + $0xc8] sm:$0x1]  ;;  %v2668_v53 = vshrl.u32 %v14931_v22, 16 }
 0x11c   : > { %12695 = vmatmul.mubr.bf16.gmra.mrb[16].mxu0 %v13965_v39  ;;  %v3390_v39 = vrot.slane %v15031_v14, 5 }
 0x11d   : > { %12698 = vmatprep.mubr.bf16.mxu0 %v13967_v56  ;;  %v15049_v56 = vrot.slane %v2640_v0, 5 }
 0x11e   : > { %v3392_v13 = vrot.slane %v3390_v39, 4  ;;  %v15056_v1 = vsel %vm14634_vm5, %v11306_v12, %v3390_v39  ;;  %v15074_v39 = vsel %vm14634_vm5, %v3399_v57, %v3400_v61  ;;  %v15076_v12 = vld [vmem:[#allocation2 + $0xc4] sm:$0xf]  ;;  %v3254_v57 = vld [vmem:[#allocation2 + $0xb4] sm:$0xe]  ;;  %v3404_v61 = vrot.slane %v15066_v33, 5 }
 0x11f   : > { %17853 = vst [vmem:[#allocation6_spill] sm:$0xff] %v15056_v1  ;;  %17856 = vst [vmem:[#allocation9_spill] sm:$0xff] %v15074_v39  ;;  %v15092_v39 = vld [vmem:[#allocation2 + $0x58] sm:$0xf] }
 0x120   : > { %v15060_v0 = vsel %vm14634_vm5, %v3392_v13, %v3393_v51  ;;  %v2557_v13 = vsel %vm14328_vm2, %v14913_v10, %v14915_v52  ;;  %v2646_v51 = vrot.slane %v2644_v44, 4  ;;  %v2571_v52 = vsel %vm14328_vm2, %v14919_v16, %v14901_v62 }
 0x121   : > { %17854 = vst [vmem:[#allocation7_spill] sm:$0xff] %v15060_v0  ;;  %v3414_v0 = vrot.slane %v15088_v3, 5  ;;  %v2581_v44 = vsel %vm14328_vm2, %v14921_v38, %v14917_v47  ;;  %v15119_v47 = vld [vmem:[#allocation2 + $0x44] sm:$0x1] }
 0x124   : > { %12699 = vmatmul.mubr.bf16.gmra.mrb[20].mxu0 %v13968_v32  ;;  %v13973_v32 = vld [vmem:[#allocation2 + $0xb4] sm:$0xff]  }
 0x125   : > { %12702 = vmatprep.mubr.bf16.mxu0 %v13970_v55  ;;  %v15064_v55 = vsel %vm14634_vm5, %v11307_v24, %v3397_v41  ;;  %v2547_v41 = vsel %vm14328_vm2, %v14911_v23, %v14899_v8  ;;  %v2504_v24 = vld [vmem:[#allocation2 + $0x54] sm:$0xf]  ;;  %v3255_v8 = vld [vmem:[#allocation2 + $0xc0] sm:$0xe]  ;;  %v3411_v23 = vrot.slane %v15076_v12, 5 }
 0x126   : > { %17855 = vst [vmem:[#allocation8_spill] sm:$0xff] %v15064_v55  ;;  %v11308_v55 = vrot.slane %v3254_v57, 9  ;;  %v11270_v10 = vcombine.low %v2547_v41, %v2557_v13  ;;  %v11309_v1 = vrot.slane %v3255_v8, 9  ;;  %v13974_v41 = vld [vmem:[#allocation2 + $0xc0] sm:$0xff]   ;;  %v2664_v13 = vshll.u32 %v14931_v22, 16 }
 0x127   : > { %v3413_v11 = vrot.slane %v3411_v23, 4  ;;  %v2679_v38 = vshrl.u32 %v2504_v24, 16  ;;  %v2595_v22 = vsel %vm14328_vm2, %v14959_v26, %v14929_v15  ;;  %v2629_v15 = vsel %vm14328_vm2, %v15025_v21, %v14995_v25 }
 0x128   : > { %v15107_v57 = vsel %vm14634_vm5, %v11308_v55, %v3404_v61  ;;  %v15117_v16 = vsel %vm14634_vm5, %v11309_v1, %v3411_v23  ;;  %v2692_v1 = vshrl.u32 %v15092_v39, 16  ;;  %v2637_v26 = vor.u32 %v15020_v43, %v15018_v6 }
 0x129   : > { %17857 = vst [vmem:[#allocation10_spill] sm:$0xff] %v15107_v57  ;;  %17859 = vst [vmem:[#allocation12_spill] sm:$0xff] %v15117_v16  ;;  %v2647_v23 = vor.u32 %v2646_v51, %v15049_v56  ;;  %v15151_v8 = vrot.slane %v2664_v13, 5  ;;  %v2712_v51 = vshll.u32 %v14955_v9, 16  ;;  %v15162_v57 = vld [vmem:[#allocation2 + $0x70] sm:$0xf] }
 0x12a   : > { %v2694_v21 = vrot.slane %v2692_v1, 4 }
 0x12c   : > { %12703 = vmatmul.mubr.bf16.gmra.mrb[24].mxu0 %v13971_v58  ;;  %v3406_v58 = vrot.slane %v3404_v61, 4  ;;  %v15125_v61 = vsel %vm14634_vm5, %v3413_v11, %v3414_v0  ;;  %v2619_v11 = vsel %vm14328_vm2, %v15011_v7, %v14985_v37  ;;  %v2507_v0 = vld [vmem:[#allocation2 + $0x60] sm:$0xf]  ;;  %v2670_v37 = vrot.slane %v2668_v53, 4 }
 0x12d   : > { %12706 = vmatprep.mubr.bf16.mxu0 %v13973_v32  ;;  %v2658_v32 = vshll.u32 %v15039_v34, 16  ;;  %v2682_v34 = vshll.u32 %v2504_v24, 16  ;;  %17860 = vst [vmem:[#allocation13_spill] sm:$0xff] %v15125_v61  ;;  %v2605_v24 = vsel %vm14328_vm2, %v14993_v49, %v14961_v48  ;;  %v2657_v48 = vrot.slane %v2655_v63, 4  ;;  %v15153_v61 = vld [vmem:[#allocation2 + $0x5c] sm:$0x1] }
 0x12e   : > { %v15113_v62 = vsel %vm14634_vm5, %v3406_v58, %v3407_v2  ;;  %v2688_v2 = vshll.u32 %v15092_v39, 16  ;;  %v2650_v58 = vshll.u32 %v15119_v47, 16  ;;  %v2681_v7 = vrot.slane %v2679_v38, 4  ;;  %v2510_v38 = vld [vmem:[#allocation2 + $0x6c] sm:$0xf] }
 0x12f   : > { %17858 = vst [vmem:[#allocation11_spill] sm:$0xff] %v15113_v62  ;;  %v2660_v49 = vrot.slane %v2658_v32, 5  ;;  %v2684_v55 = vrot.slane %v2682_v34, 5  ;;  %v2703_v6 = vshrl.u32 %v2507_v0, 16  ;;  %v2706_v43 = vshll.u32 %v2507_v0, 16 }
 0x130   : > { %v15155_v25 = vrot.slane %v2688_v2, 5  ;;  %v11272_v16 = vcombine.low %v2595_v22, %v2605_v24  ;;  %v2716_v63 = vshrl.u32 %v14955_v9, 16  ;;  %v11273_v32 = vcombine.low %v2619_v11, %v2629_v15 }
 0x131   : > { %v2652_v13 = vrot.slane %v2650_v58, 5  ;;  %v2674_v53 = vshll.u32 %v14933_v29, 16  ;;  %v2648_v34 = vrot.slane %v2647_v23, 4  ;;  %v2661_v62 = vor.u32 %v2660_v49, %v2657_v48 }
 0x132   : > { %v2671_v2 = vor.u32 %v2670_v37, %v15151_v8  ;;  %v2698_v1 = vshll.u32 %v15153_v61, 16  ;;  %v2695_v9 = vor.u32 %v2694_v21, %v15155_v25  ;;  %v2705_v22 = vrot.slane %v2703_v6, 4 }
 0x133   : > { %v2708_v24 = vrot.slane %v2706_v43, 5  ;;  %v15168_v11 = vrot.slane %v2712_v51, 5  ;;  %v2718_v29 = vrot.slane %v2716_v63, 4  ;;  %v2727_v15 = vshrl.u32 %v2510_v38, 16 }
 0x134   : > { %12707 = vmatmul.mubr.bf16.gmra.mrb[28].mxu0 %v13974_v41  ;;  %v11271_v41 = vcombine.low %v2571_v52, %v2581_v44  ;;  %v13977_v52 = vld [vmem:[%s17740_s1 + $0x148] sm:$0xff]   ;;  %v2685_v44 = vor.u32 %v2684_v55, %v2681_v7  ;;  %v2676_v23 = vrot.slane %v2674_v53, 5  ;;  %v2736_v58 = vshll.u32 %v15162_v57, 16  ;;  %v2513_v55 = vld [vmem:[#allocation2 + $0x78] sm:$0xf] }
 0x135   : > { %12726 = vmatprep.mubr.bf16.mxu0 %v11270_v10  ;;  %v2638_v10 = vrot.slane %v2637_v26, 4  ;;  %v2730_v26 = vshll.u32 %v2510_v38, 16  ;;  %v2740_v48 = vshrl.u32 %v15162_v57, 16  ;;  %v2653_v49 = vsel %vm14328_vm2, %v2648_v34, %v2652_v13  ;;  %v15183_v13 = vld [vmem:[#allocation2 + $0x74] sm:$0x1] }
 0x136   : > { %v2662_v37 = vrot.slane %v2661_v62, 4  ;;  %v2672_v7 = vrot.slane %v2671_v2, 4  ;;  %v2700_v21 = vrot.slane %v2698_v1, 5  ;;  %v2686_v6 = vrot.slane %v2685_v44, 4 }
 0x137   : > { %v2643_v0 = vsel %vm14328_vm2, %v2638_v10, %v15049_v56  ;;  %v13978_v56 = vld [vmem:[%s17740_s1 + $0x150] sm:$0xff]   ;;  %v2696_v43 = vrot.slane %v2695_v9, 4  ;;  %v2722_v51 = vshll.u32 %v14957_v40, 16  ;;  %v2719_v63 = vor.u32 %v2718_v29, %v15168_v11  ;;  %v2516_v9 = vld [vmem:[#allocation2 + $0x84] sm:$0xf] }
 0x138   : > { %v2751_v10 = vshrl.u32 %v2513_v55, 16  ;;  %v11274_v53 = vcombine.low %v2643_v0, %v2653_v49  ;;  %v15185_v62 = vrot.slane %v2736_v58, 5  ;;  %v2742_v38 = vrot.slane %v2740_v48, 4 }
 0x139   : > { %v2754_v34 = vshll.u32 %v2513_v55, 16  ;;  %v2667_v2 = vsel %vm14328_vm2, %v2662_v37, %v15151_v8  ;;  %v2677_v40 = vsel %vm14328_vm2, %v2672_v7, %v2676_v23  ;;  %v2760_v1 = vshll.u32 %v14987_v30, 16 }
 0x13a   : > { %v2764_v44 = vshrl.u32 %v14987_v30, 16  ;;  %v15203_v8 = vrot.slane %v2722_v51, 5  ;;  %v15208_v30 = vrot.slane %v2719_v63, 4  ;;  %v2746_v0 = vshll.u32 %v15183_v13, 16 }
 0x13b   : > { %v2753_v23 = vrot.slane %v2751_v10, 4  ;;  %v2775_v58 = vshrl.u32 %v2516_v9, 16  ;;  %v2743_v49 = vor.u32 %v2742_v38, %v15185_v62  ;;  %v2756_v37 = vrot.slane %v2754_v34, 5  ;;  %v2522_v34 = vld [vmem:[#allocation2 + $0x9c] sm:$0xf] }
 0x13c   : > { %12727 = vmatmul.mubr.bf16.vlgmr.msra.gmra.mrb[0].mxu0 %v11271_v41  ;;  %v2709_v41 = vor.u32 %v2708_v24, %v2705_v22  ;;  %v15194_v22 = vld [vmem:[#allocation2 + $0x88] sm:$0xf]  ;;  %v2691_v24 = vsel %vm14328_vm2, %v2686_v6, %v15155_v25  ;;  %v2778_v25 = vshll.u32 %v2516_v9, 16  ;;  %v15214_v7 = vrot.slane %v2760_v1, 5 }
 0x13d   : > { %12759 = vmatpush3.bf16.msra.mxu0 %v14983_v59  ;;  %12730 = vmatprep.mubr.bf16.mxu0 %v11272_v16  ;;  %v2729_v59 = vrot.slane %v2727_v15, 4  ;;  %v2732_v16 = vrot.slane %v2730_v26, 5  ;;  %v13979_v15 = vld [vmem:[%s17740_s1 + $0x158] sm:$0xff]   ;;  %v2784_v48 = vshll.u32 %v15194_v22, 16  ;;  %v2788_v55 = vshrl.u32 %v15194_v22, 16 }
 0x13e   : > { %12760 = vmatprep.subr.bf16.mxu0 %v13977_v52  ;;  %v15201_v29 = vrot.slane %v2709_v41, 4  ;;  %v11275_v6 = vcombine.low %v2667_v2, %v2677_v40  ;;  %v2748_v63 = vrot.slane %v2746_v0, 5  ;;  %v2780_v10 = vrot.slane %v2778_v25, 5 }
 0x13f   : > { %v2733_v26 = vor.u32 %v2732_v16, %v2729_v59  ;;  %v2519_v59 = vld [vmem:[#allocation2 + $0x90] sm:$0xf]  ;;  %v2777_v16 = vrot.slane %v2775_v58, 4  ;;  %v2790_v38 = vrot.slane %v2788_v55, 4  ;;  %v2744_v2 = vrot.slane %v2743_v49, 4 }
 0x140   : > { %v2715_v41 = vsel %vm14328_vm2, %v15201_v29, %v15168_v11  ;;  %v2757_v40 = vor.u32 %v2756_v37, %v2753_v23  ;;  %v2770_v11 = vshll.u32 %v14989_v54, 16  ;;  %v2799_v9 = vshrl.u32 %v2519_v59, 16 }
 0x141   : > { %12761 = vmatpush3.bf16.msra.mxu0 %v13977_v52  ;;  %v2701_v52 = vsel %vm14328_vm2, %v2696_v43, %v2700_v21  ;;  %v2766_v21 = vrot.slane %v2764_v44, 4  ;;  %v2734_v51 = vrot.slane %v2733_v26, 4  ;;  %v15231_v44 = vld [vmem:[#allocation2 + $0x8c] sm:$0x1]  ;;  %v2812_v29 = vshrl.u32 %v15014_v35, 16 }
 0x142   : > { %12762 = vmatprep.subr.bf16.mxu0 %v13978_v56  ;;  %v11276_v43 = vcombine.low %v2691_v24, %v2701_v52  ;;  %v2802_v24 = vshll.u32 %v2519_v59, 16  ;;  %v2808_v52 = vshll.u32 %v15014_v35, 16  ;;  %v2832_v26 = vshll.u32 %v15031_v14, 16 }
 0x143   : > { %v2767_v1 = vor.u32 %v2766_v21, %v15214_v7  ;;  %v2836_v0 = vshrl.u32 %v15031_v14, 16  ;;  %v2739_v54 = vsel %vm14328_vm2, %v2734_v51, %v15185_v62  ;;  %v2781_v23 = vor.u32 %v2780_v10, %v2777_v16  ;;  %v13982_v62 = vld [vmem:[%s17740_s1 + $0x170] sm:$0xff]  }
 0x144   : > { %12731 = vmatmul.mubr.bf16.gmra.mrb[4].mxu0 %v11273_v32  ;;  %v13980_v32 = vld [vmem:[%s17740_s1 + $0x160] sm:$0xff]   ;;  %v2794_v35 = vshll.u32 %v15231_v44, 16  ;;  %v2749_v25 = vsel %vm14328_vm2, %v2744_v2, %v2748_v63  ;;  %v2772_v49 = vrot.slane %v2770_v11, 5  ;;  %v2801_v37 = vrot.slane %v2799_v9, 4 }
 0x145   : > { %12734 = vmatprep.mubr.bf16.mxu0 %v11274_v53  ;;  %12763 = vmatpush3.bf16.msra.mxu0 %v13978_v56  ;;  %v2725_v56 = vsel %vm14328_vm2, %v15208_v30, %v15203_v8  ;;  %v15227_v53 = vrot.slane %v2784_v48, 5  ;;  %v13981_v8 = vld [vmem:[%s17740_s1 + $0x168] sm:$0xff]   ;;  %v2826_v30 = vshll.u32 %v2522_v34, 16  ;;  %v2758_v48 = vrot.slane %v2757_v40, 4 }
 0x146   : > { %12764 = vmatprep.subr.bf16.mxu0 %v13979_v15  ;;  %v2768_v55 = vrot.slane %v2767_v1, 4  ;;  %v2804_v14 = vrot.slane %v2802_v24, 5  ;;  %v15247_v21 = vrot.slane %v2808_v52, 5  ;;  %v2838_v16 = vrot.slane %v2836_v0, 4  ;;  %v13983_v52 = vld [vmem:[%s17740_s1 + $0x178] sm:$0xff]  }
 0x147   : > { %v2791_v58 = vor.u32 %v2790_v38, %v15227_v53  ;;  %v2828_v59 = vrot.slane %v2826_v30, 5  ;;  %v11277_v63 = vcombine.low %v2715_v41, %v2725_v56  ;;  %v2782_v10 = vrot.slane %v2781_v23, 4  ;;  %v2528_v56 = vld [vmem:[#allocation2 + $0xb4] sm:$0xf] }
 0x148   : > { %v11278_v2 = vcombine.low %v2739_v54, %v2749_v25  ;;  %v2763_v40 = vsel %vm14328_vm2, %v2758_v48, %v15214_v7  ;;  %v2773_v1 = vsel %vm14328_vm2, %v2768_v55, %v2772_v49  ;;  %v2805_v11 = vor.u32 %v2804_v14, %v2801_v37 }
 0x149   : > { %12765 = vmatpush3.bf16.msra.mxu0 %v13979_v15  ;;  %v2823_v15 = vshrl.u32 %v2522_v34, 16  ;;  %v2792_v38 = vrot.slane %v2791_v58, 4  ;;  %v2796_v34 = vrot.slane %v2794_v35, 5  ;;  %v2818_v24 = vshll.u32 %v15016_v50, 16 }
 0x14a   : > { %12766 = vmatprep.subr.bf16.mxu0 %v13980_v32  ;;  %v2842_v41 = vshll.u32 %v15033_v36, 16  ;;  %v2856_v36 = vshll.u32 %v15041_v60, 16  ;;  %v2871_v0 = vshrl.u32 %v2528_v56, 16  ;;  %v2874_v54 = vshll.u32 %v2528_v56, 16 }
 0x14b   : > { %v2825_v51 = vrot.slane %v2823_v15, 4  ;;  %v2797_v50 = vsel %vm14328_vm2, %v2792_v38, %v2796_v34  ;;  %v2880_v23 = vshll.u32 %v15066_v33, 16  ;;  %v2884_v58 = vshrl.u32 %v15066_v33, 16  ;;  %v2531_v38 = vld [vmem:[#allocation2 + $0xc0] sm:$0xf] }
 0x14c   : > { %12735 = vmatmul.mubr.bf16.gmra.mrb[8].mxu0 %v11275_v6  ;;  %v2814_v6 = vrot.slane %v2812_v29, 4  ;;  %v2806_v35 = vrot.slane %v2805_v11, 4  ;;  %v2820_v48 = vrot.slane %v2818_v24, 5  ;;  %v2844_v55 = vrot.slane %v2842_v41, 5 }
 0x14d   : > { %12738 = vmatprep.mubr.bf16.mxu0 %v11276_v43  ;;  %12767 = vmatpush3.bf16.msra.mxu0 %v13980_v32  ;;  %v15252_v43 = vrot.slane %v2832_v26, 5  ;;  %v2525_v32 = vld [vmem:[#allocation2 + $0xa8] sm:$0xf]  ;;  %v2829_v29 = vor.u32 %v2828_v59, %v2825_v51  ;;  %v2860_v26 = vshrl.u32 %v15041_v60, 16  ;;  %v2858_v51 = vrot.slane %v2856_v36, 5 }
 0x14e   : > { %12768 = vmatprep.subr.bf16.mxu0 %v13981_v8  ;;  %v2815_v9 = vor.u32 %v2814_v6, %v15247_v21  ;;  %v2847_v15 = vshrl.u32 %v2525_v32, 16  ;;  %v2850_v30 = vshll.u32 %v2525_v32, 16  ;;  %v11279_v6 = vcombine.low %v2763_v40, %v2773_v1 }
 0x14f   : > { %v2839_v7 = vor.u32 %v2838_v16, %v15252_v43  ;;  %v2830_v49 = vrot.slane %v2829_v29, 4  ;;  %v2862_v59 = vrot.slane %v2860_v26, 4  ;;  %v2873_v16 = vrot.slane %v2871_v0, 4 }
 0x150   : > { %v2816_v25 = vrot.slane %v2815_v9, 4  ;;  %v2849_v37 = vrot.slane %v2847_v15, 4  ;;  %v2852_v14 = vrot.slane %v2850_v30, 5  ;;  %v2876_v33 = vrot.slane %v2874_v54, 5 }
 0x151   : > { %12769 = vmatpush3.bf16.msra.mxu0 %v13981_v8  ;;  %v2787_v8 = vsel %vm14328_vm2, %v2782_v10, %v15227_v53  ;;  %v15278_v53 = vld [vmem:[%s17740_s1 + $0x180] sm:$0xff]   ;;  %v2840_v60 = vrot.slane %v2839_v7, 4  ;;  %v2886_v10 = vrot.slane %v2884_v58, 4  ;;  %v2811_v34 = vsel %vm14328_vm2, %v2806_v35, %v15247_v21 }
 0x152   : > { %12770 = vmatprep.subr.bf16.mxu0 %v13982_v62  ;;  %v2821_v32 = vsel %vm14328_vm2, %v2816_v25, %v2820_v48  ;;  %v2853_v1 = vor.u32 %v2852_v14, %v2849_v37  ;;  %v2866_v11 = vshll.u32 %v15045_v4, 16  ;;  %v2863_v9 = vor.u32 %v2862_v59, %v2858_v51  ;;  %v3240_v14 = vld [vmem:[#allocation2 + $0xc] sm:$0xe]  ;;  %v277_v59 = vld [vmem:[%s14269_s29 + $0x198] sm:$0xff] }
 0x153   : > { %v2845_v40 = vsel %vm14328_vm2, %v2840_v60, %v2844_v55  ;;  %v2890_v24 = vshll.u32 %v15068_v31, 16  ;;  %v2895_v21 = vshrl.u32 %v2531_v38, 16  ;;  %v2898_v41 = vshll.u32 %v2531_v38, 16  ;;  %v14156_v60 = vld [vmem:[#allocation2 + $0x10] sm:$0xf] }
 0x154   : > { %12739 = vmatmul.mubr.bf16.gmra.mrb[12].mxu0 %v11277_v63  ;;  %v2882_v63 = vrot.slane %v2880_v23, 5  ;;  %v2877_v56 = vor.u32 %v2876_v33, %v2873_v16  ;;  %v2904_v29 = vshll.u32 %v15076_v12, 16  ;;  %v2908_v7 = vshrl.u32 %v15076_v12, 16  ;;  %v278_v16 = vld [vmem:[%s14269_s29 + $0x1a0] sm:$0xff] }
 0x155   : > { %12742 = vmatprep.mubr.bf16.mxu0 %v11278_v2  ;;  %12771 = vmatpush3.bf16.msra.mxu0 %v13982_v62  ;;  %v11280_v62 = vcombine.low %v2787_v8, %v2797_v50  ;;  %v2835_v2 = vsel %vm14328_vm2, %v2830_v49, %v15252_v43  ;;  %v11281_v43 = vcombine.low %v2811_v34, %v2821_v32  ;;  %v2854_v30 = vrot.slane %v2853_v1, 4 }
 0x156   : > { %12772 = vmatprep.subr.bf16.mxu0 %v13983_v52  ;;  %v11282_v15 = vcombine.low %v2835_v2, %v2845_v40  ;;  %v2868_v8 = vrot.slane %v2866_v11, 5  ;;  %v2864_v50 = vrot.slane %v2863_v9, 4  ;;  %v2892_v36 = vrot.slane %v2890_v24, 5  ;;  %v14157_v2 = vld [vmem:[#allocation2 + $0x14] sm:$0x1] }
 0x157   : > { %v2897_v4 = vrot.slane %v2895_v21, 4  ;;  %v2900_v26 = vrot.slane %v2898_v41, 5  ;;  %v2878_v0 = vrot.slane %v2877_v56, 4  ;;  %v2906_v31 = vrot.slane %v2904_v29, 5  ;;  %v14158_v11 = vld [vmem:[#allocation2 + $0x1c] sm:$0xf] }
 0x158   : > { %v2910_v23 = vrot.slane %v2908_v7, 4  ;;  %v2859_v58 = vsel %vm14328_vm2, %v2854_v30, %v2858_v51  ;;  %v2869_v12 = vsel %vm14328_vm2, %v2864_v50, %v2868_v8  ;;  %v2914_v49 = vshll.u32 %v15088_v3, 16  ;;  %v3241_v41 = vld [vmem:[#allocation2 + $0x18] sm:$0xe]  ;;  %v14159_v56 = vld [vmem:[#allocation2 + $0x28] sm:$0xf] }
 0x159   : > { %12773 = vmatpush3.bf16.msra.mxu0 %v13983_v52  ;;  %v2887_v52 = vor.u32 %v2886_v10, %v2882_v63  ;;  %v2901_v35 = vor.u32 %v2900_v26, %v2897_v4  ;;  %v2883_v25 = vsel %vm14328_vm2, %v2878_v0, %v2882_v63  ;;  %v3306_v37 = vrot.slane %v14156_v60, 5  ;;  %v3242_v29 = vld [vmem:[#allocation2 + $0x24] sm:$0xe] }
 0x15a   : > { %12806 = vmatprep.subr.bf16.mxu0 %v15278_v53  ;;  %v2911_v55 = vor.u32 %v2910_v23, %v2906_v31  ;;  %v2916_v10 = vrot.slane %v2914_v49, 5  ;;  %v11998_v38 = vpack.c.bf16 %v277_v59, %v277_v59  ;;  %v11999_v34 = vpack.c.bf16 %v278_v16, %v278_v16  ;;  %v14162_v23 = vld [vmem:[#allocation2 + $0x34] sm:$0xf] }
 0x15b   : > { %v2888_v54 = vrot.slane %v2887_v52, 4  ;;  %v2902_v51 = vrot.slane %v2901_v35, 4  ;;  %v11294_v32 = vrot.slane %v3240_v14, 9  ;;  %v3308_v63 = vrot.slane %v3306_v37, 4 }
 0x15c   : > { %12743 = vmatmul.mubr.bf16.gmra.mrb[16].mxu0 %v11279_v6  ;;  %v11283_v6 = vcombine.low %v2859_v58, %v2869_v12  ;;  %v2912_v33 = vrot.slane %v2911_v55, 4  ;;  %v3309_v40 = vrot.slane %v14157_v2, 5  ;;  %565 = vst [vmem:[#allocation2 + $0xcc] sm:$0xf] %v11998_v38  ;;  %566 = vst [vmem:[#allocation2 + $0xd0] sm:$0xf] %v11999_v34 }
 0x15d   : > { %12746 = vmatprep.mubr.bf16.mxu0 %v11280_v62  ;;  %v2893_v48 = vsel %vm14328_vm2, %v2888_v54, %v2892_v36  ;;  %v2907_v3 = vsel %vm14328_vm2, %v2902_v51, %v2906_v31  ;;  %v3313_v9 = vrot.slane %v14158_v11, 5  ;;  %v3307_v24 = vsel %vm14634_vm5, %v11294_v32, %v3306_v37  ;;  %v14161_v36 = vld [vmem:[#allocation2 + $0x2c] sm:$0x1]  ;;  %v3244_v55 = vld [vmem:[#allocation2 + $0x3c] sm:$0xe] }
 0x15e   : > { %v11284_v62 = vcombine.low %v2883_v25, %v2893_v48  ;;  %v2917_v1 = vsel %vm14328_vm2, %v2912_v33, %v2916_v10  ;;  %v3310_v21 = vsel %vm14634_vm5, %v3308_v63, %v3309_v40  ;;  %v3320_v52 = vrot.slane %v14159_v56, 5  ;;  %v3243_v25 = vld [vmem:[#allocation2 + $0x30] sm:$0xe]  ;;  %v3246_v38 = vld [vmem:[#allocation2 + $0x54] sm:$0xe] }
 0x15f   : > { %v11285_v7 = vcombine.low %v2907_v3, %v2917_v1  ;;  %v11326_v30 = vcombine.low %v3307_v24, %v3310_v21  ;;  %v11295_v8 = vrot.slane %v3241_v41, 9  ;;  %v3315_v50 = vrot.slane %v3313_v9, 4  ;;  %v13987_v3 = vld [vmem:[%s17740_s1 + $0x198] sm:$0xff]  }
 0x160   : > { %v3323_v4 = vrot.slane %v14161_v36, 5  ;;  %v11296_v26 = vrot.slane %v3242_v29, 9  ;;  %v3322_v0 = vrot.slane %v3320_v52, 4  ;;  %v3327_v58 = vrot.slane %v14162_v23, 5  ;;  %v17868_v23 = vld [vmem:[#allocation7_spill] sm:$0xff] }
 0x161   : > { %v3314_v54 = vsel %vm14634_vm5, %v11295_v8, %v3313_v9  ;;  %v3334_v48 = vrot.slane %v14997_v28, 5  ;;  %v11297_v37 = vrot.slane %v3243_v25, 9  ;;  %v11298_v51 = vrot.slane %v3244_v55, 9  ;;  %v3248_v9 = vld [vmem:[#allocation2 + $0x6c] sm:$0xe]  ;;  %v17871_v25 = vld [vmem:[#allocation9_spill] sm:$0xff] }
 0x162   : > { %v3321_v12 = vsel %vm14634_vm5, %v11296_v26, %v3320_v52  ;;  %v3324_v35 = vsel %vm14634_vm5, %v3322_v0, %v3323_v4  ;;  %v3329_v14 = vrot.slane %v3327_v58, 4  ;;  %v3337_v16 = vrot.slane %v15119_v47, 5  ;;  %v13986_v47 = vld [vmem:[%s17740_s1 + $0x190] sm:$0xff]   ;;  %v13989_v52 = vld [vmem:[%s17740_s1 + $0x1a8] sm:$0xff]   ;;  %v17865_v0 = vld [vmem:[#allocation5_spill] sm:$0xff] }
 0x163   : > { %v11328_v60 = vcombine.low %v3321_v12, %v3324_v35  ;;  %v3336_v59 = vrot.slane %v3334_v48, 4  ;;  %v3328_v28 = vsel %vm14634_vm5, %v11297_v37, %v3327_v58  ;;  %v11300_v63 = vrot.slane %v3246_v38, 9  ;;  %v279_v12 = vld [vmem:[%s14269_s29 + $0x1a8] sm:$0x3]  ;;  %v17870_v35 = vld [vmem:[#allocation8_spill] sm:$0xff]  ;;  %v17873_v55 = vld [vmem:[#allocation10_spill] sm:$0xff] }
 0x164   : > { %12747 = vmatmul.mubr.bf16.gmra.mrb[20].mxu0 %v11281_v43  ;;  %v14160_v43 = vld [vmem:[#allocation2 + $0x20] sm:$0x1]  ;;  %v3351_v40 = vrot.slane %v15153_v61, 5  ;;  %v3362_v11 = vrot.slane %v15162_v57, 5  ;;  %v11302_v21 = vrot.slane %v3248_v9, 9  ;;  %v3365_v56 = vrot.slane %v15183_v13, 5 }
 0x165   : > { %12750 = vmatprep.mubr.bf16.mxu0 %v11282_v15  ;;  %v3316_v15 = vrot.slane %v14160_v43, 5  ;;  %v3338_v10 = vsel %vm14634_vm5, %v3336_v59, %v3337_v16  ;;  %v13988_v61 = vld [vmem:[%s17740_s1 + $0x1a0] sm:$0xff]   ;;  %v17861_v29 = vcombine.low %v14942_v17, %v14946_v27  ;;  %v3376_v43 = vrot.slane %v15194_v22, 5  ;;  %v13990_v13 = vld [vmem:[%s17740_s1 + $0x1b0] sm:$0xff]   ;;  %v13997_v59 = vld [vmem:[%s17740_s1 + $0x1c8] sm:$0xff]  }
 0x166   : > { %v3364_v41 = vrot.slane %v3362_v11, 4  ;;  %v3363_v57 = vsel %vm14634_vm5, %v11302_v21, %v3362_v11  ;;  %v3379_v8 = vrot.slane %v15231_v44, 5  ;;  %v17862_v22 = vcombine.low %v14971_v20, %v14975_v19  ;;  %v13994_v44 = vld [vmem:[%s17740_s1 + $0x1c0] sm:$0xff]   ;;  %v17864_v19 = vld [vmem:[#allocation4_spill] sm:$0xff]  ;;  %v14009_v11 = vld [vmem:[%s17740_s1 + $0x1e8] sm:$0xff]  }
 0x167   : > { %v3317_v31 = vsel %vm14634_vm5, %v3315_v50, %v3316_v15  ;;  %v3250_v15 = vld [vmem:[#allocation2 + $0x84] sm:$0xe]  ;;  %v3378_v27 = vrot.slane %v3376_v43, 4  ;;  %v13991_v50 = vld [vmem:[%s17740_s1 + $0x1b8] sm:$0xff]   ;;  %v17863_v20 = vcombine.low %v15001_v18, %v15005_v45  ;;  %v12000_v18 = vpack.c.bf16 %v279_v12, %v279_v12  ;;  %v17876_v37 = vld [vmem:[#allocation12_spill] sm:$0xff] }
 0x168   : > { %v11327_v49 = vcombine.low %v3314_v54, %v3317_v31  ;;  %v11304_v17 = vrot.slane %v3250_v15, 9  ;;  %v17866_v54 = vcombine.low %v17864_v19, %v17865_v0  ;;  %v17867_v31 = vld [vmem:[#allocation6_spill] sm:$0xff]  ;;  %v13992_v45 = vld [vmem:[#allocation2 + $0x18] sm:$0xff]   ;;  %v14000_v16 = vld [vmem:[%s17740_s1 + $0x1d0] sm:$0xff]  }
 0x169   : > { %v3380_v4 = vsel %vm14634_vm5, %v3378_v27, %v3379_v8  ;;  %v17869_v58 = vcombine.low %v17867_v31, %v17868_v23  ;;  %567 = vst [vmem:[#allocation2 + $0xd4] sm:$0x1] %v12000_v18  ;;  %v4128_v21 = vld [vmem:[#allocation2 + $0x24] sm:$0xf]  ;;  %v15445_v27 = vld [vmem:[#allocation2 + $0x28] sm:$0xf] }
 0x16a   : > { %v3377_v36 = vsel %vm14634_vm5, %v11304_v17, %v3376_v43  ;;  %v14012_v43 = vld [vmem:[%s17740_s1 + $0x1f0] sm:$0xff]   ;;  %v4198_v8 = vshrl.u32 %v4128_v21, 16  ;;  %v14015_v0 = vld [vmem:[%s17740_s1 + $0x1f8] sm:$0xff]   ;;  %v4207_v31 = vshll.u32 %v15445_v27, 16  ;;  %v4211_v23 = vshrl.u32 %v15445_v27, 16 }
 0x16b   : > { %v11336_v26 = vcombine.low %v3377_v36, %v3380_v4  ;;  %v4201_v36 = vshll.u32 %v4128_v21, 16  ;;  %v15469_v18 = vld [vmem:[#allocation2 + $0x88] sm:$0xf] }
 0x16c   : > { %12751 = vmatmul.mubr.bf16.gmra.mrb[24].mxu0 %v11283_v6  ;;  %v3330_v6 = vrot.slane %v14948_v46, 5  ;;  %v3335_v46 = vsel %vm14634_vm5, %v11298_v51, %v3334_v48  ;;  %v17872_v48 = vcombine.low %v17870_v35, %v17871_v25  ;;  %v13995_v51 = vld [vmem:[#allocation2 + $0x30] sm:$0xff]  }
 0x16d   : > { %12754 = vmatprep.mubr.bf16.mxu0 %v11284_v62  ;;  %v13985_v62 = vld [vmem:[%s17740_s1 + $0x188] sm:$0xff]   ;;  %v11330_v32 = vcombine.low %v3335_v46, %v3338_v10  ;;  %v14003_v46 = vld [vmem:[%s17740_s1 + $0x1d8] sm:$0xff]  }
 0x16e   : > { %v3331_v33 = vsel %vm14634_vm5, %v3329_v14, %v3330_v6  ;;  %v17877_v14 = vld [vmem:[#allocation13_spill] sm:$0xff] }
 0x16f   : > { %v11329_v34 = vcombine.low %v3328_v28, %v3331_v33  ;;  %v17878_v6 = vcombine.low %v17876_v37, %v17877_v14  ;;  %v13996_v28 = vld [vmem:[#allocation2 + $0x3c] sm:$0xff]   ;;  %v13998_v33 = vld [vmem:[#allocation2 + $0x48] sm:$0xff]   ;;  %v15410_v10 = vld [vmem:[#allocation2 + $0x58] sm:$0xf] }
 0x170   : > { %v4980_v38 = vrot.slane %v15410_v10, 5 }
 0x174   : > { %12755 = vmatmul.mubr.bf16.gmra.mrb[28].mxu0 %v11285_v7  ;;  %v3366_v7 = vsel %vm14634_vm5, %v3364_v41, %v3365_v56  ;;  %v15434_v41 = vld [vmem:[#allocation2 + $0x70] sm:$0xf]  ;;  %v15436_v56 = vld [vmem:[#allocation2 + $0x74] sm:$0x1] }
 0x175   : > { %12774 = vmatprep.mubr.bf16.mxu0 %v11326_v30  ;;  %v11334_v30 = vcombine.low %v3363_v57, %v3366_v7  ;;  %v4994_v57 = vrot.slane %v15434_v41, 5  ;;  %v4997_v7 = vrot.slane %v15436_v56, 5 }
 0x17c   : > { %12775 = vmatmul.mubr.bf16.vlgmr.msra.gmra.mrb[0].mxu0 %v11327_v49  ;;  %v17874_v49 = vld [vmem:[#allocation11_spill] sm:$0xff] }
 0x17d   : > { %12807 = vmatpush3.bf16.msra.mxu0 %v15278_v53  ;;  %12778 = vmatprep.mubr.bf16.mxu0 %v11328_v60  ;;  %v3348_v53 = vrot.slane %v15092_v39, 5  ;;  %v17875_v60 = vcombine.low %v17873_v55, %v17874_v49  ;;  %v4200_v55 = vrot.slane %v4198_v8, 4 }
 0x17e   : > { %12808 = vmatprep.subr.bf16.mxu0 %v13985_v62 }
 0x17f   : > { %v3350_v2 = vrot.slane %v3348_v53, 4  ;;  %v3349_v1 = vsel %vm14634_vm5, %v11300_v63, %v3348_v53  ;;  %v4884_v53 = vld [vmem:[#allocation2 + $0x54] sm:$0xe] }
 0x180   : > { %v11435_v63 = vrot.slane %v4884_v53, 9 }
 0x181   : > { %12809 = vmatpush3.bf16.msra.mxu0 %v13985_v62  ;;  %v3352_v39 = vsel %vm14634_vm5, %v3350_v2, %v3351_v40  ;;  %v13993_v62 = vld [vmem:[#allocation2 + $0x24] sm:$0xff]   ;;  %v4982_v2 = vrot.slane %v4980_v38, 4  ;;  %v13999_v40 = vld [vmem:[#allocation2 + $0x54] sm:$0xff]  }
 0x182   : > { %12810 = vmatprep.subr.bf16.mxu0 %v13986_v47  ;;  %v11332_v24 = vcombine.low %v3349_v1, %v3352_v39  ;;  %v14001_v1 = vld [vmem:[#allocation2 + $0x60] sm:$0xff]  }
 0x184   : > { %12779 = vmatmul.mubr.bf16.gmra.mrb[4].mxu0 %v11329_v34 }
 0x185   : > { %12782 = vmatprep.mubr.bf16.mxu0 %v11330_v32  ;;  %12811 = vmatpush3.bf16.msra.mxu0 %v13986_v47  ;;  %v15412_v47 = vld [vmem:[#allocation2 + $0x5c] sm:$0x1]  ;;  %v14006_v32 = vld [vmem:[%s17740_s1 + $0x1e0] sm:$0xff]  }
 0x186   : > { %12812 = vmatprep.subr.bf16.mxu0 %v13987_v3  ;;  %v4983_v34 = vrot.slane %v15412_v47, 5 }
 0x188   : > { %v15425_v39 = vsel %vm14634_vm5, %v4982_v2, %v4983_v34  ;;  %v14005_v34 = vld [vmem:[#allocation2 + $0x84] sm:$0xff]  }
 0x189   : > { %12813 = vmatpush3.bf16.msra.mxu0 %v13987_v3  ;;  %v15421_v3 = vsel %vm14634_vm5, %v11435_v63, %v4980_v38  ;;  %17880 = vst [vmem:[#allocation5_spill] sm:$0xff] %v15425_v39  ;;  %v15484_v63 = vld [vmem:[#allocation2 + $0x34] sm:$0xf]  ;;  %v4303_v39 = vshll.u32 %v15410_v10, 16 }
 0x18a   : > { %12814 = vmatprep.subr.bf16.mxu0 %v13988_v61  ;;  %17879 = vst [vmem:[#allocation4_spill] sm:$0xff] %v15421_v3 }
 0x18c   : > { %12783 = vmatmul.mubr.bf16.gmra.mrb[8].mxu0 %v17861_v29  ;;  %v4886_v29 = vld [vmem:[#allocation2 + $0x6c] sm:$0xe] }
 0x18d   : > { %12786 = vmatprep.mubr.bf16.mxu0 %v11332_v24  ;;  %12815 = vmatpush3.bf16.msra.mxu0 %v13988_v61  ;;  %v4125_v61 = vld [vmem:[#allocation2 + $0x18] sm:$0xf]  ;;  %v15432_v24 = vld [vmem:[#allocation2 + $0x1c] sm:$0xf]  ;;  %v11437_v15 = vrot.slane %v4886_v29, 9 }
 0x18e   : > { %12816 = vmatprep.subr.bf16.mxu0 %v13989_v52  ;;  %v4187_v17 = vshrl.u32 %v15432_v24, 16 }
 0x18f   : > { %v15449_v4 = vsel %vm14634_vm5, %v11437_v15, %v4994_v57  ;;  %v15504_v15 = vld [vmem:[#allocation2 + $0x38] sm:$0x1] }
 0x190   : > { %17881 = vst [vmem:[#allocation6_spill] sm:$0xff] %v15449_v4  ;;  %v4189_v25 = vrot.slane %v4187_v17, 4  ;;  %v15507_v17 = vld [vmem:[#allocation2 + $0x40] sm:$0xf]  ;;  %v14014_v4 = vld [vmem:[#allocation2 + $0xcc] sm:$0xff]  }
 0x191   : > { %12817 = vmatpush3.bf16.msra.mxu0 %v13989_v52  ;;  %v4174_v52 = vshrl.u32 %v4125_v61, 16 }
 0x192   : > { %12818 = vmatprep.subr.bf16.mxu0 %v13990_v13 }
 0x194   : > { %12787 = vmatmul.mubr.bf16.gmra.mrb[12].mxu0 %v17862_v22  ;;  %v14002_v22 = vld [vmem:[#allocation2 + $0x6c] sm:$0xff]  }
 0x195   : > { %12790 = vmatprep.mubr.bf16.mxu0 %v11334_v30  ;;  %12819 = vmatpush3.bf16.msra.mxu0 %v13990_v13  ;;  %v4177_v13 = vshll.u32 %v4125_v61, 16  ;;  %v4183_v30 = vshll.u32 %v15432_v24, 16 }
 0x196   : > { %12820 = vmatprep.subr.bf16.mxu0 %v13991_v50 }
 0x197   : > { %v15464_v35 = vrot.slane %v4183_v30, 5  ;;  %v4231_v30 = vshll.u32 %v15484_v63, 16 }
 0x199   : > { %12821 = vmatpush3.bf16.msra.mxu0 %v13991_v50  ;;  %v4996_v50 = vrot.slane %v4994_v57, 4  ;;  %v4190_v53 = vor.u32 %v4189_v25, %v15464_v35  ;;  %v4241_v25 = vshll.u32 %v15504_v15, 16 }
 0x19a   : > { %12854 = vmatprep.subr.bf16.mxu0 %v13994_v44 }
 0x19b   : > { %v15455_v19 = vsel %vm14634_vm5, %v4996_v50, %v4997_v7  ;;  %v4134_v7 = vld [vmem:[#allocation2 + $0x3c] sm:$0xf]  ;;  %v4235_v50 = vshrl.u32 %v15484_v63, 16 }
 0x19c   : > { %12791 = vmatmul.mubr.bf16.gmra.mrb[16].mxu0 %v17863_v20  ;;  %v4176_v20 = vrot.slane %v4174_v52, 4  ;;  %17882 = vst [vmem:[#allocation7_spill] sm:$0xff] %v15455_v19  ;;  %v4140_v19 = vld [vmem:[#allocation2 + $0x54] sm:$0xf] }
 0x19d   : > { %12794 = vmatprep.mubr.bf16.mxu0 %v11336_v26  ;;  %v15451_v26 = vld [vmem:[#allocation2 + $0x20] sm:$0x1] }
 0x19e   : > { %v4193_v49 = vshll.u32 %v15451_v26, 16 }
 0x1a4   : > { %12795 = vmatmul.mubr.bf16.gmra.mrb[20].mxu0 %v17866_v54  ;;  %v4179_v54 = vrot.slane %v4177_v13, 5  ;;  %v15502_v13 = vrot.slane %v4190_v53, 4 }
 0x1a5   : > { %12798 = vmatprep.mubr.bf16.mxu0 %v17869_v58  ;;  %v4131_v58 = vld [vmem:[#allocation2 + $0x30] sm:$0xf] }
 0x1a6   : > { %v4222_v37 = vshrl.u32 %v4131_v58, 16  ;;  %v4225_v14 = vshll.u32 %v4131_v58, 16 }
 0x1a8   : > { %v4227_v61 = vrot.slane %v4225_v14, 5 }
 0x1ac   : > { %12799 = vmatmul.mubr.bf16.gmra.mrb[24].mxu0 %v17872_v48  ;;  %v15466_v48 = vld [vmem:[#allocation2 + $0x2c] sm:$0x1] }
 0x1ad   : > { %12802 = vmatprep.mubr.bf16.mxu0 %v17875_v60  ;;  %v4203_v60 = vrot.slane %v4201_v36, 5  ;;  %v15514_v36 = vld [vmem:[#allocation2 + $0xa4] sm:$0x1] }
 0x1af   : > { %v4204_v29 = vor.u32 %v4203_v60, %v4200_v55  ;;  %v15525_v60 = vld [vmem:[#allocation2 + $0x44] sm:$0x1] }
 0x1b4   : > { %12803 = vmatmul.mubr.bf16.gmra.mrb[28].mxu0 %v17878_v6  ;;  %v4888_v6 = vld [vmem:[#allocation2 + $0x84] sm:$0xe] }
 0x1b5   : > { %12822 = vmatprep.mubr.bf16.mxu0 %v13992_v45  ;;  %v15471_v45 = vld [vmem:[#allocation2 + $0x8c] sm:$0x1] }
 0x1bc   : > { %12823 = vmatmul.mubr.bf16.vlgmr.msra.gmra.mrb[0].mxu0 %v13993_v62  ;;  %v5008_v62 = vrot.slane %v15469_v18, 5 }
 0x1bd   : > { %12855 = vmatpush3.bf16.msra.mxu0 %v13994_v44  ;;  %12826 = vmatprep.mubr.bf16.mxu0 %v13995_v51  ;;  %v14004_v44 = vld [vmem:[#allocation2 + $0x78] sm:$0xff]   ;;  %v5011_v51 = vrot.slane %v15471_v45, 5 }
 0x1be   : > { %12856 = vmatprep.subr.bf16.mxu0 %v13997_v59  ;;  %v5010_v38 = vrot.slane %v5008_v62, 4 }
 0x1c0   : > { %v15494_v21 = vsel %vm14634_vm5, %v5010_v38, %v5011_v51  ;;  %v4249_v51 = vshll.u32 %v4134_v7, 16 }
 0x1c1   : > { %12857 = vmatpush3.bf16.msra.mxu0 %v13997_v59  ;;  %v4180_v59 = vor.u32 %v4179_v54, %v4176_v20  ;;  %17884 = vst [vmem:[#allocation9_spill] sm:$0xff] %v15494_v21  ;;  %v4246_v20 = vshrl.u32 %v4134_v7, 16 }
 0x1c2   : > { %12858 = vmatprep.subr.bf16.mxu0 %v14000_v16  ;;  %v4251_v12 = vrot.slane %v4249_v51, 5  ;;  %v14013_v51 = vld [vmem:[#allocation2 + $0xc0] sm:$0xff]  }
 0x1c3   : > { %v15496_v52 = vrot.slane %v4180_v59, 4  ;;  %v4255_v59 = vshll.u32 %v15507_v17, 16  ;;  %v15534_v38 = vrot.slane %v4246_v20, 4 }
 0x1c4   : > { %12827 = vmatmul.mubr.bf16.gmra.mrb[4].mxu0 %v13996_v28  ;;  %v4213_v28 = vrot.slane %v4211_v23, 4  ;;  %v15518_v23 = vrot.slane %v4204_v29, 4 }
 0x1c5   : > { %12830 = vmatprep.mubr.bf16.mxu0 %v13998_v33  ;;  %12859 = vmatpush3.bf16.msra.mxu0 %v14000_v16  ;;  %v15475_v16 = vrot.slane %v4207_v31, 5  ;;  %v15480_v33 = vld [vmem:[%s17740_s1 + $0x200] sm:$0xff]   ;;  %v5025_v31 = vrot.slane %v15514_v36, 5  ;;  %v4186_v7 = vsel %vm14328_vm2, %v15496_v52, %v15464_v35  ;;  %v15571_v9 = vrot.slane %v4255_v59, 5 }
 0x1c6   : > { %12860 = vmatprep.subr.bf16.mxu0 %v14003_v46 }
 0x1c7   : > { %v4214_v57 = vor.u32 %v4213_v28, %v15475_v16 }
 0x1c9   : > { %12861 = vmatpush3.bf16.msra.mxu0 %v14003_v46  ;;  %v11439_v46 = vrot.slane %v4888_v6, 9  ;;  %v15520_v58 = vrot.slane %v4214_v57, 4  ;;  %v14008_v6 = vld [vmem:[#allocation2 + $0x9c] sm:$0xff]  }
 0x1ca   : > { %12862 = vmatprep.subr.bf16.mxu0 %v14006_v32 }
 0x1cb   : > { %v15488_v2 = vsel %vm14634_vm5, %v11439_v46, %v5008_v62  ;;  %v4237_v62 = vrot.slane %v4235_v50, 4  ;;  %v14010_v46 = vld [vmem:[#allocation2 + $0xa8] sm:$0xff]   ;;  %v15554_v50 = vld [vmem:[#allocation2 + $0xb0] sm:$0x1] }
 0x1cc   : > { %12831 = vmatmul.mubr.bf16.gmra.mrb[8].mxu0 %v13999_v40  ;;  %17883 = vst [vmem:[#allocation8_spill] sm:$0xff] %v15488_v2  ;;  %v14007_v40 = vld [vmem:[#allocation2 + $0x90] sm:$0xff]   ;;  %v5032_v35 = vrot.slane %v15554_v50, 5 }
 0x1cd   : > { %12834 = vmatprep.mubr.bf16.mxu0 %v14001_v1  ;;  %12863 = vmatpush3.bf16.msra.mxu0 %v14006_v32  ;;  %v4217_v32 = vshll.u32 %v15466_v48, 16  ;;  %v15490_v1 = vrot.slane %v4193_v49, 5  ;;  %v15523_v49 = vrot.slane %v4231_v30, 5  ;;  %v15552_v30 = vld [vmem:[#allocation2 + $0xac] sm:$0xf] }
 0x1ce   : > { %12864 = vmatprep.subr.bf16.mxu0 %v14009_v11 }
 0x1cf   : > { %v15509_v8 = vrot.slane %v4217_v32, 5  ;;  %v4196_v20 = vsel %vm14328_vm2, %v15502_v13, %v15490_v1 }
 0x1d1   : > { %12865 = vmatpush3.bf16.msra.mxu0 %v14009_v11  ;;  %v4224_v11 = vrot.slane %v4222_v37, 4  ;;  %v4137_v37 = vld [vmem:[#allocation2 + $0x48] sm:$0xf] }
 0x1d2   : > { %12866 = vmatprep.subr.bf16.mxu0 %v14012_v43  ;;  %v4270_v29 = vshrl.u32 %v4137_v37, 16  ;;  %v4273_v52 = vshll.u32 %v4137_v37, 16 }
 0x1d4   : > { %12835 = vmatmul.mubr.bf16.gmra.mrb[12].mxu0 %v14002_v22  ;;  %v15512_v22 = vld [vmem:[#allocation2 + $0xa0] sm:$0xf] }
 0x1d5   : > { %12838 = vmatprep.mubr.bf16.mxu0 %v14004_v44  ;;  %12867 = vmatpush3.bf16.msra.mxu0 %v14012_v43  ;;  %v4228_v44 = vor.u32 %v4227_v61, %v4224_v11  ;;  %v5022_v54 = vrot.slane %v15512_v22, 5  ;;  %v4265_v11 = vshll.u32 %v15525_v60, 16  ;;  %v15544_v61 = vld [vmem:[#allocation2 + $0x4c] sm:$0xf] }
 0x1d6   : > { %12868 = vmatprep.subr.bf16.mxu0 %v14015_v0  ;;  %v4279_v43 = vshll.u32 %v15544_v61, 16  ;;  %v4283_v1 = vshrl.u32 %v15544_v61, 16 }
 0x1d7   : > { %v5024_v14 = vrot.slane %v5022_v54, 4  ;;  %v15532_v53 = vrot.slane %v4228_v44, 4  ;;  %v15556_v44 = vld [vmem:[#allocation2 + $0xb8] sm:$0xf]  ;;  %v15587_v59 = vrot.slane %v4265_v11, 5  ;;  %v11406_v11 = vcombine.low %v4186_v7, %v4196_v20 }
 0x1d8   : > { %v15617_v7 = vld [vmem:[#allocation2 + $0xd0] sm:$0xf]  ;;  %v4252_v20 = vor.u32 %v4251_v12, %v15534_v38  ;;  %v4143_v38 = vld [vmem:[#allocation2 + $0x60] sm:$0xf] }
 0x1d9   : > { %12869 = vmatpush3.bf16.msra.mxu0 %v14015_v0  ;;  %v4890_v0 = vld [vmem:[#allocation2 + $0x9c] sm:$0xe]  ;;  %v15539_v32 = vsel %vm14634_vm5, %v5024_v14, %v5025_v31  ;;  %v4891_v31 = vld [vmem:[#allocation2 + $0xa8] sm:$0xe]  ;;  %v4892_v14 = vld [vmem:[#allocation2 + $0xb4] sm:$0xe] }
 0x1da   : > { %12902 = vmatprep.subr.bf16.mxu0 %v15480_v33  ;;  %v11441_v55 = vrot.slane %v4890_v0, 9  ;;  %17886 = vst [vmem:[#allocation11_spill] sm:$0xff] %v15539_v32  ;;  %v4238_v0 = vor.u32 %v4237_v62, %v15523_v49  ;;  %v11443_v62 = vrot.slane %v4892_v14, 9  ;;  %v4272_v14 = vrot.slane %v4270_v29, 4 }
 0x1db   : > { %v4210_v29 = vsel %vm14328_vm2, %v15518_v23, %v15475_v16  ;;  %v15621_v23 = vld [vmem:[#allocation2 + $0xd4] sm:$0x1]  ;;  %v15651_v3 = vrot.slane %v4252_v20, 4 }
 0x1dc   : > { %12839 = vmatmul.mubr.bf16.gmra.mrb[16].mxu0 %v14005_v34  ;;  %v15530_v28 = vsel %vm14634_vm5, %v11441_v55, %v5022_v54  ;;  %v4259_v34 = vshrl.u32 %v15507_v17, 16  ;;  %v15563_v54 = vld [vmem:[#allocation2 + $0xbc] sm:$0x1]  ;;  %v11442_v55 = vrot.slane %v4891_v31, 9  ;;  %v15577_v31 = vrot.slane %v4238_v0, 4 }
 0x1dd   : > { %12842 = vmatprep.mubr.bf16.mxu0 %v14007_v40  ;;  %17885 = vst [vmem:[#allocation10_spill] sm:$0xff] %v15530_v28  ;;  %v15541_v40 = vrot.slane %v4241_v25, 5  ;;  %v5029_v25 = vrot.slane %v15552_v30, 5  ;;  %v5039_v57 = vrot.slane %v15563_v54, 5 }
 0x1de   : > { %v4261_v28 = vrot.slane %v4259_v34, 4  ;;  %v15595_v34 = vld [vmem:[#allocation2 + $0x50] sm:$0x1] }
 0x1df   : > { %v5031_v13 = vrot.slane %v5029_v25, 4  ;;  %v15575_v32 = vsel %vm14634_vm5, %v11442_v55, %v5029_v25  ;;  %17891 = vst [vmem:[#allocation16_spill] sm:$0xff] %v15595_v34  ;;  %v15597_v55 = vrot.slane %v4279_v43, 5  ;;  %v4234_v43 = vsel %vm14328_vm2, %v15532_v53, %v15523_v49 }
 0x1e0   : > { %17887 = vst [vmem:[#allocation12_spill] sm:$0xff] %v15575_v32  ;;  %v4262_v16 = vor.u32 %v4261_v28, %v15571_v9  ;;  %v4294_v49 = vshrl.u32 %v4140_v19, 16  ;;  %v5053_v25 = vrot.slane %v15621_v23, 5  ;;  %v4289_v12 = vshll.u32 %v15595_v34, 16  ;;  %v15629_v32 = vld [vmem:[#allocation2 + $0x64] sm:$0xf] }
 0x1e1   : > { %v15581_v21 = vsel %vm14634_vm5, %v5031_v13, %v5032_v35  ;;  %v4275_v35 = vrot.slane %v4273_v52, 5  ;;  %v4285_v13 = vrot.slane %v4283_v1, 4  ;;  %v15613_v52 = vld [vmem:[#allocation2 + $0xc4] sm:$0xf]  ;;  %v15615_v1 = vld [vmem:[#allocation2 + $0xc8] sm:$0x1] }
 0x1e2   : > { %17888 = vst [vmem:[#allocation13_spill] sm:$0xff] %v15581_v21  ;;  %v4297_v21 = vshll.u32 %v4140_v19, 16  ;;  %17892 = vst [vmem:[#allocation17_spill] sm:$0xff] %v15629_v32  ;;  %v4318_v19 = vshrl.u32 %v4143_v38, 16  ;;  %v4291_v20 = vrot.slane %v4289_v12, 5  ;;  %v4355_v12 = vshrl.u32 %v15434_v41, 16 }
 0x1e4   : > { %12843 = vmatmul.mubr.bf16.gmra.mrb[20].mxu0 %v14008_v6  ;;  %v5036_v6 = vrot.slane %v15556_v44, 5 }
 0x1e5   : > { %12846 = vmatprep.mubr.bf16.mxu0 %v14010_v46  ;;  %v14011_v46 = vld [vmem:[#allocation2 + $0xb4] sm:$0xff]  }
 0x1e6   : > { %v5038_v37 = vrot.slane %v5036_v6, 4  ;;  %v15585_v2 = vsel %vm14634_vm5, %v11443_v62, %v5036_v6  ;;  %v4893_v62 = vld [vmem:[#allocation2 + $0xc0] sm:$0xe]  ;;  %v5050_v6 = vrot.slane %v15617_v7, 5 }
 0x1e7   : > { %17889 = vst [vmem:[#allocation14_spill] sm:$0xff] %v15585_v2  ;;  %v11444_v53 = vrot.slane %v4893_v62, 9  ;;  %v4286_v2 = vor.u32 %v4285_v13, %v15597_v55 }
 0x1e8   : > { %v15593_v0 = vsel %vm14634_vm5, %v5038_v37, %v5039_v57  ;;  %v4220_v57 = vsel %vm14328_vm2, %v15520_v58, %v15509_v8  ;;  %v5043_v8 = vrot.slane %v15613_v52, 5  ;;  %v5046_v58 = vrot.slane %v15615_v1, 5  ;;  %v4894_v37 = vld [vmem:[#allocation2 + $0xcc] sm:$0xe] }
 0x1e9   : > { %17890 = vst [vmem:[#allocation15_spill] sm:$0xff] %v15593_v0  ;;  %v11445_v0 = vrot.slane %v4894_v37, 9  ;;  %v5052_v62 = vrot.slane %v5050_v6, 4  ;;  %v4321_v37 = vshll.u32 %v4143_v38, 16  ;;  %v11407_v34 = vcombine.low %v4210_v29, %v4220_v57 }
 0x1ea   : > { %v5045_v28 = vrot.slane %v5043_v8, 4 }
 0x1eb   : > { %v15643_v13 = vsel %vm14634_vm5, %v11445_v0, %v5050_v6  ;;  %v4244_v0 = vsel %vm14328_vm2, %v15577_v31, %v15541_v40  ;;  %v15661_v6 = vrot.slane %v4262_v16, 4  ;;  %v15668_v31 = vld [vmem:[#allocation2 + $0x68] sm:$0x1] }
 0x1ec   : > { %12847 = vmatmul.mubr.bf16.gmra.mrb[24].mxu0 %v14011_v46  ;;  %v4276_v46 = vor.u32 %v4275_v35, %v4272_v14  ;;  %v4307_v14 = vshrl.u32 %v15410_v10, 16  ;;  %v15639_v35 = vsel %vm14634_vm5, %v5045_v28, %v5046_v58  ;;  %17895 = vst [vmem:[#allocation20_spill] sm:$0xff] %v15643_v13  ;;  %v4327_v10 = vshll.u32 %v15629_v32, 16 }
 0x1ed   : > { %12850 = vmatprep.mubr.bf16.mxu0 %v14013_v51  ;;  %v15633_v51 = vsel %vm14634_vm5, %v11444_v53, %v5043_v8  ;;  %17894 = vst [vmem:[#allocation19_spill] sm:$0xff] %v15639_v35  ;;  %v15649_v53 = vsel %vm14634_vm5, %v5052_v62, %v5053_v25  ;;  %v4331_v58 = vshrl.u32 %v15629_v32, 16  ;;  %v4296_v25 = vrot.slane %v4294_v49, 4 }
 0x1ee   : > { %17893 = vst [vmem:[#allocation18_spill] sm:$0xff] %v15633_v51  ;;  %17896 = vst [vmem:[#allocation21_spill] sm:$0xff] %v15649_v53  ;;  %v15663_v38 = vrot.slane %v4276_v46, 4  ;;  %v4299_v62 = vrot.slane %v4297_v21, 5  ;;  %v15665_v8 = vrot.slane %v4303_v39, 5  ;;  %v4309_v35 = vrot.slane %v4307_v14, 4 }
 0x1ef   : > { %v4146_v51 = vld [vmem:[#allocation2 + $0x6c] sm:$0xf]  ;;  %v4287_v32 = vrot.slane %v4286_v2, 4  ;;  %v4313_v28 = vshll.u32 %v15412_v47, 16  ;;  %v4320_v53 = vrot.slane %v4318_v19, 4  ;;  %v4323_v13 = vrot.slane %v4321_v37, 5 }
 0x1f0   : > { %v11408_v40 = vcombine.low %v4234_v43, %v4244_v0  ;;  %v15670_v16 = vrot.slane %v4327_v10, 5  ;;  %v4333_v49 = vrot.slane %v4331_v58, 4  ;;  %v4342_v46 = vshrl.u32 %v4146_v51, 16  ;;  %v14017_v19 = vld [vmem:[%s17740_s1 + $0x208] sm:$0xff]   ;;  %v4152_v58 = vld [vmem:[#allocation2 + $0x84] sm:$0xf] }
 0x1f1   : > { %v4345_v21 = vshll.u32 %v4146_v51, 16  ;;  %v4351_v39 = vshll.u32 %v15434_v41, 16  ;;  %v4258_v47 = vsel %vm14328_vm2, %v15651_v3, %v15571_v9  ;;  %v4268_v2 = vsel %vm14328_vm2, %v15661_v6, %v15587_v59  ;;  %v15684_v51 = vld [vmem:[#allocation2 + $0x7c] sm:$0xf] }
 0x1f2   : > { %v4310_v29 = vor.u32 %v4309_v35, %v15665_v8  ;;  %v4324_v57 = vor.u32 %v4323_v13, %v4320_v53  ;;  %v4337_v43 = vshll.u32 %v15668_v31, 16  ;;  %v4282_v3 = vsel %vm14328_vm2, %v15663_v38, %v15597_v55 }
 0x1f3   : > { %v4292_v9 = vsel %vm14328_vm2, %v4287_v32, %v4291_v20  ;;  %v15695_v59 = vrot.slane %v4313_v28, 5  ;;  %v4334_v35 = vor.u32 %v4333_v49, %v15670_v16  ;;  %v4344_v13 = vrot.slane %v4342_v46, 4 }
 0x1f4   : > { %12851 = vmatmul.mubr.bf16.gmra.mrb[28].mxu0 %v14014_v4  ;;  %v4149_v4 = vld [vmem:[#allocation2 + $0x78] sm:$0xf]  ;;  %v4347_v37 = vrot.slane %v4345_v21, 5  ;;  %v15698_v53 = vrot.slane %v4351_v39, 5  ;;  %v4357_v10 = vrot.slane %v4355_v12, 4  ;;  %v4311_v6 = vrot.slane %v4310_v29, 4 }
 0x1f5   : > { %12870 = vmatprep.mubr.bf16.mxu0 %v11406_v11  ;;  %v4300_v11 = vor.u32 %v4299_v62, %v4296_v25  ;;  %v4366_v14 = vshrl.u32 %v4149_v4, 16  ;;  %v4369_v41 = vshll.u32 %v4149_v4, 16  ;;  %v4375_v25 = vshll.u32 %v15684_v51, 16  ;;  %v14018_v62 = vld [vmem:[%s17740_s1 + $0x210] sm:$0xff]  }
 0x1f6   : > { %v4379_v55 = vshrl.u32 %v15684_v51, 16  ;;  %v4325_v32 = vrot.slane %v4324_v57, 4  ;;  %v4339_v28 = vrot.slane %v4337_v43, 5  ;;  %v4390_v49 = vshrl.u32 %v4152_v58, 16 }
 0x1f7   : > { %v4301_v0 = vrot.slane %v4300_v11, 4  ;;  %v4368_v38 = vrot.slane %v4366_v14, 4  ;;  %v4371_v20 = vrot.slane %v4369_v41, 5  ;;  %v4399_v4 = vshll.u32 %v15469_v18, 16  ;;  %v4155_v41 = vld [vmem:[#allocation2 + $0x90] sm:$0xf] }
 0x1f8   : > { %v4403_v46 = vshrl.u32 %v15469_v18, 16  ;;  %v4335_v21 = vrot.slane %v4334_v35, 4  ;;  %v4348_v39 = vor.u32 %v4347_v37, %v4344_v13  ;;  %v11409_v12 = vcombine.low %v4258_v47, %v4268_v2  ;;  %v15724_v47 = vld [vmem:[#allocation2 + $0x80] sm:$0x1]  ;;  %v15728_v35 = vld [vmem:[#allocation2 + $0x94] sm:$0xf] }
 0x1f9   : > { %v11410_v11 = vcombine.low %v4282_v3, %v4292_v9  ;;  %v15710_v29 = vrot.slane %v4375_v25, 5  ;;  %v4381_v57 = vrot.slane %v4379_v55, 4  ;;  %v4306_v43 = vsel %vm14328_vm2, %v4301_v0, %v15665_v8 }
 0x1fa   : > { %v4316_v18 = vsel %vm14328_vm2, %v4311_v6, %v15695_v59  ;;  %v4330_v14 = vsel %vm14328_vm2, %v4325_v32, %v15670_v16  ;;  %v4372_v2 = vor.u32 %v4371_v20, %v4368_v38  ;;  %v15726_v8 = vrot.slane %v4399_v4, 5 }
 0x1fb   : > { %v4405_v9 = vrot.slane %v4403_v46, 4  ;;  %v4340_v59 = vsel %vm14328_vm2, %v4335_v21, %v4339_v28  ;;  %v4349_v16 = vrot.slane %v4348_v39, 4  ;;  %v4414_v0 = vshrl.u32 %v4155_v41, 16 }
 0x1fc   : > { %12871 = vmatmul.mubr.bf16.vlgmr.msra.gmra.mrb[0].mxu0 %v11407_v34  ;;  %v4393_v34 = vshll.u32 %v4152_v58, 16  ;;  %v4385_v58 = vshll.u32 %v15724_v47, 16  ;;  %v4417_v6 = vshll.u32 %v4155_v41, 16  ;;  %v4423_v25 = vshll.u32 %v15728_v35, 16 }
 0x1fd   : > { %12903 = vmatpush3.bf16.msra.mxu0 %v15480_v33  ;;  %12874 = vmatprep.mubr.bf16.mxu0 %v11408_v40  ;;  %v4358_v33 = vor.u32 %v4357_v10, %v15698_v53  ;;  %v4361_v40 = vshll.u32 %v15436_v56, 16  ;;  %v14019_v56 = vld [vmem:[%s17740_s1 + $0x218] sm:$0xff]   ;;  %v4382_v10 = vor.u32 %v4381_v57, %v15710_v29  ;;  %v4427_v55 = vshrl.u32 %v15728_v35, 16 }
 0x1fe   : > { %12904 = vmatprep.subr.bf16.mxu0 %v14017_v19  ;;  %v4395_v3 = vrot.slane %v4393_v34, 5  ;;  %v4373_v32 = vrot.slane %v4372_v2, 4  ;;  %v4406_v28 = vor.u32 %v4405_v9, %v15726_v8  ;;  %v4409_v20 = vshll.u32 %v15471_v45, 16  ;;  %v4158_v34 = vld [vmem:[#allocation2 + $0x9c] sm:$0xf] }
 0x1ff   : > { %v4359_v13 = vrot.slane %v4358_v33, 4  ;;  %v4363_v37 = vrot.slane %v4361_v40, 5  ;;  %v11411_v4 = vcombine.low %v4306_v43, %v4316_v18  ;;  %v11412_v46 = vcombine.low %v4330_v14, %v4340_v59  ;;  %v15746_v45 = vld [vmem:[#allocation2 + $0x98] sm:$0x1] }
 0x200   : > { %v4383_v39 = vrot.slane %v4382_v10, 4  ;;  %v4387_v33 = vrot.slane %v4385_v58, 5  ;;  %v4416_v40 = vrot.slane %v4414_v0, 4  ;;  %v15748_v57 = vrot.slane %v4423_v25, 5 }
 0x201   : > { %12905 = vmatpush3.bf16.msra.mxu0 %v14017_v19  ;;  %v4392_v19 = vrot.slane %v4390_v49, 4  ;;  %v14020_v49 = vld [vmem:[%s17740_s1 + $0x220] sm:$0xff]   ;;  %v4364_v21 = vsel %vm14328_vm2, %v4359_v13, %v4363_v37  ;;  %v4429_v2 = vrot.slane %v4427_v55, 4  ;;  %v4438_v43 = vshrl.u32 %v4158_v34, 16 }
 0x202   : > { %12906 = vmatprep.subr.bf16.mxu0 %v14018_v62  ;;  %v4441_v18 = vshll.u32 %v4158_v34, 16  ;;  %v4407_v41 = vrot.slane %v4406_v28, 4  ;;  %v4451_v9 = vshrl.u32 %v15512_v22, 16  ;;  %v4388_v13 = vsel %vm14328_vm2, %v4383_v39, %v4387_v33 }
 0x203   : > { %v4396_v38 = vor.u32 %v4395_v3, %v4392_v19  ;;  %v4411_v19 = vrot.slane %v4409_v20, 5  ;;  %v14021_v3 = vld [vmem:[%s17740_s1 + $0x228] sm:$0xff]   ;;  %v4471_v37 = vshll.u32 %v15552_v30, 16  ;;  %v4475_v10 = vshrl.u32 %v15552_v30, 16  ;;  %v14022_v30 = vld [vmem:[%s17740_s1 + $0x230] sm:$0xff]  }
 0x204   : > { %12875 = vmatmul.mubr.bf16.gmra.mrb[4].mxu0 %v11409_v12  ;;  %v4419_v12 = vrot.slane %v4417_v6, 5  ;;  %v4430_v0 = vor.u32 %v4429_v2, %v15748_v57  ;;  %v4440_v6 = vrot.slane %v4438_v43, 4  ;;  %v4443_v25 = vrot.slane %v4441_v18, 5 }
 0x205   : > { %12878 = vmatprep.mubr.bf16.mxu0 %v11410_v11  ;;  %12907 = vmatpush3.bf16.msra.mxu0 %v14018_v62  ;;  %v4354_v62 = vsel %vm14328_vm2, %v4349_v16, %v15698_v53  ;;  %v4161_v11 = vld [vmem:[#allocation2 + $0xa8] sm:$0xf]  ;;  %v4378_v53 = vsel %vm14328_vm2, %v4373_v32, %v15710_v29  ;;  %v4397_v14 = vrot.slane %v4396_v38, 4  ;;  %v4433_v29 = vshll.u32 %v15746_v45, 16 }
 0x206   : > { %12908 = vmatprep.subr.bf16.mxu0 %v14019_v56  ;;  %v4462_v59 = vshrl.u32 %v4161_v11, 16  ;;  %v4465_v16 = vshll.u32 %v4161_v11, 16  ;;  %v4420_v58 = vor.u32 %v4419_v12, %v4416_v40  ;;  %v4412_v32 = vsel %vm14328_vm2, %v4407_v41, %v4411_v19  ;;  %v14023_v11 = vld [vmem:[%s17740_s1 + $0x238] sm:$0xff]  }
 0x207   : > { %v4402_v55 = vsel %vm14328_vm2, %v4397_v14, %v15726_v8  ;;  %v4453_v28 = vrot.slane %v4451_v9, 4  ;;  %v11414_v34 = vcombine.low %v4378_v53, %v4388_v13  ;;  %v4431_v39 = vrot.slane %v4430_v0, 4  ;;  %v4167_v14 = vld [vmem:[#allocation2 + $0xc0] sm:$0xf] }
 0x208   : > { %v4464_v20 = vrot.slane %v4462_v59, 4  ;;  %v4421_v8 = vrot.slane %v4420_v58, 4  ;;  %v4444_v33 = vor.u32 %v4443_v25, %v4440_v6  ;;  %v4457_v40 = vshll.u32 %v15514_v36, 16 }
 0x209   : > { %12909 = vmatpush3.bf16.msra.mxu0 %v14019_v56  ;;  %v4447_v56 = vshll.u32 %v15512_v22, 16  ;;  %v11413_v22 = vcombine.low %v4354_v62, %v4364_v21  ;;  %v4477_v62 = vrot.slane %v4475_v10, 4  ;;  %v4164_v21 = vld [vmem:[#allocation2 + $0xb4] sm:$0xf]  ;;  %v11415_v12 = vcombine.low %v4402_v55, %v4412_v32 }
 0x20a   : > { %12910 = vmatprep.subr.bf16.mxu0 %v14020_v49  ;;  %v4481_v18 = vshll.u32 %v15554_v50, 16  ;;  %v4486_v53 = vshrl.u32 %v4164_v21, 16  ;;  %v4489_v19 = vshll.u32 %v4164_v21, 16  ;;  %v4495_v36 = vshll.u32 %v15556_v44, 16 }
 0x20b   : > { %v15772_v38 = vrot.slane %v4447_v56, 5  ;;  %v4426_v56 = vsel %vm14328_vm2, %v4421_v8, %v15748_v57  ;;  %v4445_v59 = vrot.slane %v4444_v33, 4  ;;  %v4459_v50 = vrot.slane %v4457_v40, 5 }
 0x20c   : > { %12879 = vmatmul.mubr.bf16.gmra.mrb[8].mxu0 %v11411_v4  ;;  %v4435_v4 = vrot.slane %v4433_v29, 5  ;;  %v4513_v13 = vshll.u32 %v4167_v14, 16  ;;  %v4519_v29 = vshll.u32 %v15613_v52, 16  ;;  %v4483_v58 = vrot.slane %v4481_v18, 5 }
 0x20d   : > { %12882 = vmatprep.mubr.bf16.mxu0 %v11412_v46  ;;  %12911 = vmatpush3.bf16.msra.mxu0 %v14020_v49  ;;  %v4467_v49 = vrot.slane %v4465_v16, 5  ;;  %v15774_v46 = vrot.slane %v4471_v37, 5  ;;  %v4454_v2 = vor.u32 %v4453_v28, %v15772_v38  ;;  %v4510_v16 = vshrl.u32 %v4167_v14, 16 }
 0x20e   : > { %12912 = vmatprep.subr.bf16.mxu0 %v14021_v3  ;;  %v4436_v9 = vsel %vm14328_vm2, %v4431_v39, %v4435_v4  ;;  %v4523_v37 = vshrl.u32 %v15613_v52, 16  ;;  %v4488_v0 = vrot.slane %v4486_v53, 4  ;;  %v4491_v25 = vrot.slane %v4489_v19, 5 }
 0x20f   : > { %v4468_v43 = vor.u32 %v4467_v49, %v4464_v20  ;;  %v4478_v41 = vor.u32 %v4477_v62, %v15774_v46  ;;  %v4455_v10 = vrot.slane %v4454_v2, 4  ;;  %v4497_v57 = vrot.slane %v4495_v36, 5  ;;  %v4170_v49 = vld [vmem:[#allocation2 + $0xcc] sm:$0xf] }
 0x210   : > { %v11416_v55 = vcombine.low %v4426_v56, %v4436_v9  ;;  %v4512_v32 = vrot.slane %v4510_v16, 4  ;;  %v4515_v28 = vrot.slane %v4513_v13, 5  ;;  %v4525_v20 = vrot.slane %v4523_v37, 4 }
 0x211   : > { %12913 = vmatpush3.bf16.msra.mxu0 %v14021_v3  ;;  %v4499_v3 = vshrl.u32 %v15556_v44, 16  ;;  %v4469_v44 = vrot.slane %v4468_v43, 4  ;;  %v4479_v6 = vrot.slane %v4478_v41, 4  ;;  %v4450_v52 = vsel %vm14328_vm2, %v4445_v59, %v15772_v38 }
 0x212   : > { %12914 = vmatprep.subr.bf16.mxu0 %v14022_v30  ;;  %v4505_v4 = vshll.u32 %v15563_v54, 16  ;;  %v4492_v8 = vor.u32 %v4491_v25, %v4488_v0  ;;  %v4534_v33 = vshrl.u32 %v4170_v49, 16  ;;  %v4537_v40 = vshll.u32 %v4170_v49, 16  ;;  %v4880_v49 = vld [vmem:[#allocation2 + $0x24] sm:$0xe] }
 0x213   : > { %v4474_v62 = vsel %vm14328_vm2, %v4469_v44, %v15774_v46  ;;  %v4484_v21 = vsel %vm14328_vm2, %v4479_v6, %v4483_v58  ;;  %v4543_v38 = vshll.u32 %v15617_v7, 16  ;;  %v4516_v2 = vor.u32 %v4515_v28, %v4512_v32  ;;  %v4879_v44 = vld [vmem:[#allocation2 + $0x18] sm:$0xe] }
 0x214   : > { %12883 = vmatmul.mubr.bf16.gmra.mrb[12].mxu0 %v11413_v22  ;;  %v4501_v22 = vrot.slane %v4499_v3, 4  ;;  %v4529_v54 = vshll.u32 %v15615_v1, 16  ;;  %v11418_v18 = vcombine.low %v4474_v62, %v4484_v21  ;;  %v4493_v53 = vrot.slane %v4492_v8, 4 }
 0x215   : > { %12886 = vmatprep.mubr.bf16.mxu0 %v11414_v34  ;;  %12915 = vmatpush3.bf16.msra.mxu0 %v14022_v30  ;;  %v4521_v30 = vrot.slane %v4519_v29, 5  ;;  %v4460_v34 = vsel %vm14328_vm2, %v4455_v10, %v4459_v50  ;;  %v4507_v14 = vrot.slane %v4505_v4, 5  ;;  %v4536_v41 = vrot.slane %v4534_v33, 4 }
 0x216   : > { %12916 = vmatprep.subr.bf16.mxu0 %v14023_v11  ;;  %v4502_v39 = vor.u32 %v4501_v22, %v4497_v57  ;;  %v4539_v19 = vrot.slane %v4537_v40, 5  ;;  %v4545_v36 = vrot.slane %v4543_v38, 5  ;;  %v4517_v56 = vrot.slane %v4516_v2, 4  ;;  %v4882_v2 = vld [vmem:[#allocation2 + $0x3c] sm:$0xe] }
 0x217   : > { %v4526_v43 = vor.u32 %v4525_v20, %v4521_v30  ;;  %v4531_v59 = vrot.slane %v4529_v54, 5  ;;  %v4553_v13 = vshll.u32 %v15621_v23, 16  ;;  %v4945_v10 = vrot.slane %v15432_v24, 5 }
 0x218   : > { %v4503_v46 = vrot.slane %v4502_v39, 4  ;;  %v4540_v50 = vor.u32 %v4539_v19, %v4536_v41  ;;  %v4522_v29 = vsel %vm14328_vm2, %v4517_v56, %v4521_v30  ;;  %v11430_v22 = vrot.slane %v4879_v44, 9  ;;  %v17897_v19 = vld [vmem:[#allocation16_spill] sm:$0xff]  ;;  %v4887_v44 = vld [vmem:[#allocation2 + $0x78] sm:$0xe] }
 0x219   : > { %12917 = vmatpush3.bf16.msra.mxu0 %v14023_v11  ;;  %v4547_v11 = vshrl.u32 %v15617_v7, 16  ;;  %v4527_v9 = vrot.slane %v4526_v43, 4  ;;  %v4498_v7 = vsel %vm14328_vm2, %v4493_v53, %v4497_v57  ;;  %v4555_v57 = vrot.slane %v4553_v13, 5 }
 0x21a   : > { %v4508_v1 = vsel %vm14328_vm2, %v4503_v46, %v4507_v14  ;;  %v4541_v6 = vrot.slane %v4540_v50, 4  ;;  %v4948_v32 = vrot.slane %v15451_v26, 5  ;;  %v4952_v24 = vrot.slane %v15445_v27, 5  ;;  %v4881_v26 = vld [vmem:[#allocation2 + $0x30] sm:$0xe] }
 0x21b   : > { %v4549_v3 = vrot.slane %v4547_v11, 4  ;;  %v4532_v37 = vsel %vm14328_vm2, %v4527_v9, %v4531_v59  ;;  %v11419_v58 = vcombine.low %v4498_v7, %v4508_v1  ;;  %v4946_v30 = vsel %vm14634_vm5, %v11430_v22, %v4945_v10  ;;  %v17898_v9 = vld [vmem:[#allocation17_spill] sm:$0xff]  ;;  %v4885_v59 = vld [vmem:[#allocation2 + $0x60] sm:$0xe] }
 0x21c   : > { %12887 = vmatmul.mubr.bf16.gmra.mrb[16].mxu0 %v11415_v12  ;;  %v11417_v12 = vcombine.low %v4450_v52, %v4460_v34  ;;  %v11420_v0 = vcombine.low %v4522_v29, %v4532_v37  ;;  %v4546_v23 = vsel %vm14328_vm2, %v4541_v6, %v4545_v36  ;;  %v4959_v52 = vrot.slane %v15484_v63, 5  ;;  %v17900_v22 = vld [vmem:[#allocation5_spill] sm:$0xff] }
 0x21d   : > { %12890 = vmatprep.mubr.bf16.mxu0 %v11416_v55  ;;  %v4550_v16 = vor.u32 %v4549_v3, %v4545_v36  ;;  %v4947_v55 = vrot.slane %v4945_v10, 4  ;;  %v11431_v62 = vrot.slane %v4880_v49, 9  ;;  %v4954_v21 = vrot.slane %v4952_v24, 4  ;;  %v17903_v49 = vld [vmem:[#allocation7_spill] sm:$0xff] }
 0x21e   : > { %v4955_v8 = vrot.slane %v15466_v48, 5  ;;  %v11432_v39 = vrot.slane %v4881_v26, 9  ;;  %v4961_v33 = vrot.slane %v4959_v52, 4  ;;  %v4962_v27 = vrot.slane %v15504_v15, 5  ;;  %v4883_v15 = vld [vmem:[#allocation2 + $0x48] sm:$0xe] }
 0x21f   : > { %v4551_v25 = vrot.slane %v4550_v16, 4  ;;  %v4949_v20 = vsel %vm14634_vm5, %v4947_v55, %v4948_v32  ;;  %v4953_v40 = vsel %vm14634_vm5, %v11431_v62, %v4952_v24  ;;  %v4966_v63 = vrot.slane %v15507_v17, 5  ;;  %v17905_v62 = vld [vmem:[#allocation8_spill] sm:$0xff] }
 0x220   : > { %v11462_v4 = vcombine.low %v4946_v30, %v4949_v20  ;;  %v4956_v38 = vsel %vm14634_vm5, %v4954_v21, %v4955_v8  ;;  %v4960_v11 = vsel %vm14634_vm5, %v11432_v39, %v4959_v52  ;;  %v4963_v48 = vsel %vm14634_vm5, %v4961_v33, %v4962_v27  ;;  %v17908_v8 = vld [vmem:[#allocation10_spill] sm:$0xff]  ;;  %v17909_v39 = vld [vmem:[#allocation11_spill] sm:$0xff]  ;;  %v17911_v33 = vld [vmem:[#allocation12_spill] sm:$0xff] }
 0x221   : > { %v4556_v28 = vsel %vm14328_vm2, %v4551_v25, %v4555_v57  ;;  %v4973_v43 = vrot.slane %v15544_v61, 5  ;;  %v11463_v54 = vcombine.low %v4953_v40, %v4956_v38  ;;  %v4968_v53 = vrot.slane %v4966_v63, 4  ;;  %v17899_v57 = vld [vmem:[#allocation4_spill] sm:$0xff]  ;;  %v17912_v27 = vld [vmem:[#allocation13_spill] sm:$0xff]  ;;  %v17914_v38 = vld [vmem:[#allocation14_spill] sm:$0xff] }
 0x222   : > { %v11421_v34 = vcombine.low %v4546_v23, %v4556_v28  ;;  %v4969_v46 = vrot.slane %v15525_v60, 5  ;;  %v11434_v14 = vrot.slane %v4883_v15, 9  ;;  %v4976_v17 = vrot.slane %v17897_v19, 5  ;;  %v17920_v15 = vld [vmem:[#allocation20_spill] sm:$0xff]  ;;  %v14028_v19 = vld [vmem:[%s17742_s3 + $0x60] sm:$0xff]  }
 0x223   : > { %v4975_v41 = vrot.slane %v4973_v43, 4  ;;  %v4987_v60 = vrot.slane %v17898_v9, 5  ;;  %v11436_v50 = vrot.slane %v4885_v59, 9  ;;  %v4990_v13 = vrot.slane %v15668_v31, 5 }
 0x224   : > { %12891 = vmatmul.mubr.bf16.gmra.mrb[20].mxu0 %v11417_v12  ;;  %v11464_v12 = vcombine.low %v4960_v11, %v4963_v48  ;;  %v4970_v3 = vsel %vm14634_vm5, %v4968_v53, %v4969_v46  ;;  %v4974_v61 = vsel %vm14634_vm5, %v11434_v14, %v4973_v43  ;;  %v5001_v10 = vrot.slane %v15684_v51, 5  ;;  %v4889_v51 = vld [vmem:[#allocation2 + $0x90] sm:$0xe]  ;;  %v17917_v48 = vld [vmem:[#allocation18_spill] sm:$0xff]  ;;  %v14025_v46 = vld [vmem:[%s17742_s3 + $0x48] sm:$0xff]  }
 0x225   : > { %12894 = vmatprep.mubr.bf16.mxu0 %v11418_v18  ;;  %v11433_v18 = vrot.slane %v4882_v2, 9  ;;  %v4977_v56 = vsel %vm14634_vm5, %v4975_v41, %v4976_v17  ;;  %v4989_v16 = vrot.slane %v4987_v60, 4  ;;  %v4988_v29 = vsel %vm14634_vm5, %v11436_v50, %v4987_v60  ;;  %v17918_v2 = vld [vmem:[#allocation19_spill] sm:$0xff]  ;;  %v14026_v14 = vld [vmem:[%s17742_s3 + $0x50] sm:$0xff]   ;;  %v14027_v41 = vld [vmem:[%s17742_s3 + $0x58] sm:$0xff]  }
 0x226   : > { %v11466_v1 = vcombine.low %v4974_v61, %v4977_v56  ;;  %v5003_v6 = vrot.slane %v5001_v10, 4  ;;  %v5004_v25 = vrot.slane %v15724_v47, 5  ;;  %v17901_v55 = vcombine.low %v17899_v57, %v17900_v22  ;;  %v17902_v47 = vld [vmem:[#allocation6_spill] sm:$0xff]  ;;  %v14029_v17 = vld [vmem:[%s17742_s3 + $0x68] sm:$0xff]  }
 0x227   : > { %v4967_v36 = vsel %vm14634_vm5, %v11433_v18, %v4966_v63  ;;  %v4991_v37 = vsel %vm14634_vm5, %v4989_v16, %v4990_v13  ;;  %v5015_v23 = vrot.slane %v15728_v35, 5  ;;  %v11440_v24 = vrot.slane %v4889_v51, 9  ;;  %v17906_v35 = vld [vmem:[#allocation9_spill] sm:$0xff]  ;;  %v17915_v63 = vld [vmem:[#allocation15_spill] sm:$0xff]  ;;  %v14024_v18 = vld [vmem:[%s17742_s3 + $0x40] sm:$0xff]  }
 0x228   : > { %v11465_v7 = vcombine.low %v4967_v36, %v4970_v3  ;;  %v5005_v32 = vsel %vm14634_vm5, %v5003_v6, %v5004_v25  ;;  %v5018_v20 = vrot.slane %v15746_v45, 5  ;;  %v17904_v52 = vcombine.low %v17902_v47, %v17903_v49  ;;  %12950 = vmatprep.subr.bf16.mxu1 %v14024_v18  ;;  %v14030_v36 = vld [vmem:[%s17742_s3 + $0x70] sm:$0xff]  }
 0x229   : > { %v5017_v30 = vrot.slane %v5015_v23, 4  ;;  %v5016_v26 = vsel %vm14634_vm5, %v11440_v24, %v5015_v23  ;;  %v17907_v21 = vcombine.low %v17905_v62, %v17906_v35  ;;  %v17910_v45 = vcombine.low %v17908_v8, %v17909_v39  ;;  %12951 = vmatpush3.bf16.msra.mxu1 %v14024_v18 }
 0x22a   : > { %v17913_v40 = vcombine.low %v17911_v33, %v17912_v27  ;;  %v17916_v11 = vcombine.low %v17914_v38, %v17915_v63  ;;  %v17919_v43 = vcombine.low %v17917_v48, %v17918_v2  ;;  %v14215_v53 = vmov 0   ;;  %12952 = vmatprep.subr.bf16.mxu1 %v14025_v46 }
 0x22b   : > { %5454 = vst [vmem:[#allocation3 + $0x18] sm:$0xf] %v14215_v53  ;;  %5448 = vst [vmem:[#allocation3] sm:$0xf] %v14215_v53 }
 0x22c   : > { %12895 = vmatmul.mubr.bf16.gmra.mrb[24].mxu0 %v11419_v58  ;;  %v11468_v58 = vcombine.low %v4988_v29, %v4991_v37  ;;  %5449 = vst [vmem:[#allocation3 + $0x4] sm:$0xf] %v14215_v53  ;;  %5450 = vst [vmem:[#allocation3 + $0x8] sm:$0x1] %v14215_v53 }
 0x22d   : > { %12898 = vmatprep.mubr.bf16.mxu0 %v11420_v0  ;;  %v11438_v0 = vrot.slane %v4887_v44, 9  ;;  %5451 = vst [vmem:[#allocation3 + $0xc] sm:$0xf] %v14215_v53  ;;  %5452 = vst [vmem:[#allocation3 + $0x10] sm:$0xf] %v14215_v53  ;;  %12953 = vmatpush3.bf16.msra.mxu1 %v14025_v46 }
 0x22e   : > { %5453 = vst [vmem:[#allocation3 + $0x14] sm:$0x1] %v14215_v53  ;;  %5455 = vst [vmem:[#allocation3 + $0x1c] sm:$0xf] %v14215_v53  ;;  %12954 = vmatprep.subr.bf16.mxu1 %v14026_v14 }
 0x22f   : > { %v5002_v31 = vsel %vm14634_vm5, %v11438_v0, %v5001_v10  ;;  %5456 = vst [vmem:[#allocation3 + $0x20] sm:$0x1] %v14215_v53  ;;  %5457 = vst [vmem:[#allocation3 + $0x24] sm:$0xf] %v14215_v53 }
 0x230   : > { %v11470_v28 = vcombine.low %v5002_v31, %v5005_v32  ;;  %5458 = vst [vmem:[#allocation3 + $0x28] sm:$0xf] %v14215_v53  ;;  %5459 = vst [vmem:[#allocation3 + $0x2c] sm:$0x1] %v14215_v53  ;;  %v15928_v31 = vld [vmem:[%s17741_s2] ss:$0 sm:$0xff] }
 0x231   : > { %5460 = vst [vmem:[#allocation3 + $0x30] sm:$0xf] %v14215_v53  ;;  %5461 = vst [vmem:[#allocation3 + $0x34] sm:$0xf] %v14215_v53  ;;  %12955 = vmatpush3.bf16.msra.mxu1 %v14026_v14 }
 0x232   : > { %5462 = vst [vmem:[#allocation3 + $0x38] sm:$0x1] %v14215_v53  ;;  %5463 = vst [vmem:[#allocation3 + $0x3c] sm:$0xf] %v14215_v53  ;;  %12956 = vmatprep.subr.bf16.mxu1 %v14027_v41  ;;  %v6039_v3 = vld [vmem:[#allocation3] sm:$0xf] }
 0x233   : > { %5464 = vst [vmem:[#allocation3 + $0x40] sm:$0xf] %v14215_v53  ;;  %5465 = vst [vmem:[#allocation3 + $0x44] sm:$0x1] %v14215_v53  ;;  %v6040_v61 = vld [vmem:[#allocation3 + $0x4] sm:$0xf] }
 0x234   : > { %12899 = vmatmul.mubr.bf16.gmra.mrb[28].mxu0 %v11421_v34  ;;  %v5019_v34 = vsel %vm14634_vm5, %v5017_v30, %v5018_v20  ;;  %5466 = vst [vmem:[#allocation3 + $0x48] sm:$0xf] %v14215_v53  ;;  %5467 = vst [vmem:[#allocation3 + $0x4c] sm:$0xf] %v14215_v53  ;;  %v6104_v56 = vshrl.u32 %v6039_v3, 16  ;;  %v6107_v9 = vshll.u32 %v6039_v3, 16 }
 0x235   : > { %12918 = vmatprep.mubr.bf16.mxu0 %v11462_v4  ;;  %v11472_v4 = vcombine.low %v5016_v26, %v5019_v34  ;;  %5468 = vst [vmem:[#allocation3 + $0x50] sm:$0x1] %v14215_v53  ;;  %5469 = vst [vmem:[#allocation3 + $0x54] sm:$0xf] %v14215_v53  ;;  %12957 = vmatpush3.bf16.msra.mxu1 %v14027_v41  ;;  %v6113_v60 = vshll.u32 %v6040_v61, 16  ;;  %v6117_v59 = vshrl.u32 %v6040_v61, 16 }
 0x236   : > { %5470 = vst [vmem:[#allocation3 + $0x58] sm:$0xf] %v14215_v53  ;;  %5471 = vst [vmem:[#allocation3 + $0x5c] sm:$0x1] %v14215_v53  ;;  %12958 = vmatprep.subr.bf16.mxu1 %v14028_v19  ;;  %v6109_v50 = vrot.slane %v6107_v9, 5 }
 0x237   : > { %5472 = vst [vmem:[#allocation3 + $0x60] sm:$0xf] %v14215_v53  ;;  %5473 = vst [vmem:[#allocation3 + $0x64] sm:$0xf] %v14215_v53  ;;  %v6115_v16 = vrot.slane %v6113_v60, 5  ;;  %v6119_v29 = vrot.slane %v6117_v59, 4 }
 0x238   : > { %5474 = vst [vmem:[#allocation3 + $0x68] sm:$0x1] %v14215_v53  ;;  %5475 = vst [vmem:[#allocation3 + $0x6c] sm:$0xf] %v14215_v53  ;;  %v6087_v13 = vld [vmem:[#allocation3 + $0x8] sm:$0x1] }
 0x239   : > { %5476 = vst [vmem:[#allocation3 + $0x70] sm:$0xf] %v14215_v53  ;;  %5477 = vst [vmem:[#allocation3 + $0x74] sm:$0x1] %v14215_v53  ;;  %12959 = vmatpush3.bf16.msra.mxu1 %v14028_v19  ;;  %v6123_v10 = vshll.u32 %v6087_v13, 16  ;;  %v6120_v44 = vor.u32 %v6119_v29, %v6115_v16 }
 0x23a   : > { %5478 = vst [vmem:[#allocation3 + $0x78] sm:$0xf] %v14215_v53  ;;  %5479 = vst [vmem:[#allocation3 + $0x7c] sm:$0xf] %v14215_v53  ;;  %12960 = vmatprep.subr.bf16.mxu1 %v14029_v17  ;;  %v5925_v41 = vld [vmem:[#allocation3 + $0xc] sm:$0xf] }
 0x23b   : > { %5480 = vst [vmem:[#allocation3 + $0x80] sm:$0x1] %v14215_v53  ;;  %5481 = vst [vmem:[#allocation3 + $0x84] sm:$0xf] %v14215_v53  ;;  %v6125_v0 = vrot.slane %v6123_v10, 5  ;;  %v6121_v6 = vrot.slane %v6120_v44, 4 }
 0x23c   : > { %12919 = vmatmul.mubr.bf16.vlgmr.msra.gmra.mrb[0].mxu0 %v11463_v54  ;;  %v17921_v54 = vld [vmem:[#allocation21_spill] sm:$0xff]  ;;  %5482 = vst [vmem:[#allocation3 + $0x88] sm:$0xf] %v14215_v53  ;;  %5483 = vst [vmem:[#allocation3 + $0x8c] sm:$0x1] %v14215_v53 }
 0x23d   : > { %12922 = vmatprep.mubr.bf16.mxu0 %v11464_v12  ;;  %v17922_v12 = vcombine.low %v17920_v15, %v17921_v54  ;;  %5484 = vst [vmem:[#allocation3 + $0x90] sm:$0xf] %v14215_v53  ;;  %5485 = vst [vmem:[#allocation3 + $0x94] sm:$0xf] %v14215_v53  ;;  %12961 = vmatpush3.bf16.msra.mxu1 %v14029_v17  ;;  %v6126_v57 = vsel %vm14328_vm2, %v6121_v6, %v6125_v0  ;;  %v5938_v60 = vld [vmem:[#allocation3 + $0x20] sm:$0x1] }
 0x23e   : > { %5486 = vst [vmem:[#allocation3 + $0x98] sm:$0x1] %v14215_v53  ;;  %5487 = vst [vmem:[#allocation3 + $0x9c] sm:$0xf] %v14215_v53  ;;  %12962 = vmatprep.subr.bf16.mxu1 %v14030_v36  ;;  %v5931_v13 = vld [vmem:[#allocation3 + $0x14] sm:$0x1] }
 0x23f   : > { %5488 = vst [vmem:[#allocation3 + $0xa0] sm:$0xf] %v14215_v53  ;;  %5489 = vst [vmem:[#allocation3 + $0xa4] sm:$0x1] %v14215_v53 }
 0x240   : > { %5490 = vst [vmem:[#allocation3 + $0xa8] sm:$0xf] %v14215_v53  ;;  %5491 = vst [vmem:[#allocation3 + $0xac] sm:$0xf] %v14215_v53 }
 0x241   : > { %5492 = vst [vmem:[#allocation3 + $0xb0] sm:$0x1] %v14215_v53  ;;  %5493 = vst [vmem:[#allocation3 + $0xb4] sm:$0xf] %v14215_v53  ;;  %12963 = vmatpush3.bf16.msra.mxu1 %v14030_v36 }
 0x242   : > { %5494 = vst [vmem:[#allocation3 + $0xb8] sm:$0xf] %v14215_v53  ;;  %5495 = vst [vmem:[#allocation3 + $0xbc] sm:$0x1] %v14215_v53 }
 0x243   : > { %5496 = vst [vmem:[#allocation3 + $0xc0] sm:$0xf] %v14215_v53  ;;  %5497 = vst [vmem:[#allocation3 + $0xc4] sm:$0xf] %v14215_v53 }
 0x244   : > { %12923 = vmatmul.mubr.bf16.gmra.mrb[4].mxu0 %v11465_v7  ;;  %5498 = vst [vmem:[#allocation3 + $0xc8] sm:$0x1] %v14215_v53  ;;  %5499 = vst [vmem:[#allocation3 + $0xcc] sm:$0xf] %v14215_v53  ;;  %v14031_v7 = vld [vmem:[%s17742_s3 + $0x78] sm:$0xff]  }
 0x245   : > { %12926 = vmatprep.mubr.bf16.mxu0 %v11466_v1  ;;  %5500 = vst [vmem:[#allocation3 + $0xd0] sm:$0xf] %v14215_v53  ;;  %5501 = vst [vmem:[#allocation3 + $0xd4] sm:$0x1] %v14215_v53  ;;  %v6106_v1 = vrot.slane %v6104_v56, 4  ;;  %12964 = vmatprep.subr.bf16.mxu1 %v14031_v7 }
 0x246   : > { %12965 = vmatpush3.bf16.msra.mxu1 %v14031_v7 }
 0x247   : > { %v6110_v37 = vor.u32 %v6109_v50, %v6106_v1 }
 0x24c   : > { %12927 = vmatmul.mubr.bf16.gmra.mrb[8].mxu0 %v17901_v55  ;;  %v15922_v55 = vld [vmem:[%s17742_s3] sm:$0xff]  }
 0x24d   : > { %12930 = vmatprep.mubr.bf16.mxu0 %v11468_v58  ;;  %v6111_v58 = vrot.slane %v6110_v37, 4  ;;  %12998 = vmatprep.subr.bf16.mxu1 %v15922_v55 }
 0x24f   : > { %v6116_v25 = vsel %vm14328_vm2, %v6111_v58, %v6115_v16 }
 0x250   : > { %v11535_v22 = vcombine.low %v6116_v25, %v6126_v57 }
 0x252   : > { %12966 = vmatprep.mubr.bf16.mxu1 %v11535_v22 }
 0x254   : > { %12931 = vmatmul.mubr.bf16.gmra.mrb[12].mxu0 %v17904_v52 }
 0x255   : > { %12934 = vmatprep.mubr.bf16.mxu0 %v11470_v28 }
 0x25c   : > { %12935 = vmatmul.mubr.bf16.gmra.mrb[16].mxu0 %v17907_v21 }
 0x25d   : > { %12938 = vmatprep.mubr.bf16.mxu0 %v11472_v4 }
 0x264   : > { %12939 = vmatmul.mubr.bf16.gmra.mrb[20].mxu0 %v17910_v45 }
 0x265   : > { %12942 = vmatprep.mubr.bf16.mxu0 %v17913_v40 }
 0x26c   : > { %12943 = vmatmul.mubr.bf16.gmra.mrb[24].mxu0 %v17916_v11 }
 0x26d   : > { %12946 = vmatprep.mubr.bf16.mxu0 %v17919_v43  ;;  %v5934_v43 = vld [vmem:[#allocation3 + $0x18] sm:$0xf] }
 0x274   : > { %12947 = vmatmul.mubr.bf16.gmra.mrb[28].mxu0 %v17922_v12 }
 0x30f   : > { %v12920_v32 = vpop.f32.mrb[0].mxu0 }
 0x310   : > { %v5386_v23 = vadd.f32 %v12920_v32, %v15928_v31  ;;  %v5218_v51 = vpop.f32.mrb[1].mxu0 }
 0x311   : > { %v5384_v28 = vadd.f32 %v15928_v31, %v5218_v51  ;;  %v12921_v24 = vpop.f32.mrb[2].mxu0 }
 0x312   : > { %v5418_v30 = vmax.f32 %v5386_v23, 0.0  ;;  %v5387_v20 = vadd.f32 %v12921_v24, %v15928_v31  ;;  %v5221_v47 = vpop.f32.mrb[3].mxu0 }
 0x313   : > { %v5416_v49 = vmax.f32 %v5384_v28, 0.0  ;;  %v5385_v52 = vadd.f32 %v15928_v31, %v5221_v47 }
 0x314   : > { %v12003_v26 = vpack.c.bf16 %v5418_v30, %v5418_v30  ;;  %v5419_v34 = vmax.f32 %v5387_v20, 0.0 }
 0x315   : > { %v12001_v4 = vpack.c.bf16 %v5416_v49, %v5416_v49  ;;  %v5417_v62 = vmax.f32 %v5385_v52, 0.0  ;;  %v5948_v49 = vld [vmem:[#allocation3 + $0x30] sm:$0xf] }
 0x316   : > { %v5619_v35 = vshrl.u32 %v12003_v26, 16  ;;  %v12004_v21 = vpack.c.bf16 %v5419_v34, %v5419_v34  ;;  %v5622_v8 = vshll.u32 %v12003_v26, 16 }
 0x317   : > { %v5602_v39 = vshrl.u32 %v12001_v4, 16  ;;  %v5605_v45 = vshll.u32 %v12001_v4, 16  ;;  %v12002_v33 = vpack.c.bf16 %v5417_v62, %v5417_v62  ;;  %v12924_v27 = vpop.f32.mrb[4].mxu0 }
 0x318   : > { %v5621_v40 = vrot.slane %v5619_v35, 7  ;;  %v5627_v38 = vshrl.u32 %v12004_v21, 16  ;;  %v5630_v63 = vshll.u32 %v12004_v21, 16  ;;  %v5390_v11 = vadd.f32 %v12924_v27, %v15928_v31  ;;  %v5234_v48 = vpop.f32.mrb[5].mxu0  ;;  %v5941_v21 = vld [vmem:[#allocation3 + $0x24] sm:$0xf] }
 0x319   : > { %v5604_v15 = vrot.slane %v5602_v39, 7  ;;  %v5610_v54 = vshrl.u32 %v12002_v33, 16  ;;  %v5613_v12 = vshll.u32 %v12002_v33, 16  ;;  %v5388_v18 = vadd.f32 %v15928_v31, %v5234_v48  ;;  %v12925_v53 = vpop.f32.mrb[6].mxu0 }
 0x31a   : > { %v5624_v46 = vor.u32 %v5622_v8, %v5621_v40  ;;  %v5625_v14 = vrot.slane %v5621_v40, 4  ;;  %v5629_v17 = vrot.slane %v5627_v38, 7  ;;  %v5422_v36 = vmax.f32 %v5390_v11, 0.0  ;;  %v5237_v3 = vpop.f32.mrb[7].mxu0 }
 0x31b   : > { %v5607_v61 = vor.u32 %v5605_v45, %v5604_v15  ;;  %v5608_v56 = vrot.slane %v5604_v15, 4  ;;  %v5612_v59 = vrot.slane %v5610_v54, 7  ;;  %v5420_v7 = vmax.f32 %v5388_v18, 0.0 }
 0x31c   : > { %v5935_v1 = vsel %vm15937_vm11, %v5624_v46, %v5934_v43  ;;  %v5632_v50 = vor.u32 %v5630_v63, %v5629_v17  ;;  %v5634_v16 = vrot.slane %v5629_v17, 4  ;;  %v12007_v29 = vpack.c.bf16 %v5422_v36, %v5422_v36  ;;  %v5952_v17 = vld [vmem:[#allocation3 + $0x38] sm:$0x1]  ;;  %v5945_v36 = vld [vmem:[#allocation3 + $0x2c] sm:$0x1] }
 0x31d   : > { %5936 = vst [vmem:[#allocation3 + $0x18] sm:$0xf] %v5935_v1  ;;  %v5926_v37 = vsel %vm15937_vm11, %v5607_v61, %v5925_v41  ;;  %v5615_v10 = vor.u32 %v5613_v12, %v5612_v59  ;;  %v5617_v44 = vrot.slane %v5612_v59, 4  ;;  %v12005_v58 = vpack.c.bf16 %v5420_v7, %v5420_v7 }
 0x31e   : > { %5927 = vst [vmem:[#allocation3 + $0xc] sm:$0xf] %v5926_v37  ;;  %v5633_v0 = vsel %vm15944_vm12, %v5625_v14, %v5632_v50  ;;  %v5939_v6 = vsel %vm15950_vm13, %v5634_v16, %v5938_v60  ;;  %v5653_v25 = vshrl.u32 %v12007_v29, 16  ;;  %v5656_v32 = vshll.u32 %v12007_v29, 16  ;;  %v5962_v37 = vld [vmem:[#allocation3 + $0x48] sm:$0xf] }
 0x31f   : > { %5937 = vst [vmem:[#allocation3 + $0x1c] sm:$0xf] %v5633_v0  ;;  %5940 = vst [vmem:[#allocation3 + $0x20] sm:$0x1] %v5939_v6  ;;  %v5616_v57 = vsel %vm15944_vm12, %v5608_v56, %v5615_v10  ;;  %v5932_v22 = vsel %vm15950_vm13, %v5617_v44, %v5931_v13  ;;  %v5636_v23 = vshrl.u32 %v12005_v58, 16  ;;  %v12928_v51 = vpop.f32.mrb[8].mxu0  ;;  %v5391_v24 = vadd.f32 %v12925_v53, %v15928_v31 }
 0x320   : > { %5928 = vst [vmem:[#allocation3 + $0x10] sm:$0xf] %v5616_v57  ;;  %5933 = vst [vmem:[#allocation3 + $0x14] sm:$0x1] %v5932_v22  ;;  %v15966_v28 = vrot.slane %v5653_v25, 7  ;;  %v5389_v30 = vadd.f32 %v15928_v31, %v5237_v3  ;;  %v5394_v20 = vadd.f32 %v12928_v51, %v15928_v31  ;;  %v5250_v47 = vpop.f32.mrb[9].mxu0 }
 0x321   : > { %v5638_v52 = vrot.slane %v5636_v23, 7  ;;  %v5639_v26 = vshll.u32 %v12005_v58, 16  ;;  %v5392_v34 = vadd.f32 %v15928_v31, %v5250_v47  ;;  %v12929_v4 = vpop.f32.mrb[10].mxu0  ;;  %v5423_v8 = vmax.f32 %v5391_v24, 0.0 }
 0x322   : > { %v5658_v62 = vor.u32 %v5656_v32, %v15966_v28  ;;  %v5659_v35 = vrot.slane %v15966_v28, 4  ;;  %v5421_v39 = vmax.f32 %v5389_v30, 0.0  ;;  %v5253_v45 = vpop.f32.mrb[11].mxu0  ;;  %v5426_v40 = vmax.f32 %v5394_v20, 0.0  ;;  %v5955_v32 = vld [vmem:[#allocation3 + $0x3c] sm:$0xf] }
 0x323   : > { %v5641_v33 = vor.u32 %v5639_v26, %v5638_v52  ;;  %v5642_v27 = vrot.slane %v5638_v52, 4  ;;  %v5424_v38 = vmax.f32 %v5392_v34, 0.0  ;;  %v12008_v11 = vpack.c.bf16 %v5423_v8, %v5423_v8 }
 0x324   : > { %v5949_v63 = vsel %vm15937_vm11, %v5658_v62, %v5948_v49  ;;  %v12006_v48 = vpack.c.bf16 %v5421_v39, %v5421_v39  ;;  %v5395_v43 = vadd.f32 %v12929_v4, %v15928_v31  ;;  %v12011_v54 = vpack.c.bf16 %v5426_v40, %v5426_v40 }
 0x325   : > { %5950 = vst [vmem:[#allocation3 + $0x30] sm:$0xf] %v5949_v63  ;;  %v5942_v15 = vsel %vm15937_vm11, %v5641_v33, %v5941_v21  ;;  %v12009_v12 = vpack.c.bf16 %v5424_v38, %v5424_v38  ;;  %v5393_v18 = vadd.f32 %v15928_v31, %v5253_v45  ;;  %v5661_v53 = vshrl.u32 %v12008_v11, 16  ;;  %v5966_v63 = vld [vmem:[#allocation3 + $0x50] sm:$0x1] }
 0x326   : > { %5943 = vst [vmem:[#allocation3 + $0x24] sm:$0xf] %v5942_v15  ;;  %v5664_v46 = vshll.u32 %v12008_v11, 16  ;;  %v5644_v14 = vshrl.u32 %v12006_v48, 16  ;;  %v5647_v41 = vshll.u32 %v12006_v48, 16  ;;  %v5687_v3 = vshrl.u32 %v12011_v54, 16 }
 0x327   : > { %v5690_v61 = vshll.u32 %v12011_v54, 16  ;;  %v5670_v56 = vshrl.u32 %v12009_v12, 16  ;;  %v5673_v60 = vshll.u32 %v12009_v12, 16  ;;  %v12932_v59 = vpop.f32.mrb[12].mxu0  ;;  %v5663_v7 = vrot.slane %v5661_v53, 7 }
 0x328   : > { %v5646_v1 = vrot.slane %v5644_v14, 7  ;;  %v5427_v50 = vmax.f32 %v5395_v43, 0.0  ;;  %v5425_v16 = vmax.f32 %v5393_v18, 0.0  ;;  %v5266_v13 = vpop.f32.mrb[13].mxu0  ;;  %v15980_v29 = vrot.slane %v5687_v3, 7 }
 0x329   : > { %v15982_v10 = vrot.slane %v5670_v56, 7  ;;  %v5398_v44 = vadd.f32 %v12932_v59, %v15928_v31  ;;  %v5396_v58 = vadd.f32 %v15928_v31, %v5266_v13  ;;  %v12933_v0 = vpop.f32.mrb[14].mxu0  ;;  %v5666_v6 = vor.u32 %v5664_v46, %v5663_v7  ;;  %v5959_v53 = vld [vmem:[#allocation3 + $0x44] sm:$0x1] }
 0x32a   : > { %v5668_v25 = vrot.slane %v5663_v7, 4  ;;  %v5649_v57 = vor.u32 %v5647_v41, %v5646_v1  ;;  %v5651_v22 = vrot.slane %v5646_v1, 4  ;;  %v5269_v23 = vpop.f32.mrb[15].mxu0  ;;  %v5692_v51 = vor.u32 %v5690_v61, %v15980_v29 }
 0x32b   : > { %v5693_v28 = vrot.slane %v15980_v29, 4  ;;  %v5675_v24 = vor.u32 %v5673_v60, %v15982_v10  ;;  %v5676_v30 = vrot.slane %v15982_v10, 4  ;;  %v5667_v20 = vsel %vm15944_vm12, %v5659_v35, %v5666_v6  ;;  %v5969_v6 = vld [vmem:[#allocation3 + $0x54] sm:$0xf] }
 0x32c   : > { %v5953_v47 = vsel %vm15950_vm13, %v5668_v25, %v5952_v17  ;;  %v5650_v49 = vsel %vm15944_vm12, %v5642_v27, %v5649_v57  ;;  %v5946_v52 = vsel %vm15950_vm13, %v5651_v22, %v5945_v36  ;;  %5951 = vst [vmem:[#allocation3 + $0x34] sm:$0xf] %v5667_v20  ;;  %v5963_v26 = vsel %vm15937_vm11, %v5692_v51, %v5962_v37 }
 0x32d   : > { %5954 = vst [vmem:[#allocation3 + $0x38] sm:$0x1] %v5953_v47  ;;  %5944 = vst [vmem:[#allocation3 + $0x28] sm:$0xf] %v5650_v49  ;;  %v5956_v34 = vsel %vm15937_vm11, %v5675_v24, %v5955_v32  ;;  %v12012_v4 = vpack.c.bf16 %v5427_v50, %v5427_v50  ;;  %v12010_v62 = vpack.c.bf16 %v5425_v16, %v5425_v16  ;;  %v5430_v35 = vmax.f32 %v5398_v44, 0.0 }
 0x32e   : > { %5947 = vst [vmem:[#allocation3 + $0x2c] sm:$0x1] %v5946_v52  ;;  %5964 = vst [vmem:[#allocation3 + $0x48] sm:$0xf] %v5963_v26  ;;  %v5428_v21 = vmax.f32 %v5396_v58, 0.0  ;;  %v5399_v8 = vadd.f32 %v12933_v0, %v15928_v31  ;;  %v5397_v39 = vadd.f32 %v15928_v31, %v5269_v23 }
 0x32f   : > { %5957 = vst [vmem:[#allocation3 + $0x3c] sm:$0xf] %v5956_v34  ;;  %v5695_v45 = vshrl.u32 %v12012_v4, 16  ;;  %v5698_v33 = vshll.u32 %v12012_v4, 16  ;;  %v5678_v27 = vshrl.u32 %v12010_v62, 16  ;;  %v5681_v40 = vshll.u32 %v12010_v62, 16 }
 0x330   : > { %v12936_v38 = vpop.f32.mrb[16].mxu0  ;;  %v12015_v11 = vpack.c.bf16 %v5430_v35, %v5430_v35  ;;  %v12013_v48 = vpack.c.bf16 %v5428_v21, %v5428_v21  ;;  %v5431_v43 = vmax.f32 %v5399_v8, 0.0  ;;  %v5429_v15 = vmax.f32 %v5397_v39, 0.0  ;;  %v5976_v0 = vld [vmem:[#allocation3 + $0x60] sm:$0xf] }
 0x331   : > { %v5282_v54 = vpop.f32.mrb[17].mxu0  ;;  %v5697_v12 = vrot.slane %v5695_v45, 7  ;;  %v5680_v18 = vrot.slane %v5678_v27, 7  ;;  %v5402_v46 = vadd.f32 %v12936_v38, %v15928_v31  ;;  %v6041_v23 = vld [vmem:[#allocation3 + $0xc] sm:$0xf] }
 0x332   : > { %v5400_v14 = vadd.f32 %v15928_v31, %v5282_v54  ;;  %v12937_v41 = vpop.f32.mrb[18].mxu0  ;;  %v5721_v17 = vshrl.u32 %v12015_v11, 16  ;;  %v5724_v36 = vshll.u32 %v12015_v11, 16  ;;  %v5704_v3 = vshrl.u32 %v12013_v48, 16  ;;  %v5980_v52 = vld [vmem:[#allocation3 + $0x68] sm:$0x1] }
 0x333   : > { %v5707_v61 = vshll.u32 %v12013_v48, 16  ;;  %v5285_v56 = vpop.f32.mrb[19].mxu0  ;;  %v5700_v60 = vor.u32 %v5698_v33, %v5697_v12  ;;  %v5702_v59 = vrot.slane %v5697_v12, 4  ;;  %v5683_v7 = vor.u32 %v5681_v40, %v5680_v18  ;;  %v5973_v21 = vld [vmem:[#allocation3 + $0x5c] sm:$0x1] }
 0x334   : > { %v5685_v1 = vrot.slane %v5680_v18, 4  ;;  %v5723_v50 = vrot.slane %v5721_v17, 7  ;;  %v5706_v16 = vrot.slane %v5704_v3, 7  ;;  %v12016_v13 = vpack.c.bf16 %v5431_v43, %v5431_v43  ;;  %v6042_v40 = vld [vmem:[#allocation3 + $0x10] sm:$0xf] }
 0x335   : > { %v12014_v29 = vpack.c.bf16 %v5429_v15, %v5429_v15  ;;  %v5701_v37 = vsel %vm15944_vm12, %v5693_v28, %v5700_v60  ;;  %v5967_v10 = vsel %vm15950_vm13, %v5702_v59, %v5966_v63  ;;  %v5684_v44 = vsel %vm15944_vm12, %v5676_v30, %v5683_v7  ;;  %v5990_v3 = vld [vmem:[#allocation3 + $0x78] sm:$0xf] }
 0x336   : > { %v5960_v58 = vsel %vm15950_vm13, %v5685_v1, %v5959_v53  ;;  %5965 = vst [vmem:[#allocation3 + $0x4c] sm:$0xf] %v5701_v37  ;;  %5968 = vst [vmem:[#allocation3 + $0x50] sm:$0x1] %v5967_v10  ;;  %v5726_v25 = vor.u32 %v5724_v36, %v5723_v50  ;;  %v5727_v57 = vrot.slane %v5723_v50, 4  ;;  %v5709_v22 = vor.u32 %v5707_v61, %v5706_v16 }
 0x337   : > { %5958 = vst [vmem:[#allocation3 + $0x40] sm:$0xf] %v5684_v44  ;;  %5961 = vst [vmem:[#allocation3 + $0x44] sm:$0x1] %v5960_v58  ;;  %v5710_v32 = vrot.slane %v5706_v16, 4  ;;  %v5729_v51 = vshrl.u32 %v12016_v13, 16  ;;  %v5403_v8 = vadd.f32 %v12937_v41, %v15928_v31  ;;  %v5401_v39 = vadd.f32 %v15928_v31, %v5285_v56 }
 0x338   : > { %v5732_v28 = vshll.u32 %v12016_v13, 16  ;;  %v5712_v24 = vshrl.u32 %v12014_v29, 16  ;;  %v5715_v20 = vshll.u32 %v12014_v29, 16  ;;  %v16014_v47 = vpop.f32.mrb[20].mxu0  ;;  %v5977_v30 = vsel %vm15937_vm11, %v5726_v25, %v5976_v0  ;;  %v5983_v61 = vld [vmem:[#allocation3 + $0x6c] sm:$0xf] }
 0x339   : > { %v5970_v49 = vsel %vm15937_vm11, %v5709_v22, %v5969_v6  ;;  %v5434_v26 = vmax.f32 %v5402_v46, 0.0  ;;  %v5432_v34 = vmax.f32 %v5400_v14, 0.0  ;;  %v16020_v4 = vpop.f32.mrb[21].mxu0  ;;  %5978 = vst [vmem:[#allocation3 + $0x60] sm:$0xf] %v5977_v30  ;;  %v5731_v62 = vrot.slane %v5729_v51, 7 }
 0x33a   : > { %5971 = vst [vmem:[#allocation3 + $0x54] sm:$0xf] %v5970_v49  ;;  %v5714_v35 = vrot.slane %v5712_v24, 7  ;;  %v16024_v45 = vpop.f32.mrb[22].mxu0  ;;  %v6128_v38 = vshrl.u32 %v6041_v23, 16  ;;  %v6131_v63 = vshll.u32 %v6041_v23, 16 }
 0x33b   : > { %v12019_v33 = vpack.c.bf16 %v5434_v26, %v5434_v26  ;;  %v12017_v27 = vpack.c.bf16 %v5432_v34, %v5432_v34  ;;  %v16026_v11 = vpop.f32.mrb[23].mxu0  ;;  %v5734_v48 = vor.u32 %v5732_v28, %v5731_v62  ;;  %v5736_v43 = vrot.slane %v5731_v62, 4  ;;  %v6088_v1 = vld [vmem:[#allocation3 + $0x14] sm:$0x1]  ;;  %v6044_v30 = vld [vmem:[#allocation3 + $0x1c] sm:$0xf] }
 0x33c   : > { %v5717_v15 = vor.u32 %v5715_v20, %v5714_v35  ;;  %v5719_v54 = vrot.slane %v5714_v35, 4  ;;  %v5435_v59 = vmax.f32 %v5403_v8, 0.0  ;;  %v5433_v7 = vmax.f32 %v5401_v39, 0.0 }
 0x33d   : > { %v5755_v12 = vshrl.u32 %v12019_v33, 16  ;;  %v5758_v18 = vshll.u32 %v12019_v33, 16  ;;  %v5738_v53 = vshrl.u32 %v12017_v27, 16  ;;  %v5741_v46 = vshll.u32 %v12017_v27, 16  ;;  %v5994_v27 = vld [vmem:[#allocation3 + $0x80] sm:$0x1] }
 0x33e   : > { %v5735_v14 = vsel %vm15944_vm12, %v5727_v57, %v5734_v48  ;;  %v5981_v41 = vsel %vm15950_vm13, %v5736_v43, %v5980_v52  ;;  %v5718_v17 = vsel %vm15944_vm12, %v5710_v32, %v5717_v15  ;;  %v5974_v36 = vsel %vm15950_vm13, %v5719_v54, %v5973_v21  ;;  %v6043_v32 = vld [vmem:[#allocation3 + $0x18] sm:$0xf]  ;;  %v5987_v48 = vld [vmem:[#allocation3 + $0x74] sm:$0x1] }
 0x33f   : > { %5979 = vst [vmem:[#allocation3 + $0x64] sm:$0xf] %v5735_v14  ;;  %5982 = vst [vmem:[#allocation3 + $0x68] sm:$0x1] %v5981_v41  ;;  %v5757_v56 = vrot.slane %v5755_v12, 7  ;;  %v5740_v60 = vrot.slane %v5738_v53, 7  ;;  %v12020_v6 = vpack.c.bf16 %v5435_v59, %v5435_v59  ;;  %v12018_v25 = vpack.c.bf16 %v5433_v7, %v5433_v7 }
 0x340   : > { %5972 = vst [vmem:[#allocation3 + $0x58] sm:$0xf] %v5718_v17  ;;  %5975 = vst [vmem:[#allocation3 + $0x5c] sm:$0x1] %v5974_v36  ;;  %v6130_v50 = vrot.slane %v6128_v38, 4  ;;  %v6133_v16 = vrot.slane %v6131_v63, 5 }
 0x341   : > { %v6137_v13 = vshll.u32 %v6042_v40, 16  ;;  %v6141_v29 = vshrl.u32 %v6042_v40, 16  ;;  %v16036_v37 = vpop.f32.mrb[24].mxu0  ;;  %v5760_v10 = vor.u32 %v5758_v18, %v5757_v56  ;;  %v5761_v44 = vrot.slane %v5757_v56, 4  ;;  %v6089_v41 = vld [vmem:[#allocation3 + $0x20] sm:$0x1] }
 0x342   : > { %v5743_v58 = vor.u32 %v5741_v46, %v5740_v60  ;;  %v16038_v0 = vpop.f32.mrb[25].mxu0  ;;  %v6134_v57 = vor.u32 %v6133_v16, %v6130_v50  ;;  %v6147_v20 = vshll.u32 %v6088_v1, 16  ;;  %v5744_v52 = vrot.slane %v5740_v60, 4  ;;  %v6045_v60 = vld [vmem:[#allocation3 + $0x24] sm:$0xf] }
 0x343   : > { %v6139_v22 = vrot.slane %v6137_v13, 5  ;;  %v16040_v23 = vpop.f32.mrb[26].mxu0  ;;  %v5991_v51 = vsel %vm15937_vm11, %v5760_v10, %v5990_v3  ;;  %v6143_v24 = vrot.slane %v6141_v29, 4  ;;  %v5763_v26 = vshrl.u32 %v12020_v6, 16 }
 0x344   : > { %v5984_v28 = vsel %vm15937_vm11, %v5743_v58, %v5983_v61  ;;  %v16046_v49 = vpop.f32.mrb[27].mxu0  ;;  %5992 = vst [vmem:[#allocation3 + $0x78] sm:$0xf] %v5991_v51  ;;  %v5766_v34 = vshll.u32 %v12020_v6, 16  ;;  %v5746_v62 = vshrl.u32 %v12018_v25, 16  ;;  %v5749_v35 = vshll.u32 %v12018_v25, 16 }
 0x345   : > { %5985 = vst [vmem:[#allocation3 + $0x6c] sm:$0xf] %v5984_v28  ;;  %v6135_v21 = vrot.slane %v6134_v57, 4  ;;  %v6144_v8 = vor.u32 %v6143_v24, %v6139_v22  ;;  %v6149_v39 = vrot.slane %v6147_v20, 5  ;;  %v5765_v33 = vrot.slane %v5763_v26, 7 }
 0x346   : > { %v5748_v40 = vrot.slane %v5746_v62, 7  ;;  %v6152_v38 = vshrl.u32 %v6043_v32, 16  ;;  %v6155_v63 = vshll.u32 %v6043_v32, 16  ;;  %v6161_v54 = vshll.u32 %v6044_v30, 16  ;;  %v6046_v28 = vld [vmem:[#allocation3 + $0x28] sm:$0xf] }
 0x347   : > { %v6140_v43 = vsel %vm14328_vm2, %v6135_v21, %v6139_v22  ;;  %v6145_v15 = vrot.slane %v6144_v8, 4  ;;  %v6165_v12 = vshrl.u32 %v6044_v30, 16  ;;  %v5768_v18 = vor.u32 %v5766_v34, %v5765_v33  ;;  %v16050_v17 = vpop.f32.mrb[28].mxu0 }
 0x348   : > { %v5770_v53 = vrot.slane %v5765_v33, 4  ;;  %v5751_v46 = vor.u32 %v5749_v35, %v5748_v40  ;;  %v5753_v14 = vrot.slane %v5748_v40, 4  ;;  %v6154_v3 = vrot.slane %v6152_v38, 4  ;;  %v16054_v59 = vpop.f32.mrb[29].mxu0 }
 0x349   : > { %v6150_v36 = vsel %vm14328_vm2, %v6145_v15, %v6149_v39  ;;  %v6157_v61 = vrot.slane %v6155_v63, 5  ;;  %v6163_v56 = vrot.slane %v6161_v54, 5  ;;  %v5769_v7 = vsel %vm15944_vm12, %v5761_v44, %v5768_v18  ;;  %v16064_v13 = vpop.f32.mrb[30].mxu0  ;;  %v14033_v44 = vld [vmem:[%s17742_s3 + $0x8] sm:$0xff]  }
 0x34a   : > { %v5995_v1 = vsel %vm15950_vm13, %v5770_v53, %v5994_v27  ;;  %v5752_v50 = vsel %vm15944_vm12, %v5744_v52, %v5751_v46  ;;  %v5988_v16 = vsel %vm15950_vm13, %v5753_v14, %v5987_v48  ;;  %5993 = vst [vmem:[#allocation3 + $0x7c] sm:$0xf] %v5769_v7  ;;  %v11536_v29 = vcombine.low %v6140_v43, %v6150_v36  ;;  %v16069_v25 = vpop.f32.mrb[31].mxu0  ;;  %v5997_v53 = vld [vmem:[#allocation3 + $0x84] sm:$0xf] }
 0x34b   : > { %5996 = vst [vmem:[#allocation3 + $0x80] sm:$0x1] %v5995_v1  ;;  %5986 = vst [vmem:[#allocation3 + $0x70] sm:$0xf] %v5752_v50  ;;  %v6158_v10 = vor.u32 %v6157_v61, %v6154_v3  ;;  %v6167_v58 = vrot.slane %v6165_v12, 4  ;;  %v6171_v6 = vshll.u32 %v6089_v41, 16  ;;  %v5406_v57 = vadd.f32 %v16014_v47, %v15928_v31 }
 0x34c   : > { %5989 = vst [vmem:[#allocation3 + $0x74] sm:$0x1] %v5988_v16  ;;  %v5404_v22 = vadd.f32 %v15928_v31, %v16020_v4  ;;  %v5407_v32 = vadd.f32 %v16024_v45, %v15928_v31  ;;  %v5405_v51 = vadd.f32 %v15928_v31, %v16026_v11  ;;  %12967 = vmatmul.mubr.bf16.vlgmr.msra.gmra.mrb[0].mxu1 %v11536_v29  ;;  %v6176_v52 = vshrl.u32 %v6045_v60, 16  ;;  %v14034_v11 = vld [vmem:[%s17742_s3 + $0x10] sm:$0xff]   ;;  %v6004_v12 = vld [vmem:[#allocation3 + $0x90] sm:$0xf] }
 0x34d   : > { %v6159_v24 = vrot.slane %v6158_v10, 4  ;;  %v6168_v20 = vor.u32 %v6167_v58, %v6163_v56  ;;  %v6173_v30 = vrot.slane %v6171_v6, 5  ;;  %12999 = vmatpush3.bf16.msra.mxu1 %v15922_v55  ;;  %v5438_v26 = vmax.f32 %v5406_v57, 0.0  ;;  %v14035_v36 = vld [vmem:[%s17742_s3 + $0x18] sm:$0xff]   ;;  %v6001_v7 = vld [vmem:[#allocation3 + $0x8c] sm:$0x1] }
 0x34e   : > { %v5436_v34 = vmax.f32 %v5404_v22, 0.0  ;;  %v5439_v47 = vmax.f32 %v5407_v32, 0.0  ;;  %v5437_v62 = vmax.f32 %v5405_v51, 0.0  ;;  %v6178_v45 = vrot.slane %v6176_v52, 4  ;;  %13000 = vmatprep.subr.bf16.mxu1 %v14033_v44  ;;  %v14036_v58 = vld [vmem:[%s17742_s3 + $0x20] sm:$0xff]  }
 0x34f   : > { %v6164_v4 = vsel %vm14328_vm2, %v6159_v24, %v6163_v56  ;;  %v6169_v35 = vrot.slane %v6168_v20, 4  ;;  %v6179_v21 = vshll.u32 %v6045_v60, 16  ;;  %v12023_v8 = vpack.c.bf16 %v5438_v26, %v5438_v26  ;;  %v6008_v56 = vld [vmem:[#allocation3 + $0x98] sm:$0x1]  ;;  %v6090_v20 = vld [vmem:[#allocation3 + $0x2c] sm:$0x1] }
 0x350   : > { %v12021_v39 = vpack.c.bf16 %v5436_v34, %v5436_v34  ;;  %v12024_v33 = vpack.c.bf16 %v5439_v47, %v5439_v47  ;;  %v12022_v27 = vpack.c.bf16 %v5437_v62, %v5437_v62  ;;  %v6185_v38 = vshll.u32 %v6046_v28, 16  ;;  %v16099_v62 = vld [vmem:[#allocation3 + $0x34] sm:$0xf] }
 0x351   : > { %v6174_v55 = vsel %vm14328_vm2, %v6169_v35, %v6173_v30  ;;  %v6181_v40 = vrot.slane %v6179_v21, 5  ;;  %v6189_v63 = vshrl.u32 %v6046_v28, 16  ;;  %v5789_v43 = vshrl.u32 %v12023_v8, 16  ;;  %13001 = vmatpush3.bf16.msra.mxu1 %v14033_v44  ;;  %v16093_v30 = vld [vmem:[#allocation3 + $0x30] sm:$0xf] }
 0x352   : > { %v11537_v48 = vcombine.low %v6164_v4, %v6174_v55  ;;  %v5792_v15 = vshll.u32 %v12023_v8, 16  ;;  %v5772_v54 = vshrl.u32 %v12021_v39, 16  ;;  %v5775_v18 = vshll.u32 %v12021_v39, 16  ;;  %13002 = vmatprep.subr.bf16.mxu1 %v14034_v11  ;;  %v6091_v4 = vld [vmem:[#allocation3 + $0x38] sm:$0x1] }
 0x353   : > { %v5797_v46 = vshrl.u32 %v12024_v33, 16  ;;  %v5800_v14 = vshll.u32 %v12024_v33, 16  ;;  %v5780_v41 = vshrl.u32 %v12022_v27, 16  ;;  %v5791_v3 = vrot.slane %v5789_v43, 7 }
 0x354   : > { %12970 = vmatprep.mubr.bf16.mxu1 %v11537_v48  ;;  %v5774_v61 = vrot.slane %v5772_v54, 7  ;;  %v5783_v60 = vshll.u32 %v12022_v27, 16  ;;  %v6182_v1 = vor.u32 %v6181_v40, %v6178_v45  ;;  %v6187_v29 = vrot.slane %v6185_v38, 5  ;;  %v14037_v48 = vld [vmem:[%s17742_s3 + $0x28] sm:$0xff]  }
 0x355   : > { %v5799_v50 = vrot.slane %v5797_v46, 7  ;;  %v5782_v16 = vrot.slane %v5780_v41, 7  ;;  %v6191_v10 = vrot.slane %v6189_v63, 4  ;;  %v5794_v6 = vor.u32 %v5792_v15, %v5791_v3  ;;  %13003 = vmatpush3.bf16.msra.mxu1 %v14034_v11  ;;  %v16122_v41 = vld [vmem:[#allocation3 + $0x3c] sm:$0xf] }
 0x356   : > { %v5795_v44 = vrot.slane %v5791_v3, 4  ;;  %v5777_v57 = vor.u32 %v5775_v18, %v5774_v61  ;;  %v5778_v22 = vrot.slane %v5774_v61, 4  ;;  %13004 = vmatprep.subr.bf16.mxu1 %v14035_v36  ;;  %v6183_v34 = vrot.slane %v6182_v1, 4  ;;  %v14038_v1 = vld [vmem:[%s17742_s3 + $0x30] sm:$0xff]  }
 0x357   : > { %v5802_v32 = vor.u32 %v5800_v14, %v5799_v50  ;;  %v5804_v51 = vrot.slane %v5799_v50, 4  ;;  %v5785_v28 = vor.u32 %v5783_v60, %v5782_v16  ;;  %v5787_v24 = vrot.slane %v5782_v16, 4 }
 0x358   : > { %v6005_v52 = vsel %vm15937_vm11, %v5794_v6, %v6004_v12  ;;  %v5998_v26 = vsel %vm15937_vm11, %v5777_v57, %v5997_v53  ;;  %v6192_v47 = vor.u32 %v6191_v10, %v6187_v29  ;;  %v6188_v8 = vsel %vm14328_vm2, %v6183_v34, %v6187_v29  ;;  %v14039_v34 = vld [vmem:[%s17742_s3 + $0x38] sm:$0xff]  }
 0x359   : > { %6006 = vst [vmem:[#allocation3 + $0x90] sm:$0xf] %v6005_v52  ;;  %5999 = vst [vmem:[#allocation3 + $0x84] sm:$0xf] %v5998_v26  ;;  %v5803_v35 = vsel %vm15944_vm12, %v5795_v44, %v5802_v32  ;;  %v6009_v45 = vsel %vm15950_vm13, %v5804_v51, %v6008_v56  ;;  %v5786_v21 = vsel %vm15944_vm12, %v5778_v22, %v5785_v28  ;;  %v6195_v33 = vshll.u32 %v6090_v20, 16 }
 0x35a   : > { %v6002_v11 = vsel %vm15950_vm13, %v5787_v24, %v6001_v7  ;;  %6007 = vst [vmem:[#allocation3 + $0x94] sm:$0xf] %v5803_v35  ;;  %6010 = vst [vmem:[#allocation3 + $0x98] sm:$0x1] %v6009_v45  ;;  %v6193_v39 = vrot.slane %v6192_v47, 4  ;;  %v6200_v27 = vshrl.u32 %v16093_v30, 16  ;;  %13005 = vmatpush3.bf16.msra.mxu1 %v14035_v36  ;;  %v5410_v54 = vadd.f32 %v16036_v37, %v15928_v31 }
 0x35b   : > { %6000 = vst [vmem:[#allocation3 + $0x88] sm:$0xf] %v5786_v21  ;;  %6003 = vst [vmem:[#allocation3 + $0x8c] sm:$0x1] %v6002_v11  ;;  %v6203_v55 = vshll.u32 %v16093_v30, 16  ;;  %v6209_v40 = vshll.u32 %v16099_v62, 16  ;;  %13006 = vmatprep.subr.bf16.mxu1 %v14036_v58  ;;  %v5408_v12 = vadd.f32 %v15928_v31, %v16038_v0  ;;  %v5411_v56 = vadd.f32 %v16040_v23, %v15928_v31 }
 0x35c   : > { %v6213_v38 = vshrl.u32 %v16099_v62, 16  ;;  %v6219_v63 = vshll.u32 %v6091_v4, 16  ;;  %v6197_v43 = vrot.slane %v6195_v33, 5  ;;  %v6202_v15 = vrot.slane %v6200_v27, 4  ;;  %v6018_v28 = vld [vmem:[#allocation3 + $0xa8] sm:$0xf] }
 0x35d   : > { %v6205_v18 = vrot.slane %v6203_v55, 5  ;;  %v6211_v53 = vrot.slane %v6209_v40, 5  ;;  %v5442_v3 = vmax.f32 %v5410_v54, 0.0  ;;  %v5440_v61 = vmax.f32 %v5408_v12, 0.0  ;;  %v6011_v24 = vld [vmem:[#allocation3 + $0x9c] sm:$0xf] }
 0x35e   : > { %v6215_v46 = vrot.slane %v6213_v38, 4  ;;  %v6221_v14 = vrot.slane %v6219_v63, 5  ;;  %v6198_v36 = vsel %vm14328_vm2, %v6193_v39, %v6197_v43  ;;  %13007 = vmatpush3.bf16.msra.mxu1 %v14036_v58  ;;  %v5409_v0 = vadd.f32 %v15928_v31, %v16046_v49  ;;  %v16139_v26 = vld [vmem:[#allocation3 + $0x40] sm:$0xf]  ;;  %v6092_v45 = vld [vmem:[#allocation3 + $0x44] sm:$0x1] }
 0x35f   : > { %v11538_v60 = vcombine.low %v6188_v8, %v6198_v36  ;;  %v6206_v37 = vor.u32 %v6205_v18, %v6202_v15  ;;  %13008 = vmatprep.subr.bf16.mxu1 %v14037_v48  ;;  %v12027_v50 = vpack.c.bf16 %v5442_v3, %v5442_v3  ;;  %v12025_v16 = vpack.c.bf16 %v5440_v61, %v5440_v61  ;;  %v6022_v63 = vld [vmem:[#allocation3 + $0xb0] sm:$0x1]  ;;  %v16148_v12 = vld [vmem:[%s17742_s3 + $0x80] sm:$0xff]  }
 0x360   : > { %v6216_v7 = vor.u32 %v6215_v46, %v6211_v53  ;;  %v5443_v29 = vmax.f32 %v5411_v56, 0.0  ;;  %v6224_v10 = vshrl.u32 %v16122_v41, 16  ;;  %v5441_v58 = vmax.f32 %v5409_v0, 0.0  ;;  %v6015_v46 = vld [vmem:[#allocation3 + $0xa4] sm:$0x1] }
 0x361   : > { %12971 = vmatmul.mubr.bf16.gmra.mrb[4].mxu1 %v11538_v60  ;;  %v6207_v6 = vrot.slane %v6206_v37, 4  ;;  %v6227_v44 = vshll.u32 %v16122_v41, 16  ;;  %v5823_v57 = vshrl.u32 %v12027_v50, 16  ;;  %v5826_v22 = vshll.u32 %v12027_v50, 16  ;;  %v16155_v37 = vld [vmem:[#allocation3 + $0x48] sm:$0xf] }
 0x362   : > { %v6217_v23 = vrot.slane %v6216_v7, 4  ;;  %v5806_v32 = vshrl.u32 %v12025_v16, 16  ;;  %v5809_v31 = vshll.u32 %v12025_v16, 16  ;;  %13009 = vmatpush3.bf16.msra.mxu1 %v14037_v48  ;;  %v12028_v20 = vpack.c.bf16 %v5443_v29, %v5443_v29  ;;  %v16157_v7 = vld [vmem:[#allocation3 + $0x4c] sm:$0xf] }
 0x363   : > { %v6212_v49 = vsel %vm14328_vm2, %v6207_v6, %v6211_v53  ;;  %v12026_v52 = vpack.c.bf16 %v5441_v58, %v5441_v58  ;;  %13010 = vmatprep.subr.bf16.mxu1 %v14038_v1  ;;  %v5825_v4 = vrot.slane %v5823_v57, 7  ;;  %v6226_v21 = vrot.slane %v6224_v10, 4  ;;  %v16159_v29 = vld [vmem:[#allocation3 + $0x50] sm:$0x1] }
 0x364   : > { %v6222_v51 = vsel %vm14328_vm2, %v6217_v23, %v6221_v14  ;;  %v5808_v35 = vrot.slane %v5806_v32, 7  ;;  %v5831_v11 = vshrl.u32 %v12028_v20, 16  ;;  %v5834_v8 = vshll.u32 %v12028_v20, 16 }
 0x365   : > { %v11539_v47 = vcombine.low %v6212_v49, %v6222_v51  ;;  %v5814_v39 = vshrl.u32 %v12026_v52, 16  ;;  %v5817_v33 = vshll.u32 %v12026_v52, 16  ;;  %v5828_v27 = vor.u32 %v5826_v22, %v5825_v4 }
 0x366   : > { %v5829_v55 = vrot.slane %v5825_v4, 4  ;;  %v5811_v40 = vor.u32 %v5809_v31, %v5808_v35  ;;  %v5812_v38 = vrot.slane %v5808_v35, 4  ;;  %13011 = vmatpush3.bf16.msra.mxu1 %v14038_v1  ;;  %v5833_v48 = vrot.slane %v5831_v11, 7  ;;  %v16181_v11 = vld [vmem:[#allocation3 + $0x54] sm:$0xf] }
 0x367   : > { %12974 = vmatprep.mubr.bf16.mxu1 %v11539_v47  ;;  %v5816_v43 = vrot.slane %v5814_v39, 7  ;;  %v6229_v15 = vrot.slane %v6227_v44, 5  ;;  %v6233_v54 = vshll.u32 %v16139_v26, 16  ;;  %13012 = vmatprep.subr.bf16.mxu1 %v14039_v34  ;;  %v6019_v18 = vsel %vm15937_vm11, %v5828_v27, %v6018_v28  ;;  %v14163_v28 = vld [vmem:[%s17741_s2] ss:$0 sm:$0xff] }
 0x368   : > { %v6012_v53 = vsel %vm15937_vm11, %v5811_v40, %v6011_v24  ;;  %v6237_v14 = vshrl.u32 %v16139_v26, 16  ;;  %v6243_v36 = vshll.u32 %v6092_v45, 16  ;;  %6020 = vst [vmem:[#allocation3 + $0xa8] sm:$0xf] %v6019_v18  ;;  %v5836_v3 = vor.u32 %v5834_v8, %v5833_v48 }
 0x369   : > { %6013 = vst [vmem:[#allocation3 + $0x9c] sm:$0xf] %v6012_v53  ;;  %v5838_v61 = vrot.slane %v5833_v48, 4  ;;  %v5819_v56 = vor.u32 %v5817_v33, %v5816_v43  ;;  %v5821_v60 = vrot.slane %v5816_v43, 4  ;;  %v6230_v0 = vor.u32 %v6229_v15, %v6226_v21 }
 0x36a   : > { %v6235_v1 = vrot.slane %v6233_v54, 5  ;;  %v6239_v50 = vrot.slane %v6237_v14, 4  ;;  %v6245_v16 = vrot.slane %v6243_v36, 5  ;;  %13013 = vmatpush3.bf16.msra.mxu1 %v14039_v34  ;;  %v5837_v10 = vsel %vm15944_vm12, %v5829_v55, %v5836_v3  ;;  %v6032_v14 = vld [vmem:[#allocation3 + $0xc0] sm:$0xf] }
 0x36b   : > { %v6023_v6 = vsel %vm15950_vm13, %v5838_v61, %v6022_v63  ;;  %v5820_v23 = vsel %vm15944_vm12, %v5812_v38, %v5819_v56  ;;  %v6016_v58 = vsel %vm15950_vm13, %v5821_v60, %v6015_v46  ;;  %13046 = vmatprep.subr.bf16.mxu1 %v16148_v12  ;;  %6021 = vst [vmem:[#allocation3 + $0xac] sm:$0xf] %v5837_v10  ;;  %v6231_v44 = vrot.slane %v6230_v0, 4  ;;  %v16193_v60 = vld [vmem:[#allocation3 + $0x58] sm:$0xf] }
 0x36c   : > { %6024 = vst [vmem:[#allocation3 + $0xb0] sm:$0x1] %v6023_v6  ;;  %6014 = vst [vmem:[#allocation3 + $0xa0] sm:$0xf] %v5820_v23  ;;  %v6240_v57 = vor.u32 %v6239_v50, %v6235_v1  ;;  %v6248_v22 = vshrl.u32 %v16155_v37, 16  ;;  %v6251_v32 = vshll.u32 %v16155_v37, 16  ;;  %v5414_v24 = vadd.f32 %v14163_v28, %v16050_v17 }
 0x36d   : > { %6017 = vst [vmem:[#allocation3 + $0xa4] sm:$0x1] %v6016_v58  ;;  %v6257_v31 = vshll.u32 %v16157_v7, 16  ;;  %v6261_v49 = vshrl.u32 %v16157_v7, 16  ;;  %v6267_v51 = vshll.u32 %v16159_v29, 16  ;;  %v6236_v20 = vsel %vm14328_vm2, %v6231_v44, %v6235_v1 }
 0x36e   : > { %v6241_v52 = vrot.slane %v6240_v57, 4  ;;  %v6250_v34 = vrot.slane %v6248_v22, 4  ;;  %v6253_v47 = vrot.slane %v6251_v32, 5  ;;  %v5446_v21 = vmax.f32 %v5414_v24, 0.0  ;;  %v6025_v22 = vld [vmem:[#allocation3 + $0xb4] sm:$0xf] }
 0x36f   : > { %v6259_v4 = vrot.slane %v6257_v31, 5  ;;  %v6263_v35 = vrot.slane %v6261_v49, 4  ;;  %v6269_v45 = vrot.slane %v6267_v51, 5  ;;  %v5412_v33 = vadd.f32 %v14163_v28, %v16054_v59 }
 0x370   : > { %v6246_v8 = vsel %vm14328_vm2, %v6241_v52, %v6245_v16  ;;  %v6254_v39 = vor.u32 %v6253_v47, %v6250_v34  ;;  %v5415_v17 = vadd.f32 %v14163_v28, %v16064_v13  ;;  %v12031_v40 = vpack.c.bf16 %v5446_v21, %v5446_v21  ;;  %v16200_v21 = vld [vmem:[#allocation3 + $0x5c] sm:$0x1] }
 0x371   : > { %v11540_v27 = vcombine.low %v6236_v20, %v6246_v8  ;;  %v6264_v55 = vor.u32 %v6263_v35, %v6259_v4  ;;  %v5413_v38 = vadd.f32 %v14163_v28, %v16069_v25  ;;  %v5444_v48 = vmax.f32 %v5412_v33, 0.0  ;;  %v6036_v28 = vld [vmem:[#allocation3 + $0xc8] sm:$0x1] }
 0x372   : > { %v6255_v63 = vrot.slane %v6254_v39, 4  ;;  %v5447_v43 = vmax.f32 %v5415_v17, 0.0  ;;  %v6272_v15 = vshrl.u32 %v16181_v11, 16  ;;  %v5857_v18 = vshrl.u32 %v12031_v40, 16 }
 0x373   : > { %12975 = vmatmul.mubr.bf16.gmra.mrb[8].mxu1 %v11540_v27  ;;  %v6265_v54 = vrot.slane %v6264_v55, 4  ;;  %v5860_v53 = vshll.u32 %v12031_v40, 16  ;;  %v5445_v46 = vmax.f32 %v5413_v38, 0.0  ;;  %v12029_v13 = vpack.c.bf16 %v5444_v48, %v5444_v48  ;;  %v16202_v27 = vld [vmem:[#allocation3 + $0x60] sm:$0xf] }
 0x374   : > { %v6260_v59 = vsel %vm14328_vm2, %v6255_v63, %v6259_v4  ;;  %v12032_v36 = vpack.c.bf16 %v5447_v43, %v5447_v43  ;;  %v6274_v3 = vrot.slane %v6272_v15, 4  ;;  %v5859_v61 = vrot.slane %v5857_v18, 7  ;;  %v16204_v55 = vld [vmem:[#allocation3 + $0x64] sm:$0xf]  ;;  %v16212_v43 = vld [vmem:[#allocation3 + $0x68] sm:$0x1] }
 0x375   : > { %v6270_v25 = vsel %vm14328_vm2, %v6265_v54, %v6269_v45  ;;  %v12030_v56 = vpack.c.bf16 %v5445_v46, %v5445_v46  ;;  %v6275_v0 = vshll.u32 %v16181_v11, 16  ;;  %v5840_v50 = vshrl.u32 %v12029_v13, 16  ;;  %v6029_v45 = vld [vmem:[#allocation3 + $0xbc] sm:$0x1] }
 0x376   : > { %v11541_v1 = vcombine.low %v6260_v59, %v6270_v25  ;;  %v5843_v16 = vshll.u32 %v12029_v13, 16  ;;  %v5865_v10 = vshrl.u32 %v12032_v36, 16  ;;  %v5862_v6 = vor.u32 %v5860_v53, %v5859_v61  ;;  %v16219_v53 = vld [vmem:[#allocation3 + $0x6c] sm:$0xf] }
 0x377   : > { %v5863_v23 = vrot.slane %v5859_v61, 4  ;;  %v5868_v58 = vshll.u32 %v12032_v36, 16  ;;  %v5848_v44 = vshrl.u32 %v12030_v56, 16  ;;  %v5842_v57 = vrot.slane %v5840_v50, 7  ;;  %v16224_v36 = vld [vmem:[#allocation3 + $0x70] sm:$0xf] }
 0x378   : > { %12978 = vmatprep.mubr.bf16.mxu1 %v11541_v1  ;;  %v5867_v32 = vrot.slane %v5865_v10, 7  ;;  %v5851_v31 = vshll.u32 %v12030_v56, 16  ;;  %v6277_v49 = vrot.slane %v6275_v0, 5  ;;  %v6033_v51 = vsel %vm15937_vm11, %v5862_v6, %v6032_v14  ;;  %v16230_v50 = vld [vmem:[#allocation3 + $0x74] sm:$0x1] }
 0x379   : > { %v5850_v24 = vrot.slane %v5848_v44, 7  ;;  %v6281_v20 = vshll.u32 %v16193_v60, 16  ;;  %v6285_v52 = vshrl.u32 %v16193_v60, 16  ;;  %6034 = vst [vmem:[#allocation3 + $0xc0] sm:$0xf] %v6033_v51  ;;  %v5845_v34 = vor.u32 %v5843_v16, %v5842_v57 }
 0x37a   : > { %v5846_v47 = vrot.slane %v5842_v57, 4  ;;  %v5870_v4 = vor.u32 %v5868_v58, %v5867_v32  ;;  %v5872_v35 = vrot.slane %v5867_v32, 4  ;;  %v6278_v33 = vor.u32 %v6277_v49, %v6274_v3  ;;  %v16232_v16 = vld [vmem:[#allocation3 + $0x78] sm:$0xf] }
 0x37b   : > { %v5853_v8 = vor.u32 %v5851_v31, %v5850_v24  ;;  %v5855_v39 = vrot.slane %v5850_v24, 4  ;;  %v6283_v17 = vrot.slane %v6281_v20, 5  ;;  %v6026_v40 = vsel %vm15937_vm11, %v5845_v34, %v6025_v22  ;;  %v16240_v31 = vld [vmem:[#allocation3 + $0x7c] sm:$0xf] }
 0x37c   : > { %v5871_v38 = vsel %vm15944_vm12, %v5863_v23, %v5870_v4  ;;  %v6037_v63 = vsel %vm15950_vm13, %v5872_v35, %v6036_v28  ;;  %v6287_v48 = vrot.slane %v6285_v52, 4  ;;  %6027 = vst [vmem:[#allocation3 + $0xb4] sm:$0xf] %v6026_v40  ;;  %v6279_v2 = vrot.slane %v6278_v33, 4 }
 0x37d   : > { %6035 = vst [vmem:[#allocation3 + $0xc4] sm:$0xf] %v5871_v38  ;;  %6038 = vst [vmem:[#allocation3 + $0xc8] sm:$0x1] %v6037_v63  ;;  %v5854_v15 = vsel %vm15944_vm12, %v5846_v47, %v5853_v8  ;;  %v6030_v54 = vsel %vm15950_vm13, %v5855_v39, %v6029_v45  ;;  %v6291_v18 = vshll.u32 %v16200_v21, 16  ;;  %v6296_v59 = vshrl.u32 %v16202_v27, 16 }
 0x37e   : > { %6028 = vst [vmem:[#allocation3 + $0xb8] sm:$0xf] %v5854_v15  ;;  %6031 = vst [vmem:[#allocation3 + $0xbc] sm:$0x1] %v6030_v54  ;;  %v6288_v46 = vor.u32 %v6287_v48, %v6283_v17  ;;  %v6299_v14 = vshll.u32 %v16202_v27, 16  ;;  %v6305_v13 = vshll.u32 %v16204_v55, 16  ;;  %v6284_v19 = vsel %vm14328_vm2, %v6279_v2, %v6283_v17 }
 0x37f   : > { %v6293_v9 = vrot.slane %v6291_v18, 5  ;;  %v6309_v3 = vshrl.u32 %v16204_v55, 16  ;;  %v6315_v25 = vshll.u32 %v16212_v43, 16  ;;  %v6298_v56 = vrot.slane %v6296_v59, 4  ;;  %v16243_v45 = vld [vmem:[#allocation3 + $0x80] sm:$0x1] }
 0x380   : > { %v6289_v61 = vrot.slane %v6288_v46, 4  ;;  %v6301_v0 = vrot.slane %v6299_v14, 5  ;;  %v6307_v1 = vrot.slane %v6305_v13, 5  ;;  %v6320_v23 = vshrl.u32 %v16219_v53, 16  ;;  %v16250_v63 = vld [vmem:[#allocation3 + $0x84] sm:$0xf] }
 0x381   : > { %v6311_v10 = vrot.slane %v6309_v3, 4  ;;  %v6317_v6 = vrot.slane %v6315_v25, 5  ;;  %v6323_v58 = vshll.u32 %v16219_v53, 16  ;;  %v6329_v22 = vshll.u32 %v16224_v36, 16  ;;  %v16252_v48 = vld [vmem:[#allocation3 + $0x88] sm:$0xf] }
 0x382   : > { %v6294_v44 = vsel %vm14328_vm2, %v6289_v61, %v6293_v9  ;;  %v6302_v57 = vor.u32 %v6301_v0, %v6298_v56  ;;  %v6333_v32 = vshrl.u32 %v16224_v36, 16  ;;  %v6322_v28 = vrot.slane %v6320_v23, 4  ;;  %v16261_v61 = vld [vmem:[#allocation3 + $0x90] sm:$0xf] }
 0x383   : > { %v11542_v49 = vcombine.low %v6284_v19, %v6294_v44  ;;  %v6312_v51 = vor.u32 %v6311_v10, %v6307_v1  ;;  %v6325_v24 = vrot.slane %v6323_v58, 5  ;;  %v6331_v52 = vrot.slane %v6329_v22, 5  ;;  %v16269_v22 = vld [vmem:[#allocation3 + $0x94] sm:$0xf] }
 0x384   : > { %v6303_v20 = vrot.slane %v6302_v57, 4  ;;  %v6335_v34 = vrot.slane %v6333_v32, 4  ;;  %v6339_v47 = vshll.u32 %v16230_v50, 16  ;;  %v6344_v8 = vshrl.u32 %v16232_v16, 16 }
 0x385   : > { %12979 = vmatmul.mubr.bf16.gmra.mrb[12].mxu1 %v11542_v49  ;;  %v6313_v4 = vrot.slane %v6312_v51, 4  ;;  %v6326_v35 = vor.u32 %v6325_v24, %v6322_v28  ;;  %v6347_v39 = vshll.u32 %v16232_v16, 16  ;;  %v6353_v38 = vshll.u32 %v16240_v31, 16 }
 0x386   : > { %v6308_v33 = vsel %vm14328_vm2, %v6303_v20, %v6307_v1  ;;  %v6336_v17 = vor.u32 %v6335_v34, %v6331_v52  ;;  %v6341_v40 = vrot.slane %v6339_v47, 5  ;;  %v6346_v2 = vrot.slane %v6344_v8, 4  ;;  %v16265_v1 = vld [vmem:[#allocation3 + $0x8c] sm:$0x1]  ;;  %v16277_v8 = vld [vmem:[#allocation3 + $0x98] sm:$0x1] }
 0x387   : > { %v6318_v15 = vsel %vm14328_vm2, %v6313_v4, %v6317_v6  ;;  %v6327_v54 = vrot.slane %v6326_v35, 4  ;;  %v6349_v18 = vrot.slane %v6347_v39, 5  ;;  %v6355_v14 = vrot.slane %v6353_v38, 5 }
 0x388   : > { %v11543_v46 = vcombine.low %v6308_v33, %v6318_v15  ;;  %v6337_v59 = vrot.slane %v6336_v17, 4  ;;  %v6357_v13 = vshrl.u32 %v16240_v31, 16  ;;  %v6363_v3 = vshll.u32 %v16243_v45, 16  ;;  %v16281_v15 = vld [vmem:[#allocation3 + $0x9c] sm:$0xf] }
 0x389   : > { %v6332_v19 = vsel %vm14328_vm2, %v6327_v54, %v6331_v52  ;;  %v6350_v9 = vor.u32 %v6349_v18, %v6346_v2  ;;  %v6368_v25 = vshrl.u32 %v16250_v63, 16  ;;  %v6371_v10 = vshll.u32 %v16250_v63, 16 }
 0x38a   : > { %12982 = vmatprep.mubr.bf16.mxu1 %v11543_v46  ;;  %v6342_v56 = vsel %vm14328_vm2, %v6337_v59, %v6341_v40  ;;  %v6359_v0 = vrot.slane %v6357_v13, 4  ;;  %v6377_v6 = vshll.u32 %v16252_v48, 16  ;;  %v6365_v44 = vrot.slane %v6363_v3, 5  ;;  %v16285_v59 = vld [vmem:[#allocation3 + $0xa0] sm:$0xf] }
 0x38b   : > { %v11544_v23 = vcombine.low %v6332_v19, %v6342_v56  ;;  %v6351_v58 = vrot.slane %v6350_v9, 4  ;;  %v6370_v57 = vrot.slane %v6368_v25, 4  ;;  %v6373_v49 = vrot.slane %v6371_v10, 5  ;;  %v16288_v3 = vld [vmem:[#allocation3 + $0xa8] sm:$0xf] }
 0x38c   : > { %v6360_v32 = vor.u32 %v6359_v0, %v6355_v14  ;;  %v6379_v51 = vrot.slane %v6377_v6, 5  ;;  %v6381_v28 = vshrl.u32 %v16252_v48, 16  ;;  %v6387_v20 = vshll.u32 %v16265_v1, 16 }
 0x38d   : > { %12983 = vmatmul.mubr.bf16.gmra.mrb[16].mxu1 %v11544_v23  ;;  %v6356_v24 = vsel %vm14328_vm2, %v6351_v58, %v6355_v14  ;;  %v6392_v52 = vshrl.u32 %v16261_v61, 16  ;;  %v6395_v34 = vshll.u32 %v16261_v61, 16  ;;  %v6374_v4 = vor.u32 %v6373_v49, %v6370_v57 }
 0x38e   : > { %v6361_v47 = vrot.slane %v6360_v32, 4  ;;  %v6383_v35 = vrot.slane %v6381_v28, 4  ;;  %v6401_v39 = vshll.u32 %v16269_v22, 16  ;;  %v6389_v33 = vrot.slane %v6387_v20, 5 }
 0x38f   : > { %v6394_v17 = vrot.slane %v6392_v52, 4  ;;  %v6397_v40 = vrot.slane %v6395_v34, 5  ;;  %v6405_v38 = vshrl.u32 %v16269_v22, 16  ;;  %v6375_v2 = vrot.slane %v6374_v4, 4  ;;  %v16304_v4 = vld [vmem:[#allocation3 + $0xb0] sm:$0x1] }
 0x390   : > { %v6366_v54 = vsel %vm14328_vm2, %v6361_v47, %v6365_v44  ;;  %v6384_v18 = vor.u32 %v6383_v35, %v6379_v51  ;;  %v6403_v46 = vrot.slane %v6401_v39, 5  ;;  %v6411_v9 = vshll.u32 %v16277_v8, 16  ;;  %v16294_v44 = vld [vmem:[#allocation3 + $0xa4] sm:$0x1]  ;;  %v16306_v35 = vld [vmem:[#allocation3 + $0xb4] sm:$0xf] }
 0x391   : > { %v11545_v14 = vcombine.low %v6356_v24, %v6366_v54  ;;  %v6398_v13 = vor.u32 %v6397_v40, %v6394_v17  ;;  %v6407_v19 = vrot.slane %v6405_v38, 4  ;;  %v6380_v25 = vsel %vm14328_vm2, %v6375_v2, %v6379_v51  ;;  %v16300_v24 = vld [vmem:[#allocation3 + $0xac] sm:$0xf]  ;;  %v16310_v38 = vld [vmem:[#allocation3 + $0xb8] sm:$0xf] }
 0x392   : > { %v6385_v56 = vrot.slane %v6384_v18, 4  ;;  %v6416_v0 = vshrl.u32 %v16281_v15, 16  ;;  %v6419_v10 = vshll.u32 %v16281_v15, 16  ;;  %v6413_v58 = vrot.slane %v6411_v9, 5 }
 0x393   : > { %12986 = vmatprep.mubr.bf16.mxu1 %v11545_v14  ;;  %v6399_v6 = vrot.slane %v6398_v13, 4  ;;  %v6408_v23 = vor.u32 %v6407_v19, %v6403_v46  ;;  %v6425_v57 = vshll.u32 %v16285_v59, 16  ;;  %v6429_v51 = vshrl.u32 %v16285_v59, 16 }
 0x394   : > { %v6390_v32 = vsel %vm14328_vm2, %v6385_v56, %v6389_v33  ;;  %v6418_v49 = vrot.slane %v6416_v0, 4  ;;  %v6421_v28 = vrot.slane %v6419_v10, 5  ;;  %v6435_v33 = vshll.u32 %v16294_v44, 16 }
 0x395   : > { %v11546_v20 = vcombine.low %v6380_v25, %v6390_v32  ;;  %v6404_v52 = vsel %vm14328_vm2, %v6399_v6, %v6403_v46  ;;  %v6409_v34 = vrot.slane %v6408_v23, 4  ;;  %v6427_v47 = vrot.slane %v6425_v57, 5 }
 0x396   : > { %v6422_v39 = vor.u32 %v6421_v28, %v6418_v49  ;;  %v6431_v17 = vrot.slane %v6429_v51, 4  ;;  %v6440_v40 = vshrl.u32 %v16288_v3, 16  ;;  %v6443_v2 = vshll.u32 %v16288_v3, 16  ;;  %v16321_v28 = vld [vmem:[#allocation3 + $0xbc] sm:$0x1] }
 0x397   : > { %12987 = vmatmul.mubr.bf16.gmra.mrb[20].mxu1 %v11546_v20  ;;  %v6414_v54 = vsel %vm14328_vm2, %v6409_v34, %v6413_v58  ;;  %v6449_v18 = vshll.u32 %v16300_v24, 16  ;;  %v6453_v46 = vshrl.u32 %v16300_v24, 16  ;;  %v6437_v9 = vrot.slane %v6435_v33, 5 }
 0x398   : > { %v11547_v14 = vcombine.low %v6404_v52, %v6414_v54  ;;  %v6423_v13 = vrot.slane %v6422_v39, 4  ;;  %v6432_v19 = vor.u32 %v6431_v17, %v6427_v47  ;;  %v6442_v25 = vrot.slane %v6440_v40, 4 }
 0x399   : > { %v6445_v56 = vrot.slane %v6443_v2, 5  ;;  %v6451_v0 = vrot.slane %v6449_v18, 5  ;;  %v6455_v10 = vrot.slane %v6453_v46, 4  ;;  %v6459_v58 = vshll.u32 %v16304_v4, 16 }
 0x39a   : > { %12990 = vmatprep.mubr.bf16.mxu1 %v11547_v14  ;;  %v6428_v6 = vsel %vm14328_vm2, %v6423_v13, %v6427_v47  ;;  %v6433_v23 = vrot.slane %v6432_v19, 4  ;;  %v6464_v57 = vshrl.u32 %v16306_v35, 16  ;;  %v6467_v51 = vshll.u32 %v16306_v35, 16 }
 0x39b   : > { %v6446_v32 = vor.u32 %v6445_v56, %v6442_v25  ;;  %v6456_v49 = vor.u32 %v6455_v10, %v6451_v0  ;;  %v6473_v20 = vshll.u32 %v16310_v38, 16  ;;  %v6461_v34 = vrot.slane %v6459_v58, 5  ;;  %v14164_v10 = vld [vmem:[#allocation3] sm:$0xf] }
 0x39c   : > { %v6438_v52 = vsel %vm14328_vm2, %v6433_v23, %v6437_v9  ;;  %v6466_v39 = vrot.slane %v6464_v57, 4  ;;  %v6477_v47 = vshrl.u32 %v16310_v38, 16  ;;  %v6469_v54 = vrot.slane %v6467_v51, 5 }
 0x39d   : > { %v11548_v17 = vcombine.low %v6428_v6, %v6438_v52  ;;  %v6447_v33 = vrot.slane %v6446_v32, 4  ;;  %v6457_v40 = vrot.slane %v6456_v49, 4  ;;  %v6475_v2 = vrot.slane %v6473_v20, 5  ;;  %v16333_v6 = vld [vmem:[#allocation3 + $0x4] sm:$0xf] }
 0x39e   : > { %v6479_v18 = vrot.slane %v6477_v47, 4  ;;  %v6483_v46 = vshll.u32 %v16321_v28, 16  ;;  %v6470_v19 = vor.u32 %v6469_v54, %v6466_v39  ;;  %v11559_v23 = vcombine.low %v14164_v10, %v16333_v6  ;;  %v14166_v54 = vld [vmem:[#allocation3 + $0xc] sm:$0xf]  ;;  %v14048_v10 = vld [vmem:[%s17742_s3 + $0x90] sm:$0xff]  }
 0x39f   : > { %12991 = vmatmul.mubr.bf16.gmra.mrb[24].mxu1 %v11548_v17  ;;  %v6452_v14 = vsel %vm14328_vm2, %v6447_v33, %v6451_v0  ;;  %v6462_v13 = vsel %vm14328_vm2, %v6457_v40, %v6461_v34  ;;  %v11566_v32 = vcombine.low %v16181_v11, %v16193_v60  ;;  %v11567_v0 = vcombine.low %v16202_v27, %v16204_v55  ;;  %v7092_v17 = vld [vmem:[#allocation3 + $0x78] sm:$0xe]  ;;  %v7082_v27 = vld [vmem:[#allocation3] sm:$0xe] }
 0x3a0   : > { %v11549_v9 = vcombine.low %v6452_v14, %v6462_v13  ;;  %v6480_v25 = vor.u32 %v6479_v18, %v6475_v2  ;;  %v6471_v56 = vrot.slane %v6470_v19, 4  ;;  %v6485_v57 = vrot.slane %v6483_v46, 5  ;;  %v14045_v46 = vld [vmem:[%s17742_s3 + $0x88] sm:$0xff]   ;;  %v14168_v14 = vld [vmem:[#allocation3 + $0x18] sm:$0xf] }
 0x3a1   : > { %v11568_v51 = vcombine.low %v16219_v53, %v16224_v36  ;;  %v11569_v20 = vcombine.low %v16232_v16, %v16240_v31  ;;  %v11570_v52 = vcombine.low %v16250_v63, %v16252_v48  ;;  %v16364_v13 = vld [vmem:[#allocation3 + $0x1c] sm:$0xf]  ;;  %v7191_v40 = vrot.slane %v16212_v43, 5 }
 0x3a2   : > { %12994 = vmatprep.mubr.bf16.mxu1 %v11549_v9  ;;  %v6481_v58 = vrot.slane %v6480_v25, 4  ;;  %v6476_v49 = vsel %vm14328_vm2, %v6471_v56, %v6475_v2  ;;  %v16358_v2 = vld [vmem:[#allocation3 + $0x10] sm:$0xf]  ;;  %v11561_v19 = vcombine.low %v14168_v14, %v16364_v13  ;;  %v7089_v9 = vld [vmem:[#allocation3 + $0x54] sm:$0xe]  ;;  %v7181_v56 = vrot.slane %v16193_v60, 5 }
 0x3a3   : > { %v11560_v18 = vcombine.low %v14166_v54, %v16358_v2  ;;  %v7090_v25 = vld [vmem:[#allocation3 + $0x60] sm:$0xe]  ;;  %v11563_v14 = vcombine.low %v16093_v30, %v16099_v62  ;;  %v7195_v30 = vrot.slane %v16224_v36, 5  ;;  %v7093_v62 = vld [vmem:[#allocation3 + $0x84] sm:$0xe]  ;;  %v17929_v11 = vcombine.low %v16261_v61, %v16269_v22 }
 0x3a4   : > { %v6486_v34 = vsel %vm14328_vm2, %v6481_v58, %v6485_v57  ;;  %v7188_v58 = vrot.slane %v16204_v55, 5  ;;  %v7091_v57 = vld [vmem:[#allocation3 + $0x6c] sm:$0xe]  ;;  %v7183_v54 = vrot.slane %v7181_v56, 4  ;;  %v7132_v60 = vrot.slane %v16333_v6, 5 }
 0x3a5   : > { %v11550_v33 = vcombine.low %v6476_v49, %v6486_v34  ;;  %v14170_v49 = vld [vmem:[#allocation3 + $0x24] sm:$0xf]  ;;  %v16373_v34 = vld [vmem:[#allocation3 + $0x28] sm:$0xf]  ;;  %v17930_v36 = vcombine.low %v16281_v15, %v16285_v59  ;;  %v17931_v16 = vcombine.low %v16288_v3, %v16300_v24  ;;  %v7146_v61 = vrot.slane %v16364_v13, 5 }
 0x3a6   : > { %v14172_v55 = vld [vmem:[#allocation3 + $0x8] sm:$0x1]  ;;  %v7134_v53 = vrot.slane %v7132_v60, 4  ;;  %v17932_v15 = vcombine.low %v16306_v35, %v16310_v38  ;;  %v14173_v3 = vld [vmem:[#allocation3 + $0x14] sm:$0x1]  ;;  %v7153_v13 = vrot.slane %v16373_v34, 5 }
 0x3a7   : > { %12995 = vmatmul.mubr.bf16.gmra.mrb[28].mxu1 %v11550_v33  ;;  %v11562_v33 = vcombine.low %v14170_v49, %v16373_v34  ;;  %v7197_v49 = vrot.slane %v7195_v30, 4  ;;  %v14175_v35 = vld [vmem:[#allocation3 + $0x34] sm:$0xf]  ;;  %v7085_v34 = vld [vmem:[#allocation3 + $0x24] sm:$0xe] }
 0x3a8   : > { %13014 = vmatprep.mubr.bf16.mxu1 %v11559_v23  ;;  %v11590_v23 = vrot.slane %v7089_v9, 9  ;;  %v7190_v9 = vrot.slane %v7188_v58, 4 }
 0x3af   : > { %13015 = vmatmul.mubr.bf16.vlgmr.msra.gmra.mrb[0].mxu1 %v11560_v18  ;;  %v7184_v18 = vrot.slane %v16200_v21, 5 }
 0x3b0   : > { %13018 = vmatprep.mubr.bf16.mxu1 %v11561_v19  ;;  %13047 = vmatpush3.bf16.msra.mxu1 %v16148_v12  ;;  %v11591_v12 = vrot.slane %v7090_v25, 9  ;;  %v16381_v19 = vsel %vm14634_vm5, %v11590_v23, %v7181_v56  ;;  %v11592_v25 = vrot.slane %v7091_v57, 9  ;;  %v14051_v56 = vld [vmem:[%s17742_s3 + $0x98] sm:$0xff]   ;;  %v7198_v23 = vrot.slane %v16230_v50, 5  ;;  %v7096_v57 = vld [vmem:[#allocation3 + $0xa8] sm:$0xe] }
 0x3b1   : > { %13048 = vmatprep.subr.bf16.mxu1 %v14045_v46  ;;  %v16386_v47 = vsel %vm14634_vm5, %v7183_v54, %v7184_v18  ;;  %v11593_v54 = vrot.slane %v7092_v17, 9  ;;  %v7205_v18 = vrot.slane %v16243_v45, 5  ;;  %v7212_v45 = vrot.slane %v16265_v1, 5 }
 0x3b2   : > { %v16390_v21 = vsel %vm14634_vm5, %v11591_v12, %v7188_v58  ;;  %v7202_v58 = vrot.slane %v16240_v31, 5  ;;  %v7094_v12 = vld [vmem:[#allocation3 + $0x90] sm:$0xe]  ;;  %v16409_v43 = vsel %vm14634_vm5, %v11592_v25, %v7195_v30  ;;  %v16414_v50 = vsel %vm14634_vm5, %v7197_v49, %v7198_v23  ;;  %v14054_v25 = vld [vmem:[%s17742_s3 + $0xa0] sm:$0xff]   ;;  %v7095_v23 = vld [vmem:[#allocation3 + $0x9c] sm:$0xe] }
 0x3b3   : > { %v11564_v1 = vcombine.low %v16122_v41, %v16139_v26  ;;  %v7223_v41 = vrot.slane %v16285_v59, 5  ;;  %v7237_v26 = vrot.slane %v16310_v38, 5  ;;  %v7083_v59 = vld [vmem:[#allocation3 + $0xc] sm:$0xe]  ;;  %v7160_v38 = vrot.slane %v14175_v35, 5 }
 0x3b4   : > { %13049 = vmatpush3.bf16.msra.mxu1 %v14045_v46  ;;  %v16400_v46 = vsel %vm14634_vm5, %v7190_v9, %v7191_v40  ;;  %v7204_v39 = vrot.slane %v7202_v58, 4  ;;  %v11594_v40 = vrot.slane %v7093_v62, 9  ;;  %v7209_v9 = vrot.slane %v16252_v48, 5 }
 0x3b5   : > { %13050 = vmatprep.subr.bf16.mxu1 %v14048_v10  ;;  %v16418_v17 = vsel %vm14634_vm5, %v11593_v54, %v7202_v58  ;;  %v11595_v62 = vrot.slane %v7094_v12, 9  ;;  %v7219_v54 = vrot.slane %v16277_v8, 5  ;;  %v11596_v12 = vrot.slane %v7095_v23, 9 }
 0x3b6   : > { %v7211_v30 = vrot.slane %v7209_v9, 4  ;;  %v7233_v23 = vrot.slane %v16304_v4, 5  ;;  %v7139_v48 = vrot.slane %v16358_v2, 5 }
 0x3b7   : > { %13019 = vmatmul.mubr.bf16.gmra.mrb[4].mxu1 %v11562_v33  ;;  %v7216_v33 = vrot.slane %v16269_v22, 5  ;;  %v16468_v58 = vsel %vm14634_vm5, %v11596_v12, %v7223_v41  ;;  %v14060_v12 = vld [vmem:[%s17742_s3 + $0xb0] sm:$0xff]  }
 0x3b8   : > { %13022 = vmatprep.mubr.bf16.mxu1 %v11563_v14  ;;  %13051 = vmatpush3.bf16.msra.mxu1 %v14048_v10  ;;  %v16429_v14 = vsel %vm14634_vm5, %v7204_v39, %v7205_v18  ;;  %v16438_v10 = vsel %vm14634_vm5, %v11594_v40, %v7209_v9  ;;  %v16442_v39 = vsel %vm14634_vm5, %v7211_v30, %v7212_v45  ;;  %v7230_v40 = vrot.slane %v16300_v24, 5  ;;  %v7097_v9 = vld [vmem:[#allocation3 + $0xb4] sm:$0xe] }
 0x3b9   : > { %13052 = vmatprep.subr.bf16.mxu1 %v14051_v56  ;;  %v7218_v49 = vrot.slane %v7216_v33, 4  ;;  %v16446_v18 = vsel %vm14634_vm5, %v11595_v62, %v7216_v33  ;;  %v14057_v45 = vld [vmem:[%s17742_s3 + $0xa8] sm:$0xff]   ;;  %v7226_v30 = vrot.slane %v16294_v44, 5  ;;  %v11597_v62 = vrot.slane %v7096_v57, 9 }
 0x3ba   : > { %v11598_v57 = vrot.slane %v7097_v9, 9  ;;  %v7141_v6 = vrot.slane %v7139_v48, 4  ;;  %v7142_v24 = vrot.slane %v14173_v3, 5  ;;  %v7087_v3 = vld [vmem:[#allocation3 + $0x3c] sm:$0xe] }
 0x3bb   : > { %v16453_v8 = vsel %vm14634_vm5, %v7218_v49, %v7219_v54  ;;  %v11565_v49 = vcombine.low %v16155_v37, %v16157_v7  ;;  %v7232_v54 = vrot.slane %v7230_v40, 4  ;;  %v16476_v44 = vsel %vm14634_vm5, %v11597_v62, %v7230_v40 }
 0x3bc   : > { %13053 = vmatpush3.bf16.msra.mxu1 %v14051_v56  ;;  %v7225_v56 = vrot.slane %v7223_v41, 4  ;;  %v7240_v41 = vrot.slane %v16321_v28, 5  ;;  %v14063_v28 = vld [vmem:[%s17742_s3 + $0xb8] sm:$0xff]   ;;  %v7143_v2 = vsel %vm14634_vm5, %v7141_v6, %v7142_v24  ;;  %v17946_v40 = vcombine.low %v16438_v10, %v16442_v39  ;;  %v8718_v10 = vld [vmem:[#allocation3 + $0xb4] sm:$0xe] }
 0x3bd   : > { %13054 = vmatprep.subr.bf16.mxu1 %v14054_v25  ;;  %v16482_v4 = vsel %vm14634_vm5, %v7232_v54, %v7233_v23 }
 0x3be   : > { %v16472_v33 = vsel %vm14634_vm5, %v7225_v56, %v7226_v30  ;;  %v11584_v30 = vrot.slane %v7083_v59, 9 }
 0x3bf   : > { %13023 = vmatmul.mubr.bf16.gmra.mrb[8].mxu1 %v11564_v1  ;;  %v7239_v1 = vrot.slane %v7237_v26, 4 }
 0x3c0   : > { %13026 = vmatprep.mubr.bf16.mxu1 %v11565_v49  ;;  %13055 = vmatpush3.bf16.msra.mxu1 %v14054_v25  ;;  %v16492_v25 = vsel %vm14634_vm5, %v11598_v57, %v7237_v26  ;;  %v14064_v26 = vld [vmem:[%s17742_s3 + $0xc0] sm:$0xff]   ;;  %v7140_v54 = vsel %vm14634_vm5, %v11584_v30, %v7139_v48  ;;  %v7174_v48 = vrot.slane %v16157_v7, 5  ;;  %v14179_v7 = vld [vmem:[#allocation3 + $0x44] sm:$0x1] }
 0x3c1   : > { %13056 = vmatprep.subr.bf16.mxu1 %v14057_v45  ;;  %v16496_v9 = vsel %vm14634_vm5, %v7239_v1, %v7240_v41  ;;  %v11616_v23 = vcombine.low %v7140_v54, %v7143_v2  ;;  %v14065_v1 = vld [vmem:[%s17742_s3 + $0xc8] sm:$0xff]   ;;  %v14068_v30 = vld [vmem:[%s17742_s3 + $0xe0] sm:$0xff]   ;;  %v11588_v2 = vrot.slane %v7087_v3, 9 }
 0x3c2   : > { %v7176_v24 = vrot.slane %v7174_v48, 4  ;;  %v14069_v54 = vld [vmem:[%s17742_s3 + $0xe8] sm:$0xff]  }
 0x3c4   : > { %13057 = vmatpush3.bf16.msra.mxu1 %v14057_v45 }
 0x3c5   : > { %13058 = vmatprep.subr.bf16.mxu1 %v14060_v12 }
 0x3c7   : > { %13027 = vmatmul.mubr.bf16.gmra.mrb[12].mxu1 %v11566_v32  ;;  %v7135_v32 = vrot.slane %v14172_v55, 5  ;;  %v14177_v55 = vld [vmem:[#allocation3 + $0x38] sm:$0x1] }
 0x3c8   : > { %13030 = vmatprep.mubr.bf16.mxu1 %v11567_v0  ;;  %13059 = vmatpush3.bf16.msra.mxu1 %v14060_v12  ;;  %v11583_v0 = vrot.slane %v7082_v27, 9  ;;  %v7155_v12 = vrot.slane %v7153_v13, 4  ;;  %v7086_v27 = vld [vmem:[#allocation3 + $0x30] sm:$0xe] }
 0x3c9   : > { %13060 = vmatprep.subr.bf16.mxu1 %v14063_v28  ;;  %v7136_v63 = vsel %vm14634_vm5, %v7134_v53, %v7135_v32  ;;  %v7163_v32 = vrot.slane %v14177_v55, 5  ;;  %v11586_v53 = vrot.slane %v7085_v34, 9  ;;  %v16592_v34 = vld [vmem:[#allocation3 + $0x34] sm:$0xf]  ;;  %v17933_v55 = vcombine.low %v16381_v19, %v16386_v47  ;;  %v16613_v47 = vld [vmem:[%s17742_s3 + $0x100] sm:$0xff]  }
 0x3ca   : > { %v7133_v31 = vsel %vm14634_vm5, %v11583_v0, %v7132_v60  ;;  %v14066_v0 = vld [vmem:[%s17742_s3 + $0xd0] sm:$0xff]   ;;  %v16615_v19 = vld [vmem:[#allocation3 + $0x50] sm:$0x1] }
 0x3cb   : > { %v11615_v22 = vcombine.low %v7133_v31, %v7136_v63  ;;  %v11587_v63 = vrot.slane %v7086_v27, 9 }
 0x3cc   : > { %13061 = vmatpush3.bf16.msra.mxu1 %v14063_v28  ;;  %v7162_v28 = vrot.slane %v7160_v38, 4 }
 0x3cd   : > { %13094 = vmatprep.subr.bf16.mxu1 %v14064_v26  ;;  %v7161_v6 = vsel %vm14634_vm5, %v11587_v63, %v7160_v38 }
 0x3cf   : > { %13031 = vmatmul.mubr.bf16.gmra.mrb[16].mxu1 %v11568_v51  ;;  %v7148_v51 = vrot.slane %v7146_v61, 4 }
 0x3d0   : > { %13034 = vmatprep.mubr.bf16.mxu1 %v11569_v20  ;;  %v7084_v20 = vld [vmem:[#allocation3 + $0x18] sm:$0xe] }
 0x3d1   : > { %v11585_v62 = vrot.slane %v7084_v20, 9  ;;  %v7170_v20 = vrot.slane %v14179_v7, 5 }
 0x3d3   : > { %v7147_v57 = vsel %vm14634_vm5, %v11585_v62, %v7146_v61  ;;  %v7154_v61 = vsel %vm14634_vm5, %v11586_v53, %v7153_v13  ;;  %v8707_v53 = vld [vmem:[#allocation3 + $0x30] sm:$0xe] }
 0x3d7   : > { %13035 = vmatmul.mubr.bf16.gmra.mrb[20].mxu1 %v11570_v52  ;;  %v14174_v52 = vld [vmem:[#allocation3 + $0x20] sm:$0x1] }
 0x3d8   : > { %13038 = vmatprep.mubr.bf16.mxu1 %v17929_v11  ;;  %v7149_v45 = vrot.slane %v14174_v52, 5  ;;  %v14176_v11 = vld [vmem:[#allocation3 + $0x2c] sm:$0x1]  ;;  %v7088_v52 = vld [vmem:[#allocation3 + $0x48] sm:$0xe] }
 0x3d9   : > { %v7156_v60 = vrot.slane %v14176_v11, 5  ;;  %v11589_v62 = vrot.slane %v7088_v52, 9  ;;  %v16594_v11 = vld [vmem:[#allocation3 + $0x38] sm:$0x1]  ;;  %v16634_v52 = vld [vmem:[#allocation3 + $0x64] sm:$0xf] }
 0x3da   : > { %v7150_v49 = vsel %vm14634_vm5, %v7148_v51, %v7149_v45  ;;  %v7177_v45 = vrot.slane %v16159_v29, 5 }
 0x3db   : > { %v11617_v41 = vcombine.low %v7147_v57, %v7150_v49  ;;  %v7175_v29 = vsel %vm14634_vm5, %v11589_v62, %v7174_v48  ;;  %v14070_v57 = vld [vmem:[%s17742_s3 + $0xf0] sm:$0xff]   ;;  %v8791_v48 = vrot.slane %v16592_v34, 5 }
 0x3dc   : > { %v7178_v49 = vsel %vm14634_vm5, %v7176_v24, %v7177_v45 }
 0x3dd   : > { %v8793_v3 = vrot.slane %v8791_v48, 4 }
 0x3df   : > { %13039 = vmatmul.mubr.bf16.gmra.mrb[24].mxu1 %v17930_v36  ;;  %v7157_v36 = vsel %vm14634_vm5, %v7155_v12, %v7156_v60  ;;  %v14071_v12 = vld [vmem:[%s17742_s3 + $0xf8] sm:$0xff]  }
 0x3e0   : > { %13042 = vmatprep.mubr.bf16.mxu1 %v17931_v16  ;;  %v14178_v16 = vld [vmem:[#allocation3 + $0x40] sm:$0xf] }
 0x3e1   : > { %v7167_v31 = vrot.slane %v14178_v16, 5  ;;  %v16596_v60 = vld [vmem:[#allocation3 + $0x40] sm:$0xf] }
 0x3e2   : > { %v8798_v7 = vrot.slane %v16596_v60, 5 }
 0x3e3   : > { %v7169_v51 = vrot.slane %v7167_v31, 4  ;;  %v7168_v35 = vsel %vm14634_vm5, %v11588_v2, %v7167_v31 }
 0x3e5   : > { %v7171_v13 = vsel %vm14634_vm5, %v7169_v51, %v7170_v20  ;;  %v8710_v20 = vld [vmem:[#allocation3 + $0x54] sm:$0xe] }
 0x3e6   : > { %v11620_v38 = vcombine.low %v7168_v35, %v7171_v13  ;;  %v8800_v35 = vrot.slane %v8798_v7, 4 }
 0x3e7   : > { %13043 = vmatmul.mubr.bf16.gmra.mrb[28].mxu1 %v17932_v15  ;;  %v14067_v15 = vld [vmem:[%s17742_s3 + $0xd8] sm:$0xff]  }
 0x3e8   : > { %13062 = vmatprep.mubr.bf16.mxu1 %v11615_v22  ;;  %v11618_v22 = vcombine.low %v7154_v61, %v7157_v36  ;;  %v17934_v36 = vcombine.low %v16390_v21, %v16400_v46  ;;  %v8709_v61 = vld [vmem:[#allocation3 + $0x48] sm:$0xe]  ;;  %v16620_v21 = vld [vmem:[#allocation3 + $0x5c] sm:$0x1] }
 0x3e9   : > { %v11724_v2 = vrot.slane %v8709_v61, 9 }
 0x3ef   : > { %13063 = vmatmul.mubr.bf16.vlgmr.msra.gmra.mrb[0].mxu1 %v11616_v23  ;;  %v11621_v23 = vcombine.low %v7175_v29, %v7178_v49  ;;  %v8711_v29 = vld [vmem:[#allocation3 + $0x60] sm:$0xe] }
 0x3f0   : > { %13066 = vmatprep.mubr.bf16.mxu1 %v11617_v41  ;;  %13095 = vmatpush3.bf16.msra.mxu1 %v14064_v26  ;;  %v7164_v26 = vsel %vm14634_vm5, %v7162_v28, %v7163_v32  ;;  %v16587_v41 = vld [vmem:[#allocation3 + $0x2c] sm:$0x1]  ;;  %v8706_v28 = vld [vmem:[#allocation3 + $0x24] sm:$0xe]  ;;  %v16602_v32 = vld [vmem:[#allocation3 + $0x44] sm:$0x1] }
 0x3f1   : > { %13096 = vmatprep.subr.bf16.mxu1 %v14065_v1  ;;  %v11619_v59 = vcombine.low %v7161_v6, %v7164_v26  ;;  %v11721_v16 = vrot.slane %v8706_v28, 9  ;;  %v8787_v63 = vrot.slane %v16587_v41, 5  ;;  %v8708_v26 = vld [vmem:[#allocation3 + $0x3c] sm:$0xe] }
 0x3f2   : > { %v11723_v24 = vrot.slane %v8708_v26, 9  ;;  %v17937_v26 = vcombine.low %v16418_v17, %v16429_v14 }
 0x3f4   : > { %13097 = vmatpush3.bf16.msra.mxu1 %v14065_v1  ;;  %v16585_v1 = vld [vmem:[#allocation3 + $0x28] sm:$0xf]  ;;  %v16649_v49 = vsel %vm14634_vm5, %v11723_v24, %v8798_v7  ;;  %v16685_v24 = vld [vmem:[#allocation3 + $0x80] sm:$0x1] }
 0x3f5   : > { %13098 = vmatprep.subr.bf16.mxu1 %v14066_v0  ;;  %v8784_v27 = vrot.slane %v16585_v1, 5 }
 0x3f7   : > { %13067 = vmatmul.mubr.bf16.gmra.mrb[4].mxu1 %v11618_v22  ;;  %v8786_v31 = vrot.slane %v8784_v27, 4  ;;  %v16618_v22 = vld [vmem:[#allocation3 + $0x58] sm:$0xf]  ;;  %v16624_v46 = vsel %vm14634_vm5, %v11721_v16, %v8784_v27  ;;  %v17935_v27 = vcombine.low %v16409_v43, %v16414_v50  ;;  %v8815_v16 = vrot.slane %v16620_v21, 5  ;;  %v16675_v43 = vld [vmem:[#allocation3 + $0x7c] sm:$0xf] }
 0x3f8   : > { %13070 = vmatprep.mubr.bf16.mxu1 %v11619_v59  ;;  %13099 = vmatpush3.bf16.msra.mxu1 %v14066_v0  ;;  %v16604_v0 = vld [vmem:[#allocation3 + $0x4c] sm:$0xf]  ;;  %v8794_v59 = vrot.slane %v16594_v11, 5  ;;  %v8812_v28 = vrot.slane %v16618_v22, 5  ;;  %v16721_v50 = vld [vmem:[#allocation3 + $0xa0] sm:$0xf] }
 0x3f9   : > { %13100 = vmatprep.subr.bf16.mxu1 %v14067_v15  ;;  %v16628_v6 = vsel %vm14634_vm5, %v8786_v31, %v8787_v63  ;;  %v8805_v13 = vrot.slane %v16604_v0, 5  ;;  %v8819_v31 = vrot.slane %v16634_v52, 5  ;;  %v8712_v63 = vld [vmem:[#allocation3 + $0x6c] sm:$0xe] }
 0x3fa   : > { %v16645_v62 = vsel %vm14634_vm5, %v8793_v3, %v8794_v59  ;;  %v8814_v61 = vrot.slane %v8812_v28, 4  ;;  %v8713_v59 = vld [vmem:[#allocation3 + $0x78] sm:$0xe]  ;;  %v16683_v3 = vld [vmem:[#allocation3 + $0x74] sm:$0x1] }
 0x3fb   : > { %v8821_v7 = vrot.slane %v8819_v31, 4  ;;  %v8829_v17 = vrot.slane %v16683_v3, 5 }
 0x3fc   : > { %13101 = vmatpush3.bf16.msra.mxu1 %v14067_v15  ;;  %v11722_v15 = vrot.slane %v8707_v53, 9 }
 0x3fd   : > { %13102 = vmatprep.subr.bf16.mxu1 %v14068_v30 }
 0x3fe   : > { %v16638_v45 = vsel %vm14634_vm5, %v11722_v15, %v8791_v48  ;;  %v11726_v15 = vrot.slane %v8711_v29, 9 }
 0x3ff   : > { %13071 = vmatmul.mubr.bf16.gmra.mrb[8].mxu1 %v11620_v38  ;;  %v8808_v38 = vrot.slane %v16615_v19, 5 }
 0x400   : > { %13074 = vmatprep.mubr.bf16.mxu1 %v11621_v23  ;;  %13103 = vmatpush3.bf16.msra.mxu1 %v14068_v30  ;;  %v8801_v30 = vrot.slane %v16602_v32, 5 }
 0x401   : > { %13104 = vmatprep.subr.bf16.mxu1 %v14069_v54 }
 0x402   : > { %v16664_v53 = vsel %vm14634_vm5, %v8800_v35, %v8801_v30  ;;  %v16694_v30 = vld [vmem:[#allocation3 + $0x88] sm:$0xf]  ;;  %v16702_v35 = vsel %vm14634_vm5, %v11726_v15, %v8819_v31  ;;  %v7988_v31 = vld [vmem:[#allocation3 + $0xa4] sm:$0x1] }
 0x403   : > { %17941 = vst [vmem:[#allocation6_spill] sm:$0xff] %v16702_v35  ;;  %v8840_v23 = vrot.slane %v16694_v30, 5 }
 0x404   : > { %13105 = vmatpush3.bf16.msra.mxu1 %v14069_v54  ;;  %v16652_v54 = vld [vmem:[#allocation3 + $0x68] sm:$0x1] }
 0x405   : > { %13106 = vmatprep.subr.bf16.mxu1 %v14070_v57 }
 0x407   : > { %13075 = vmatmul.mubr.bf16.gmra.mrb[12].mxu1 %v17933_v55  ;;  %v16660_v55 = vld [vmem:[#allocation3 + $0x70] sm:$0xf] }
 0x408   : > { %13078 = vmatprep.mubr.bf16.mxu1 %v17934_v36  ;;  %13107 = vmatpush3.bf16.msra.mxu1 %v14070_v57  ;;  %v8807_v57 = vrot.slane %v8805_v13, 4  ;;  %v16668_v36 = vsel %vm14634_vm5, %v11724_v2, %v8805_v13  ;;  %v7982_v2 = vld [vmem:[#allocation3 + $0x8c] sm:$0x1]  ;;  %v16698_v13 = vsel %vm14634_vm5, %v8814_v61, %v8815_v16  ;;  %v8826_v29 = vrot.slane %v16660_v55, 5  ;;  %v7985_v61 = vld [vmem:[#allocation3 + $0x98] sm:$0x1] }
 0x409   : > { %13108 = vmatprep.subr.bf16.mxu1 %v14071_v12  ;;  %17936 = vst [vmem:[#allocation16_spill] sm:$0xff] %v16668_v36  ;;  %17940 = vst [vmem:[#allocation5_spill] sm:$0xff] %v16698_v13  ;;  %v8833_v16 = vrot.slane %v16675_v43, 5  ;;  %v8843_v51 = vrot.slane %v7982_v2, 5  ;;  %v17948_v2 = vcombine.low %v16446_v18, %v16453_v8  ;;  %v16748_v13 = vld [vmem:[#allocation3 + $0xb8] sm:$0xf] }
 0x40a   : > { %v16681_v48 = vsel %vm14634_vm5, %v8807_v57, %v8808_v38  ;;  %v11727_v38 = vrot.slane %v8712_v63, 9  ;;  %v16705_v57 = vld [vmem:[#allocation3 + $0x94] sm:$0xf]  ;;  %v8828_v15 = vrot.slane %v8826_v29, 4  ;;  %v8854_v8 = vrot.slane %v16721_v50, 5 }
 0x40b   : > { %17938 = vst [vmem:[#allocation17_spill] sm:$0xff] %v16681_v48  ;;  %v8847_v56 = vrot.slane %v16705_v57, 5 }
 0x40c   : > { %13109 = vmatpush3.bf16.msra.mxu1 %v14071_v12  ;;  %v11725_v12 = vrot.slane %v8710_v20, 9  ;;  %v8822_v20 = vrot.slane %v16652_v54, 5  ;;  %v16718_v63 = vsel %vm14634_vm5, %v11727_v38, %v8826_v29  ;;  %v16731_v38 = vsel %vm14634_vm5, %v8828_v15, %v8829_v17  ;;  %v8716_v17 = vld [vmem:[#allocation3 + $0x9c] sm:$0xe]  ;;  %v8717_v15 = vld [vmem:[#allocation3 + $0xa8] sm:$0xe] }
 0x40d   : > { %13142 = vmatprep.subr.bf16.mxu1 %v16613_v47  ;;  %17943 = vst [vmem:[#allocation8_spill] sm:$0xff] %v16718_v63  ;;  %17945 = vst [vmem:[#allocation10_spill] sm:$0xff] %v16731_v38  ;;  %v8849_v39 = vrot.slane %v8847_v56, 4 }
 0x40e   : > { %v16691_v14 = vsel %vm14634_vm5, %v11725_v12, %v8812_v28  ;;  %v16711_v28 = vsel %vm14634_vm5, %v8821_v7, %v8822_v20  ;;  %v8715_v12 = vld [vmem:[#allocation3 + $0x90] sm:$0xe]  ;;  %v8835_v7 = vrot.slane %v8833_v16, 4  ;;  %v8836_v20 = vrot.slane %v16685_v24, 5 }
 0x40f   : > { %13079 = vmatmul.mubr.bf16.gmra.mrb[16].mxu1 %v17935_v27  ;;  %17939 = vst [vmem:[#allocation4_spill] sm:$0xff] %v16691_v14  ;;  %17942 = vst [vmem:[#allocation7_spill] sm:$0xff] %v16711_v28  ;;  %v11728_v27 = vrot.slane %v8713_v59, 9  ;;  %v8842_v28 = vrot.slane %v8840_v23, 4  ;;  %v11730_v35 = vrot.slane %v8715_v12, 9 }
 0x410   : > { %13082 = vmatprep.mubr.bf16.mxu1 %v17937_v26  ;;  %v8714_v26 = vld [vmem:[#allocation3 + $0x84] sm:$0xe]  ;;  %v16741_v37 = vsel %vm14634_vm5, %v8835_v7, %v8836_v20  ;;  %v7974_v14 = vld [vmem:[#allocation3 + $0x6c] sm:$0xf] }
 0x411   : > { %v16725_v59 = vsel %vm14634_vm5, %v11728_v27, %v8833_v16  ;;  %v11729_v29 = vrot.slane %v8714_v26, 9  ;;  %v7990_v27 = vld [vmem:[#allocation3 + $0xac] sm:$0xf]  ;;  %17947 = vst [vmem:[#allocation11_spill] sm:$0xff] %v16741_v37  ;;  %v7991_v26 = vld [vmem:[#allocation3 + $0xb0] sm:$0x1]  ;;  %v16756_v12 = vsel %vm14634_vm5, %v8842_v28, %v8843_v51  ;;  %v16760_v18 = vsel %vm14634_vm5, %v11730_v35, %v8847_v56 }
 0x412   : > { %17944 = vst [vmem:[#allocation9_spill] sm:$0xff] %v16725_v59  ;;  %v7994_v16 = vld [vmem:[#allocation3 + $0xbc] sm:$0x1]  ;;  %17950 = vst [vmem:[#allocation13_spill] sm:$0xff] %v16756_v12  ;;  %v7996_v20 = vld [vmem:[#allocation3 + $0xc4] sm:$0xf]  ;;  %v17957_v51 = vcombine.low %v16468_v58, %v16472_v33 }
 0x413   : > { %v16752_v7 = vsel %vm14634_vm5, %v11729_v29, %v8840_v23  ;;  %17951 = vst [vmem:[#allocation14_spill] sm:$0xff] %v16760_v18  ;;  %v11731_v23 = vrot.slane %v8716_v17, 9  ;;  %v8861_v29 = vrot.slane %v7990_v27, 5  ;;  %v7997_v37 = vld [vmem:[#allocation3 + $0xc8] sm:$0x1]  ;;  %v8856_v28 = vrot.slane %v8854_v8, 4 }
 0x414   : > { %17949 = vst [vmem:[#allocation12_spill] sm:$0xff] %v16752_v7  ;;  %v8857_v56 = vrot.slane %v7988_v31, 5  ;;  %v11732_v35 = vrot.slane %v8717_v15, 9  ;;  %v8868_v12 = vrot.slane %v16748_v13, 5  ;;  %v8875_v31 = vrot.slane %v7996_v20, 5  ;;  %v14085_v7 = vld [vmem:[#allocation3 + $0x78] sm:$0xff]  }
 0x415   : > { %v16773_v59 = vsel %vm14634_vm5, %v11731_v23, %v8854_v8  ;;  %v8863_v38 = vrot.slane %v8861_v29, 4  ;;  %v8871_v23 = vrot.slane %v7994_v16, 5  ;;  %v17958_v20 = vcombine.low %v16476_v44, %v16482_v4  ;;  %v14072_v4 = vld [vmem:[#allocation3 + $0xc] sm:$0xff]  }
 0x416   : > { %17953 = vst [vmem:[#allocation18_spill] sm:$0xff] %v16773_v59  ;;  %v16778_v27 = vsel %vm14634_vm5, %v8856_v28, %v8857_v56  ;;  %v16782_v17 = vsel %vm14634_vm5, %v11732_v35, %v8861_v29  ;;  %v8877_v56 = vrot.slane %v8875_v31, 4  ;;  %v14075_v35 = vld [vmem:[#allocation3 + $0x24] sm:$0xff]   ;;  %v16834_v28 = vld [vmem:[#allocation3 + $0x14] sm:$0x1] }
 0x417   : > { %13083 = vmatmul.mubr.bf16.gmra.mrb[20].mxu1 %v17946_v40  ;;  %v8850_v40 = vrot.slane %v7985_v61, 5  ;;  %v8864_v61 = vrot.slane %v7991_v26, 5  ;;  %17954 = vst [vmem:[#allocation19_spill] sm:$0xff] %v16778_v27  ;;  %17955 = vst [vmem:[#allocation20_spill] sm:$0xff] %v16782_v17  ;;  %v8870_v26 = vrot.slane %v8868_v12, 4  ;;  %v8080_v27 = vshll.u32 %v16592_v34, 16 }
 0x418   : > { %13086 = vmatprep.mubr.bf16.mxu1 %v17948_v2 }
 0x419   : > { %v16767_v2 = vsel %vm14634_vm5, %v8849_v39, %v8850_v40  ;;  %v8719_v39 = vld [vmem:[#allocation3 + $0xc0] sm:$0xe]  ;;  %v11733_v40 = vrot.slane %v8718_v10, 9  ;;  %v16788_v8 = vsel %vm14634_vm5, %v8863_v38, %v8864_v61  ;;  %v8878_v10 = vrot.slane %v7997_v37, 5  ;;  %v14073_v61 = vld [vmem:[#allocation3 + $0x18] sm:$0xff]  }
 0x41a   : > { %17952 = vst [vmem:[#allocation15_spill] sm:$0xff] %v16767_v2  ;;  %17956 = vst [vmem:[#allocation21_spill] sm:$0xff] %v16788_v8  ;;  %v11734_v29 = vrot.slane %v8719_v39, 9  ;;  %v16804_v16 = vsel %vm14634_vm5, %v8870_v26, %v8871_v23  ;;  %v14080_v39 = vld [vmem:[%s17742_s3 + $0x110] sm:$0xff]  }
 0x41b   : > { %v16800_v38 = vsel %vm14634_vm5, %v11733_v40, %v8868_v12  ;;  %17960 = vst [vmem:[#allocation23_spill] sm:$0xff] %v16804_v16  ;;  %v16814_v37 = vsel %vm14634_vm5, %v8877_v56, %v8878_v10  ;;  %v17963_v12 = vcombine.low %v16492_v25, %v16496_v9  ;;  %v7950_v40 = vld [vmem:[#allocation3 + $0xc] sm:$0xf]  ;;  %v14076_v56 = vld [vmem:[#allocation3 + $0x30] sm:$0xff]   ;;  %v14083_v10 = vld [vmem:[%s17742_s3 + $0x118] sm:$0xff]   ;;  %v8056_v16 = vshll.u32 %v16585_v1, 16 }
 0x41c   : > { %17959 = vst [vmem:[#allocation22_spill] sm:$0xff] %v16800_v38  ;;  %v16810_v33 = vsel %vm14634_vm5, %v11734_v29, %v8875_v31  ;;  %17962 = vst [vmem:[#allocation25_spill] sm:$0xff] %v16814_v37  ;;  %v7951_v31 = vld [vmem:[#allocation3 + $0x10] sm:$0xf]  ;;  %v7999_v25 = vshrl.u32 %v7950_v40, 16  ;;  %v8002_v9 = vshll.u32 %v7950_v40, 16 }
 0x41d   : > { %17961 = vst [vmem:[#allocation24_spill] sm:$0xff] %v16810_v33  ;;  %v8008_v26 = vshll.u32 %v7951_v31, 16  ;;  %v8012_v23 = vshrl.u32 %v7951_v31, 16  ;;  %v7953_v29 = vld [vmem:[#allocation3 + $0x18] sm:$0xf]  ;;  %v14086_v31 = vld [vmem:[%s17742_s3 + $0x120] sm:$0xff]  }
 0x41e   : > { %v16842_v33 = vld [vmem:[#allocation3 + $0x20] sm:$0x1] }
 0x41f   : > { %13087 = vmatmul.mubr.bf16.gmra.mrb[24].mxu1 %v17957_v51  ;;  %v14077_v51 = vld [vmem:[%s17742_s3 + $0x108] sm:$0xff]   ;;  %v8014_v40 = vrot.slane %v8012_v23, 4 }
 0x420   : > { %13090 = vmatprep.mubr.bf16.mxu1 %v17958_v20  ;;  %v7954_v20 = vld [vmem:[#allocation3 + $0x1c] sm:$0xf]  ;;  %v14081_v23 = vld [vmem:[#allocation3 + $0x54] sm:$0xff]  }
 0x421   : > { %v8032_v44 = vshll.u32 %v7954_v20, 16  ;;  %v8036_v58 = vshrl.u32 %v7954_v20, 16  ;;  %v8018_v20 = vshll.u32 %v16834_v28, 16 }
 0x423   : > { %v8020_v38 = vrot.slane %v8018_v20, 5 }
 0x427   : > { %13091 = vmatmul.mubr.bf16.gmra.mrb[28].mxu1 %v17963_v12  ;;  %v8026_v12 = vshll.u32 %v7953_v29, 16 }
 0x428   : > { %13110 = vmatprep.mubr.bf16.mxu1 %v14072_v4  ;;  %v8023_v4 = vshrl.u32 %v7953_v29, 16 }
 0x429   : > { %v8028_v37 = vrot.slane %v8026_v12, 5 }
 0x42a   : > { %v8025_v15 = vrot.slane %v8023_v4, 4 }
 0x42f   : > { %13111 = vmatmul.mubr.bf16.vlgmr.msra.gmra.mrb[0].mxu1 %v14073_v61  ;;  %v8001_v61 = vrot.slane %v7999_v25, 4  ;;  %v14089_v25 = vld [vmem:[%s17742_s3 + $0x128] sm:$0xff]  }
 0x430   : > { %13114 = vmatprep.mubr.bf16.mxu1 %v14075_v35  ;;  %13143 = vmatpush3.bf16.msra.mxu1 %v16613_v47  ;;  %v14078_v47 = vld [vmem:[#allocation3 + $0x3c] sm:$0xff]   ;;  %v8010_v35 = vrot.slane %v8008_v26, 5  ;;  %v8038_v26 = vrot.slane %v8036_v58, 4 }
 0x431   : > { %13144 = vmatprep.subr.bf16.mxu1 %v14077_v51 }
 0x434   : > { %13145 = vmatpush3.bf16.msra.mxu1 %v14077_v51  ;;  %v8004_v51 = vrot.slane %v8002_v9, 5  ;;  %v16839_v9 = vrot.slane %v8032_v44, 5  ;;  %v14092_v44 = vld [vmem:[%s17742_s3 + $0x130] sm:$0xff]  }
 0x435   : > { %13146 = vmatprep.subr.bf16.mxu1 %v14080_v39 }
 0x436   : > { %v8005_v29 = vor.u32 %v8004_v51, %v8001_v61  ;;  %v8039_v58 = vor.u32 %v8038_v26, %v16839_v9  ;;  %v14082_v26 = vld [vmem:[#allocation3 + $0x60] sm:$0xff]  }
 0x437   : > { %13115 = vmatmul.mubr.bf16.gmra.mrb[4].mxu1 %v14076_v56  ;;  %v7956_v56 = vld [vmem:[#allocation3 + $0x24] sm:$0xf] }
 0x438   : > { %13118 = vmatprep.mubr.bf16.mxu1 %v14078_v47  ;;  %13147 = vmatpush3.bf16.msra.mxu1 %v14080_v39  ;;  %v8015_v47 = vor.u32 %v8014_v40, %v8010_v35  ;;  %v14079_v39 = vld [vmem:[#allocation3 + $0x48] sm:$0xff]   ;;  %v8047_v4 = vshrl.u32 %v7956_v56, 16  ;;  %v8050_v12 = vshll.u32 %v7956_v56, 16  ;;  %v8006_v61 = vrot.slane %v8005_v29, 4 }
 0x439   : > { %13148 = vmatprep.subr.bf16.mxu1 %v14083_v10  ;;  %v8042_v40 = vshll.u32 %v16842_v33, 16  ;;  %v8040_v20 = vrot.slane %v8039_v58, 4  ;;  %v8084_v58 = vshrl.u32 %v16592_v34, 16  ;;  %v8128_v34 = vshll.u32 %v16604_v0, 16 }
 0x43a   : > { %v8016_v51 = vrot.slane %v8015_v47, 4  ;;  %v8049_v8 = vrot.slane %v8047_v4, 4  ;;  %v8052_v56 = vrot.slane %v8050_v12, 5  ;;  %v8011_v29 = vsel %vm14328_vm2, %v8006_v61, %v8010_v35 }
 0x43b   : > { %v8044_v4 = vrot.slane %v8042_v40, 5  ;;  %v16858_v12 = vrot.slane %v8056_v16, 5  ;;  %v8108_v40 = vshrl.u32 %v16596_v60, 16 }
 0x43c   : > { %13149 = vmatpush3.bf16.msra.mxu1 %v14083_v10  ;;  %v8029_v10 = vor.u32 %v8028_v37, %v8025_v15  ;;  %v8060_v15 = vshrl.u32 %v16585_v1, 16  ;;  %v8021_v47 = vsel %vm14328_vm2, %v8016_v51, %v8020_v38  ;;  %v8066_v1 = vshll.u32 %v16587_v41, 16 }
 0x43d   : > { %13150 = vmatprep.subr.bf16.mxu1 %v14086_v31  ;;  %v16861_v38 = vcombine.low %v8011_v29, %v8021_v47  ;;  %v8110_v18 = vrot.slane %v8108_v40, 4 }
 0x43e   : > { %v8030_v37 = vrot.slane %v8029_v10, 4  ;;  %v8053_v10 = vor.u32 %v8052_v56, %v8049_v8  ;;  %v8062_v17 = vrot.slane %v8060_v15, 4  ;;  %v8104_v8 = vshll.u32 %v16596_v60, 16  ;;  %v7965_v56 = vld [vmem:[#allocation3 + $0x48] sm:$0xf] }
 0x43f   : > { %13119 = vmatmul.mubr.bf16.gmra.mrb[8].mxu1 %v14079_v39  ;;  %v7962_v39 = vld [vmem:[#allocation3 + $0x3c] sm:$0xf]  ;;  %v8045_v15 = vsel %vm14328_vm2, %v8040_v20, %v8044_v4  ;;  %v8086_v20 = vrot.slane %v8084_v58, 4  ;;  %v8119_v4 = vshrl.u32 %v7965_v56, 16  ;;  %v8152_v58 = vshll.u32 %v16618_v22, 16 }
 0x440   : > { %13122 = vmatprep.mubr.bf16.mxu1 %v14081_v23  ;;  %13151 = vmatpush3.bf16.msra.mxu1 %v14086_v31  ;;  %v7959_v31 = vld [vmem:[#allocation3 + $0x30] sm:$0xf]  ;;  %v14095_v23 = vld [vmem:[%s17742_s3 + $0x138] sm:$0xff]   ;;  %v8035_v51 = vsel %vm14328_vm2, %v8030_v37, %v16839_v9  ;;  %v8095_v16 = vshrl.u32 %v7962_v39, 16  ;;  %v8098_v41 = vshll.u32 %v7962_v39, 16  ;;  %v16875_v9 = vld [vmem:[%s17742_s3 + $0x140] sm:$0xff]   ;;  %v8063_v60 = vor.u32 %v8062_v17, %v16858_v12 }
 0x441   : > { %13152 = vmatprep.subr.bf16.mxu1 %v14089_v25  ;;  %v8071_v35 = vshrl.u32 %v7959_v31, 16  ;;  %v8074_v61 = vshll.u32 %v7959_v31, 16  ;;  %v16877_v37 = vrot.slane %v8066_v1, 5  ;;  %v16881_v31 = vrot.slane %v8053_v10, 4  ;;  %v7968_v39 = vld [vmem:[#allocation3 + $0x54] sm:$0xf] }
 0x442   : > { %v8097_v59 = vrot.slane %v8095_v16, 4  ;;  %v8100_v1 = vrot.slane %v8098_v41, 5  ;;  %v16886_v2 = vrot.slane %v8104_v8, 5  ;;  %v8143_v10 = vshrl.u32 %v7968_v39, 16 }
 0x443   : > { %v8073_v29 = vrot.slane %v8071_v35, 4  ;;  %v8076_v47 = vrot.slane %v8074_v61, 5  ;;  %v8146_v35 = vshll.u32 %v7968_v39, 16  ;;  %v14087_v61 = vld [vmem:[#allocation3 + $0x84] sm:$0xff]   ;;  %v8156_v16 = vshrl.u32 %v16618_v22, 16 }
 0x444   : > { %13153 = vmatpush3.bf16.msra.mxu1 %v14089_v25  ;;  %v14084_v25 = vld [vmem:[#allocation3 + $0x6c] sm:$0xff]   ;;  %v8064_v41 = vrot.slane %v8063_v60, 4  ;;  %v8090_v8 = vshll.u32 %v16594_v11, 16  ;;  %v8121_v40 = vrot.slane %v8119_v4, 4  ;;  %v8114_v39 = vshll.u32 %v16602_v32, 16 }
 0x445   : > { %13154 = vmatprep.subr.bf16.mxu1 %v14092_v44  ;;  %v8145_v63 = vrot.slane %v8143_v10, 4  ;;  %v8148_v22 = vrot.slane %v8146_v35, 5  ;;  %v8158_v60 = vrot.slane %v8156_v16, 4  ;;  %v14090_v16 = vld [vmem:[#allocation3 + $0x9c] sm:$0xff]  }
 0x446   : > { %v8069_v32 = vsel %vm14328_vm2, %v8064_v41, %v16877_v37  ;;  %v8116_v10 = vrot.slane %v8114_v39, 5  ;;  %v8191_v39 = vshrl.u32 %v7974_v14, 16 }
 0x447   : > { %13123 = vmatmul.mubr.bf16.gmra.mrb[12].mxu1 %v14082_v26  ;;  %v16884_v26 = vrot.slane %v8080_v27, 5  ;;  %v16891_v27 = vcombine.low %v8035_v51, %v8045_v15  ;;  %v8111_v15 = vor.u32 %v8110_v18, %v16886_v2  ;;  %v8092_v18 = vrot.slane %v8090_v8, 5 }
 0x448   : > { %13126 = vmatprep.mubr.bf16.mxu1 %v14084_v25  ;;  %13155 = vmatpush3.bf16.msra.mxu1 %v14092_v44  ;;  %v8132_v44 = vshrl.u32 %v16604_v0, 16  ;;  %v8122_v25 = vshll.u32 %v7965_v56, 16  ;;  %v16889_v0 = vrot.slane %v8128_v34, 5  ;;  %v7971_v34 = vld [vmem:[#allocation3 + $0x60] sm:$0xf] }
 0x449   : > { %13156 = vmatprep.subr.bf16.mxu1 %v14095_v23  ;;  %v8087_v51 = vor.u32 %v8086_v20, %v16884_v26  ;;  %v8167_v11 = vshrl.u32 %v7971_v34, 16  ;;  %v8170_v4 = vshll.u32 %v7971_v34, 16  ;;  %v8112_v20 = vrot.slane %v8111_v15, 4 }
 0x44a   : > { %v8134_v17 = vrot.slane %v8132_v44, 4  ;;  %v8124_v56 = vrot.slane %v8122_v25, 5  ;;  %v8077_v44 = vor.u32 %v8076_v47, %v8073_v29  ;;  %v8176_v29 = vshll.u32 %v16634_v52, 16 }
 0x44b   : > { %v8180_v47 = vshrl.u32 %v16634_v52, 16  ;;  %v8172_v34 = vrot.slane %v8170_v4, 5  ;;  %v16941_v4 = vld [vmem:[#allocation3 + $0x78] sm:$0xf] }
 0x44c   : > { %13157 = vmatpush3.bf16.msra.mxu1 %v14095_v23  ;;  %v8059_v23 = vsel %vm14328_vm2, %v16881_v31, %v16858_v12  ;;  %v8101_v12 = vor.u32 %v8100_v1, %v8097_v59  ;;  %v8135_v31 = vor.u32 %v8134_v17, %v16889_v0  ;;  %v8125_v25 = vor.u32 %v8124_v56, %v8121_v40  ;;  %v14088_v1 = vld [vmem:[#allocation3 + $0x90] sm:$0xff]  }
 0x44d   : > { %13190 = vmatprep.subr.bf16.mxu1 %v16875_v9  ;;  %v8088_v59 = vrot.slane %v8087_v51, 4  ;;  %v8078_v17 = vrot.slane %v8077_v44, 4  ;;  %v8169_v56 = vrot.slane %v8167_v11, 4  ;;  %v16913_v36 = vrot.slane %v8176_v29, 5 }
 0x44e   : > { %v8136_v35 = vrot.slane %v8135_v31, 4  ;;  %v8102_v40 = vrot.slane %v8101_v12, 4  ;;  %v8126_v52 = vrot.slane %v8125_v25, 4  ;;  %v8182_v37 = vrot.slane %v8180_v47, 4 }
 0x44f   : > { %13127 = vmatmul.mubr.bf16.gmra.mrb[16].mxu1 %v14085_v7  ;;  %v16904_v7 = vrot.slane %v8152_v58, 5  ;;  %v8149_v58 = vor.u32 %v8148_v22, %v8145_v63  ;;  %v16915_v41 = vcombine.low %v8059_v23, %v8069_v32  ;;  %v8093_v8 = vsel %vm14328_vm2, %v8088_v59, %v8092_v18  ;;  %v16952_v32 = vld [vmem:[#allocation3 + $0x20] sm:$0x1]  ;;  %v14091_v59 = vld [vmem:[#allocation3 + $0xa8] sm:$0xff]  }
 0x450   : > { %13130 = vmatprep.mubr.bf16.mxu1 %v14087_v61  ;;  %v8138_v61 = vshll.u32 %v16615_v19, 16  ;;  %v8117_v63 = vsel %vm14328_vm2, %v8112_v20, %v8116_v10  ;;  %v8162_v44 = vshll.u32 %v16620_v21, 16  ;;  %v8194_v12 = vshll.u32 %v7974_v14, 16  ;;  %17964 = vst [vmem:[#allocation26_spill] sm:$0xff] %v16952_v32  ;;  %v14093_v10 = vld [vmem:[#allocation3 + $0xb4] sm:$0xff]  }
 0x451   : > { %v8159_v19 = vor.u32 %v8158_v60, %v16904_v7  ;;  %v16924_v15 = vrot.slane %v8149_v58, 4  ;;  %v8083_v23 = vsel %vm14328_vm2, %v8078_v17, %v16884_v26  ;;  %v8173_v22 = vor.u32 %v8172_v34, %v8169_v56  ;;  %v16943_v26 = vld [vmem:[#allocation3 + $0x1c] sm:$0xf]  ;;  %v10343_v17 = vld [vmem:[#allocation3 + $0x18] sm:$0xe] }
 0x452   : > { %v8140_v48 = vrot.slane %v8138_v61, 5  ;;  %v8200_v60 = vshll.u32 %v16660_v55, 16  ;;  %v16932_v11 = vcombine.low %v8083_v23, %v8093_v8  ;;  %v8107_v21 = vsel %vm14328_vm2, %v8102_v40, %v16886_v2  ;;  %v16954_v2 = vld [vmem:[#allocation3 + $0x28] sm:$0xf]  ;;  %v16973_v40 = vld [vmem:[#allocation3 + $0x34] sm:$0xf] }
 0x453   : > { %v16929_v31 = vrot.slane %v8159_v19, 4  ;;  %v8183_v14 = vor.u32 %v8182_v37, %v16913_v36  ;;  %v16945_v25 = vcombine.low %v8107_v21, %v8117_v63  ;;  %v16949_v29 = vrot.slane %v8162_v44, 5  ;;  %17965 = vst [vmem:[#allocation27_spill] sm:$0xff] %v16954_v2  ;;  %17966 = vst [vmem:[#allocation28_spill] sm:$0xff] %v16973_v40  ;;  %v10344_v56 = vld [vmem:[#allocation3 + $0x24] sm:$0xe] }
 0x454   : > { %v8141_v51 = vsel %vm14328_vm2, %v8136_v35, %v8140_v48  ;;  %v8131_v48 = vsel %vm14328_vm2, %v8126_v52, %v16889_v0  ;;  %v16960_v18 = vrot.slane %v8191_v39, 4  ;;  %v16962_v20 = vrot.slane %v8194_v12, 5  ;;  %v16981_v8 = vld [vmem:[#allocation3 + $0x2c] sm:$0x1]  ;;  %v16983_v63 = vld [vmem:[#allocation3 + $0x38] sm:$0x1] }
 0x455   : > { %v16947_v61 = vcombine.low %v8131_v48, %v8141_v51  ;;  %v16969_v58 = vrot.slane %v8173_v22, 4  ;;  %v10409_v19 = vrot.slane %v16943_v26, 5  ;;  %v16976_v34 = vrot.slane %v8183_v14, 4  ;;  %17967 = vst [vmem:[#allocation29_spill] sm:$0xff] %v16981_v8  ;;  %17968 = vst [vmem:[#allocation30_spill] sm:$0xff] %v16983_v63  ;;  %v14094_v21 = vld [vmem:[#allocation3 + $0xc0] sm:$0xff]  }
 0x456   : > { %v8215_v52 = vshrl.u32 %v16941_v4, 16  ;;  %v16985_v44 = vld [vmem:[#allocation3 + $0x40] sm:$0xf]  ;;  %v11855_v51 = vrot.slane %v10343_v17, 9  ;;  %v10412_v12 = vrot.slane %v16952_v32, 5  ;;  %v10416_v23 = vrot.slane %v16954_v2, 5 }
 0x457   : > { %13131 = vmatmul.mubr.bf16.gmra.mrb[20].mxu1 %v14088_v1  ;;  %v8204_v1 = vshrl.u32 %v16660_v55, 16  ;;  %17969 = vst [vmem:[#allocation31_spill] sm:$0xff] %v16985_v44  ;;  %v10411_v39 = vrot.slane %v10409_v19, 4  ;;  %v11856_v48 = vrot.slane %v10344_v56, 9  ;;  %v10345_v14 = vld [vmem:[#allocation3 + $0x30] sm:$0xe] }
 0x458   : > { %13134 = vmatprep.mubr.bf16.mxu1 %v14090_v16  ;;  %v16971_v16 = vrot.slane %v8200_v60, 5  ;;  %v10418_v55 = vrot.slane %v10416_v23, 4  ;;  %v10419_v47 = vrot.slane %v16981_v8, 5  ;;  %v10346_v0 = vld [vmem:[#allocation3 + $0x3c] sm:$0xe]  ;;  %v10430_v37 = vrot.slane %v16985_v44, 5 }
 0x459   : > { %v16991_v60 = vrot.slane %v8204_v1, 4  ;;  %v17002_v17 = vsel %vm14634_vm5, %v10411_v39, %v10412_v12  ;;  %v17005_v1 = vrot.slane %v8215_v52, 4  ;;  %v17008_v56 = vld [vmem:[#allocation3 + $0x44] sm:$0x1]  ;;  %v17015_v39 = vsel %vm14634_vm5, %v11856_v48, %v10416_v23  ;;  %v10347_v35 = vld [vmem:[#allocation3 + $0x48] sm:$0xe] }
 0x45a   : > { %17972 = vst [vmem:[#allocation34_spill] sm:$0xff] %v17002_v17  ;;  %17973 = vst [vmem:[#allocation35_spill] sm:$0xff] %v17008_v56  ;;  %v17019_v12 = vsel %vm14634_vm5, %v10418_v55, %v10419_v47  ;;  %v11857_v52 = vrot.slane %v10345_v14, 9  ;;  %v17022_v8 = vld [vmem:[#allocation3 + $0x58] sm:$0xf]  ;;  %v10432_v55 = vrot.slane %v10430_v37, 4 }
 0x45b   : > { %17974 = vst [vmem:[#allocation36_spill] sm:$0xff] %v17015_v39  ;;  %17975 = vst [vmem:[#allocation37_spill] sm:$0xff] %v17019_v12  ;;  %v17029_v48 = vld [vmem:[#allocation3 + $0x5c] sm:$0x1]  ;;  %v10433_v14 = vrot.slane %v17008_v56, 5  ;;  %v11859_v23 = vrot.slane %v10347_v35, 9 }
 0x45c   : > { %17976 = vst [vmem:[#allocation38_spill] sm:$0xff] %v17022_v8  ;;  %17977 = vst [vmem:[#allocation39_spill] sm:$0xff] %v17029_v48  ;;  %v10348_v44 = vld [vmem:[#allocation3 + $0x54] sm:$0xe]  ;;  %v17036_v32 = vld [vmem:[#allocation3 + $0x64] sm:$0xf] }
 0x45d   : > { %17979 = vst [vmem:[#allocation41_spill] sm:$0xff] %v17036_v32  ;;  %v17048_v39 = vld [vmem:[#allocation3 + $0x70] sm:$0xf]  ;;  %v9612_v2 = vld [vmem:[#allocation3 + $0x74] sm:$0x1] }
 0x45e   : > { %17982 = vst [vmem:[#allocation44_spill] sm:$0xff] %v17048_v39 }
 0x45f   : > { %13135 = vmatmul.mubr.bf16.gmra.mrb[24].mxu1 %v14091_v59  ;;  %v16994_v59 = vld [vmem:[#allocation3 + $0x4c] sm:$0xf] }
 0x460   : > { %13138 = vmatprep.mubr.bf16.mxu1 %v14093_v10  ;;  %17970 = vst [vmem:[#allocation32_spill] sm:$0xff] %v16994_v59  ;;  %v16998_v10 = vsel %vm14634_vm5, %v11855_v51, %v10409_v19  ;;  %v10423_v19 = vrot.slane %v16973_v40, 5  ;;  %v9603_v51 = vld [vmem:[#allocation3 + $0x50] sm:$0x1]  ;;  %v11858_v40 = vrot.slane %v10346_v0, 9  ;;  %v10437_v12 = vrot.slane %v16994_v59, 5 }
 0x461   : > { %17971 = vst [vmem:[#allocation33_spill] sm:$0xff] %v16998_v10  ;;  %v10426_v10 = vrot.slane %v16983_v63, 5  ;;  %v11860_v59 = vrot.slane %v10348_v44, 9  ;;  %v10350_v63 = vld [vmem:[#allocation3 + $0x6c] sm:$0xe] }
 0x462   : > { %v10425_v17 = vrot.slane %v10423_v19, 4  ;;  %v17033_v47 = vsel %vm14634_vm5, %v11857_v52, %v10423_v19  ;;  %v17044_v0 = vsel %vm14634_vm5, %v11858_v40, %v10430_v37  ;;  %v10349_v19 = vld [vmem:[#allocation3 + $0x60] sm:$0xe]  ;;  %v9609_v52 = vld [vmem:[#allocation3 + $0x68] sm:$0x1]  ;;  %v10444_v40 = vrot.slane %v17022_v8, 5 }
 0x463   : > { %17978 = vst [vmem:[#allocation40_spill] sm:$0xff] %v17033_v47  ;;  %17981 = vst [vmem:[#allocation43_spill] sm:$0xff] %v17044_v0  ;;  %v9614_v37 = vld [vmem:[#allocation3 + $0x7c] sm:$0xf]  ;;  %v10439_v56 = vrot.slane %v10437_v12, 4  ;;  %v10454_v35 = vrot.slane %v9609_v52, 5 }
 0x464   : > { %v17040_v22 = vsel %vm14634_vm5, %v10425_v17, %v10426_v10  ;;  %v17054_v10 = vsel %vm14634_vm5, %v10432_v55, %v10433_v14  ;;  %v10440_v17 = vrot.slane %v9603_v51, 5  ;;  %v11861_v55 = vrot.slane %v10349_v19, 9  ;;  %v9615_v14 = vld [vmem:[#allocation3 + $0x80] sm:$0x1]  ;;  %v10351_v0 = vld [vmem:[#allocation3 + $0x78] sm:$0xe] }
 0x465   : > { %17980 = vst [vmem:[#allocation42_spill] sm:$0xff] %v17040_v22  ;;  %17983 = vst [vmem:[#allocation45_spill] sm:$0xff] %v17054_v10  ;;  %v10446_v22 = vrot.slane %v10444_v40, 4  ;;  %v10451_v51 = vrot.slane %v17036_v32, 5  ;;  %v17071_v44 = vsel %vm14634_vm5, %v11860_v59, %v10444_v40  ;;  %v10458_v10 = vrot.slane %v17048_v39, 5  ;;  %v14097_v59 = vld [vmem:[%s17742_s3 + $0x148] sm:$0xff]  }
 0x466   : > { %v17067_v47 = vsel %vm14634_vm5, %v10439_v56, %v10440_v17  ;;  %v11862_v56 = vrot.slane %v10350_v63, 9  ;;  %v10461_v39 = vrot.slane %v9612_v2, 5  ;;  %v10353_v8 = vld [vmem:[#allocation3 + $0x90] sm:$0xe]  ;;  %v9621_v52 = vld [vmem:[#allocation3 + $0x98] sm:$0x1] }
 0x467   : > { %13139 = vmatmul.mubr.bf16.gmra.mrb[28].mxu1 %v14094_v21  ;;  %v17062_v21 = vsel %vm14634_vm5, %v11859_v23, %v10437_v12  ;;  %17985 = vst [vmem:[#allocation47_spill] sm:$0xff] %v17067_v47  ;;  %v9618_v12 = vld [vmem:[#allocation3 + $0x8c] sm:$0x1]  ;;  %v10453_v32 = vrot.slane %v10451_v51, 4  ;;  %v17087_v17 = vsel %vm14634_vm5, %v11861_v55, %v10451_v51  ;;  %v10460_v40 = vrot.slane %v10458_v10, 4  ;;  %v14098_v2 = vld [vmem:[%s17742_s3 + $0x150] sm:$0xff]  }
 0x468   : > { %13158 = vmatprep.mubr.bf16.mxu1 %v16861_v38  ;;  %v10447_v38 = vrot.slane %v17029_v48, 5  ;;  %17984 = vst [vmem:[#allocation46_spill] sm:$0xff] %v17062_v21  ;;  %v9617_v48 = vld [vmem:[#allocation3 + $0x88] sm:$0xf]  ;;  %17986 = vst [vmem:[#allocation48_spill] sm:$0xff] %v17087_v17  ;;  %v17095_v63 = vsel %vm14634_vm5, %v11862_v56, %v10458_v10  ;;  %v10465_v21 = vrot.slane %v9614_v37, 5 }
 0x469   : > { %v10352_v23 = vld [vmem:[#allocation3 + $0x84] sm:$0xe]  ;;  %v9620_v47 = vld [vmem:[#allocation3 + $0x94] sm:$0xf]  ;;  %17988 = vst [vmem:[#allocation50_spill] sm:$0xff] %v17095_v63  ;;  %v17102_v51 = vsel %vm14634_vm5, %v10460_v40, %v10461_v39  ;;  %v10475_v37 = vrot.slane %v9618_v12, 5 }
 0x46a   : > { %v17078_v19 = vsel %vm14634_vm5, %v10446_v22, %v10447_v38  ;;  %v17091_v22 = vsel %vm14634_vm5, %v10453_v32, %v10454_v35  ;;  %v11863_v38 = vrot.slane %v10351_v0, 9  ;;  %v9623_v55 = vld [vmem:[#allocation3 + $0xa0] sm:$0xf]  ;;  %17989 = vst [vmem:[#allocation51_spill] sm:$0xff] %v17102_v51  ;;  %v10468_v32 = vrot.slane %v9615_v14, 5 }
 0x46b   : > { %17987 = vst [vmem:[#allocation49_spill] sm:$0xff] %v17091_v22  ;;  %v10472_v35 = vrot.slane %v9617_v48, 5  ;;  %v10467_v10 = vrot.slane %v10465_v21, 4  ;;  %v10354_v56 = vld [vmem:[#allocation3 + $0x9c] sm:$0xe]  ;;  %v11865_v14 = vrot.slane %v10353_v8, 9 }
 0x46c   : > { %v9624_v39 = vld [vmem:[#allocation3 + $0xa4] sm:$0x1]  ;;  %v17113_v48 = vsel %vm14634_vm5, %v11863_v38, %v10465_v21  ;;  %v9626_v40 = vld [vmem:[#allocation3 + $0xac] sm:$0xf]  ;;  %v9627_v22 = vld [vmem:[#allocation3 + $0xb0] sm:$0x1] }
 0x46d   : > { %v10482_v0 = vrot.slane %v9621_v52, 5  ;;  %v10486_v51 = vrot.slane %v9623_v55, 5  ;;  %v9629_v63 = vld [vmem:[#allocation3 + $0xb8] sm:$0xf]  ;;  %v11866_v38 = vrot.slane %v10354_v56, 9 }
 0x46e   : > { %v10355_v17 = vld [vmem:[#allocation3 + $0xa8] sm:$0xe]  ;;  %v9632_v21 = vld [vmem:[#allocation3 + $0xc4] sm:$0xf] }
 0x46f   : > { %13159 = vmatmul.mubr.bf16.vlgmr.msra.gmra.mrb[0].mxu1 %v16891_v27  ;;  %v11864_v27 = vrot.slane %v10352_v23, 9  ;;  %v17117_v23 = vsel %vm14634_vm5, %v10467_v10, %v10468_v32  ;;  %v17993_v32 = vshll.u32 %v16675_v43, 16  ;;  %v10488_v55 = vrot.slane %v10486_v51, 4  ;;  %v18062_v5 = vld [vmem:[#allocation46_spill] sm:$0xff] }
 0x470   : > { %13162 = vmatprep.mubr.bf16.mxu1 %v16915_v41  ;;  %13191 = vmatpush3.bf16.msra.mxu1 %v16875_v9  ;;  %v10474_v41 = vrot.slane %v10472_v35, 4  ;;  %v10479_v9 = vrot.slane %v9620_v47, 5  ;;  %17990 = vst [vmem:[#allocation52_spill] sm:$0xff] %v17117_v23  ;;  %v10500_v23 = vrot.slane %v9629_v63, 5  ;;  %v7980_v63 = vld [vmem:[#allocation3 + $0x84] sm:$0xf] }
 0x471   : > { %13192 = vmatprep.subr.bf16.mxu1 %v14097_v59  ;;  %v17121_v12 = vsel %vm14634_vm5, %v11864_v27, %v10472_v35  ;;  %v17131_v10 = vrot.slane %v17993_v32, 5  ;;  %v10489_v35 = vrot.slane %v9624_v39, 5  ;;  %v10356_v27 = vld [vmem:[#allocation3 + $0xb4] sm:$0xe]  ;;  %v17148_v32 = vsel %vm14634_vm5, %v11866_v38, %v10486_v51 }
 0x472   : > { %17991 = vst [vmem:[#allocation53_spill] sm:$0xff] %v17121_v12  ;;  %v17127_v8 = vsel %vm14634_vm5, %v10474_v41, %v10475_v37  ;;  %v10481_v47 = vrot.slane %v10479_v9, 4  ;;  %v14099_v37 = vld [vmem:[%s17742_s3 + $0x158] sm:$0xff]   ;;  %v9630_v41 = vld [vmem:[#allocation3 + $0xbc] sm:$0x1]  ;;  %v10493_v39 = vrot.slane %v9626_v40, 5 }
 0x473   : > { %17992 = vst [vmem:[#allocation54_spill] sm:$0xff] %v17127_v8  ;;  %v17154_v8 = vsel %vm14634_vm5, %v10488_v55, %v10489_v35  ;;  %v11867_v12 = vrot.slane %v10355_v17, 9  ;;  %v10496_v51 = vrot.slane %v9627_v22, 5  ;;  %v11868_v38 = vrot.slane %v10356_v27, 9 }
 0x474   : > { %13193 = vmatpush3.bf16.msra.mxu1 %v14097_v59  ;;  %v17140_v59 = vsel %vm14634_vm5, %v11865_v14, %v10479_v9  ;;  %v17144_v56 = vsel %vm14634_vm5, %v10481_v47, %v10482_v0  ;;  %v10357_v14 = vld [vmem:[#allocation3 + $0xc0] sm:$0xe]  ;;  %v9633_v9 = vld [vmem:[#allocation3 + $0xc8] sm:$0x1]  ;;  %v10495_v47 = vrot.slane %v10493_v39, 4  ;;  %v17994_v40 = vshrl.u32 %v16675_v43, 16 }
 0x475   : > { %13194 = vmatprep.subr.bf16.mxu1 %v14098_v2  ;;  %v10502_v55 = vrot.slane %v10500_v23, 4  ;;  %v10503_v35 = vrot.slane %v9630_v41, 5  ;;  %v10507_v17 = vrot.slane %v9632_v21, 5  ;;  %v17167_v0 = vsel %vm14634_vm5, %v11867_v12, %v10493_v39 }
 0x476   : > { %v8230_v52 = vrot.slane %v17994_v40, 4  ;;  %v17175_v43 = vsel %vm14634_vm5, %v11868_v38, %v10500_v23  ;;  %v11869_v22 = vrot.slane %v10357_v14, 9  ;;  %v10510_v41 = vrot.slane %v9633_v9, 5 }
 0x477   : > { %13163 = vmatmul.mubr.bf16.gmra.mrb[4].mxu1 %v16932_v11  ;;  %v14100_v11 = vld [vmem:[%s17742_s3 + $0x160] sm:$0xff]   ;;  %v17181_v21 = vsel %vm14634_vm5, %v10502_v55, %v10503_v35  ;;  %v10509_v27 = vrot.slane %v10507_v17, 4  ;;  %v17995_v12 = vshll.u32 %v16941_v4, 16  ;;  %v8239_v14 = vshrl.u32 %v7980_v63, 16 }
 0x478   : > { %13166 = vmatprep.mubr.bf16.mxu1 %v16945_v25  ;;  %13195 = vmatpush3.bf16.msra.mxu1 %v14098_v2  ;;  %v17171_v25 = vsel %vm14634_vm5, %v10495_v47, %v10496_v51  ;;  %v8248_v47 = vshll.u32 %v16694_v30, 16  ;;  %v8252_v51 = vshrl.u32 %v16694_v30, 16  ;;  %v11900_v23 = vcombine.low %v17175_v43, %v17181_v21 }
 0x479   : > { %13196 = vmatprep.subr.bf16.mxu1 %v14099_v37  ;;  %v11899_v2 = vcombine.low %v17167_v0, %v17171_v25  ;;  %v8220_v39 = vrot.slane %v17995_v12, 5  ;;  %v8242_v38 = vshll.u32 %v7980_v63, 16  ;;  %v17191_v40 = vsel %vm14634_vm5, %v11869_v22, %v10507_v17  ;;  %v14101_v17 = vld [vmem:[%s17742_s3 + $0x168] sm:$0xff]   ;;  %v11911_v0 = vld [vmem:[%s14269_s29 + $0x19] sm:$0xff] }
 0x47a   : > { %v17195_v9 = vsel %vm14634_vm5, %v10509_v27, %v10510_v41  ;;  %v17996_v4 = vor.u32 %v16962_v20, %v16960_v18  ;;  %v17997_v30 = vor.u32 %v16991_v60, %v16971_v16  ;;  %v17998_v18 = vsel %vm14328_vm2, %v16929_v31, %v16949_v29  ;;  %v7983_v31 = vld [vmem:[#allocation3 + $0x90] sm:$0xf] }
 0x47b   : > { %v11901_v63 = vcombine.low %v17191_v40, %v17195_v9  ;;  %v17999_v20 = vsel %vm14328_vm2, %v16924_v15, %v16904_v7  ;;  %v18001_v27 = vshll.u32 %v16683_v3, 16  ;;  %v8234_v12 = vshll.u32 %v16685_v24, 16  ;;  %v11912_v9 = vld [vmem:[%s14269_s29 + $0x21] sm:$0xff] }
 0x47c   : > { %13197 = vmatpush3.bf16.msra.mxu1 %v14099_v37  ;;  %v8198_v55 = vrot.slane %v17996_v4, 4  ;;  %v8208_v35 = vrot.slane %v17997_v30, 4  ;;  %v8231_v37 = vor.u32 %v8230_v52, %v17131_v10  ;;  %v11701_v60 = vcombine.low %v17999_v20, %v17998_v18 }
 0x47d   : > { %13198 = vmatprep.subr.bf16.mxu1 %v14100_v11  ;;  %v18000_v52 = vshll.u32 %v16652_v54, 16  ;;  %v8212_v41 = vrot.slane %v18001_v27, 5  ;;  %v17225_v4 = vrot.slane %v8248_v47, 5  ;;  %v8254_v30 = vrot.slane %v8252_v51, 4  ;;  %v14103_v27 = vld [vmem:[%s17742_s3 + $0x178] sm:$0xff]  }
 0x47e   : > { %v8179_v7 = vsel %vm14328_vm2, %v16969_v58, %v16913_v36  ;;  %v8221_v54 = vor.u32 %v8220_v39, %v17005_v1  ;;  %v8241_v15 = vrot.slane %v8239_v14, 4  ;;  %v8244_v29 = vrot.slane %v8242_v38, 5  ;;  %v14102_v36 = vld [vmem:[%s17742_s3 + $0x170] sm:$0xff]  }
 0x47f   : > { %v8188_v22 = vrot.slane %v18000_v52, 5  ;;  %13167 = vmatmul.mubr.bf16.gmra.mrb[8].mxu1 %v16947_v61  ;;  %v8203_v24 = vsel %vm14328_vm2, %v8198_v55, %v16971_v16  ;;  %v8213_v61 = vsel %vm14328_vm2, %v8208_v35, %v8212_v41  ;;  %v8232_v47 = vrot.slane %v8231_v37, 4 }
 0x480   : > { %13170 = vmatprep.mubr.bf16.mxu1 %v11701_v60  ;;  %13199 = vmatpush3.bf16.msra.mxu1 %v14100_v11  ;;  %v8263_v58 = vshrl.u32 %v7983_v31, 16  ;;  %v8266_v1 = vshll.u32 %v7983_v31, 16  ;;  %v8272_v11 = vshll.u32 %v16705_v57, 16  ;;  %v8276_v39 = vshrl.u32 %v16705_v57, 16  ;;  %v14180_v60 = vld [vmem:[#allocation3 + $0x8c] sm:$0x1] }
 0x481   : > { %v8189_v3 = vsel %vm14328_vm2, %v16976_v34, %v8188_v22  ;;  %13200 = vmatprep.subr.bf16.mxu1 %v14101_v17  ;;  %v7986_v34 = vld [vmem:[#allocation3 + $0x9c] sm:$0xf]  ;;  %v8236_v51 = vrot.slane %v8234_v12, 5  ;;  %v8255_v14 = vor.u32 %v8254_v30, %v17225_v4  ;;  %v8296_v16 = vshll.u32 %v16721_v50, 16 }
 0x482   : > { %v8300_v38 = vshrl.u32 %v16721_v50, 16  ;;  %v11702_v55 = vcombine.low %v8179_v7, %v8189_v3  ;;  %v11703_v35 = vcombine.low %v8203_v24, %v8213_v61  ;;  %v8222_v37 = vrot.slane %v8221_v54, 4 }
 0x483   : > { %v8245_v18 = vor.u32 %v8244_v29, %v8241_v15  ;;  %v8237_v20 = vsel %vm14328_vm2, %v8232_v47, %v8236_v51  ;;  %v8258_v52 = vshll.u32 %v14180_v60, 16  ;;  %v8287_v22 = vshrl.u32 %v7986_v34, 16  ;;  %v7989_v47 = vld [vmem:[#allocation3 + $0xa8] sm:$0xf] }
 0x484   : > { %13201 = vmatpush3.bf16.msra.mxu1 %v14101_v17  ;;  %v8290_v57 = vshll.u32 %v7986_v34, 16  ;;  %v8265_v41 = vrot.slane %v8263_v58, 4  ;;  %v8268_v12 = vrot.slane %v8266_v1, 5  ;;  %v17253_v50 = vrot.slane %v8272_v11, 5  ;;  %v17263_v58 = vld [vmem:[%s17742_s3 + $0x180] sm:$0xff]  }
 0x485   : > { %13202 = vmatprep.subr.bf16.mxu1 %v14102_v36  ;;  %v8278_v30 = vrot.slane %v8276_v39, 4  ;;  %v8256_v31 = vrot.slane %v8255_v14, 4  ;;  %v17255_v17 = vrot.slane %v8296_v16, 5  ;;  %v8302_v7 = vrot.slane %v8300_v38, 4  ;;  %v14181_v39 = vld [vmem:[#allocation3 + $0xac] sm:$0xf] }
 0x486   : > { %v8227_v54 = vsel %vm14328_vm2, %v8222_v37, %v17131_v10  ;;  %v8246_v15 = vrot.slane %v8245_v18, 4  ;;  %v8260_v3 = vrot.slane %v8258_v52, 5  ;;  %v8289_v24 = vrot.slane %v8287_v22, 4  ;;  %v7992_v10 = vld [vmem:[#allocation3 + $0xb4] sm:$0xf] }
 0x487   : > { %13171 = vmatmul.mubr.bf16.gmra.mrb[12].mxu1 %v11702_v55  ;;  %v11704_v29 = vcombine.low %v8227_v54, %v8237_v20  ;;  %v8292_v61 = vrot.slane %v8290_v57, 5  ;;  %v8269_v1 = vor.u32 %v8268_v12, %v8265_v41  ;;  %v8279_v11 = vor.u32 %v8278_v30, %v17253_v50  ;;  %v14183_v52 = vld [vmem:[#allocation3 + $0xa4] sm:$0x1] }
 0x488   : > { %13174 = vmatprep.mubr.bf16.mxu1 %v11703_v35  ;;  %13203 = vmatpush3.bf16.msra.mxu1 %v14102_v36  ;;  %v8320_v34 = vshll.u32 %v14181_v39, 16  ;;  %v8324_v51 = vshrl.u32 %v14181_v39, 16  ;;  %v8261_v36 = vsel %vm14328_vm2, %v8256_v31, %v8260_v3  ;;  %v8303_v14 = vor.u32 %v8302_v7, %v17255_v17  ;;  %v14182_v35 = vld [vmem:[#allocation3 + $0x98] sm:$0x1] }
 0x489   : > { %13204 = vmatprep.subr.bf16.mxu1 %v14103_v27  ;;  %v8344_v16 = vshll.u32 %v16748_v13, 16  ;;  %v8348_v38 = vshrl.u32 %v16748_v13, 16  ;;  %v8251_v55 = vsel %vm14328_vm2, %v8246_v15, %v17225_v4  ;;  %v8282_v37 = vshll.u32 %v14182_v35, 16 }
 0x48a   : > { %v8311_v18 = vshrl.u32 %v7989_v47, 16  ;;  %v8314_v20 = vshll.u32 %v7989_v47, 16  ;;  %v8293_v60 = vor.u32 %v8292_v61, %v8289_v24  ;;  %v8306_v22 = vshll.u32 %v14183_v52, 16 }
 0x48b   : > { %v8335_v57 = vshrl.u32 %v7992_v10, 16  ;;  %v8338_v41 = vshll.u32 %v7992_v10, 16  ;;  %v11705_v12 = vcombine.low %v8251_v55, %v8261_v36  ;;  %v8280_v30 = vrot.slane %v8279_v11, 4  ;;  %v7995_v10 = vld [vmem:[#allocation3 + $0xc0] sm:$0xf] }
 0x48c   : > { %13205 = vmatpush3.bf16.msra.mxu1 %v14103_v27  ;;  %v8322_v31 = vrot.slane %v8320_v34, 5  ;;  %v8326_v13 = vrot.slane %v8324_v51, 4  ;;  %v8270_v7 = vrot.slane %v8269_v1, 4  ;;  %v8304_v54 = vrot.slane %v8303_v14, 4  ;;  %v14184_v34 = vld [vmem:[#allocation3 + $0xc4] sm:$0xf] }
 0x48d   : > { %13238 = vmatprep.subr.bf16.mxu1 %v17263_v58  ;;  %v8346_v4 = vrot.slane %v8344_v16, 5  ;;  %v8350_v15 = vrot.slane %v8348_v38, 4  ;;  %v8284_v3 = vrot.slane %v8282_v37, 5  ;;  %v8313_v47 = vrot.slane %v8311_v18, 4  ;;  %v14185_v55 = vld [vmem:[#allocation3 + $0xb0] sm:$0x1] }
 0x48e   : > { %v8316_v27 = vrot.slane %v8314_v20, 5  ;;  %v8294_v24 = vrot.slane %v8293_v60, 4  ;;  %v8308_v61 = vrot.slane %v8306_v22, 5  ;;  %v8337_v39 = vrot.slane %v8335_v57, 4  ;;  %v14186_v57 = vld [vmem:[#allocation3 + $0xbc] sm:$0x1] }
 0x48f   : > { %13175 = vmatmul.mubr.bf16.gmra.mrb[16].mxu1 %v11704_v29  ;;  %v8340_v35 = vrot.slane %v8338_v41, 5  ;;  %v8285_v36 = vsel %vm14328_vm2, %v8280_v30, %v8284_v3  ;;  %v8327_v11 = vor.u32 %v8326_v13, %v8322_v31  ;;  %v8368_v51 = vshll.u32 %v14184_v34, 16 }
 0x490   : > { %13178 = vmatprep.mubr.bf16.mxu1 %v11705_v12  ;;  %v8372_v29 = vshrl.u32 %v14184_v34, 16  ;;  %v8275_v1 = vsel %vm14328_vm2, %v8270_v7, %v17253_v50  ;;  %v8309_v14 = vsel %vm14328_vm2, %v8304_v54, %v8308_v61  ;;  %v8351_v16 = vor.u32 %v8350_v15, %v8346_v4  ;;  %v14188_v34 = vld [vmem:[#allocation3 + $0xc8] sm:$0x1] }
 0x491   : > { %v8317_v38 = vor.u32 %v8316_v27, %v8313_v47  ;;  %v8330_v37 = vshll.u32 %v14185_v55, 16  ;;  %v8359_v18 = vshrl.u32 %v7995_v10, 16  ;;  %v8362_v20 = vshll.u32 %v7995_v10, 16 }
 0x492   : > { %v11706_v60 = vcombine.low %v8275_v1, %v8285_v36  ;;  %v8299_v52 = vsel %vm14328_vm2, %v8294_v24, %v17255_v17  ;;  %v8341_v22 = vor.u32 %v8340_v35, %v8337_v39  ;;  %v8354_v41 = vshll.u32 %v14186_v57, 16  ;;  %v14187_v39 = vld [vmem:[#allocation3 + $0x10] sm:$0xf] }
 0x493   : > { %v11707_v12 = vcombine.low %v8299_v52, %v8309_v14  ;;  %v8328_v30 = vrot.slane %v8327_v11, 4  ;;  %v8370_v50 = vrot.slane %v8368_v51, 5  ;;  %v8374_v13 = vrot.slane %v8372_v29, 4 }
 0x494   : > { %v8352_v7 = vrot.slane %v8351_v16, 4  ;;  %v8318_v54 = vrot.slane %v8317_v38, 4  ;;  %v8332_v15 = vrot.slane %v8330_v37, 5  ;;  %v8361_v3 = vrot.slane %v8359_v18, 4  ;;  %v8704_v18 = vld [vmem:[#allocation3 + $0xc] sm:$0xe] }
 0x495   : > { %v8364_v47 = vrot.slane %v8362_v20, 5  ;;  %v8342_v27 = vrot.slane %v8341_v22, 4  ;;  %v8356_v61 = vrot.slane %v8354_v41, 5  ;;  %v8375_v17 = vor.u32 %v8374_v13, %v8370_v50 }
 0x496   : > { %v8333_v10 = vsel %vm14328_vm2, %v8328_v30, %v8332_v15  ;;  %v8770_v35 = vrot.slane %v14187_v39, 5  ;;  %v8323_v36 = vsel %vm14328_vm2, %v8318_v54, %v8322_v31  ;;  %v8378_v51 = vshll.u32 %v14188_v34, 16  ;;  %v18009_v39 = vld [vmem:[#allocation5_spill] sm:$0xff] }
 0x497   : > { %13179 = vmatmul.mubr.bf16.gmra.mrb[20].mxu1 %v11706_v60  ;;  %v8357_v24 = vsel %vm14328_vm2, %v8352_v7, %v8356_v61  ;;  %v8365_v11 = vor.u32 %v8364_v47, %v8361_v3  ;;  %v11708_v29 = vcombine.low %v8323_v36, %v8333_v10  ;;  %v8347_v1 = vsel %vm14328_vm2, %v8342_v27, %v8346_v4  ;;  %v14189_v60 = vld [vmem:[#allocation3 + $0x1c] sm:$0xf]  ;;  %v14107_v61 = vld [vmem:[%s17742_s3 + $0x198] sm:$0xff]   ;;  %v18011_v36 = vld [vmem:[#allocation6_spill] sm:$0xff] }
 0x498   : > { %13182 = vmatprep.mubr.bf16.mxu1 %v11707_v12  ;;  %v11709_v14 = vcombine.low %v8347_v1, %v8357_v24  ;;  %v8376_v16 = vrot.slane %v8375_v17, 4  ;;  %v8772_v38 = vrot.slane %v8770_v35, 4  ;;  %v8380_v37 = vrot.slane %v8378_v51, 5  ;;  %v18005_v17 = vld [vmem:[#allocation16_spill] sm:$0xff]  ;;  %v18006_v24 = vld [vmem:[#allocation17_spill] sm:$0xff] }
 0x499   : > { %v8366_v55 = vrot.slane %v8365_v11, 4  ;;  %v8773_v20 = vrot.slane %v16834_v28, 5  ;;  %v8777_v52 = vrot.slane %v14189_v60, 5  ;;  %v11719_v22 = vrot.slane %v8704_v18, 9  ;;  %v8705_v28 = vld [vmem:[#allocation3 + $0x18] sm:$0xe] }
 0x49a   : > { %v8381_v31 = vsel %vm14328_vm2, %v8376_v16, %v8380_v37  ;;  %v8780_v7 = vrot.slane %v16842_v33, 5  ;;  %v11720_v54 = vrot.slane %v8705_v28, 9  ;;  %v18002_v27 = vcombine.low %v16624_v46, %v16628_v6  ;;  %v14106_v33 = vld [vmem:[%s17742_s3 + $0x190] sm:$0xff]   ;;  %v14108_v6 = vld [vmem:[%s17742_s3 + $0x1a0] sm:$0xff]   ;;  %v18012_v11 = vld [vmem:[#allocation7_spill] sm:$0xff] }
 0x49b   : > { %v8774_v57 = vsel %vm14634_vm5, %v8772_v38, %v8773_v20  ;;  %v8371_v4 = vsel %vm14328_vm2, %v8366_v55, %v8370_v50  ;;  %v8771_v12 = vsel %vm14634_vm5, %v11719_v22, %v8770_v35  ;;  %v8779_v13 = vrot.slane %v8777_v52, 4  ;;  %v14105_v50 = vld [vmem:[%s17742_s3 + $0x188] sm:$0xff]   ;;  %v14111_v35 = vld [vmem:[%s17742_s3 + $0x1b8] sm:$0xff]   ;;  %v18014_v51 = vld [vmem:[#allocation8_spill] sm:$0xff] }
 0x49c   : > { %v11710_v41 = vcombine.low %v8371_v4, %v8381_v31  ;;  %v11751_v30 = vcombine.low %v8771_v12, %v8774_v57  ;;  %v8778_v3 = vsel %vm14634_vm5, %v11720_v54, %v8777_v52  ;;  %v18003_v10 = vcombine.low %v16638_v45, %v16645_v62  ;;  %v18008_v62 = vld [vmem:[#allocation4_spill] sm:$0xff]  ;;  %v18017_v16 = vld [vmem:[#allocation9_spill] sm:$0xff]  ;;  %v18018_v38 = vld [vmem:[#allocation11_spill] sm:$0xff] }
 0x49d   : > { %v8781_v15 = vsel %vm14634_vm5, %v8779_v13, %v8780_v7  ;;  %v18004_v46 = vcombine.low %v16649_v49, %v16664_v53  ;;  %v18007_v45 = vcombine.low %v18005_v17, %v18006_v24  ;;  %v18010_v49 = vcombine.low %v18008_v62, %v18009_v39  ;;  %v14110_v53 = vld [vmem:[%s17742_s3 + $0x1b0] sm:$0xff]   ;;  %v18021_v18 = vld [vmem:[#allocation13_spill] sm:$0xff]  ;;  %v18023_v31 = vld [vmem:[#allocation14_spill] sm:$0xff] }
 0x49e   : > { %v11752_v47 = vcombine.low %v8778_v3, %v8781_v15  ;;  %v18013_v34 = vcombine.low %v18011_v36, %v18012_v11  ;;  %v18019_v55 = vcombine.low %v18017_v16, %v18018_v38  ;;  %v18020_v37 = vld [vmem:[#allocation12_spill] sm:$0xff]  ;;  %v18024_v60 = vld [vmem:[#allocation15_spill] sm:$0xff]  ;;  %v18026_v22 = vld [vmem:[#allocation18_spill] sm:$0xff]  ;;  %v9647_v11 = vshll.u32 %v16943_v26, 16 }
 0x49f   : > { %13183 = vmatmul.mubr.bf16.gmra.mrb[24].mxu1 %v11708_v29  ;;  %v18015_v29 = vld [vmem:[#allocation10_spill] sm:$0xff]  ;;  %v18022_v20 = vcombine.low %v18020_v37, %v18021_v18  ;;  %v18025_v52 = vcombine.low %v18023_v31, %v18024_v60  ;;  %v18027_v57 = vld [vmem:[#allocation19_spill] sm:$0xff]  ;;  %v18030_v12 = vld [vmem:[#allocation21_spill] sm:$0xff] }
 0x4a0   : > { %13186 = vmatprep.mubr.bf16.mxu1 %v11709_v14  ;;  %v18016_v1 = vcombine.low %v18014_v51, %v18015_v29  ;;  %v14114_v14 = vld [vmem:[%s17742_s3 + $0x1c0] sm:$0xff]   ;;  %v18028_v4 = vcombine.low %v18026_v22, %v18027_v57  ;;  %v18033_v28 = vld [vmem:[#allocation23_spill] sm:$0xff]  ;;  %v14112_v54 = vld [vmem:[#allocation3 + $0x18] sm:$0xff]   ;;  %v9649_v38 = vrot.slane %v9647_v11, 5 }
 0x4a1   : > { %v18032_v13 = vld [vmem:[#allocation22_spill] sm:$0xff]  ;;  %v18035_v15 = vld [vmem:[#allocation24_spill] sm:$0xff]  ;;  %v18036_v3 = vld [vmem:[#allocation25_spill] sm:$0xff] }
 0x4a2   : > { %v18034_v7 = vcombine.low %v18032_v13, %v18033_v28  ;;  %v14119_v17 = vld [vmem:[#allocation3 + $0x54] sm:$0xff]   ;;  %v14122_v39 = vld [vmem:[#allocation3 + $0x6c] sm:$0xff]   ;;  %v9592_v51 = vld [vmem:[#allocation3 + $0x24] sm:$0xf] }
 0x4a3   : > { %v14129_v24 = vld [vmem:[%s17742_s3 + $0x1e8] sm:$0xff]   ;;  %v14132_v62 = vld [vmem:[%s17742_s3 + $0x1f0] sm:$0xff]   ;;  %v14125_v29 = vld [vmem:[#allocation3 + $0x84] sm:$0xff]   ;;  %v9662_v37 = vshrl.u32 %v9592_v51, 16  ;;  %v9665_v18 = vshll.u32 %v9592_v51, 16 }
 0x4a4   : > { %v9589_v36 = vld [vmem:[#allocation3 + $0x18] sm:$0xf]  ;;  %v14127_v16 = vld [vmem:[#allocation3 + $0x90] sm:$0xff]   ;;  %v18039_v13 = vld [vmem:[#allocation26_spill] sm:$0xff] }
 0x4a5   : > { %v18038_v60 = vld [vmem:[#allocation27_spill] sm:$0xff]  ;;  %v9667_v57 = vrot.slane %v9665_v18, 5  ;;  %v9657_v28 = vshll.u32 %v18039_v13, 16 }
 0x4a7   : > { %13187 = vmatmul.mubr.bf16.gmra.mrb[28].mxu1 %v11710_v41  ;;  %v18029_v41 = vld [vmem:[#allocation20_spill] sm:$0xff] }
 0x4a8   : > { %13206 = vmatprep.mubr.bf16.mxu1 %v11751_v30  ;;  %v18031_v30 = vcombine.low %v18029_v41, %v18030_v12  ;;  %v9595_v41 = vld [vmem:[#allocation3 + $0x30] sm:$0xf]  ;;  %v14128_v12 = vld [vmem:[#allocation3 + $0x9c] sm:$0xff]  }
 0x4af   : > { %13207 = vmatmul.mubr.bf16.vlgmr.msra.gmra.mrb[0].mxu1 %v11752_v47  ;;  %v18037_v47 = vcombine.low %v18035_v15, %v18036_v3  ;;  %v9686_v15 = vshrl.u32 %v9595_v41, 16 }
 0x4b0   : > { %13210 = vmatprep.mubr.bf16.mxu1 %v18002_v27  ;;  %13239 = vmatpush3.bf16.msra.mxu1 %v17263_v58  ;;  %v14109_v58 = vld [vmem:[%s17742_s3 + $0x1a8] sm:$0xff]  }
 0x4b1   : > { %13240 = vmatprep.subr.bf16.mxu1 %v14105_v50  ;;  %v14117_v27 = vld [vmem:[%s17742_s3 + $0x1c8] sm:$0xff]  }
 0x4b4   : > { %13241 = vmatpush3.bf16.msra.mxu1 %v14105_v50  ;;  %v14113_v50 = vld [vmem:[#allocation3 + $0x24] sm:$0xff]  }
 0x4b5   : > { %13242 = vmatprep.subr.bf16.mxu1 %v14106_v33 }
 0x4b7   : > { %13211 = vmatmul.mubr.bf16.gmra.mrb[4].mxu1 %v18003_v10  ;;  %v14116_v10 = vld [vmem:[#allocation3 + $0x3c] sm:$0xff]  }
 0x4b8   : > { %13214 = vmatprep.mubr.bf16.mxu1 %v18004_v46  ;;  %13243 = vmatpush3.bf16.msra.mxu1 %v14106_v33  ;;  %v14115_v33 = vld [vmem:[#allocation3 + $0x30] sm:$0xff]   ;;  %v14123_v46 = vld [vmem:[%s17742_s3 + $0x1d8] sm:$0xff]  }
 0x4b9   : > { %13244 = vmatprep.subr.bf16.mxu1 %v14107_v61 }
 0x4bc   : > { %13245 = vmatpush3.bf16.msra.mxu1 %v14107_v61  ;;  %v14120_v61 = vld [vmem:[%s17742_s3 + $0x1d0] sm:$0xff]  }
 0x4bd   : > { %13246 = vmatprep.subr.bf16.mxu1 %v14108_v6 }
 0x4bf   : > { %13215 = vmatmul.mubr.bf16.gmra.mrb[8].mxu1 %v18007_v45  ;;  %v14121_v45 = vld [vmem:[#allocation3 + $0x60] sm:$0xff]  }
 0x4c0   : > { %13218 = vmatprep.mubr.bf16.mxu1 %v18010_v49  ;;  %13247 = vmatpush3.bf16.msra.mxu1 %v14108_v6  ;;  %v14118_v6 = vld [vmem:[#allocation3 + $0x48] sm:$0xff]   ;;  %v14135_v49 = vld [vmem:[%s17742_s3 + $0x1f8] sm:$0xff]  }
 0x4c1   : > { %13248 = vmatprep.subr.bf16.mxu1 %v14109_v58 }
 0x4c4   : > { %13249 = vmatpush3.bf16.msra.mxu1 %v14109_v58  ;;  %v14126_v58 = vld [vmem:[%s17742_s3 + $0x1e0] sm:$0xff]  }
 0x4c5   : > { %13250 = vmatprep.subr.bf16.mxu1 %v14110_v53 }
 0x4c7   : > { %13219 = vmatmul.mubr.bf16.gmra.mrb[12].mxu1 %v18013_v34  ;;  %v9651_v34 = vshrl.u32 %v16943_v26, 16  ;;  %v9664_v26 = vrot.slane %v9662_v37, 4 }
 0x4c8   : > { %13222 = vmatprep.mubr.bf16.mxu1 %v18016_v1  ;;  %13251 = vmatpush3.bf16.msra.mxu1 %v14110_v53  ;;  %v14124_v53 = vld [vmem:[#allocation3 + $0x78] sm:$0xff]   ;;  %v9638_v1 = vshrl.u32 %v9589_v36, 16 }
 0x4c9   : > { %13252 = vmatprep.subr.bf16.mxu1 %v14111_v35 }
 0x4cc   : > { %13253 = vmatpush3.bf16.msra.mxu1 %v14111_v35  ;;  %v17398_v35 = vld [vmem:[%s17742_s3 + $0x200] sm:$0xff]  }
 0x4cd   : > { %13286 = vmatprep.subr.bf16.mxu1 %v14114_v14 }
 0x4cf   : > { %13223 = vmatmul.mubr.bf16.gmra.mrb[16].mxu1 %v18019_v55  ;;  %v9653_v55 = vrot.slane %v9651_v34, 4  ;;  %v14131_v34 = vld [vmem:[#allocation3 + $0xb4] sm:$0xff]  }
 0x4d0   : > { %13226 = vmatprep.mubr.bf16.mxu1 %v18022_v20  ;;  %v9640_v20 = vrot.slane %v9638_v1, 4  ;;  %v18042_v1 = vld [vmem:[#allocation30_spill] sm:$0xff] }
 0x4d1   : > { %v9654_v22 = vor.u32 %v9653_v55, %v9649_v38  ;;  %v14133_v55 = vld [vmem:[#allocation3 + $0xc0] sm:$0xff]  }
 0x4d3   : > { %v9655_v3 = vrot.slane %v9654_v22, 4 }
 0x4d7   : > { %13227 = vmatmul.mubr.bf16.gmra.mrb[20].mxu1 %v18025_v52  ;;  %v9671_v52 = vshll.u32 %v18038_v60, 16 }
 0x4d8   : > { %13230 = vmatprep.mubr.bf16.mxu1 %v18028_v4  ;;  %v9675_v4 = vshrl.u32 %v18038_v60, 16 }
 0x4df   : > { %13231 = vmatmul.mubr.bf16.gmra.mrb[24].mxu1 %v18031_v30 }
 0x4e0   : > { %13234 = vmatprep.mubr.bf16.mxu1 %v18034_v7  ;;  %v14130_v7 = vld [vmem:[#allocation3 + $0xa8] sm:$0xff]  }
 0x4e7   : > { %13235 = vmatmul.mubr.bf16.gmra.mrb[28].mxu1 %v18037_v47  ;;  %v9668_v47 = vor.u32 %v9667_v57, %v9664_v26  ;;  %v18044_v57 = vld [vmem:[#allocation32_spill] sm:$0xff] }
 0x4e8   : > { %13254 = vmatprep.mubr.bf16.mxu1 %v14112_v54  ;;  %v17406_v54 = vrot.slane %v9671_v52, 5  ;;  %v9601_v52 = vld [vmem:[#allocation3 + $0x48] sm:$0xf]  ;;  %v9747_v13 = vshrl.u32 %v18044_v57, 16 }
 0x4ef   : > { %13255 = vmatmul.mubr.bf16.vlgmr.msra.gmra.mrb[0].mxu1 %v14113_v50  ;;  %v9677_v50 = vrot.slane %v9675_v4, 4  ;;  %v9743_v4 = vshll.u32 %v18044_v57, 16 }
 0x4f0   : > { %13258 = vmatprep.mubr.bf16.mxu1 %v14115_v33  ;;  %13287 = vmatpush3.bf16.msra.mxu1 %v14114_v14  ;;  %v9641_v14 = vshll.u32 %v9589_v36, 16  ;;  %v18040_v33 = vld [vmem:[#allocation28_spill] sm:$0xff] }
 0x4f1   : > { %13288 = vmatprep.subr.bf16.mxu1 %v14117_v27 }
 0x4f2   : > { %v9643_v31 = vrot.slane %v9641_v14, 5  ;;  %v9705_v14 = vshll.u32 %v18042_v1, 16 }
 0x4f4   : > { %13289 = vmatpush3.bf16.msra.mxu1 %v14117_v27  ;;  %v9644_v30 = vor.u32 %v9643_v31, %v9640_v20  ;;  %v9689_v27 = vshll.u32 %v9595_v41, 16  ;;  %v18043_v20 = vld [vmem:[#allocation31_spill] sm:$0xff] }
 0x4f5   : > { %13290 = vmatprep.subr.bf16.mxu1 %v14120_v61  ;;  %v9719_v31 = vshll.u32 %v18043_v20, 16  ;;  %v9723_v60 = vshrl.u32 %v18043_v20, 16  ;;  %v17430_v41 = vld [vmem:[#allocation3 + $0xd0] sm:$0xf] }
 0x4f7   : > { %13259 = vmatmul.mubr.bf16.gmra.mrb[4].mxu1 %v14116_v10  ;;  %v9699_v10 = vshrl.u32 %v18040_v33, 16 }
 0x4f8   : > { %13262 = vmatprep.mubr.bf16.mxu1 %v14118_v6  ;;  %13291 = vmatpush3.bf16.msra.mxu1 %v14120_v61  ;;  %v9695_v61 = vshll.u32 %v18040_v33, 16  ;;  %v9659_v6 = vrot.slane %v9657_v28, 5  ;;  %v10358_v28 = vld [vmem:[#allocation3 + $0xcc] sm:$0xe] }
 0x4f9   : > { %13292 = vmatprep.subr.bf16.mxu1 %v14123_v46  ;;  %v9701_v11 = vrot.slane %v9699_v10, 4  ;;  %v11870_v33 = vrot.slane %v10358_v28, 9  ;;  %v17440_v10 = vrot.slane %v9719_v31, 5 }
 0x4fa   : > { %v17416_v36 = vrot.slane %v9695_v61, 5 }
 0x4fc   : > { %13293 = vmatpush3.bf16.msra.mxu1 %v14123_v46  ;;  %v9645_v46 = vrot.slane %v9644_v30, 4  ;;  %v9702_v30 = vor.u32 %v9701_v11, %v17416_v36 }
 0x4fd   : > { %13294 = vmatprep.subr.bf16.mxu1 %v14126_v58 }
 0x4fe   : > { %v9650_v51 = vsel %vm14328_vm2, %v9645_v46, %v9649_v38  ;;  %v9725_v46 = vrot.slane %v9723_v60, 4  ;;  %v9703_v31 = vrot.slane %v9702_v30, 4  ;;  %v18046_v60 = vld [vmem:[#allocation35_spill] sm:$0xff] }
 0x4ff   : > { %13263 = vmatmul.mubr.bf16.gmra.mrb[8].mxu1 %v14119_v17 }
 0x500   : > { %13266 = vmatprep.mubr.bf16.mxu1 %v14121_v45  ;;  %13295 = vmatpush3.bf16.msra.mxu1 %v14126_v58  ;;  %v18041_v58 = vld [vmem:[#allocation29_spill] sm:$0xff]  ;;  %v9598_v45 = vld [vmem:[#allocation3 + $0x3c] sm:$0xf]  ;;  %v9726_v57 = vor.u32 %v9725_v46, %v17440_v10 }
 0x501   : > { %13296 = vmatprep.subr.bf16.mxu1 %v14129_v24  ;;  %v9681_v17 = vshll.u32 %v18041_v58, 16  ;;  %v9713_v18 = vshll.u32 %v9598_v45, 16  ;;  %v14134_v58 = vld [vmem:[#allocation3 + $0xcc] sm:$0xff]  }
 0x503   : > { %v9715_v61 = vrot.slane %v9713_v18, 5 }
 0x504   : > { %13297 = vmatpush3.bf16.msra.mxu1 %v14129_v24  ;;  %v9688_v24 = vrot.slane %v9686_v15, 4 }
 0x505   : > { %13298 = vmatprep.subr.bf16.mxu1 %v14132_v62 }
 0x507   : > { %13267 = vmatmul.mubr.bf16.gmra.mrb[12].mxu1 %v14122_v39  ;;  %v17413_v39 = vrot.slane %v9668_v47, 4  ;;  %v18045_v47 = vld [vmem:[#allocation38_spill] sm:$0xff] }
 0x508   : > { %13270 = vmatprep.mubr.bf16.mxu1 %v14124_v53  ;;  %13299 = vmatpush3.bf16.msra.mxu1 %v14132_v62  ;;  %v9660_v62 = vsel %vm14328_vm2, %v9655_v3, %v9659_v6  ;;  %v9691_v53 = vrot.slane %v9689_v27, 5  ;;  %v9771_v27 = vshrl.u32 %v18045_v47, 16 }
 0x509   : > { %13300 = vmatprep.subr.bf16.mxu1 %v14135_v49  ;;  %v11831_v37 = vcombine.low %v9650_v51, %v9660_v62  ;;  %v9674_v22 = vsel %vm14328_vm2, %v17413_v39, %v17406_v54  ;;  %v9749_v39 = vrot.slane %v9747_v13, 4 }
 0x50a   : > { %v9692_v26 = vor.u32 %v9691_v53, %v9688_v24  ;;  %v9737_v24 = vshll.u32 %v9601_v52, 16  ;;  %v9773_v1 = vrot.slane %v9771_v27, 4 }
 0x50c   : > { %13301 = vmatpush3.bf16.msra.mxu1 %v14135_v49  ;;  %v9678_v49 = vor.u32 %v9677_v50, %v17406_v54  ;;  %v9604_v54 = vld [vmem:[#allocation3 + $0x54] sm:$0xf]  ;;  %v9767_v50 = vshll.u32 %v18045_v47, 16  ;;  %v9693_v20 = vrot.slane %v9692_v26, 4 }
 0x50d   : > { %13334 = vmatprep.subr.bf16.mxu1 %v17398_v35  ;;  %v9761_v53 = vshll.u32 %v9604_v54, 16 }
 0x50e   : > { %v9679_v38 = vrot.slane %v9678_v49, 4  ;;  %v9758_v49 = vshrl.u32 %v9604_v54, 16  ;;  %v17452_v51 = vrot.slane %v9767_v50, 5  ;;  %v14190_v50 = vld [vmem:[#allocation3 + $0x50] sm:$0x1] }
 0x50f   : > { %13271 = vmatmul.mubr.bf16.gmra.mrb[16].mxu1 %v14125_v29  ;;  %v17420_v29 = vrot.slane %v9681_v17, 5  ;;  %v9734_v17 = vshrl.u32 %v9601_v52, 16  ;;  %v9729_v52 = vshll.u32 %v18046_v60, 16  ;;  %v9753_v27 = vshll.u32 %v14190_v50, 16 }
 0x510   : > { %13274 = vmatprep.mubr.bf16.mxu1 %v14127_v16  ;;  %v9710_v16 = vshrl.u32 %v9598_v45, 16  ;;  %v17442_v45 = vrot.slane %v9743_v4, 5  ;;  %v9739_v4 = vrot.slane %v9737_v24, 5  ;;  %v9760_v28 = vrot.slane %v9758_v49, 4 }
 0x511   : > { %v9684_v18 = vsel %vm14328_vm2, %v9679_v38, %v17420_v29  ;;  %v9774_v54 = vor.u32 %v9773_v1, %v17452_v51  ;;  %v18047_v29 = vld [vmem:[#allocation41_spill] sm:$0xff]  ;;  %v9731_v46 = vrot.slane %v9729_v52, 5 }
 0x512   : > { %v9712_v3 = vrot.slane %v9710_v16, 4  ;;  %v9607_v16 = vld [vmem:[#allocation3 + $0x60] sm:$0xf]  ;;  %v9750_v13 = vor.u32 %v9749_v39, %v17442_v45  ;;  %v9791_v38 = vshll.u32 %v18047_v29, 16  ;;  %v9795_v26 = vshrl.u32 %v18047_v29, 16 }
 0x513   : > { %v9785_v47 = vshll.u32 %v9607_v16, 16  ;;  %v11832_v30 = vcombine.low %v9674_v22, %v9684_v18  ;;  %v14137_v22 = vld [vmem:[%s17742_s3 + $0x208] sm:$0xff]  }
 0x514   : > { %v9716_v42 = vor.u32 %v9715_v61, %v9712_v3  ;;  %v9698_v3 = vsel %vm14328_vm2, %v9693_v20, %v17416_v36  ;;  %v9727_v61 = vrot.slane %v9726_v57, 4  ;;  %v9751_v24 = vrot.slane %v9750_v13, 4  ;;  %v9613_v13 = vld [vmem:[#allocation3 + $0x78] sm:$0xf] }
 0x515   : > { %v9775_v36 = vrot.slane %v9774_v54, 4  ;;  %v9787_v1 = vrot.slane %v9785_v47, 5  ;;  %v9755_v20 = vrot.slane %v9753_v27, 5  ;;  %v9833_v50 = vshll.u32 %v9613_v13, 16 }
 0x517   : > { %13275 = vmatmul.mubr.bf16.gmra.mrb[20].mxu1 %v14128_v12  ;;  %v17432_v12 = vld [vmem:[#allocation3 + $0xd4] sm:$0x1] }
 0x518   : > { %13278 = vmatprep.mubr.bf16.mxu1 %v14130_v7  ;;  %v10514_v7 = vrot.slane %v17430_v41, 5  ;;  %v10517_v15 = vrot.slane %v17432_v12, 5 }
 0x51a   : > { %v10516_v6 = vrot.slane %v10514_v7, 4  ;;  %v17446_v62 = vsel %vm14634_vm5, %v11870_v33, %v10514_v7  ;;  %v9763_v7 = vrot.slane %v9761_v53, 5  ;;  %v9717_v33 = vrot.slane %v9716_v42, 4  ;;  %v9610_v53 = vld [vmem:[#allocation3 + $0x6c] sm:$0xf] }
 0x51c   : > { %v17450_v11 = vsel %vm14634_vm5, %v10516_v6, %v10517_v15  ;;  %v9782_v15 = vshrl.u32 %v9607_v16, 16  ;;  %v18048_v6 = vld [vmem:[#allocation39_spill] sm:$0xff]  ;;  %v9764_v39 = vor.u32 %v9763_v7, %v9760_v28  ;;  %v17474_v16 = vrot.slane %v9791_v38, 5 }
 0x51d   : > { %v9722_v42 = vsel %vm14328_vm2, %v9717_v33, %v17440_v10  ;;  %v9732_v28 = vsel %vm14328_vm2, %v9727_v61, %v9731_v46  ;;  %v14138_v10 = vld [vmem:[%s17742_s3 + $0x210] sm:$0xff]  }
 0x51e   : > { %v9784_v49 = vrot.slane %v9782_v15, 4  ;;  %v9756_v15 = vsel %vm14328_vm2, %v9751_v24, %v9755_v20  ;;  %v9765_v54 = vrot.slane %v9764_v39, 4  ;;  %v14192_v61 = vld [vmem:[#allocation3 + $0x7c] sm:$0xf] }
 0x51f   : > { %13279 = vmatmul.mubr.bf16.gmra.mrb[24].mxu1 %v14131_v34  ;;  %v9707_v34 = vrot.slane %v9705_v14, 5  ;;  %v9736_v14 = vrot.slane %v9734_v17, 4  ;;  %v9839_v46 = vshll.u32 %v14192_v61, 16 }
 0x520   : > { %13282 = vmatprep.mubr.bf16.mxu1 %v14133_v55  ;;  %v11902_v55 = vcombine.low %v17446_v62, %v17450_v11  ;;  %v9788_v29 = vor.u32 %v9787_v1, %v9784_v49  ;;  %v9770_v24 = vsel %vm14328_vm2, %v9765_v54, %v17452_v51  ;;  %v14139_v1 = vld [vmem:[%s17742_s3 + $0x218] sm:$0xff]  }
 0x521   : > { %v9740_v17 = vor.u32 %v9739_v4, %v9736_v14  ;;  %v9806_v14 = vshrl.u32 %v9610_v53, 16  ;;  %v9809_v4 = vshll.u32 %v9610_v53, 16 }
 0x522   : > { %v9789_v53 = vrot.slane %v9788_v29, 4  ;;  %v14195_v29 = vld [vmem:[#allocation3 + $0x94] sm:$0xf] }
 0x523   : > { %v9741_v7 = vrot.slane %v9740_v17, 4  ;;  %v9808_v27 = vrot.slane %v9806_v14, 4  ;;  %v9811_v33 = vrot.slane %v9809_v4, 5 }
 0x525   : > { %v9746_v17 = vsel %vm14328_vm2, %v9741_v7, %v17442_v45  ;;  %v9835_v45 = vrot.slane %v9833_v50, 5 }
 0x526   : > { %v11835_v39 = vcombine.low %v9746_v17, %v9756_v15  ;;  %v14140_v15 = vld [vmem:[%s17742_s3 + $0x220] sm:$0xff]  }
 0x527   : > { %13283 = vmatmul.mubr.bf16.gmra.mrb[28].mxu1 %v14134_v58  ;;  %v9777_v58 = vshll.u32 %v18048_v6, 16  ;;  %v9843_v6 = vshrl.u32 %v14192_v61, 16  ;;  %v14196_v61 = vld [vmem:[#allocation3 + $0x80] sm:$0x1] }
 0x528   : > { %13302 = vmatprep.mubr.bf16.mxu1 %v11831_v37  ;;  %v9708_v37 = vsel %vm14328_vm2, %v9703_v31, %v9707_v34  ;;  %v9797_v34 = vrot.slane %v9795_v26, 4  ;;  %v18049_v31 = vld [vmem:[#allocation44_spill] sm:$0xff] }
 0x529   : > { %v11833_v18 = vcombine.low %v9698_v3, %v9708_v37  ;;  %v9815_v60 = vshll.u32 %v18049_v31, 16  ;;  %v9819_v52 = vshrl.u32 %v18049_v31, 16  ;;  %v9779_v57 = vrot.slane %v9777_v58, 5 }
 0x52a   : > { %v9798_v38 = vor.u32 %v9797_v34, %v17474_v16  ;;  %v9830_v37 = vshrl.u32 %v9613_v13, 16  ;;  %v11834_v58 = vcombine.low %v9722_v42, %v9732_v28  ;;  %v9616_v34 = vld [vmem:[#allocation3 + $0x84] sm:$0xf]  ;;  %v17504_v42 = vrot.slane %v9839_v46, 5  ;;  %v14194_v13 = vld [vmem:[#allocation3 + $0x88] sm:$0xf] }
 0x52b   : > { %v9780_v47 = vsel %vm14328_vm2, %v9775_v36, %v9779_v57  ;;  %v9821_v3 = vrot.slane %v9819_v52, 4  ;;  %v14193_v52 = vld [vmem:[#allocation3 + $0x74] sm:$0x1]  ;;  %v9845_v57 = vrot.slane %v9843_v6, 4  ;;  %v9854_v14 = vshrl.u32 %v9616_v34, 16 }
 0x52c   : > { %v11836_v49 = vcombine.low %v9770_v24, %v9780_v47  ;;  %v9832_v31 = vrot.slane %v9830_v37, 4  ;;  %v9825_v51 = vshll.u32 %v14193_v52, 16  ;;  %v9857_v4 = vshll.u32 %v9616_v34, 16 }
 0x52d   : > { %v9863_v28 = vshll.u32 %v14194_v13, 16  ;;  %v9867_v7 = vshrl.u32 %v14194_v13, 16  ;;  %v9849_v46 = vshll.u32 %v14196_v61, 16  ;;  %v9856_v6 = vrot.slane %v9854_v14, 4 }
 0x52e   : > { %v9836_v37 = vor.u32 %v9835_v45, %v9832_v31 }
 0x52f   : > { %13303 = vmatmul.mubr.bf16.vlgmr.msra.gmra.mrb[0].mxu1 %v11832_v30  ;;  %v17492_v30 = vrot.slane %v9815_v60, 5  ;;  %v9812_v60 = vor.u32 %v9811_v33, %v9808_v27  ;;  %v9827_v27 = vrot.slane %v9825_v51, 5  ;;  %v9846_v33 = vor.u32 %v9845_v57, %v17504_v42 }
 0x530   : > { %13306 = vmatprep.mubr.bf16.mxu1 %v11833_v18  ;;  %13335 = vmatpush3.bf16.msra.mxu1 %v17398_v35  ;;  %v14191_v35 = vld [vmem:[#allocation3 + $0x68] sm:$0x1]  ;;  %v9799_v18 = vrot.slane %v9798_v38, 4  ;;  %v9887_v38 = vshll.u32 %v14195_v29, 16  ;;  %v17515_v17 = vrot.slane %v9863_v28, 5  ;;  %v9869_v24 = vrot.slane %v9867_v7, 4 }
 0x531   : > { %13336 = vmatprep.subr.bf16.mxu1 %v14137_v22  ;;  %v9801_v26 = vshll.u32 %v14191_v35, 16  ;;  %v9822_v20 = vor.u32 %v9821_v3, %v17492_v30  ;;  %v9891_v35 = vshrl.u32 %v14195_v29, 16  ;;  %v9813_v50 = vrot.slane %v9812_v60, 4  ;;  %v14197_v7 = vld [vmem:[#allocation3 + $0x8c] sm:$0x1] }
 0x532   : > { %v17517_v34 = vrot.slane %v9887_v38, 5  ;;  %v9837_v31 = vrot.slane %v9836_v37, 4  ;;  %v9870_v52 = vor.u32 %v9869_v24, %v17515_v17  ;;  %v9625_v38 = vld [vmem:[#allocation3 + $0xa8] sm:$0xf] }
 0x533   : > { %v9803_v36 = vrot.slane %v9801_v26, 5  ;;  %v9794_v26 = vsel %vm14328_vm2, %v9789_v53, %v17474_v16  ;;  %v9823_v3 = vrot.slane %v9822_v20, 4  ;;  %v9818_v45 = vsel %vm14328_vm2, %v9813_v50, %v17492_v30 }
 0x534   : > { %13337 = vmatpush3.bf16.msra.mxu1 %v14137_v22  ;;  %v9619_v22 = vld [vmem:[#allocation3 + $0x90] sm:$0xf]  ;;  %v9842_v30 = vsel %vm14328_vm2, %v9837_v31, %v17504_v42  ;;  %v9929_v24 = vshll.u32 %v9625_v38, 16 }
 0x535   : > { %13338 = vmatprep.subr.bf16.mxu1 %v14138_v10  ;;  %v9878_v54 = vshrl.u32 %v9619_v22, 16  ;;  %v9881_v47 = vshll.u32 %v9619_v22, 16  ;;  %v9847_v22 = vrot.slane %v9846_v33, 4  ;;  %v9871_v33 = vrot.slane %v9870_v52, 4 }
 0x537   : > { %13307 = vmatmul.mubr.bf16.gmra.mrb[4].mxu1 %v11834_v58  ;;  %v9859_v58 = vrot.slane %v9857_v4, 5  ;;  %v9880_v16 = vrot.slane %v9878_v54, 4  ;;  %v9883_v53 = vrot.slane %v9881_v47, 5  ;;  %v9851_v4 = vrot.slane %v9849_v46, 5  ;;  %v14198_v47 = vld [vmem:[#allocation3 + $0xa0] sm:$0xf] }
 0x538   : > { %13310 = vmatprep.mubr.bf16.mxu1 %v11835_v39  ;;  %13339 = vmatpush3.bf16.msra.mxu1 %v14138_v10  ;;  %v9804_v10 = vsel %vm14328_vm2, %v9799_v18, %v9803_v36  ;;  %v9622_v39 = vld [vmem:[#allocation3 + $0x9c] sm:$0xf]  ;;  %v9893_v36 = vrot.slane %v9891_v35, 4  ;;  %v14141_v18 = vld [vmem:[%s17742_s3 + $0x228] sm:$0xff]   ;;  %v9873_v54 = vshll.u32 %v14197_v7, 16  ;;  %v9915_v29 = vshrl.u32 %v14198_v47, 16 }
 0x539   : > { %13340 = vmatprep.subr.bf16.mxu1 %v14139_v1  ;;  %v11837_v20 = vcombine.low %v9794_v26, %v9804_v10  ;;  %v9860_v60 = vor.u32 %v9859_v58, %v9856_v6  ;;  %v9902_v51 = vshrl.u32 %v9622_v39, 16  ;;  %v9905_v57 = vshll.u32 %v9622_v39, 16  ;;  %v14199_v26 = vld [vmem:[#allocation3 + $0x98] sm:$0x1]  ;;  %v14143_v39 = vld [vmem:[%s17742_s3 + $0x238] sm:$0xff]  }
 0x53a   : > { %v9884_v13 = vor.u32 %v9883_v53, %v9880_v16  ;;  %v9894_v28 = vor.u32 %v9893_v36, %v17517_v34  ;;  %v9852_v35 = vsel %vm14328_vm2, %v9847_v22, %v9851_v4  ;;  %v9897_v10 = vshll.u32 %v14199_v26, 16  ;;  %v14202_v7 = vld [vmem:[#allocation3 + $0xb8] sm:$0xf] }
 0x53b   : > { %v9904_v61 = vrot.slane %v9902_v51, 4  ;;  %v9907_v46 = vrot.slane %v9905_v57, 5  ;;  %v9926_v58 = vshrl.u32 %v9625_v38, 16  ;;  %v11839_v16 = vcombine.low %v9842_v30, %v9852_v35  ;;  %v14201_v51 = vld [vmem:[#allocation3 + $0xa4] sm:$0x1] }
 0x53c   : > { %13341 = vmatpush3.bf16.msra.mxu1 %v14139_v1  ;;  %v9828_v1 = vsel %vm14328_vm2, %v9823_v3, %v9827_v27  ;;  %v14200_v3 = vld [vmem:[#allocation3 + $0xac] sm:$0xf]  ;;  %v9861_v27 = vrot.slane %v9860_v60, 4  ;;  %v9885_v42 = vrot.slane %v9884_v13, 4  ;;  %v9895_v6 = vrot.slane %v9894_v28, 4 }
 0x53d   : > { %13342 = vmatprep.subr.bf16.mxu1 %v14140_v15  ;;  %v11838_v14 = vcombine.low %v9818_v45, %v9828_v1  ;;  %v9935_v37 = vshll.u32 %v14200_v3, 16  ;;  %v9939_v50 = vshrl.u32 %v14200_v3, 16  ;;  %v9875_v53 = vrot.slane %v9873_v54, 5  ;;  %v14203_v38 = vld [vmem:[#allocation3 + $0xc4] sm:$0xf] }
 0x53e   : > { %v9899_v1 = vrot.slane %v9897_v10, 5  ;;  %v9866_v22 = vsel %vm14328_vm2, %v9861_v27, %v17515_v17  ;;  %v9908_v52 = vor.u32 %v9907_v46, %v9904_v61  ;;  %v9921_v57 = vshll.u32 %v14201_v51, 16  ;;  %v14204_v27 = vld [vmem:[#allocation3 + $0xb0] sm:$0x1] }
 0x53f   : > { %13311 = vmatmul.mubr.bf16.gmra.mrb[8].mxu1 %v11836_v49  ;;  %v14142_v49 = vld [vmem:[%s17742_s3 + $0x230] sm:$0xff]   ;;  %v17542_v31 = vrot.slane %v9935_v37, 5  ;;  %v9941_v45 = vrot.slane %v9939_v50, 4  ;;  %v9876_v60 = vsel %vm14328_vm2, %v9871_v33, %v9875_v53  ;;  %v9928_v13 = vrot.slane %v9926_v58, 4 }
 0x540   : > { %13314 = vmatprep.mubr.bf16.mxu1 %v11837_v20  ;;  %13343 = vmatpush3.bf16.msra.mxu1 %v14140_v15  ;;  %v9911_v15 = vshll.u32 %v14198_v47, 16  ;;  %v9917_v20 = vrot.slane %v9915_v29, 4  ;;  %v9900_v4 = vsel %vm14328_vm2, %v9895_v6, %v9899_v1  ;;  %v9931_v28 = vrot.slane %v9929_v24, 5 }
 0x541   : > { %13344 = vmatprep.subr.bf16.mxu1 %v14141_v18  ;;  %v9959_v54 = vshll.u32 %v14202_v7, 16  ;;  %v9963_v47 = vshrl.u32 %v14202_v7, 16  ;;  %v9942_v29 = vor.u32 %v9941_v45, %v17542_v31  ;;  %v9983_v35 = vshll.u32 %v14203_v38, 16  ;;  %v14205_v7 = vld [vmem:[#allocation3 + $0xbc] sm:$0x1] }
 0x542   : > { %v17540_v36 = vrot.slane %v9911_v15, 5  ;;  %v9631_v15 = vld [vmem:[#allocation3 + $0xc0] sm:$0xf]  ;;  %v9987_v26 = vshrl.u32 %v14203_v38, 16  ;;  %v9909_v3 = vrot.slane %v9908_v52, 4  ;;  %v9923_v37 = vrot.slane %v9921_v57, 5 }
 0x543   : > { %v9932_v50 = vor.u32 %v9931_v28, %v9928_v13  ;;  %v9945_v33 = vshll.u32 %v14204_v27, 16  ;;  %v9974_v61 = vshrl.u32 %v9631_v15, 16  ;;  %v9977_v46 = vshll.u32 %v9631_v15, 16 }
 0x544   : > { %13345 = vmatpush3.bf16.msra.mxu1 %v14141_v18  ;;  %v9628_v18 = vld [vmem:[#allocation3 + $0xb4] sm:$0xf]  ;;  %v9918_v30 = vor.u32 %v9917_v20, %v17540_v36  ;;  %v9961_v24 = vrot.slane %v9959_v54, 5  ;;  %v9943_v53 = vrot.slane %v9942_v29, 4  ;;  %v9985_v1 = vrot.slane %v9983_v35, 5 }
 0x545   : > { %13346 = vmatprep.subr.bf16.mxu1 %v14142_v49  ;;  %v9950_v17 = vshrl.u32 %v9628_v18, 16  ;;  %v9989_v45 = vrot.slane %v9987_v26, 4  ;;  %v9933_v52 = vrot.slane %v9932_v50, 4  ;;  %v9947_v51 = vrot.slane %v9945_v33, 5  ;;  %v14206_v26 = vld [vmem:[#allocation3 + $0xc8] sm:$0x1] }
 0x546   : > { %v9919_v6 = vrot.slane %v9918_v30, 4  ;;  %v9976_v57 = vrot.slane %v9974_v61, 4  ;;  %v9969_v54 = vshll.u32 %v14205_v7, 16  ;;  %v18060_v7 = vld [vmem:[#allocation45_spill] sm:$0xff] }
 0x547   : > { %13315 = vmatmul.mubr.bf16.gmra.mrb[12].mxu1 %v11838_v14  ;;  %v9890_v14 = vsel %vm14328_vm2, %v9885_v42, %v17517_v34  ;;  %v11840_v34 = vcombine.low %v9866_v22, %v9876_v60  ;;  %v9634_v42 = vld [vmem:[#allocation3 + $0xcc] sm:$0xf]  ;;  %v9952_v58 = vrot.slane %v9950_v17, 4  ;;  %v10011_v60 = vshrl.u32 %v17430_v41, 16 }
 0x548   : > { %13318 = vmatprep.mubr.bf16.mxu1 %v11839_v16  ;;  %13347 = vmatpush3.bf16.msra.mxu1 %v14142_v49  ;;  %v9953_v49 = vshll.u32 %v9628_v18, 16  ;;  %v11841_v10 = vcombine.low %v9890_v14, %v9900_v4  ;;  %v9965_v16 = vrot.slane %v9963_v47, 4  ;;  %v9998_v18 = vshrl.u32 %v9634_v42, 16 }
 0x549   : > { %13348 = vmatprep.subr.bf16.mxu1 %v14143_v39  ;;  %v10001_v22 = vshll.u32 %v9634_v42, 16  ;;  %v9979_v14 = vrot.slane %v9977_v46, 5  ;;  %v9914_v4 = vsel %vm14328_vm2, %v9909_v3, %v17540_v36  ;;  %v9924_v13 = vsel %vm14328_vm2, %v9919_v6, %v9923_v37 }
 0x54a   : > { %v9955_v20 = vrot.slane %v9953_v49, 5  ;;  %v9966_v28 = vor.u32 %v9965_v16, %v9961_v24  ;;  %v9948_v30 = vsel %vm14328_vm2, %v9943_v53, %v9947_v51  ;;  %v9990_v47 = vor.u32 %v9989_v45, %v9985_v1  ;;  %v18050_v51 = vld [vmem:[#allocation33_spill] sm:$0xff] }
 0x54b   : > { %v10003_v15 = vrot.slane %v10001_v22, 5  ;;  %v10013_v49 = vrot.slane %v10011_v60, 4  ;;  %v11842_v38 = vcombine.low %v9914_v4, %v9924_v13  ;;  %v9938_v36 = vsel %vm14328_vm2, %v9933_v52, %v17542_v31  ;;  %v18054_v4 = vld [vmem:[#allocation37_spill] sm:$0xff] }
 0x54c   : > { %13349 = vmatpush3.bf16.msra.mxu1 %v14143_v39  ;;  %v10007_v39 = vshll.u32 %v17430_v41, 16  ;;  %v9956_v17 = vor.u32 %v9955_v20, %v9952_v58  ;;  %v10000_v41 = vrot.slane %v9998_v18, 4  ;;  %v9980_v35 = vor.u32 %v9979_v14, %v9976_v57  ;;  %v18053_v14 = vld [vmem:[#allocation36_spill] sm:$0xff] }
 0x54d   : > { %v9967_v3 = vrot.slane %v9966_v28, 4  ;;  %v9971_v37 = vrot.slane %v9969_v54, 5  ;;  %v9991_v50 = vrot.slane %v9990_v47, 4  ;;  %v10017_v46 = vshll.u32 %v17432_v12, 16  ;;  %v18057_v28 = vld [vmem:[#allocation42_spill] sm:$0xff]  ;;  %v18063_v47 = vld [vmem:[#allocation47_spill] sm:$0xff] }
 0x54e   : > { %v10009_v29 = vrot.slane %v10007_v39, 5  ;;  %v9957_v27 = vrot.slane %v9956_v17, 4  ;;  %v10004_v33 = vor.u32 %v10003_v15, %v10000_v41  ;;  %v9981_v42 = vrot.slane %v9980_v35, 4  ;;  %v18059_v17 = vld [vmem:[#allocation43_spill] sm:$0xff] }
 0x54f   : > { %13319 = vmatmul.mubr.bf16.gmra.mrb[16].mxu1 %v11840_v34  ;;  %v9993_v34 = vshll.u32 %v14206_v26, 16  ;;  %v9972_v58 = vsel %vm14328_vm2, %v9967_v3, %v9971_v37  ;;  %v10019_v45 = vrot.slane %v10017_v46, 5  ;;  %v18055_v13 = vcombine.low %v18053_v14, %v18054_v4  ;;  %v18070_v35 = vld [vmem:[#allocation51_spill] sm:$0xff]  ;;  %v18074_v3 = vld [vmem:[#allocation53_spill] sm:$0xff]  ;;  %v18075_v37 = vld [vmem:[#allocation54_spill] sm:$0xff] }
 0x550   : > { %13322 = vmatprep.mubr.bf16.mxu1 %v11841_v10  ;;  %v11843_v10 = vcombine.low %v9938_v36, %v9948_v30  ;;  %v10014_v61 = vor.u32 %v10013_v49, %v10009_v29  ;;  %v9962_v16 = vsel %vm14328_vm2, %v9957_v27, %v9961_v24  ;;  %v10005_v53 = vrot.slane %v10004_v33, 4  ;;  %v18051_v24 = vld [vmem:[#allocation34_spill] sm:$0xff]  ;;  %v18067_v49 = vld [vmem:[#allocation49_spill] sm:$0xff] }
 0x551   : > { %v9995_v6 = vrot.slane %v9993_v34, 5  ;;  %v11844_v18 = vcombine.low %v9962_v16, %v9972_v58  ;;  %v9986_v22 = vsel %vm14328_vm2, %v9981_v42, %v9985_v1  ;;  %v18052_v57 = vcombine.low %v18050_v51, %v18051_v24  ;;  %v18056_v1 = vld [vmem:[#allocation40_spill] sm:$0xff]  ;;  %v18069_v36 = vld [vmem:[#allocation50_spill] sm:$0xff] }
 0x552   : > { %v10015_v20 = vrot.slane %v10014_v61, 4  ;;  %v10010_v12 = vsel %vm14328_vm2, %v10005_v53, %v10009_v29  ;;  %v18058_v30 = vcombine.low %v18056_v1, %v18057_v28  ;;  %v18061_v54 = vcombine.low %v18059_v17, %v18060_v7  ;;  %v18066_v29 = vld [vmem:[#allocation48_spill] sm:$0xff]  ;;  %v11917_v33 = vld [vmem:[%s14269_s29 + $0x61] sm:$0xff] }
 0x553   : > { %v9996_v31 = vsel %vm14328_vm2, %v9991_v50, %v9995_v6  ;;  %v18064_v41 = vcombine.low %v18062_v5, %v18063_v47  ;;  %v18065_v15 = vcombine.low %v17071_v44, %v17078_v19  ;;  %v18071_v26 = vcombine.low %v18069_v36, %v18070_v35  ;;  %v18072_v34 = vld [vmem:[#allocation52_spill] sm:$0xff]  ;;  %v11920_v17 = vld [vmem:[%s14269_s29 + $0x81] sm:$0xff] }
 0x554   : > { %v11845_v39 = vcombine.low %v9986_v22, %v9996_v31  ;;  %v10020_v60 = vsel %vm14328_vm2, %v10015_v20, %v10019_v45  ;;  %v18076_v50 = vcombine.low %v18074_v3, %v18075_v37  ;;  %v18077_v44 = vcombine.low %v17140_v59, %v17144_v56  ;;  %v11913_v59 = vld [vmem:[%s14269_s29 + $0x31] sm:$0xff]  ;;  %v11915_v42 = vld [vmem:[%s14269_s29 + $0x49] sm:$0xff] }
 0x555   : > { %v11846_v52 = vcombine.low %v10010_v12, %v10020_v60  ;;  %v18078_v19 = vcombine.low %v17148_v32, %v17154_v8  ;;  %v11918_v31 = vld [vmem:[%s14269_s29 + $0x69] sm:$0xff]  ;;  %v11916_v45 = vld [vmem:[%s14269_s29 + $0x51] sm:$0xff] }
 0x556   : > { %v11924_v37 = vld [vmem:[%s14269_s29 + $0xb1] sm:$0xff] }
 0x557   : > { %13323 = vmatmul.mubr.bf16.gmra.mrb[20].mxu1 %v11842_v38  ;;  %v18068_v38 = vcombine.low %v18066_v29, %v18067_v49 }
 0x558   : > { %13326 = vmatprep.mubr.bf16.mxu1 %v11843_v10  ;;  %v18073_v10 = vcombine.low %v17113_v48, %v18072_v34  ;;  %v17632_v48 = vld [vmem:[%s17743_s4] ss:$0 sm:$0xff] }
 0x55f   : > { %13327 = vmatmul.mubr.bf16.gmra.mrb[24].mxu1 %v11844_v18 }
 0x560   : > { %13330 = vmatprep.mubr.bf16.mxu1 %v11845_v39 }
 0x567   : > { %13331 = vmatmul.mubr.bf16.gmra.mrb[28].mxu1 %v11846_v52  ;;  %v11921_v52 = vld [vmem:[%s14269_s29 + $0x91] sm:$0xff] }
 0x568   : > { %13350 = vmatprep.mubr.bf16.mxu1 %v18052_v57  ;;  %v11919_v57 = vld [vmem:[%s14269_s29 + $0x79] sm:$0xff] }
 0x56f   : > { %13351 = vmatmul.mubr.bf16.vlgmr.msra.gmra.mrb[0].mxu1 %v18055_v13  ;;  %v11922_v13 = vld [vmem:[%s14269_s29 + $0x99] sm:$0xff] }
 0x570   : > { %13354 = vmatprep.mubr.bf16.mxu1 %v18058_v30 }
 0x577   : > { %13355 = vmatmul.mubr.bf16.gmra.mrb[4].mxu1 %v18061_v54 }
 0x578   : > { %13358 = vmatprep.mubr.bf16.mxu1 %v18064_v41 }
 0x57f   : > { %13359 = vmatmul.mubr.bf16.gmra.mrb[8].mxu1 %v18065_v15  ;;  %v11925_v15 = vld [vmem:[%s14269_s29 + $0xc1] sm:$0xff] }
 0x580   : > { %13362 = vmatprep.mubr.bf16.mxu1 %v18068_v38  ;;  %v11923_v38 = vld [vmem:[%s14269_s29 + $0xa9] sm:$0xff] }
 0x587   : > { %13363 = vmatmul.mubr.bf16.gmra.mrb[12].mxu1 %v18071_v26  ;;  %v11926_v26 = vld [vmem:[%s14269_s29 + $0xc9] sm:$0xff] }
 0x588   : > { %13366 = vmatprep.mubr.bf16.mxu1 %v18073_v10 }
 0x58f   : > { %13367 = vmatmul.mubr.bf16.gmra.mrb[16].mxu1 %v18076_v50 }
 0x590   : > { %13370 = vmatprep.mubr.bf16.mxu1 %v18077_v44 }
 0x597   : > { %13371 = vmatmul.mubr.bf16.gmra.mrb[20].mxu1 %v18078_v19 }
 0x598   : > { %13374 = vmatprep.mubr.bf16.mxu1 %v11899_v2  ;;  %v11914_v2 = vld [vmem:[%s14269_s29 + $0x39] sm:$0xff] }
 0x59f   : > { %13375 = vmatmul.mubr.bf16.gmra.mrb[24].mxu1 %v11900_v23 }
 0x5a0   : > { %13378 = vmatprep.mubr.bf16.mxu1 %v11901_v63 }
 0x5a7   : > { %13379 = vmatmul.mubr.bf16.gmra.mrb[28].mxu1 %v11902_v55 }
 0x642   : > { %v13352_v8 = vpop.f32.mrb[0].mxu1 }
 0x643   : > { %v10883_v56 = vadd.f32 %v13352_v8, %v17632_v48  ;;  %v10682_v32 = vpop.f32.mrb[1].mxu1 }
 0x644   : > { %v10881_v25 = vadd.f32 %v17632_v48, %v10682_v32  ;;  %v13353_v43 = vpop.f32.mrb[2].mxu1 }
 0x645   : > { %v10915_v21 = vadd.f32 %v11913_v59, %v10883_v56  ;;  %v10884_v23 = vadd.f32 %v13353_v43, %v17632_v48  ;;  %v10685_v40 = vpop.f32.mrb[3].mxu1  ;;  %v11929_v56 = vld [vmem:[%s14269_s29 + $0xf1] sm:$0xff] }
 0x646   : > { %v10913_v63 = vadd.f32 %v11911_v0, %v10881_v25  ;;  %v10882_v62 = vadd.f32 %v17632_v48, %v10685_v40  ;;  %v11927_v25 = vld [vmem:[%s14269_s29 + $0xd9] sm:$0xff] }
 0x647   : > { %10947 = vst [vmem:[%s17641_s10 + $0x10] sm:$0xff] %v10915_v21  ;;  %v10916_v11 = vadd.f32 %v11914_v2, %v10884_v23  ;;  %v11930_v21 = vld [vmem:[%s14269_s29 + $0xf9] sm:$0xff] }
 0x648   : > { %10945 = vst [vmem:[%s17641_s10] sm:$0xff] %v10913_v63  ;;  %v10914_v55 = vadd.f32 %v11912_v9, %v10882_v62  ;;  %v11928_v63 = vld [vmem:[%s14269_s29 + $0xe1] sm:$0xff] }
 0x649   : > { %10948 = vst [vmem:[%s17641_s10 + $0x18] sm:$0xff] %v10916_v11 }
 0x64a   : > { %10946 = vst [vmem:[%s17641_s10 + $0x8] sm:$0xff] %v10914_v55  ;;  %v13356_v27 = vpop.f32.mrb[4].mxu1 }
 0x64b   : > { %v10887_v61 = vadd.f32 %v13356_v27, %v17632_v48  ;;  %v10698_v46 = vpop.f32.mrb[5].mxu1 }
 0x64c   : > { %v10885_v6 = vadd.f32 %v17632_v48, %v10698_v46  ;;  %v13357_v58 = vpop.f32.mrb[6].mxu1 }
 0x64d   : > { %v10919_v16 = vadd.f32 %v11917_v33, %v10887_v61  ;;  %v10888_v53 = vadd.f32 %v13357_v58, %v17632_v48  ;;  %v10701_v20 = vpop.f32.mrb[7].mxu1  ;;  %v11933_v61 = vld [vmem:[%s14269_s29 + $0x121] sm:$0xff] }
 0x64e   : > { %v10917_v18 = vadd.f32 %v11915_v42, %v10885_v6  ;;  %v10886_v22 = vadd.f32 %v17632_v48, %v10701_v20  ;;  %v11931_v6 = vld [vmem:[%s14269_s29 + $0x109] sm:$0xff] }
 0x64f   : > { %10951 = vst [vmem:[%s17641_s10 + $0x30] sm:$0xff] %v10919_v16  ;;  %v10920_v39 = vadd.f32 %v11918_v31, %v10888_v53  ;;  %v11934_v16 = vld [vmem:[%s14269_s29 + $0x129] sm:$0xff] }
 0x650   : > { %10949 = vst [vmem:[%s17641_s10 + $0x20] sm:$0xff] %v10917_v18  ;;  %v10918_v12 = vadd.f32 %v11916_v45, %v10886_v22  ;;  %v11932_v18 = vld [vmem:[%s14269_s29 + $0x111] sm:$0xff] }
 0x651   : > { %10952 = vst [vmem:[%s17641_s10 + $0x38] sm:$0xff] %v10920_v39 }
 0x652   : > { %10950 = vst [vmem:[%s17641_s10 + $0x28] sm:$0xff] %v10918_v12  ;;  %v13360_v60 = vpop.f32.mrb[8].mxu1 }
 0x653   : > { %v10891_v51 = vadd.f32 %v13360_v60, %v17632_v48  ;;  %v10714_v24 = vpop.f32.mrb[9].mxu1 }
 0x654   : > { %v10889_v14 = vadd.f32 %v17632_v48, %v10714_v24  ;;  %v13361_v4 = vpop.f32.mrb[10].mxu1 }
 0x655   : > { %v10923_v1 = vadd.f32 %v11921_v52, %v10891_v51  ;;  %v10892_v28 = vadd.f32 %v13361_v4, %v17632_v48  ;;  %v10717_v30 = vpop.f32.mrb[11].mxu1  ;;  %v11937_v51 = vld [vmem:[%s14269_s29 + $0x151] sm:$0xff] }
 0x656   : > { %v10921_v7 = vadd.f32 %v11919_v57, %v10889_v14  ;;  %v10890_v54 = vadd.f32 %v17632_v48, %v10717_v30  ;;  %v11935_v14 = vld [vmem:[%s14269_s29 + $0x139] sm:$0xff] }
 0x657   : > { %10955 = vst [vmem:[%s17641_s10 + $0x50] sm:$0xff] %v10923_v1  ;;  %v10924_v5 = vadd.f32 %v11922_v13, %v10892_v28  ;;  %v11938_v1 = vld [vmem:[%s14269_s29 + $0x159] sm:$0xff] }
 0x658   : > { %10953 = vst [vmem:[%s17641_s10 + $0x40] sm:$0xff] %v10921_v7  ;;  %v10922_v47 = vadd.f32 %v11920_v17, %v10890_v54  ;;  %v11936_v7 = vld [vmem:[%s14269_s29 + $0x141] sm:$0xff] }
 0x659   : > { %10956 = vst [vmem:[%s17641_s10 + $0x58] sm:$0xff] %v10924_v5 }
 0x65a   : > { %10954 = vst [vmem:[%s17641_s10 + $0x48] sm:$0xff] %v10922_v47  ;;  %v13364_v41 = vpop.f32.mrb[12].mxu1 }
 0x65b   : > { %v10895_v29 = vadd.f32 %v13364_v41, %v17632_v48  ;;  %v10730_v49 = vpop.f32.mrb[13].mxu1 }
 0x65c   : > { %v10893_v36 = vadd.f32 %v17632_v48, %v10730_v49  ;;  %v13365_v35 = vpop.f32.mrb[14].mxu1 }
 0x65d   : > { %v10927_v34 = vadd.f32 %v11925_v15, %v10895_v29  ;;  %v10896_v10 = vadd.f32 %v13365_v35, %v17632_v48  ;;  %v10733_v3 = vpop.f32.mrb[15].mxu1  ;;  %v11941_v29 = vld [vmem:[%s14269_s29 + $0x181] sm:$0xff] }
 0x65e   : > { %v10925_v50 = vadd.f32 %v11923_v38, %v10893_v36  ;;  %v10894_v44 = vadd.f32 %v17632_v48, %v10733_v3  ;;  %v11939_v36 = vld [vmem:[%s14269_s29 + $0x169] sm:$0xff] }
 0x65f   : > { %10959 = vst [vmem:[%s17641_s10 + $0x70] sm:$0xff] %v10927_v34  ;;  %v10928_v19 = vadd.f32 %v11926_v26, %v10896_v10  ;;  %v11942_v34 = vld [vmem:[%s14269_s29 + $0x189] sm:$0xff] }
 0x660   : > { %10957 = vst [vmem:[%s17641_s10 + $0x60] sm:$0xff] %v10925_v50  ;;  %v10926_v8 = vadd.f32 %v11924_v37, %v10894_v44  ;;  %v11940_v50 = vld [vmem:[%s14269_s29 + $0x171] sm:$0xff] }
 0x661   : > { %10960 = vst [vmem:[%s17641_s10 + $0x78] sm:$0xff] %v10928_v19 }
 0x662   : > { %10958 = vst [vmem:[%s17641_s10 + $0x68] sm:$0xff] %v10926_v8  ;;  %v13368_v59 = vpop.f32.mrb[16].mxu1 }
 0x663   : > { %v10899_v32 = vadd.f32 %v13368_v59, %v17632_v48  ;;  %v10746_v0 = vpop.f32.mrb[17].mxu1 }
 0x664   : > { %v10897_v43 = vadd.f32 %v17632_v48, %v10746_v0  ;;  %v13369_v2 = vpop.f32.mrb[18].mxu1 }
 0x665   : > { %v10931_v23 = vadd.f32 %v11929_v56, %v10899_v32  ;;  %v10900_v40 = vadd.f32 %v13369_v2, %v17632_v48  ;;  %v10749_v9 = vpop.f32.mrb[19].mxu1 }
 0x666   : > { %v10929_v62 = vadd.f32 %v11927_v25, %v10897_v43  ;;  %v10898_v11 = vadd.f32 %v17632_v48, %v10749_v9 }
 0x667   : > { %10963 = vst [vmem:[%s17641_s10 + $0x90] sm:$0xff] %v10931_v23  ;;  %v10932_v55 = vadd.f32 %v11930_v21, %v10900_v40 }
 0x668   : > { %10961 = vst [vmem:[%s17641_s10 + $0x80] sm:$0xff] %v10929_v62  ;;  %v10930_v27 = vadd.f32 %v11928_v63, %v10898_v11 }
 0x669   : > { %10964 = vst [vmem:[%s17641_s10 + $0x98] sm:$0xff] %v10932_v55 }
 0x66a   : > { %10962 = vst [vmem:[%s17641_s10 + $0x88] sm:$0xff] %v10930_v27  ;;  %v13372_v33 = vpop.f32.mrb[20].mxu1 }
 0x66b   : > { %v10903_v46 = vadd.f32 %v13372_v33, %v17632_v48  ;;  %v10762_v42 = vpop.f32.mrb[21].mxu1 }
 0x66c   : > { %v10901_v58 = vadd.f32 %v17632_v48, %v10762_v42  ;;  %v13373_v31 = vpop.f32.mrb[22].mxu1 }
 0x66d   : > { %v10935_v53 = vadd.f32 %v11933_v61, %v10903_v46  ;;  %v10904_v20 = vadd.f32 %v13373_v31, %v17632_v48  ;;  %v10765_v45 = vpop.f32.mrb[23].mxu1 }
 0x66e   : > { %v10933_v22 = vadd.f32 %v11931_v6, %v10901_v58  ;;  %v10902_v39 = vadd.f32 %v17632_v48, %v10765_v45 }
 0x66f   : > { %10967 = vst [vmem:[%s17641_s10 + $0xb0] sm:$0xff] %v10935_v53  ;;  %v10936_v12 = vadd.f32 %v11934_v16, %v10904_v20 }
 0x670   : > { %10965 = vst [vmem:[%s17641_s10 + $0xa0] sm:$0xff] %v10933_v22  ;;  %v10934_v60 = vadd.f32 %v11932_v18, %v10902_v39 }
 0x671   : > { %10968 = vst [vmem:[%s17641_s10 + $0xb8] sm:$0xff] %v10936_v12 }
 0x672   : > { %10966 = vst [vmem:[%s17641_s10 + $0xa8] sm:$0xff] %v10934_v60  ;;  %v13376_v52 = vpop.f32.mrb[24].mxu1 }
 0x673   : > { %v10907_v24 = vadd.f32 %v13376_v52, %v17632_v48  ;;  %v10778_v57 = vpop.f32.mrb[25].mxu1 }
 0x674   : > { %v10905_v4 = vadd.f32 %v17632_v48, %v10778_v57  ;;  %v13377_v13 = vpop.f32.mrb[26].mxu1 }
 0x675   : > { %v10939_v28 = vadd.f32 %v11937_v51, %v10907_v24  ;;  %v10908_v30 = vadd.f32 %v13377_v13, %v17632_v48  ;;  %v10781_v17 = vpop.f32.mrb[27].mxu1 }
 0x676   : > { %v10937_v54 = vadd.f32 %v11935_v14, %v10905_v4  ;;  %v10906_v5 = vadd.f32 %v17632_v48, %v10781_v17 }
 0x677   : > { %10971 = vst [vmem:[%s17641_s10 + $0xd0] sm:$0xff] %v10939_v28  ;;  %v10940_v47 = vadd.f32 %v11938_v1, %v10908_v30 }
 0x678   : > { %10969 = vst [vmem:[%s17641_s10 + $0xc0] sm:$0xff] %v10937_v54  ;;  %v10938_v41 = vadd.f32 %v11936_v7, %v10906_v5 }
 0x679   : > { %10972 = vst [vmem:[%s17641_s10 + $0xd8] sm:$0xff] %v10940_v47 }
 0x67a   : > { %10970 = vst [vmem:[%s17641_s10 + $0xc8] sm:$0xff] %v10938_v41  ;;  %v13380_v15 = vpop.f32.mrb[28].mxu1 }
 0x67b   : > { %v10911_v49 = vadd.f32 %v13380_v15, %v17632_v48  ;;  %v10794_v38 = vpop.f32.mrb[29].mxu1 }
 0x67c   : > { %v10909_v35 = vadd.f32 %v17632_v48, %v10794_v38  ;;  %v13381_v26 = vpop.f32.mrb[30].mxu1 }
 0x67d   : > { %v10943_v10 = vadd.f32 %v11941_v29, %v10911_v49  ;;  %v10912_v3 = vadd.f32 %v13381_v26, %v17632_v48  ;;  %v10797_v37 = vpop.f32.mrb[31].mxu1 }
 0x67e   : > { %v10941_v44 = vadd.f32 %v11939_v36, %v10909_v35  ;;  %v10910_v19 = vadd.f32 %v17632_v48, %v10797_v37 }
 0x67f   : > { %10975 = vst [vmem:[%s17641_s10 + $0xf0] sm:$0xff] %v10943_v10  ;;  %v10944_v8 = vadd.f32 %v11942_v34, %v10912_v3 }
 0x680   : > { %10973 = vst [vmem:[%s17641_s10 + $0xe0] sm:$0xff] %v10941_v44  ;;  %v10942_v59 = vadd.f32 %v11940_v50, %v10910_v19 }
 0x681   : > { %10976 = vst [vmem:[%s17641_s10 + $0xf8] sm:$0xff] %v10944_v8 }
 0x682   : > { %10974 = vst [vmem:[%s17641_s10 + $0xe8] sm:$0xff] %v10942_v59 }
 0x683 PF: > { %s15_s18 = sadd.s32 1, %s14213_s18  }
 0x684   : > { %p12_p4 = scmp.ge.s32.totalorder %s15_s18, 4  }
 0x686   :  { %14 = sbr.rel (!%p12_p4) target bundleno = 1 (0x1), region = 91 }

</bundles_post_ra>
